<compile_context>
chip_gen: v7x
topology: tpu7x:2x2x1
jax: 0.10.0
libtpu: 0.0.40
codegen_flags: <defaults>
</compile_context>

<pallas_src>
import numpy as np
import jax
import jax.numpy as jnp
from jax.experimental import pallas as pl
from jax.experimental.pallas import tpu as pltpu


# ---------------------------------------------------------------------------
# Host-side, shape-only helpers (exact 0/1 selection matrices & masks)
# ---------------------------------------------------------------------------
def _ln(s):
    """Rows of the flattened stride-1 result needed so that row h*(s+2)+w
    (h, w in [0, s)) is the conv/pool output at (h, w)."""
    return (s - 1) * (s + 2) + s


def _sel_stride2_np(s):
    """0/1 matrix: picks stride-2 samples of one image's flattened stride-1
    result at spatial s and scatters them into the next layer's zero-padded,
    row-flattened slab at spatial s // 2."""
    wp, so = s + 2, s // 2
    wpo = so + 2
    g = np.zeros((wpo * wpo, _ln(s)), np.float32)
    for i in range(so):
        for j in range(so):
            g[(i + 1) * wpo + (j + 1), (2 * i) * wp + 2 * j] = 1.0
    return g


def _valid_mask_np(s, b):
    """(L, 1) 0/1 mask marking which rows of the batched flattened stride-1
    result are real output pixels (the rest is slab-overlap garbage)."""
    wp = s + 2
    p = wp * wp
    L = (b - 1) * p + _ln(s)
    m = np.zeros((L, 1), np.float32)
    for r in range(L):
        rp = r % p
        if (rp // wp) < s and (rp % wp) < s:
            m[r, 0] = 1.0
    return m


def _final_sel_np(b):
    """(B, L) 0/1 matrix picking each image's single 1x1 pooled output row."""
    p3 = 16                       # (2 + 2) ** 2
    L3 = (b - 1) * p3 + _ln(2)
    sel = np.zeros((b, L3), np.float32)
    for i in range(b):
        sel[i, i * p3] = 1.0
    return sel


# ---------------------------------------------------------------------------
# Fused encoder builder
# ---------------------------------------------------------------------------
def make_encoder_forward(inp_ch, inp_size, num_channels, num_blocks, max_b_tile=8):
    # TODO(synk): generalize the fused spatial pipeline to inp_size != 16
    #             (final stage spatial > 1x1); structure below assumes /16.
    assert inp_size == 16, "fused kernel written for the standard /16 path"
    assert num_channels % 2 == 0
    half = num_channels // 2
    c = num_channels

    s0, s1, s2, s3 = 16, 8, 4, 2
    P0, P1, P2, P3 = 18 * 18, 10 * 10, 6 * 6, 4 * 4

    def build_kernel(B):
        L0 = (B - 1) * P0 + _ln(s0)
        L1 = (B - 1) * P1 + _ln(s1)
        L2 = (B - 1) * P2 + _ln(s2)
        L3 = (B - 1) * P3 + _ln(s3)

        def kernel(x_ref, wc1_ref, wh_ref, wd_ref, wcc_ref, we_ref,
                   g16_ref, g8_ref, g4_ref, m8_ref, m4_ref, m2_ref, sel_ref,
                   o_ref, b8a, b8b, b4a, b4b, b2a, b2b):

            def mxdot(a, b):                  # bf16 x bf16 -> f32 accumulation
                return jnp.dot(a, b, preferred_element_type=jnp.float32)

            def conv_taps(src_ref, w_ref, widx, s, L):
                """3x3 / pad 1 / stride 1 conv of the batched, padded,
                row-flattened bf16 slab as 9 shifted whole-slab matmuls
                (batch folded into M; garbage rows masked later)."""
                wpad = s + 2
                acc = None
                for ky in range(3):
                    for kx in range(3):
                        off = ky * wpad + kx
                        d = mxdot(src_ref[off:off + L, :],
                                  w_ref[widx, ky * 3 + kx])
                        acc = d if acc is None else acc + d
                return acc                     # (L, Cout) f32

            def pool_taps(src_ref, s, L):
                """3x3 / pad 1 / stride 1 avg pool (count_include_pad=True)."""
                wpad = s + 2
                acc = None
                for ky in range(3):
                    for kx in range(3):
                        off = ky * wpad + kx
                        v = src_ref[off:off + L, :].astype(jnp.float32)
                        acc = v if acc is None else acc + v
                return acc * (1.0 / 9.0)

            def put_s1(dst_ref, val_f32, m_ref, s, L):
                """Stride-1 re-pad: zero the garbage rows with a 0/1 mask and
                store shifted by wp+1 into the (zero-bordered) bf16 slab.
                No matmul."""
                wpad = s + 2
                dst_ref[wpad + 1:wpad + 1 + L, :] = (
                    (val_f32 * m_ref[...]).astype(dst_ref.dtype))

            def put_s2(dst_ref, g_ref, acc_f32, s_in, P_in, P_out):
                """Stride-2 subsample + re-pad: exact 0/1 bf16 matmul per image
                (K = ln(s_in), so each matmul is dense in K)."""
                g = g_ref[...]
                acc_bf = acc_f32.astype(jnp.bfloat16)
                lin = _ln(s_in)
                for b in range(B):
                    seg = acc_bf[b * P_in:b * P_in + lin, :]
                    dst_ref[b * P_out:(b + 1) * P_out, :] = (
                        mxdot(g, seg).astype(dst_ref.dtype))

            def resblock(a_ref, tmp_ref, w_ref, i1, i2, m_ref, s, L):
                wpad = s + 2
                h1 = jnp.maximum(conv_taps(a_ref, w_ref, i1, s, L), 0.0)
                put_s1(tmp_ref, h1, m_ref, s, L)
                h2 = conv_taps(tmp_ref, w_ref, i2, s, L)
                ident = a_ref[wpad + 1:wpad + 1 + L, :].astype(jnp.float32)
                put_s1(a_ref, jnp.maximum(h2 + ident, 0.0), m_ref, s, L)

            # tmp slabs whose first write each step is a partial (shifted)
            # store need their zero border established once per grid step
            b8b[...] = jnp.zeros_like(b8b)
            b2b[...] = jnp.zeros_like(b2b)

            xin = x_ref.at[0]                  # (B*P0, inp_ch) bf16 view

            # ---- DownSample.conv1 (3x3 / s2) + relu : 16x16 x Cin -> 8x8 x half
            acc = jnp.maximum(conv_taps(xin, wc1_ref, 0, s0, L0), 0.0)
            put_s2(b8a, g16_ref, acc, s0, P0, P1)

            # ---- DownSample.resblocks1 (half @ 8x8) --------------------------
            resblock(b8a, b8b, wh_ref, 0, 1, m8_ref, s1, L1)

            # ---- DownSample.downsample_block (stride 2, conv shortcut): 8 -> 4
            acc = jnp.maximum(conv_taps(b8a, wd_ref, 0, s1, L1), 0.0)
            put_s2(b4a, g8_ref, acc, s1, P1, P2)           # relu(conv1_s2(x))
            h2 = conv_taps(b4a, wcc_ref, 0, s2, L2)        # conv2 (stride 1)
            acc = conv_taps(b8a, wd_ref, 1, s1, L1)        # shortcut conv (s2)
            put_s2(b4b, g8_ref, acc, s1, P1, P2)
            wp2 = s2 + 2
            ident = b4b[wp2 + 1:wp2 + 1 + L2, :].astype(jnp.float32)
            put_s1(b4a, jnp.maximum(h2 + ident, 0.0), m4_ref, s2, L2)

            # ---- DownSample.resblocks2 (C @ 4x4) -----------------------------
            resblock(b4a, b4b, wcc_ref, 1, 2, m4_ref, s2, L2)

            # ---- DownSample.pooling1 (AvgPool 3x3 / s2 / p1): 4 -> 2 ---------
            put_s2(b2a, g4_ref, pool_taps(b4a, s2, L2), s2, P2, P3)

            # ---- DownSample.resblocks3 (C @ 2x2) -----------------------------
            resblock(b2a, b2b, wcc_ref, 3, 4, m2_ref, s3, L3)

            # ---- DownSample.pooling2: 2 -> 1, pick each image's valid row ----
            pooled = pool_taps(b2a, s3, L3)                        # (L3, C) f32
            v = mxdot(sel_ref[...], pooled.astype(jnp.bfloat16))   # (B, C) f32

            # ---- Encoder.resblocks at 1x1: 3x3 conv == centre-tap matmul -----
            for blk in range(num_blocks):
                h = jnp.maximum(mxdot(v.astype(jnp.bfloat16), we_ref[2 * blk]),
                                0.0)
                v = jnp.maximum(
                    mxdot(h.astype(jnp.bfloat16), we_ref[2 * blk + 1]) + v, 0.0)

            o_ref[0] = v.astype(o_ref.dtype)

        return kernel

    def forward(params, x_nchw):
        n = x_nchw.shape[0]
        # Batch tile: fold several images into every matmul's M dimension, but
        # keep >= 2 grid steps whenever possible (v7x megacore: 2 TensorCores).
        b_tile = max(1, min(max_b_tile, (n + 1) // 2))
        grid_n = -(-n // b_tile)
        n_pad = grid_n * b_tile
        B = b_tile

        # --- input: NCHW -> padded NHWC, row-flattened per batch tile (bf16) --
        x = jnp.transpose(x_nchw, (0, 2, 3, 1)).astype(jnp.bfloat16)
        x = jnp.pad(x, ((0, n_pad - n), (1, 1), (1, 1), (0, 0)))
        x = x.reshape(grid_n, B * P0, inp_ch)

        # --- weights: packed per-shape groups, bf16 taps -----------------------
        ds = params["ds"]

        def taps(wv):                       # HWIO (3,3,ci,co) -> (9,ci,co) bf16
            return wv.reshape(9, wv.shape[2], wv.shape[3]).astype(jnp.bfloat16)

        w_c1 = taps(ds["conv1"])[None]                                 # (1,9,Ci,half)
        w_h = jnp.stack([taps(ds["rb1_c1"]), taps(ds["rb1_c2"])])      # (2,9,half,half)
        w_d = jnp.stack([taps(ds["db_c1"]), taps(ds["conv2"])])        # (2,9,half,c)
        w_cc = jnp.stack([taps(ds["db_c2"]),
                          taps(ds["rb2_c1"]), taps(ds["rb2_c2"]),
                          taps(ds["rb3_c1"]), taps(ds["rb3_c2"])])     # (5,9,c,c)
        enc_taps = [w[1, 1].astype(jnp.bfloat16)
                    for pair in params["resblocks"] for w in pair]
        w_e = (jnp.stack(enc_taps) if enc_taps
               else jnp.zeros((1, c, c), jnp.bfloat16))                # (2nb,c,c)

        # --- exact 0/1 selection matrices & validity masks (trace-time consts) -
        g16 = jnp.asarray(_sel_stride2_np(s0), jnp.bfloat16)
        g8 = jnp.asarray(_sel_stride2_np(s1), jnp.bfloat16)
        g4 = jnp.asarray(_sel_stride2_np(s2), jnp.bfloat16)
        m8 = jnp.asarray(_valid_mask_np(s1, B), jnp.float32)
        m4 = jnp.asarray(_valid_mask_np(s2, B), jnp.float32)
        m2 = jnp.asarray(_valid_mask_np(s3, B), jnp.float32)
        sel = jnp.asarray(_final_sel_np(B), jnp.bfloat16)

        consts = [w_c1, w_h, w_d, w_cc, w_e, g16, g8, g4, m8, m4, m2, sel]

        def const_spec(a):
            return pl.BlockSpec(a.shape, lambda i, _nd=a.ndim: (0,) * _nd)

        out = pl.pallas_call(
            build_kernel(B),
            out_shape=jax.ShapeDtypeStruct((grid_n, B, c), jnp.float32),
            grid=(grid_n,),
            in_specs=([pl.BlockSpec((1, B * P0, inp_ch), lambda i: (i, 0, 0))]
                      + [const_spec(a) for a in consts]),
            out_specs=pl.BlockSpec((1, B, c), lambda i: (i, 0, 0)),
            scratch_shapes=[
                pltpu.VMEM((B * P1, half), jnp.bfloat16),   # 8x8 slabs
                pltpu.VMEM((B * P1, half), jnp.bfloat16),
                pltpu.VMEM((B * P2, c), jnp.bfloat16),      # 4x4 slabs
                pltpu.VMEM((B * P2, c), jnp.bfloat16),
                pltpu.VMEM((B * P3, c), jnp.bfloat16),      # 2x2 slabs
                pltpu.VMEM((B * P3, c), jnp.bfloat16),
            ],
            compiler_params=pltpu.CompilerParams(
                dimension_semantics=("parallel",)),
        )(x, *consts)

        out = out.reshape(n_pad, c)[:n]
        # (N, C) -> NCHW (N, C, 1, 1) for parity with the PyTorch module
        return out.reshape(n, 1, 1, c).transpose(0, 3, 1, 2)

    return forward


# ---------------------------------------------------------------------------
# Deterministic parameter init (HWIO conv weights, bias=False everywhere)
# ---------------------------------------------------------------------------
def _conv_w(key, cin, cout, scale=0.1):
    return scale * jax.random.normal(key, (3, 3, cin, cout), jnp.float32)


def init_encoder_params(key, inp_ch, num_channels, num_blocks):
    half = num_channels // 2
    keys = jax.random.split(key, 10 + 2 * num_blocks)
    ds = {
        "conv1": _conv_w(keys[0], inp_ch, half),
        "rb1_c1": _conv_w(keys[1], half, half),
        "rb1_c2": _conv_w(keys[2], half, half),
        "conv2": _conv_w(keys[3], half, num_channels),        # shortcut conv
        "db_c1": _conv_w(keys[4], half, num_channels),
        "db_c2": _conv_w(keys[5], num_channels, num_channels),
        "rb2_c1": _conv_w(keys[6], num_channels, num_channels),
        "rb2_c2": _conv_w(keys[7], num_channels, num_channels),
        "rb3_c1": _conv_w(keys[8], num_channels, num_channels),
        "rb3_c2": _conv_w(keys[9], num_channels, num_channels),
    }
    resblocks = [(_conv_w(keys[10 + 2 * b], num_channels, num_channels),
                  _conv_w(keys[11 + 2 * b], num_channels, num_channels))
                 for b in range(num_blocks)]
    return {"ds": ds, "resblocks": resblocks}


# ---------------------------------------------------------------------------
# Pure-JAX f32 reference (straight transcription of the PyTorch module)
# ---------------------------------------------------------------------------
def _reference_forward(params, x_nchw):
    dn = ("NHWC", "HWIO", "NHWC")

    def conv(x, w, stride):
        return jax.lax.conv_general_dilated(
            x, w, window_strides=(stride, stride), padding=[(1, 1), (1, 1)],
            dimension_numbers=dn)

    def avgpool(x):
        s = jax.lax.reduce_window(x, 0.0, jax.lax.add, (1, 3, 3, 1),
                                  (1, 2, 2, 1),
                                  [(0, 0), (1, 1), (1, 1), (0, 0)])
        return s / 9.0

    relu = jax.nn.relu
    ds = params["ds"]
    x = jnp.transpose(x_nchw, (0, 2, 3, 1))
    x = relu(conv(x, ds["conv1"], 2))
    h = relu(conv(x, ds["rb1_c1"], 1)); x = relu(conv(h, ds["rb1_c2"], 1) + x)
    idn = conv(x, ds["conv2"], 2)
    h = relu(conv(x, ds["db_c1"], 2)); x = relu(conv(h, ds["db_c2"], 1) + idn)
    h = relu(conv(x, ds["rb2_c1"], 1)); x = relu(conv(h, ds["rb2_c2"], 1) + x)
    x = avgpool(x)
    h = relu(conv(x, ds["rb3_c1"], 1)); x = relu(conv(h, ds["rb3_c2"], 1) + x)
    x = avgpool(x)
    for (w1, w2) in params["resblocks"]:
        h = relu(conv(x, w1, 1)); x = relu(conv(h, w2, 1) + x)
    return jnp.transpose(x, (0, 3, 1, 2))


# ---------------------------------------------------------------------------
if __name__ == "__main__":
    # Small shapes consistent with Encoder(inp_ch=4, inp_size=16, num_channels=32)
    batch, inp_ch, inp_size, num_channels, num_blocks = 2, 4, 16, 32, 1

    key = jax.random.PRNGKey(0)
    k_params, k_x = jax.random.split(key)
    params = init_encoder_params(k_params, inp_ch, num_channels, num_blocks)
    x_nchw = jax.random.normal(k_x, (batch, inp_ch, inp_size, inp_size),
                               jnp.float32)

    forward = make_encoder_forward(inp_ch, inp_size, num_channels, num_blocks)
    out_nchw = jax.jit(forward)(params, x_nchw)
    jax.block_until_ready(out_nchw)

    # Expected: (2, 32, 1, 1) — 16x16 input downsampled by 16x.
    assert out_nchw.shape == (batch, num_channels, 1, 1)
    assert bool(jnp.all(jnp.isfinite(out_nchw)))

    # Compare against an f32 XLA reference (kernel uses bf16 -> loose tolerance)
    ref = _reference_forward(params, x_nchw)
    max_err = float(jnp.max(jnp.abs(out_nchw - ref)))
    assert max_err < 1e-1, f"mismatch vs reference: max abs err = {max_err}"

    print("KERNEL_OK")
</pallas_src>

<mosaic_0001>
module attributes {stable_mosaic.version = 11 : i64} {
  func.func @kernel(%arg0: i32, %arg1: memref<1x324x4xbf16, #tpu.memory_space<vmem>>, %arg2: memref<1x9x4x16xbf16, #tpu.memory_space<vmem>>, %arg3: memref<2x9x16x16xbf16, #tpu.memory_space<vmem>>, %arg4: memref<2x9x16x32xbf16, #tpu.memory_space<vmem>>, %arg5: memref<5x9x32x32xbf16, #tpu.memory_space<vmem>>, %arg6: memref<2x32x32xbf16, #tpu.memory_space<vmem>>, %arg7: memref<100x286xbf16, #tpu.memory_space<vmem>>, %arg8: memref<36x78xbf16, #tpu.memory_space<vmem>>, %arg9: memref<16x22xbf16, #tpu.memory_space<vmem>>, %arg10: memref<78x1xf32, #tpu.memory_space<vmem>>, %arg11: memref<22x1xf32, #tpu.memory_space<vmem>>, %arg12: memref<6x1xf32, #tpu.memory_space<vmem>>, %arg13: memref<1x6xbf16, #tpu.memory_space<vmem>>, %arg14: memref<1x1x32xf32, #tpu.memory_space<vmem>>, %arg15: memref<100x16xbf16, #tpu.memory_space<vmem>>, %arg16: memref<100x16xbf16, #tpu.memory_space<vmem>>, %arg17: memref<36x32xbf16, #tpu.memory_space<vmem>>, %arg18: memref<36x32xbf16, #tpu.memory_space<vmem>>, %arg19: memref<16x32xbf16, #tpu.memory_space<vmem>>, %arg20: memref<16x32xbf16, #tpu.memory_space<vmem>>) attributes {dimension_semantics = [#tpu.dimension_semantics<parallel>], iteration_bounds = array<i64: 2>, scalar_prefetch = 0 : i64, scratch_operands = 6 : i64, tpu.core_type = #tpu.core_type<tc>, window_params = [{transform_indices = @transform_0, window_bounds = array<i64: 1, 324, 4>}, {pipeline_mode = #tpu.pipeline_mode<synchronous>, transform_indices = @transform_1, window_bounds = array<i64: 1, 9, 4, 16>}, {pipeline_mode = #tpu.pipeline_mode<synchronous>, transform_indices = @transform_2, window_bounds = array<i64: 2, 9, 16, 16>}, {pipeline_mode = #tpu.pipeline_mode<synchronous>, transform_indices = @transform_3, window_bounds = array<i64: 2, 9, 16, 32>}, {pipeline_mode = #tpu.pipeline_mode<synchronous>, transform_indices = @transform_4, window_bounds = array<i64: 5, 9, 32, 32>}, {pipeline_mode = #tpu.pipeline_mode<synchronous>, transform_indices = @transform_5, window_bounds = array<i64: 2, 32, 32>}, {pipeline_mode = #tpu.pipeline_mode<synchronous>, transform_indices = @transform_6, window_bounds = array<i64: 100, 286>}, {pipeline_mode = #tpu.pipeline_mode<synchronous>, transform_indices = @transform_7, window_bounds = array<i64: 36, 78>}, {pipeline_mode = #tpu.pipeline_mode<synchronous>, transform_indices = @transform_8, window_bounds = array<i64: 16, 22>}, {pipeline_mode = #tpu.pipeline_mode<synchronous>, transform_indices = @transform_9, window_bounds = array<i64: 78, 1>}, {pipeline_mode = #tpu.pipeline_mode<synchronous>, transform_indices = @transform_10, window_bounds = array<i64: 22, 1>}, {pipeline_mode = #tpu.pipeline_mode<synchronous>, transform_indices = @transform_11, window_bounds = array<i64: 6, 1>}, {pipeline_mode = #tpu.pipeline_mode<synchronous>, transform_indices = @transform_12, window_bounds = array<i64: 1, 6>}, {transform_indices = @transform_13, window_bounds = array<i64: 1, 1, 32>}]} {
    %cst = arith.constant 0.000000e+00 : bf16
    %0 = vector.broadcast %cst : bf16 to vector<100x16xbf16>
    %c0 = arith.constant 0 : index
    %c0_0 = arith.constant 0 : index
    %1 = vector.load %arg16[%c0, %c0_0] : memref<100x16xbf16, #tpu.memory_space<vmem>>, vector<100x16xbf16>
    tpu.vector_store %arg16[%c0, %c0_0], %0 {strides = array<i32>} : memref<100x16xbf16, #tpu.memory_space<vmem>>, vector<100x16xbf16>,
    %cst_1 = arith.constant 0.000000e+00 : bf16
    %2 = vector.broadcast %cst_1 : bf16 to vector<16x32xbf16>
    %c0_2 = arith.constant 0 : index
    %c0_3 = arith.constant 0 : index
    %3 = vector.load %arg20[%c0_2, %c0_3] : memref<16x32xbf16, #tpu.memory_space<vmem>>, vector<16x32xbf16>
    tpu.vector_store %arg20[%c0_2, %c0_3], %2 {strides = array<i32>} : memref<16x32xbf16, #tpu.memory_space<vmem>>, vector<16x32xbf16>,
    %c0_i32 = arith.constant 0 : i32
    %c0_i32_4 = arith.constant 0 : i32
    %c0_i32_5 = arith.constant 0 : i32
    %4 = tpu.memref_slice %arg1[%c0_i32, %c0_i32_4, %c0_i32_5] : memref<1x324x4xbf16, #tpu.memory_space<vmem>> -> memref<1x324x4xbf16, #tpu.memory_space<vmem>>
    %5 = tpu.memref_squeeze %4 : memref<1x324x4xbf16, #tpu.memory_space<vmem>> -> memref<324x4xbf16, #tpu.memory_space<vmem>>
    %c0_6 = arith.constant 0 : index
    %c0_7 = arith.constant 0 : index
    %6 = vector.load %5[%c0_6, %c0_7] : memref<324x4xbf16, #tpu.memory_space<vmem>>, vector<286x4xbf16>
    %c0_8 = arith.constant 0 : index
    %c0_9 = arith.constant 0 : index
    %c0_10 = arith.constant 0 : index
    %c0_11 = arith.constant 0 : index
    %7 = vector.load %arg2[%c0_8, %c0_9, %c0_10, %c0_11] : memref<1x9x4x16xbf16, #tpu.memory_space<vmem>>, vector<1x1x4x16xbf16>
    %8 = vector.shape_cast %7 : vector<1x1x4x16xbf16> to vector<4x16xbf16>
    %cst_12 = arith.constant dense<0.000000e+00> : vector<286x16xf32>
    %9 = tpu.matmul %6, %8, %cst_12 {dimension_numbers = #tpu.dot_dimension_numbers<[1], [0], [0], [1], [0, 0, 1, 1], [], []>} : vector<286x4xbf16>, vector<4x16xbf16>, vector<286x16xf32> -> vector<286x16xf32>
    %c0_i32_13 = arith.constant 0 : i32
    %c0_i32_14 = arith.constant 0 : i32
    %c0_i32_15 = arith.constant 0 : i32
    %10 = tpu.memref_slice %arg1[%c0_i32_13, %c0_i32_14, %c0_i32_15] : memref<1x324x4xbf16, #tpu.memory_space<vmem>> -> memref<1x324x4xbf16, #tpu.memory_space<vmem>>
    %11 = tpu.memref_squeeze %10 : memref<1x324x4xbf16, #tpu.memory_space<vmem>> -> memref<324x4xbf16, #tpu.memory_space<vmem>>
    %c1 = arith.constant 1 : index
    %c0_16 = arith.constant 0 : index
    %12 = vector.load %11[%c1, %c0_16] : memref<324x4xbf16, #tpu.memory_space<vmem>>, vector<286x4xbf16>
    %c0_17 = arith.constant 0 : index
    %c1_18 = arith.constant 1 : index
    %c0_19 = arith.constant 0 : index
    %c0_20 = arith.constant 0 : index
    %13 = vector.load %arg2[%c0_17, %c1_18, %c0_19, %c0_20] : memref<1x9x4x16xbf16, #tpu.memory_space<vmem>>, vector<1x1x4x16xbf16>
    %14 = vector.shape_cast %13 : vector<1x1x4x16xbf16> to vector<4x16xbf16>
    %cst_21 = arith.constant dense<0.000000e+00> : vector<286x16xf32>
    %15 = tpu.matmul %12, %14, %cst_21 {dimension_numbers = #tpu.dot_dimension_numbers<[1], [0], [0], [1], [0, 0, 1, 1], [], []>} : vector<286x4xbf16>, vector<4x16xbf16>, vector<286x16xf32> -> vector<286x16xf32>
    %16 = arith.addf %9, %15 : vector<286x16xf32>
    %c0_i32_22 = arith.constant 0 : i32
    %c0_i32_23 = arith.constant 0 : i32
    %c0_i32_24 = arith.constant 0 : i32
    %17 = tpu.memref_slice %arg1[%c0_i32_22, %c0_i32_23, %c0_i32_24] : memref<1x324x4xbf16, #tpu.memory_space<vmem>> -> memref<1x324x4xbf16, #tpu.memory_space<vmem>>
    %18 = tpu.memref_squeeze %17 : memref<1x324x4xbf16, #tpu.memory_space<vmem>> -> memref<324x4xbf16, #tpu.memory_space<vmem>>
    %c2 = arith.constant 2 : index
    %c0_25 = arith.constant 0 : index
    %19 = vector.load %18[%c2, %c0_25] : memref<324x4xbf16, #tpu.memory_space<vmem>>, vector<286x4xbf16>
    %c0_26 = arith.constant 0 : index
    %c2_27 = arith.constant 2 : index
    %c0_28 = arith.constant 0 : index
    %c0_29 = arith.constant 0 : index
    %20 = vector.load %arg2[%c0_26, %c2_27, %c0_28, %c0_29] : memref<1x9x4x16xbf16, #tpu.memory_space<vmem>>, vector<1x1x4x16xbf16>
    %21 = vector.shape_cast %20 : vector<1x1x4x16xbf16> to vector<4x16xbf16>
    %cst_30 = arith.constant dense<0.000000e+00> : vector<286x16xf32>
    %22 = tpu.matmul %19, %21, %cst_30 {dimension_numbers = #tpu.dot_dimension_numbers<[1], [0], [0], [1], [0, 0, 1, 1], [], []>} : vector<286x4xbf16>, vector<4x16xbf16>, vector<286x16xf32> -> vector<286x16xf32>
    %23 = arith.addf %16, %22 : vector<286x16xf32>
    %c0_i32_31 = arith.constant 0 : i32
    %c0_i32_32 = arith.constant 0 : i32
    %c0_i32_33 = arith.constant 0 : i32
    %24 = tpu.memref_slice %arg1[%c0_i32_31, %c0_i32_32, %c0_i32_33] : memref<1x324x4xbf16, #tpu.memory_space<vmem>> -> memref<1x324x4xbf16, #tpu.memory_space<vmem>>
    %25 = tpu.memref_squeeze %24 : memref<1x324x4xbf16, #tpu.memory_space<vmem>> -> memref<324x4xbf16, #tpu.memory_space<vmem>>
    %c18 = arith.constant 18 : index
    %c0_34 = arith.constant 0 : index
    %26 = vector.load %25[%c18, %c0_34] : memref<324x4xbf16, #tpu.memory_space<vmem>>, vector<286x4xbf16>
    %c0_35 = arith.constant 0 : index
    %c3 = arith.constant 3 : index
    %c0_36 = arith.constant 0 : index
    %c0_37 = arith.constant 0 : index
    %27 = vector.load %arg2[%c0_35, %c3, %c0_36, %c0_37] : memref<1x9x4x16xbf16, #tpu.memory_space<vmem>>, vector<1x1x4x16xbf16>
    %28 = vector.shape_cast %27 : vector<1x1x4x16xbf16> to vector<4x16xbf16>
    %cst_38 = arith.constant dense<0.000000e+00> : vector<286x16xf32>
    %29 = tpu.matmul %26, %28, %cst_38 {dimension_numbers = #tpu.dot_dimension_numbers<[1], [0], [0], [1], [0, 0, 1, 1], [], []>} : vector<286x4xbf16>, vector<4x16xbf16>, vector<286x16xf32> -> vector<286x16xf32>
    %30 = arith.addf %23, %29 : vector<286x16xf32>
    %c0_i32_39 = arith.constant 0 : i32
    %c0_i32_40 = arith.constant 0 : i32
    %c0_i32_41 = arith.constant 0 : i32
    %31 = tpu.memref_slice %arg1[%c0_i32_39, %c0_i32_40, %c0_i32_41] : memref<1x324x4xbf16, #tpu.memory_space<vmem>> -> memref<1x324x4xbf16, #tpu.memory_space<vmem>>
    %32 = tpu.memref_squeeze %31 : memref<1x324x4xbf16, #tpu.memory_space<vmem>> -> memref<324x4xbf16, #tpu.memory_space<vmem>>
    %c19 = arith.constant 19 : index
    %c0_42 = arith.constant 0 : index
    %33 = vector.load %32[%c19, %c0_42] : memref<324x4xbf16, #tpu.memory_space<vmem>>, vector<286x4xbf16>
    %c0_43 = arith.constant 0 : index
    %c4 = arith.constant 4 : index
    %c0_44 = arith.constant 0 : index
    %c0_45 = arith.constant 0 : index
    %34 = vector.load %arg2[%c0_43, %c4, %c0_44, %c0_45] : memref<1x9x4x16xbf16, #tpu.memory_space<vmem>>, vector<1x1x4x16xbf16>
    %35 = vector.shape_cast %34 : vector<1x1x4x16xbf16> to vector<4x16xbf16>
    %cst_46 = arith.constant dense<0.000000e+00> : vector<286x16xf32>
    %36 = tpu.matmul %33, %35, %cst_46 {dimension_numbers = #tpu.dot_dimension_numbers<[1], [0], [0], [1], [0, 0, 1, 1], [], []>} : vector<286x4xbf16>, vector<4x16xbf16>, vector<286x16xf32> -> vector<286x16xf32>
    %37 = arith.addf %30, %36 : vector<286x16xf32>
    %c0_i32_47 = arith.constant 0 : i32
    %c0_i32_48 = arith.constant 0 : i32
    %c0_i32_49 = arith.constant 0 : i32
    %38 = tpu.memref_slice %arg1[%c0_i32_47, %c0_i32_48, %c0_i32_49] : memref<1x324x4xbf16, #tpu.memory_space<vmem>> -> memref<1x324x4xbf16, #tpu.memory_space<vmem>>
    %39 = tpu.memref_squeeze %38 : memref<1x324x4xbf16, #tpu.memory_space<vmem>> -> memref<324x4xbf16, #tpu.memory_space<vmem>>
    %c20 = arith.constant 20 : index
    %c0_50 = arith.constant 0 : index
    %40 = vector.load %39[%c20, %c0_50] : memref<324x4xbf16, #tpu.memory_space<vmem>>, vector<286x4xbf16>
    %c0_51 = arith.constant 0 : index
    %c5 = arith.constant 5 : index
    %c0_52 = arith.constant 0 : index
    %c0_53 = arith.constant 0 : index
    %41 = vector.load %arg2[%c0_51, %c5, %c0_52, %c0_53] : memref<1x9x4x16xbf16, #tpu.memory_space<vmem>>, vector<1x1x4x16xbf16>
    %42 = vector.shape_cast %41 : vector<1x1x4x16xbf16> to vector<4x16xbf16>
    %cst_54 = arith.constant dense<0.000000e+00> : vector<286x16xf32>
    %43 = tpu.matmul %40, %42, %cst_54 {dimension_numbers = #tpu.dot_dimension_numbers<[1], [0], [0], [1], [0, 0, 1, 1], [], []>} : vector<286x4xbf16>, vector<4x16xbf16>, vector<286x16xf32> -> vector<286x16xf32>
    %44 = arith.addf %37, %43 : vector<286x16xf32>
    %c0_i32_55 = arith.constant 0 : i32
    %c0_i32_56 = arith.constant 0 : i32
    %c0_i32_57 = arith.constant 0 : i32
    %45 = tpu.memref_slice %arg1[%c0_i32_55, %c0_i32_56, %c0_i32_57] : memref<1x324x4xbf16, #tpu.memory_space<vmem>> -> memref<1x324x4xbf16, #tpu.memory_space<vmem>>
    %46 = tpu.memref_squeeze %45 : memref<1x324x4xbf16, #tpu.memory_space<vmem>> -> memref<324x4xbf16, #tpu.memory_space<vmem>>
    %c36 = arith.constant 36 : index
    %c0_58 = arith.constant 0 : index
    %47 = vector.load %46[%c36, %c0_58] : memref<324x4xbf16, #tpu.memory_space<vmem>>, vector<286x4xbf16>
    %c0_59 = arith.constant 0 : index
    %c6 = arith.constant 6 : index
    %c0_60 = arith.constant 0 : index
    %c0_61 = arith.constant 0 : index
    %48 = vector.load %arg2[%c0_59, %c6, %c0_60, %c0_61] : memref<1x9x4x16xbf16, #tpu.memory_space<vmem>>, vector<1x1x4x16xbf16>
    %49 = vector.shape_cast %48 : vector<1x1x4x16xbf16> to vector<4x16xbf16>
    %cst_62 = arith.constant dense<0.000000e+00> : vector<286x16xf32>
    %50 = tpu.matmul %47, %49, %cst_62 {dimension_numbers = #tpu.dot_dimension_numbers<[1], [0], [0], [1], [0, 0, 1, 1], [], []>} : vector<286x4xbf16>, vector<4x16xbf16>, vector<286x16xf32> -> vector<286x16xf32>
    %51 = arith.addf %44, %50 : vector<286x16xf32>
    %c0_i32_63 = arith.constant 0 : i32
    %c0_i32_64 = arith.constant 0 : i32
    %c0_i32_65 = arith.constant 0 : i32
    %52 = tpu.memref_slice %arg1[%c0_i32_63, %c0_i32_64, %c0_i32_65] : memref<1x324x4xbf16, #tpu.memory_space<vmem>> -> memref<1x324x4xbf16, #tpu.memory_space<vmem>>
    %53 = tpu.memref_squeeze %52 : memref<1x324x4xbf16, #tpu.memory_space<vmem>> -> memref<324x4xbf16, #tpu.memory_space<vmem>>
    %c37 = arith.constant 37 : index
    %c0_66 = arith.constant 0 : index
    %54 = vector.load %53[%c37, %c0_66] : memref<324x4xbf16, #tpu.memory_space<vmem>>, vector<286x4xbf16>
    %c0_67 = arith.constant 0 : index
    %c7 = arith.constant 7 : index
    %c0_68 = arith.constant 0 : index
    %c0_69 = arith.constant 0 : index
    %55 = vector.load %arg2[%c0_67, %c7, %c0_68, %c0_69] : memref<1x9x4x16xbf16, #tpu.memory_space<vmem>>, vector<1x1x4x16xbf16>
    %56 = vector.shape_cast %55 : vector<1x1x4x16xbf16> to vector<4x16xbf16>
    %cst_70 = arith.constant dense<0.000000e+00> : vector<286x16xf32>
    %57 = tpu.matmul %54, %56, %cst_70 {dimension_numbers = #tpu.dot_dimension_numbers<[1], [0], [0], [1], [0, 0, 1, 1], [], []>} : vector<286x4xbf16>, vector<4x16xbf16>, vector<286x16xf32> -> vector<286x16xf32>
    %58 = arith.addf %51, %57 : vector<286x16xf32>
    %c0_i32_71 = arith.constant 0 : i32
    %c0_i32_72 = arith.constant 0 : i32
    %c0_i32_73 = arith.constant 0 : i32
    %59 = tpu.memref_slice %arg1[%c0_i32_71, %c0_i32_72, %c0_i32_73] : memref<1x324x4xbf16, #tpu.memory_space<vmem>> -> memref<1x324x4xbf16, #tpu.memory_space<vmem>>
    %60 = tpu.memref_squeeze %59 : memref<1x324x4xbf16, #tpu.memory_space<vmem>> -> memref<324x4xbf16, #tpu.memory_space<vmem>>
    %c38 = arith.constant 38 : index
    %c0_74 = arith.constant 0 : index
    %61 = vector.load %60[%c38, %c0_74] : memref<324x4xbf16, #tpu.memory_space<vmem>>, vector<286x4xbf16>
    %c0_75 = arith.constant 0 : index
    %c8 = arith.constant 8 : index
    %c0_76 = arith.constant 0 : index
    %c0_77 = arith.constant 0 : index
    %62 = vector.load %arg2[%c0_75, %c8, %c0_76, %c0_77] : memref<1x9x4x16xbf16, #tpu.memory_space<vmem>>, vector<1x1x4x16xbf16>
    %63 = vector.shape_cast %62 : vector<1x1x4x16xbf16> to vector<4x16xbf16>
    %cst_78 = arith.constant dense<0.000000e+00> : vector<286x16xf32>
    %64 = tpu.matmul %61, %63, %cst_78 {dimension_numbers = #tpu.dot_dimension_numbers<[1], [0], [0], [1], [0, 0, 1, 1], [], []>} : vector<286x4xbf16>, vector<4x16xbf16>, vector<286x16xf32> -> vector<286x16xf32>
    %65 = arith.addf %58, %64 : vector<286x16xf32>
    %cst_79 = arith.constant 0.000000e+00 : f32
    %66 = vector.broadcast %cst_79 : f32 to vector<286x16xf32>
    %67 = arith.maximumf %65, %66 : vector<286x16xf32>
    %c0_80 = arith.constant 0 : index
    %c0_81 = arith.constant 0 : index
    %68 = vector.load %arg7[%c0_80, %c0_81] : memref<100x286xbf16, #tpu.memory_space<vmem>>, vector<100x286xbf16>
    %69 = arith.truncf %67 : vector<286x16xf32> to vector<286x16xbf16>
    %cst_82 = arith.constant dense<0.000000e+00> : vector<100x16xf32>
    %70 = tpu.matmul %68, %69, %cst_82 {dimension_numbers = #tpu.dot_dimension_numbers<[1], [0], [0], [1], [0, 0, 1, 1], [], []>} : vector<100x286xbf16>, vector<286x16xbf16>, vector<100x16xf32> -> vector<100x16xf32>
    %71 = arith.truncf %70 : vector<100x16xf32> to vector<100x16xbf16>
    %c0_83 = arith.constant 0 : index
    %c0_84 = arith.constant 0 : index
    %72 = vector.load %arg15[%c0_83, %c0_84] : memref<100x16xbf16, #tpu.memory_space<vmem>>, vector<100x16xbf16>
    tpu.vector_store %arg15[%c0_83, %c0_84], %71 {strides = array<i32>} : memref<100x16xbf16, #tpu.memory_space<vmem>>, vector<100x16xbf16>,
    %c0_85 = arith.constant 0 : index
    %c0_86 = arith.constant 0 : index
    %73 = vector.load %arg15[%c0_85, %c0_86] : memref<100x16xbf16, #tpu.memory_space<vmem>>, vector<78x16xbf16>
    %c0_87 = arith.constant 0 : index
    %c0_88 = arith.constant 0 : index
    %c0_89 = arith.constant 0 : index
    %c0_90 = arith.constant 0 : index
    %74 = vector.load %arg3[%c0_87, %c0_88, %c0_89, %c0_90] : memref<2x9x16x16xbf16, #tpu.memory_space<vmem>>, vector<1x1x16x16xbf16>
    %75 = vector.shape_cast %74 : vector<1x1x16x16xbf16> to vector<16x16xbf16>
    %cst_91 = arith.constant dense<0.000000e+00> : vector<78x16xf32>
    %76 = tpu.matmul %73, %75, %cst_91 {dimension_numbers = #tpu.dot_dimension_numbers<[1], [0], [0], [1], [0, 0, 1, 1], [], []>} : vector<78x16xbf16>, vector<16x16xbf16>, vector<78x16xf32> -> vector<78x16xf32>
    %c1_92 = arith.constant 1 : index
    %c0_93 = arith.constant 0 : index
    %77 = vector.load %arg15[%c1_92, %c0_93] : memref<100x16xbf16, #tpu.memory_space<vmem>>, vector<78x16xbf16>
    %c0_94 = arith.constant 0 : index
    %c1_95 = arith.constant 1 : index
    %c0_96 = arith.constant 0 : index
    %c0_97 = arith.constant 0 : index
    %78 = vector.load %arg3[%c0_94, %c1_95, %c0_96, %c0_97] : memref<2x9x16x16xbf16, #tpu.memory_space<vmem>>, vector<1x1x16x16xbf16>
    %79 = vector.shape_cast %78 : vector<1x1x16x16xbf16> to vector<16x16xbf16>
    %cst_98 = arith.constant dense<0.000000e+00> : vector<78x16xf32>
    %80 = tpu.matmul %77, %79, %cst_98 {dimension_numbers = #tpu.dot_dimension_numbers<[1], [0], [0], [1], [0, 0, 1, 1], [], []>} : vector<78x16xbf16>, vector<16x16xbf16>, vector<78x16xf32> -> vector<78x16xf32>
    %81 = arith.addf %76, %80 : vector<78x16xf32>
    %c2_99 = arith.constant 2 : index
    %c0_100 = arith.constant 0 : index
    %82 = vector.load %arg15[%c2_99, %c0_100] : memref<100x16xbf16, #tpu.memory_space<vmem>>, vector<78x16xbf16>
    %c0_101 = arith.constant 0 : index
    %c2_102 = arith.constant 2 : index
    %c0_103 = arith.constant 0 : index
    %c0_104 = arith.constant 0 : index
    %83 = vector.load %arg3[%c0_101, %c2_102, %c0_103, %c0_104] : memref<2x9x16x16xbf16, #tpu.memory_space<vmem>>, vector<1x1x16x16xbf16>
    %84 = vector.shape_cast %83 : vector<1x1x16x16xbf16> to vector<16x16xbf16>
    %cst_105 = arith.constant dense<0.000000e+00> : vector<78x16xf32>
    %85 = tpu.matmul %82, %84, %cst_105 {dimension_numbers = #tpu.dot_dimension_numbers<[1], [0], [0], [1], [0, 0, 1, 1], [], []>} : vector<78x16xbf16>, vector<16x16xbf16>, vector<78x16xf32> -> vector<78x16xf32>
    %86 = arith.addf %81, %85 : vector<78x16xf32>
    %c10 = arith.constant 10 : index
    %c0_106 = arith.constant 0 : index
    %87 = vector.load %arg15[%c10, %c0_106] : memref<100x16xbf16, #tpu.memory_space<vmem>>, vector<78x16xbf16>
    %c0_107 = arith.constant 0 : index
    %c3_108 = arith.constant 3 : index
    %c0_109 = arith.constant 0 : index
    %c0_110 = arith.constant 0 : index
    %88 = vector.load %arg3[%c0_107, %c3_108, %c0_109, %c0_110] : memref<2x9x16x16xbf16, #tpu.memory_space<vmem>>, vector<1x1x16x16xbf16>
    %89 = vector.shape_cast %88 : vector<1x1x16x16xbf16> to vector<16x16xbf16>
    %cst_111 = arith.constant dense<0.000000e+00> : vector<78x16xf32>
    %90 = tpu.matmul %87, %89, %cst_111 {dimension_numbers = #tpu.dot_dimension_numbers<[1], [0], [0], [1], [0, 0, 1, 1], [], []>} : vector<78x16xbf16>, vector<16x16xbf16>, vector<78x16xf32> -> vector<78x16xf32>
    %91 = arith.addf %86, %90 : vector<78x16xf32>
    %c11 = arith.constant 11 : index
    %c0_112 = arith.constant 0 : index
    %92 = vector.load %arg15[%c11, %c0_112] : memref<100x16xbf16, #tpu.memory_space<vmem>>, vector<78x16xbf16>
    %c0_113 = arith.constant 0 : index
    %c4_114 = arith.constant 4 : index
    %c0_115 = arith.constant 0 : index
    %c0_116 = arith.constant 0 : index
    %93 = vector.load %arg3[%c0_113, %c4_114, %c0_115, %c0_116] : memref<2x9x16x16xbf16, #tpu.memory_space<vmem>>, vector<1x1x16x16xbf16>
    %94 = vector.shape_cast %93 : vector<1x1x16x16xbf16> to vector<16x16xbf16>
    %cst_117 = arith.constant dense<0.000000e+00> : vector<78x16xf32>
    %95 = tpu.matmul %92, %94, %cst_117 {dimension_numbers = #tpu.dot_dimension_numbers<[1], [0], [0], [1], [0, 0, 1, 1], [], []>} : vector<78x16xbf16>, vector<16x16xbf16>, vector<78x16xf32> -> vector<78x16xf32>
    %96 = arith.addf %91, %95 : vector<78x16xf32>
    %c12 = arith.constant 12 : index
    %c0_118 = arith.constant 0 : index
    %97 = vector.load %arg15[%c12, %c0_118] : memref<100x16xbf16, #tpu.memory_space<vmem>>, vector<78x16xbf16>
    %c0_119 = arith.constant 0 : index
    %c5_120 = arith.constant 5 : index
    %c0_121 = arith.constant 0 : index
    %c0_122 = arith.constant 0 : index
    %98 = vector.load %arg3[%c0_119, %c5_120, %c0_121, %c0_122] : memref<2x9x16x16xbf16, #tpu.memory_space<vmem>>, vector<1x1x16x16xbf16>
    %99 = vector.shape_cast %98 : vector<1x1x16x16xbf16> to vector<16x16xbf16>
    %cst_123 = arith.constant dense<0.000000e+00> : vector<78x16xf32>
    %100 = tpu.matmul %97, %99, %cst_123 {dimension_numbers = #tpu.dot_dimension_numbers<[1], [0], [0], [1], [0, 0, 1, 1], [], []>} : vector<78x16xbf16>, vector<16x16xbf16>, vector<78x16xf32> -> vector<78x16xf32>
    %101 = arith.addf %96, %100 : vector<78x16xf32>
    %c20_124 = arith.constant 20 : index
    %c0_125 = arith.constant 0 : index
    %102 = vector.load %arg15[%c20_124, %c0_125] : memref<100x16xbf16, #tpu.memory_space<vmem>>, vector<78x16xbf16>
    %c0_126 = arith.constant 0 : index
    %c6_127 = arith.constant 6 : index
    %c0_128 = arith.constant 0 : index
    %c0_129 = arith.constant 0 : index
    %103 = vector.load %arg3[%c0_126, %c6_127, %c0_128, %c0_129] : memref<2x9x16x16xbf16, #tpu.memory_space<vmem>>, vector<1x1x16x16xbf16>
    %104 = vector.shape_cast %103 : vector<1x1x16x16xbf16> to vector<16x16xbf16>
    %cst_130 = arith.constant dense<0.000000e+00> : vector<78x16xf32>
    %105 = tpu.matmul %102, %104, %cst_130 {dimension_numbers = #tpu.dot_dimension_numbers<[1], [0], [0], [1], [0, 0, 1, 1], [], []>} : vector<78x16xbf16>, vector<16x16xbf16>, vector<78x16xf32> -> vector<78x16xf32>
    %106 = arith.addf %101, %105 : vector<78x16xf32>
    %c21 = arith.constant 21 : index
    %c0_131 = arith.constant 0 : index
    %107 = vector.load %arg15[%c21, %c0_131] : memref<100x16xbf16, #tpu.memory_space<vmem>>, vector<78x16xbf16>
    %c0_132 = arith.constant 0 : index
    %c7_133 = arith.constant 7 : index
    %c0_134 = arith.constant 0 : index
    %c0_135 = arith.constant 0 : index
    %108 = vector.load %arg3[%c0_132, %c7_133, %c0_134, %c0_135] : memref<2x9x16x16xbf16, #tpu.memory_space<vmem>>, vector<1x1x16x16xbf16>
    %109 = vector.shape_cast %108 : vector<1x1x16x16xbf16> to vector<16x16xbf16>
    %cst_136 = arith.constant dense<0.000000e+00> : vector<78x16xf32>
    %110 = tpu.matmul %107, %109, %cst_136 {dimension_numbers = #tpu.dot_dimension_numbers<[1], [0], [0], [1], [0, 0, 1, 1], [], []>} : vector<78x16xbf16>, vector<16x16xbf16>, vector<78x16xf32> -> vector<78x16xf32>
    %111 = arith.addf %106, %110 : vector<78x16xf32>
    %c22 = arith.constant 22 : index
    %c0_137 = arith.constant 0 : index
    %112 = vector.load %arg15[%c22, %c0_137] : memref<100x16xbf16, #tpu.memory_space<vmem>>, vector<78x16xbf16>
    %c0_138 = arith.constant 0 : index
    %c8_139 = arith.constant 8 : index
    %c0_140 = arith.constant 0 : index
    %c0_141 = arith.constant 0 : index
    %113 = vector.load %arg3[%c0_138, %c8_139, %c0_140, %c0_141] : memref<2x9x16x16xbf16, #tpu.memory_space<vmem>>, vector<1x1x16x16xbf16>
    %114 = vector.shape_cast %113 : vector<1x1x16x16xbf16> to vector<16x16xbf16>
    %cst_142 = arith.constant dense<0.000000e+00> : vector<78x16xf32>
    %115 = tpu.matmul %112, %114, %cst_142 {dimension_numbers = #tpu.dot_dimension_numbers<[1], [0], [0], [1], [0, 0, 1, 1], [], []>} : vector<78x16xbf16>, vector<16x16xbf16>, vector<78x16xf32> -> vector<78x16xf32>
    %116 = arith.addf %111, %115 : vector<78x16xf32>
    %cst_143 = arith.constant 0.000000e+00 : f32
    %117 = vector.broadcast %cst_143 : f32 to vector<78x16xf32>
    %118 = arith.maximumf %116, %117 : vector<78x16xf32>
    %c0_144 = arith.constant 0 : index
    %c0_145 = arith.constant 0 : index
    %119 = vector.load %arg10[%c0_144, %c0_145] : memref<78x1xf32, #tpu.memory_space<vmem>>, vector<78x1xf32>
    %120 = vector.broadcast %119 : vector<78x1xf32> to vector<78x16xf32>
    %121 = arith.mulf %118, %120 : vector<78x16xf32>
    %122 = arith.truncf %121 : vector<78x16xf32> to vector<78x16xbf16>
    %c11_146 = arith.constant 11 : index
    %c0_147 = arith.constant 0 : index
    %123 = vector.load %arg16[%c11_146, %c0_147] : memref<100x16xbf16, #tpu.memory_space<vmem>>, vector<78x16xbf16>
    tpu.vector_store %arg16[%c11_146, %c0_147], %122 {strides = array<i32>} : memref<100x16xbf16, #tpu.memory_space<vmem>>, vector<78x16xbf16>,
    %c0_148 = arith.constant 0 : index
    %c0_149 = arith.constant 0 : index
    %124 = vector.load %arg16[%c0_148, %c0_149] : memref<100x16xbf16, #tpu.memory_space<vmem>>, vector<78x16xbf16>
    %c1_150 = arith.constant 1 : index
    %c0_151 = arith.constant 0 : index
    %c0_152 = arith.constant 0 : index
    %c0_153 = arith.constant 0 : index
    %125 = vector.load %arg3[%c1_150, %c0_151, %c0_152, %c0_153] : memref<2x9x16x16xbf16, #tpu.memory_space<vmem>>, vector<1x1x16x16xbf16>
    %126 = vector.shape_cast %125 : vector<1x1x16x16xbf16> to vector<16x16xbf16>
    %cst_154 = arith.constant dense<0.000000e+00> : vector<78x16xf32>
    %127 = tpu.matmul %124, %126, %cst_154 {dimension_numbers = #tpu.dot_dimension_numbers<[1], [0], [0], [1], [0, 0, 1, 1], [], []>} : vector<78x16xbf16>, vector<16x16xbf16>, vector<78x16xf32> -> vector<78x16xf32>
    %c1_155 = arith.constant 1 : index
    %c0_156 = arith.constant 0 : index
    %128 = vector.load %arg16[%c1_155, %c0_156] : memref<100x16xbf16, #tpu.memory_space<vmem>>, vector<78x16xbf16>
    %c1_157 = arith.constant 1 : index
    %c1_158 = arith.constant 1 : index
    %c0_159 = arith.constant 0 : index
    %c0_160 = arith.constant 0 : index
    %129 = vector.load %arg3[%c1_157, %c1_158, %c0_159, %c0_160] : memref<2x9x16x16xbf16, #tpu.memory_space<vmem>>, vector<1x1x16x16xbf16>
    %130 = vector.shape_cast %129 : vector<1x1x16x16xbf16> to vector<16x16xbf16>
    %cst_161 = arith.constant dense<0.000000e+00> : vector<78x16xf32>
    %131 = tpu.matmul %128, %130, %cst_161 {dimension_numbers = #tpu.dot_dimension_numbers<[1], [0], [0], [1], [0, 0, 1, 1], [], []>} : vector<78x16xbf16>, vector<16x16xbf16>, vector<78x16xf32> -> vector<78x16xf32>
    %132 = arith.addf %127, %131 : vector<78x16xf32>
    %c2_162 = arith.constant 2 : index
    %c0_163 = arith.constant 0 : index
    %133 = vector.load %arg16[%c2_162, %c0_163] : memref<100x16xbf16, #tpu.memory_space<vmem>>, vector<78x16xbf16>
    %c1_164 = arith.constant 1 : index
    %c2_165 = arith.constant 2 : index
    %c0_166 = arith.constant 0 : index
    %c0_167 = arith.constant 0 : index
    %134 = vector.load %arg3[%c1_164, %c2_165, %c0_166, %c0_167] : memref<2x9x16x16xbf16, #tpu.memory_space<vmem>>, vector<1x1x16x16xbf16>
    %135 = vector.shape_cast %134 : vector<1x1x16x16xbf16> to vector<16x16xbf16>
    %cst_168 = arith.constant dense<0.000000e+00> : vector<78x16xf32>
    %136 = tpu.matmul %133, %135, %cst_168 {dimension_numbers = #tpu.dot_dimension_numbers<[1], [0], [0], [1], [0, 0, 1, 1], [], []>} : vector<78x16xbf16>, vector<16x16xbf16>, vector<78x16xf32> -> vector<78x16xf32>
    %137 = arith.addf %132, %136 : vector<78x16xf32>
    %c10_169 = arith.constant 10 : index
    %c0_170 = arith.constant 0 : index
    %138 = vector.load %arg16[%c10_169, %c0_170] : memref<100x16xbf16, #tpu.memory_space<vmem>>, vector<78x16xbf16>
    %c1_171 = arith.constant 1 : index
    %c3_172 = arith.constant 3 : index
    %c0_173 = arith.constant 0 : index
    %c0_174 = arith.constant 0 : index
    %139 = vector.load %arg3[%c1_171, %c3_172, %c0_173, %c0_174] : memref<2x9x16x16xbf16, #tpu.memory_space<vmem>>, vector<1x1x16x16xbf16>
    %140 = vector.shape_cast %139 : vector<1x1x16x16xbf16> to vector<16x16xbf16>
    %cst_175 = arith.constant dense<0.000000e+00> : vector<78x16xf32>
    %141 = tpu.matmul %138, %140, %cst_175 {dimension_numbers = #tpu.dot_dimension_numbers<[1], [0], [0], [1], [0, 0, 1, 1], [], []>} : vector<78x16xbf16>, vector<16x16xbf16>, vector<78x16xf32> -> vector<78x16xf32>
    %142 = arith.addf %137, %141 : vector<78x16xf32>
    %c11_176 = arith.constant 11 : index
    %c0_177 = arith.constant 0 : index
    %143 = vector.load %arg16[%c11_176, %c0_177] : memref<100x16xbf16, #tpu.memory_space<vmem>>, vector<78x16xbf16>
    %c1_178 = arith.constant 1 : index
    %c4_179 = arith.constant 4 : index
    %c0_180 = arith.constant 0 : index
    %c0_181 = arith.constant 0 : index
    %144 = vector.load %arg3[%c1_178, %c4_179, %c0_180, %c0_181] : memref<2x9x16x16xbf16, #tpu.memory_space<vmem>>, vector<1x1x16x16xbf16>
    %145 = vector.shape_cast %144 : vector<1x1x16x16xbf16> to vector<16x16xbf16>
    %cst_182 = arith.constant dense<0.000000e+00> : vector<78x16xf32>
    %146 = tpu.matmul %143, %145, %cst_182 {dimension_numbers = #tpu.dot_dimension_numbers<[1], [0], [0], [1], [0, 0, 1, 1], [], []>} : vector<78x16xbf16>, vector<16x16xbf16>, vector<78x16xf32> -> vector<78x16xf32>
    %147 = arith.addf %142, %146 : vector<78x16xf32>
    %c12_183 = arith.constant 12 : index
    %c0_184 = arith.constant 0 : index
    %148 = vector.load %arg16[%c12_183, %c0_184] : memref<100x16xbf16, #tpu.memory_space<vmem>>, vector<78x16xbf16>
    %c1_185 = arith.constant 1 : index
    %c5_186 = arith.constant 5 : index
    %c0_187 = arith.constant 0 : index
    %c0_188 = arith.constant 0 : index
    %149 = vector.load %arg3[%c1_185, %c5_186, %c0_187, %c0_188] : memref<2x9x16x16xbf16, #tpu.memory_space<vmem>>, vector<1x1x16x16xbf16>
    %150 = vector.shape_cast %149 : vector<1x1x16x16xbf16> to vector<16x16xbf16>
    %cst_189 = arith.constant dense<0.000000e+00> : vector<78x16xf32>
    %151 = tpu.matmul %148, %150, %cst_189 {dimension_numbers = #tpu.dot_dimension_numbers<[1], [0], [0], [1], [0, 0, 1, 1], [], []>} : vector<78x16xbf16>, vector<16x16xbf16>, vector<78x16xf32> -> vector<78x16xf32>
    %152 = arith.addf %147, %151 : vector<78x16xf32>
    %c20_190 = arith.constant 20 : index
    %c0_191 = arith.constant 0 : index
    %153 = vector.load %arg16[%c20_190, %c0_191] : memref<100x16xbf16, #tpu.memory_space<vmem>>, vector<78x16xbf16>
    %c1_192 = arith.constant 1 : index
    %c6_193 = arith.constant 6 : index
    %c0_194 = arith.constant 0 : index
    %c0_195 = arith.constant 0 : index
    %154 = vector.load %arg3[%c1_192, %c6_193, %c0_194, %c0_195] : memref<2x9x16x16xbf16, #tpu.memory_space<vmem>>, vector<1x1x16x16xbf16>
    %155 = vector.shape_cast %154 : vector<1x1x16x16xbf16> to vector<16x16xbf16>
    %cst_196 = arith.constant dense<0.000000e+00> : vector<78x16xf32>
    %156 = tpu.matmul %153, %155, %cst_196 {dimension_numbers = #tpu.dot_dimension_numbers<[1], [0], [0], [1], [0, 0, 1, 1], [], []>} : vector<78x16xbf16>, vector<16x16xbf16>, vector<78x16xf32> -> vector<78x16xf32>
    %157 = arith.addf %152, %156 : vector<78x16xf32>
    %c21_197 = arith.constant 21 : index
    %c0_198 = arith.constant 0 : index
    %158 = vector.load %arg16[%c21_197, %c0_198] : memref<100x16xbf16, #tpu.memory_space<vmem>>, vector<78x16xbf16>
    %c1_199 = arith.constant 1 : index
    %c7_200 = arith.constant 7 : index
    %c0_201 = arith.constant 0 : index
    %c0_202 = arith.constant 0 : index
    %159 = vector.load %arg3[%c1_199, %c7_200, %c0_201, %c0_202] : memref<2x9x16x16xbf16, #tpu.memory_space<vmem>>, vector<1x1x16x16xbf16>
    %160 = vector.shape_cast %159 : vector<1x1x16x16xbf16> to vector<16x16xbf16>
    %cst_203 = arith.constant dense<0.000000e+00> : vector<78x16xf32>
    %161 = tpu.matmul %158, %160, %cst_203 {dimension_numbers = #tpu.dot_dimension_numbers<[1], [0], [0], [1], [0, 0, 1, 1], [], []>} : vector<78x16xbf16>, vector<16x16xbf16>, vector<78x16xf32> -> vector<78x16xf32>
    %162 = arith.addf %157, %161 : vector<78x16xf32>
    %c22_204 = arith.constant 22 : index
    %c0_205 = arith.constant 0 : index
    %163 = vector.load %arg16[%c22_204, %c0_205] : memref<100x16xbf16, #tpu.memory_space<vmem>>, vector<78x16xbf16>
    %c1_206 = arith.constant 1 : index
    %c8_207 = arith.constant 8 : index
    %c0_208 = arith.constant 0 : index
    %c0_209 = arith.constant 0 : index
    %164 = vector.load %arg3[%c1_206, %c8_207, %c0_208, %c0_209] : memref<2x9x16x16xbf16, #tpu.memory_space<vmem>>, vector<1x1x16x16xbf16>
    %165 = vector.shape_cast %164 : vector<1x1x16x16xbf16> to vector<16x16xbf16>
    %cst_210 = arith.constant dense<0.000000e+00> : vector<78x16xf32>
    %166 = tpu.matmul %163, %165, %cst_210 {dimension_numbers = #tpu.dot_dimension_numbers<[1], [0], [0], [1], [0, 0, 1, 1], [], []>} : vector<78x16xbf16>, vector<16x16xbf16>, vector<78x16xf32> -> vector<78x16xf32>
    %167 = arith.addf %162, %166 : vector<78x16xf32>
    %c11_211 = arith.constant 11 : index
    %c0_212 = arith.constant 0 : index
    %168 = vector.load %arg15[%c11_211, %c0_212] : memref<100x16xbf16, #tpu.memory_space<vmem>>, vector<78x16xbf16>
    %169 = arith.extf %168 : vector<78x16xbf16> to vector<78x16xf32>
    %170 = arith.addf %167, %169 : vector<78x16xf32>
    %cst_213 = arith.constant 0.000000e+00 : f32
    %171 = vector.broadcast %cst_213 : f32 to vector<78x16xf32>
    %172 = arith.maximumf %170, %171 : vector<78x16xf32>
    %c0_214 = arith.constant 0 : index
    %c0_215 = arith.constant 0 : index
    %173 = vector.load %arg10[%c0_214, %c0_215] : memref<78x1xf32, #tpu.memory_space<vmem>>, vector<78x1xf32>
    %174 = vector.broadcast %173 : vector<78x1xf32> to vector<78x16xf32>
    %175 = arith.mulf %172, %174 : vector<78x16xf32>
    %176 = arith.truncf %175 : vector<78x16xf32> to vector<78x16xbf16>
    %c11_216 = arith.constant 11 : index
    %c0_217 = arith.constant 0 : index
    %177 = vector.load %arg15[%c11_216, %c0_217] : memref<100x16xbf16, #tpu.memory_space<vmem>>, vector<78x16xbf16>
    tpu.vector_store %arg15[%c11_216, %c0_217], %176 {strides = array<i32>} : memref<100x16xbf16, #tpu.memory_space<vmem>>, vector<78x16xbf16>,
    %c0_218 = arith.constant 0 : index
    %c0_219 = arith.constant 0 : index
    %178 = vector.load %arg15[%c0_218, %c0_219] : memref<100x16xbf16, #tpu.memory_space<vmem>>, vector<78x16xbf16>
    %c0_220 = arith.constant 0 : index
    %c0_221 = arith.constant 0 : index
    %c0_222 = arith.constant 0 : index
    %c0_223 = arith.constant 0 : index
    %179 = vector.load %arg4[%c0_220, %c0_221, %c0_222, %c0_223] : memref<2x9x16x32xbf16, #tpu.memory_space<vmem>>, vector<1x1x16x32xbf16>
    %180 = vector.shape_cast %179 : vector<1x1x16x32xbf16> to vector<16x32xbf16>
    %cst_224 = arith.constant dense<0.000000e+00> : vector<78x32xf32>
    %181 = tpu.matmul %178, %180, %cst_224 {dimension_numbers = #tpu.dot_dimension_numbers<[1], [0], [0], [1], [0, 0, 1, 1], [], []>} : vector<78x16xbf16>, vector<16x32xbf16>, vector<78x32xf32> -> vector<78x32xf32>
    %c1_225 = arith.constant 1 : index
    %c0_226 = arith.constant 0 : index
    %182 = vector.load %arg15[%c1_225, %c0_226] : memref<100x16xbf16, #tpu.memory_space<vmem>>, vector<78x16xbf16>
    %c0_227 = arith.constant 0 : index
    %c1_228 = arith.constant 1 : index
    %c0_229 = arith.constant 0 : index
    %c0_230 = arith.constant 0 : index
    %183 = vector.load %arg4[%c0_227, %c1_228, %c0_229, %c0_230] : memref<2x9x16x32xbf16, #tpu.memory_space<vmem>>, vector<1x1x16x32xbf16>
    %184 = vector.shape_cast %183 : vector<1x1x16x32xbf16> to vector<16x32xbf16>
    %cst_231 = arith.constant dense<0.000000e+00> : vector<78x32xf32>
    %185 = tpu.matmul %182, %184, %cst_231 {dimension_numbers = #tpu.dot_dimension_numbers<[1], [0], [0], [1], [0, 0, 1, 1], [], []>} : vector<78x16xbf16>, vector<16x32xbf16>, vector<78x32xf32> -> vector<78x32xf32>
    %186 = arith.addf %181, %185 : vector<78x32xf32>
    %c2_232 = arith.constant 2 : index
    %c0_233 = arith.constant 0 : index
    %187 = vector.load %arg15[%c2_232, %c0_233] : memref<100x16xbf16, #tpu.memory_space<vmem>>, vector<78x16xbf16>
    %c0_234 = arith.constant 0 : index
    %c2_235 = arith.constant 2 : index
    %c0_236 = arith.constant 0 : index
    %c0_237 = arith.constant 0 : index
    %188 = vector.load %arg4[%c0_234, %c2_235, %c0_236, %c0_237] : memref<2x9x16x32xbf16, #tpu.memory_space<vmem>>, vector<1x1x16x32xbf16>
    %189 = vector.shape_cast %188 : vector<1x1x16x32xbf16> to vector<16x32xbf16>
    %cst_238 = arith.constant dense<0.000000e+00> : vector<78x32xf32>
    %190 = tpu.matmul %187, %189, %cst_238 {dimension_numbers = #tpu.dot_dimension_numbers<[1], [0], [0], [1], [0, 0, 1, 1], [], []>} : vector<78x16xbf16>, vector<16x32xbf16>, vector<78x32xf32> -> vector<78x32xf32>
    %191 = arith.addf %186, %190 : vector<78x32xf32>
    %c10_239 = arith.constant 10 : index
    %c0_240 = arith.constant 0 : index
    %192 = vector.load %arg15[%c10_239, %c0_240] : memref<100x16xbf16, #tpu.memory_space<vmem>>, vector<78x16xbf16>
    %c0_241 = arith.constant 0 : index
    %c3_242 = arith.constant 3 : index
    %c0_243 = arith.constant 0 : index
    %c0_244 = arith.constant 0 : index
    %193 = vector.load %arg4[%c0_241, %c3_242, %c0_243, %c0_244] : memref<2x9x16x32xbf16, #tpu.memory_space<vmem>>, vector<1x1x16x32xbf16>
    %194 = vector.shape_cast %193 : vector<1x1x16x32xbf16> to vector<16x32xbf16>
    %cst_245 = arith.constant dense<0.000000e+00> : vector<78x32xf32>
    %195 = tpu.matmul %192, %194, %cst_245 {dimension_numbers = #tpu.dot_dimension_numbers<[1], [0], [0], [1], [0, 0, 1, 1], [], []>} : vector<78x16xbf16>, vector<16x32xbf16>, vector<78x32xf32> -> vector<78x32xf32>
    %196 = arith.addf %191, %195 : vector<78x32xf32>
    %c11_246 = arith.constant 11 : index
    %c0_247 = arith.constant 0 : index
    %197 = vector.load %arg15[%c11_246, %c0_247] : memref<100x16xbf16, #tpu.memory_space<vmem>>, vector<78x16xbf16>
    %c0_248 = arith.constant 0 : index
    %c4_249 = arith.constant 4 : index
    %c0_250 = arith.constant 0 : index
    %c0_251 = arith.constant 0 : index
    %198 = vector.load %arg4[%c0_248, %c4_249, %c0_250, %c0_251] : memref<2x9x16x32xbf16, #tpu.memory_space<vmem>>, vector<1x1x16x32xbf16>
    %199 = vector.shape_cast %198 : vector<1x1x16x32xbf16> to vector<16x32xbf16>
    %cst_252 = arith.constant dense<0.000000e+00> : vector<78x32xf32>
    %200 = tpu.matmul %197, %199, %cst_252 {dimension_numbers = #tpu.dot_dimension_numbers<[1], [0], [0], [1], [0, 0, 1, 1], [], []>} : vector<78x16xbf16>, vector<16x32xbf16>, vector<78x32xf32> -> vector<78x32xf32>
    %201 = arith.addf %196, %200 : vector<78x32xf32>
    %c12_253 = arith.constant 12 : index
    %c0_254 = arith.constant 0 : index
    %202 = vector.load %arg15[%c12_253, %c0_254] : memref<100x16xbf16, #tpu.memory_space<vmem>>, vector<78x16xbf16>
    %c0_255 = arith.constant 0 : index
    %c5_256 = arith.constant 5 : index
    %c0_257 = arith.constant 0 : index
    %c0_258 = arith.constant 0 : index
    %203 = vector.load %arg4[%c0_255, %c5_256, %c0_257, %c0_258] : memref<2x9x16x32xbf16, #tpu.memory_space<vmem>>, vector<1x1x16x32xbf16>
    %204 = vector.shape_cast %203 : vector<1x1x16x32xbf16> to vector<16x32xbf16>
    %cst_259 = arith.constant dense<0.000000e+00> : vector<78x32xf32>
    %205 = tpu.matmul %202, %204, %cst_259 {dimension_numbers = #tpu.dot_dimension_numbers<[1], [0], [0], [1], [0, 0, 1, 1], [], []>} : vector<78x16xbf16>, vector<16x32xbf16>, vector<78x32xf32> -> vector<78x32xf32>
    %206 = arith.addf %201, %205 : vector<78x32xf32>
    %c20_260 = arith.constant 20 : index
    %c0_261 = arith.constant 0 : index
    %207 = vector.load %arg15[%c20_260, %c0_261] : memref<100x16xbf16, #tpu.memory_space<vmem>>, vector<78x16xbf16>
    %c0_262 = arith.constant 0 : index
    %c6_263 = arith.constant 6 : index
    %c0_264 = arith.constant 0 : index
    %c0_265 = arith.constant 0 : index
    %208 = vector.load %arg4[%c0_262, %c6_263, %c0_264, %c0_265] : memref<2x9x16x32xbf16, #tpu.memory_space<vmem>>, vector<1x1x16x32xbf16>
    %209 = vector.shape_cast %208 : vector<1x1x16x32xbf16> to vector<16x32xbf16>
    %cst_266 = arith.constant dense<0.000000e+00> : vector<78x32xf32>
    %210 = tpu.matmul %207, %209, %cst_266 {dimension_numbers = #tpu.dot_dimension_numbers<[1], [0], [0], [1], [0, 0, 1, 1], [], []>} : vector<78x16xbf16>, vector<16x32xbf16>, vector<78x32xf32> -> vector<78x32xf32>
    %211 = arith.addf %206, %210 : vector<78x32xf32>
    %c21_267 = arith.constant 21 : index
    %c0_268 = arith.constant 0 : index
    %212 = vector.load %arg15[%c21_267, %c0_268] : memref<100x16xbf16, #tpu.memory_space<vmem>>, vector<78x16xbf16>
    %c0_269 = arith.constant 0 : index
    %c7_270 = arith.constant 7 : index
    %c0_271 = arith.constant 0 : index
    %c0_272 = arith.constant 0 : index
    %213 = vector.load %arg4[%c0_269, %c7_270, %c0_271, %c0_272] : memref<2x9x16x32xbf16, #tpu.memory_space<vmem>>, vector<1x1x16x32xbf16>
    %214 = vector.shape_cast %213 : vector<1x1x16x32xbf16> to vector<16x32xbf16>
    %cst_273 = arith.constant dense<0.000000e+00> : vector<78x32xf32>
    %215 = tpu.matmul %212, %214, %cst_273 {dimension_numbers = #tpu.dot_dimension_numbers<[1], [0], [0], [1], [0, 0, 1, 1], [], []>} : vector<78x16xbf16>, vector<16x32xbf16>, vector<78x32xf32> -> vector<78x32xf32>
    %216 = arith.addf %211, %215 : vector<78x32xf32>
    %c22_274 = arith.constant 22 : index
    %c0_275 = arith.constant 0 : index
    %217 = vector.load %arg15[%c22_274, %c0_275] : memref<100x16xbf16, #tpu.memory_space<vmem>>, vector<78x16xbf16>
    %c0_276 = arith.constant 0 : index
    %c8_277 = arith.constant 8 : index
    %c0_278 = arith.constant 0 : index
    %c0_279 = arith.constant 0 : index
    %218 = vector.load %arg4[%c0_276, %c8_277, %c0_278, %c0_279] : memref<2x9x16x32xbf16, #tpu.memory_space<vmem>>, vector<1x1x16x32xbf16>
    %219 = vector.shape_cast %218 : vector<1x1x16x32xbf16> to vector<16x32xbf16>
    %cst_280 = arith.constant dense<0.000000e+00> : vector<78x32xf32>
    %220 = tpu.matmul %217, %219, %cst_280 {dimension_numbers = #tpu.dot_dimension_numbers<[1], [0], [0], [1], [0, 0, 1, 1], [], []>} : vector<78x16xbf16>, vector<16x32xbf16>, vector<78x32xf32> -> vector<78x32xf32>
    %221 = arith.addf %216, %220 : vector<78x32xf32>
    %cst_281 = arith.constant 0.000000e+00 : f32
    %222 = vector.broadcast %cst_281 : f32 to vector<78x32xf32>
    %223 = arith.maximumf %221, %222 : vector<78x32xf32>
    %c0_282 = arith.constant 0 : index
    %c0_283 = arith.constant 0 : index
    %224 = vector.load %arg8[%c0_282, %c0_283] : memref<36x78xbf16, #tpu.memory_space<vmem>>, vector<36x78xbf16>
    %225 = arith.truncf %223 : vector<78x32xf32> to vector<78x32xbf16>
    %cst_284 = arith.constant dense<0.000000e+00> : vector<36x32xf32>
    %226 = tpu.matmul %224, %225, %cst_284 {dimension_numbers = #tpu.dot_dimension_numbers<[1], [0], [0], [1], [0, 0, 1, 1], [], []>} : vector<36x78xbf16>, vector<78x32xbf16>, vector<36x32xf32> -> vector<36x32xf32>
    %227 = arith.truncf %226 : vector<36x32xf32> to vector<36x32xbf16>
    %c0_285 = arith.constant 0 : index
    %c0_286 = arith.constant 0 : index
    %228 = vector.load %arg17[%c0_285, %c0_286] : memref<36x32xbf16, #tpu.memory_space<vmem>>, vector<36x32xbf16>
    tpu.vector_store %arg17[%c0_285, %c0_286], %227 {strides = array<i32>} : memref<36x32xbf16, #tpu.memory_space<vmem>>, vector<36x32xbf16>,
    %c0_287 = arith.constant 0 : index
    %c0_288 = arith.constant 0 : index
    %229 = vector.load %arg17[%c0_287, %c0_288] : memref<36x32xbf16, #tpu.memory_space<vmem>>, vector<22x32xbf16>
    %c0_289 = arith.constant 0 : index
    %c0_290 = arith.constant 0 : index
    %c0_291 = arith.constant 0 : index
    %c0_292 = arith.constant 0 : index
    %230 = vector.load %arg5[%c0_289, %c0_290, %c0_291, %c0_292] : memref<5x9x32x32xbf16, #tpu.memory_space<vmem>>, vector<1x1x32x32xbf16>
    %231 = vector.shape_cast %230 : vector<1x1x32x32xbf16> to vector<32x32xbf16>
    %cst_293 = arith.constant dense<0.000000e+00> : vector<22x32xf32>
    %232 = tpu.matmul %229, %231, %cst_293 {dimension_numbers = #tpu.dot_dimension_numbers<[1], [0], [0], [1], [0, 0, 1, 1], [], []>} : vector<22x32xbf16>, vector<32x32xbf16>, vector<22x32xf32> -> vector<22x32xf32>
    %c1_294 = arith.constant 1 : index
    %c0_295 = arith.constant 0 : index
    %233 = vector.load %arg17[%c1_294, %c0_295] : memref<36x32xbf16, #tpu.memory_space<vmem>>, vector<22x32xbf16>
    %c0_296 = arith.constant 0 : index
    %c1_297 = arith.constant 1 : index
    %c0_298 = arith.constant 0 : index
    %c0_299 = arith.constant 0 : index
    %234 = vector.load %arg5[%c0_296, %c1_297, %c0_298, %c0_299] : memref<5x9x32x32xbf16, #tpu.memory_space<vmem>>, vector<1x1x32x32xbf16>
    %235 = vector.shape_cast %234 : vector<1x1x32x32xbf16> to vector<32x32xbf16>
    %cst_300 = arith.constant dense<0.000000e+00> : vector<22x32xf32>
    %236 = tpu.matmul %233, %235, %cst_300 {dimension_numbers = #tpu.dot_dimension_numbers<[1], [0], [0], [1], [0, 0, 1, 1], [], []>} : vector<22x32xbf16>, vector<32x32xbf16>, vector<22x32xf32> -> vector<22x32xf32>
    %237 = arith.addf %232, %236 : vector<22x32xf32>
    %c2_301 = arith.constant 2 : index
    %c0_302 = arith.constant 0 : index
    %238 = vector.load %arg17[%c2_301, %c0_302] : memref<36x32xbf16, #tpu.memory_space<vmem>>, vector<22x32xbf16>
    %c0_303 = arith.constant 0 : index
    %c2_304 = arith.constant 2 : index
    %c0_305 = arith.constant 0 : index
    %c0_306 = arith.constant 0 : index
    %239 = vector.load %arg5[%c0_303, %c2_304, %c0_305, %c0_306] : memref<5x9x32x32xbf16, #tpu.memory_space<vmem>>, vector<1x1x32x32xbf16>
    %240 = vector.shape_cast %239 : vector<1x1x32x32xbf16> to vector<32x32xbf16>
    %cst_307 = arith.constant dense<0.000000e+00> : vector<22x32xf32>
    %241 = tpu.matmul %238, %240, %cst_307 {dimension_numbers = #tpu.dot_dimension_numbers<[1], [0], [0], [1], [0, 0, 1, 1], [], []>} : vector<22x32xbf16>, vector<32x32xbf16>, vector<22x32xf32> -> vector<22x32xf32>
    %242 = arith.addf %237, %241 : vector<22x32xf32>
    %c6_308 = arith.constant 6 : index
    %c0_309 = arith.constant 0 : index
    %243 = vector.load %arg17[%c6_308, %c0_309] : memref<36x32xbf16, #tpu.memory_space<vmem>>, vector<22x32xbf16>
    %c0_310 = arith.constant 0 : index
    %c3_311 = arith.constant 3 : index
    %c0_312 = arith.constant 0 : index
    %c0_313 = arith.constant 0 : index
    %244 = vector.load %arg5[%c0_310, %c3_311, %c0_312, %c0_313] : memref<5x9x32x32xbf16, #tpu.memory_space<vmem>>, vector<1x1x32x32xbf16>
    %245 = vector.shape_cast %244 : vector<1x1x32x32xbf16> to vector<32x32xbf16>
    %cst_314 = arith.constant dense<0.000000e+00> : vector<22x32xf32>
    %246 = tpu.matmul %243, %245, %cst_314 {dimension_numbers = #tpu.dot_dimension_numbers<[1], [0], [0], [1], [0, 0, 1, 1], [], []>} : vector<22x32xbf16>, vector<32x32xbf16>, vector<22x32xf32> -> vector<22x32xf32>
    %247 = arith.addf %242, %246 : vector<22x32xf32>
    %c7_315 = arith.constant 7 : index
    %c0_316 = arith.constant 0 : index
    %248 = vector.load %arg17[%c7_315, %c0_316] : memref<36x32xbf16, #tpu.memory_space<vmem>>, vector<22x32xbf16>
    %c0_317 = arith.constant 0 : index
    %c4_318 = arith.constant 4 : index
    %c0_319 = arith.constant 0 : index
    %c0_320 = arith.constant 0 : index
    %249 = vector.load %arg5[%c0_317, %c4_318, %c0_319, %c0_320] : memref<5x9x32x32xbf16, #tpu.memory_space<vmem>>, vector<1x1x32x32xbf16>
    %250 = vector.shape_cast %249 : vector<1x1x32x32xbf16> to vector<32x32xbf16>
    %cst_321 = arith.constant dense<0.000000e+00> : vector<22x32xf32>
    %251 = tpu.matmul %248, %250, %cst_321 {dimension_numbers = #tpu.dot_dimension_numbers<[1], [0], [0], [1], [0, 0, 1, 1], [], []>} : vector<22x32xbf16>, vector<32x32xbf16>, vector<22x32xf32> -> vector<22x32xf32>
    %252 = arith.addf %247, %251 : vector<22x32xf32>
    %c8_322 = arith.constant 8 : index
    %c0_323 = arith.constant 0 : index
    %253 = vector.load %arg17[%c8_322, %c0_323] : memref<36x32xbf16, #tpu.memory_space<vmem>>, vector<22x32xbf16>
    %c0_324 = arith.constant 0 : index
    %c5_325 = arith.constant 5 : index
    %c0_326 = arith.constant 0 : index
    %c0_327 = arith.constant 0 : index
    %254 = vector.load %arg5[%c0_324, %c5_325, %c0_326, %c0_327] : memref<5x9x32x32xbf16, #tpu.memory_space<vmem>>, vector<1x1x32x32xbf16>
    %255 = vector.shape_cast %254 : vector<1x1x32x32xbf16> to vector<32x32xbf16>
    %cst_328 = arith.constant dense<0.000000e+00> : vector<22x32xf32>
    %256 = tpu.matmul %253, %255, %cst_328 {dimension_numbers = #tpu.dot_dimension_numbers<[1], [0], [0], [1], [0, 0, 1, 1], [], []>} : vector<22x32xbf16>, vector<32x32xbf16>, vector<22x32xf32> -> vector<22x32xf32>
    %257 = arith.addf %252, %256 : vector<22x32xf32>
    %c12_329 = arith.constant 12 : index
    %c0_330 = arith.constant 0 : index
    %258 = vector.load %arg17[%c12_329, %c0_330] : memref<36x32xbf16, #tpu.memory_space<vmem>>, vector<22x32xbf16>
    %c0_331 = arith.constant 0 : index
    %c6_332 = arith.constant 6 : index
    %c0_333 = arith.constant 0 : index
    %c0_334 = arith.constant 0 : index
    %259 = vector.load %arg5[%c0_331, %c6_332, %c0_333, %c0_334] : memref<5x9x32x32xbf16, #tpu.memory_space<vmem>>, vector<1x1x32x32xbf16>
    %260 = vector.shape_cast %259 : vector<1x1x32x32xbf16> to vector<32x32xbf16>
    %cst_335 = arith.constant dense<0.000000e+00> : vector<22x32xf32>
    %261 = tpu.matmul %258, %260, %cst_335 {dimension_numbers = #tpu.dot_dimension_numbers<[1], [0], [0], [1], [0, 0, 1, 1], [], []>} : vector<22x32xbf16>, vector<32x32xbf16>, vector<22x32xf32> -> vector<22x32xf32>
    %262 = arith.addf %257, %261 : vector<22x32xf32>
    %c13 = arith.constant 13 : index
    %c0_336 = arith.constant 0 : index
    %263 = vector.load %arg17[%c13, %c0_336] : memref<36x32xbf16, #tpu.memory_space<vmem>>, vector<22x32xbf16>
    %c0_337 = arith.constant 0 : index
    %c7_338 = arith.constant 7 : index
    %c0_339 = arith.constant 0 : index
    %c0_340 = arith.constant 0 : index
    %264 = vector.load %arg5[%c0_337, %c7_338, %c0_339, %c0_340] : memref<5x9x32x32xbf16, #tpu.memory_space<vmem>>, vector<1x1x32x32xbf16>
    %265 = vector.shape_cast %264 : vector<1x1x32x32xbf16> to vector<32x32xbf16>
    %cst_341 = arith.constant dense<0.000000e+00> : vector<22x32xf32>
    %266 = tpu.matmul %263, %265, %cst_341 {dimension_numbers = #tpu.dot_dimension_numbers<[1], [0], [0], [1], [0, 0, 1, 1], [], []>} : vector<22x32xbf16>, vector<32x32xbf16>, vector<22x32xf32> -> vector<22x32xf32>
    %267 = arith.addf %262, %266 : vector<22x32xf32>
    %c14 = arith.constant 14 : index
    %c0_342 = arith.constant 0 : index
    %268 = vector.load %arg17[%c14, %c0_342] : memref<36x32xbf16, #tpu.memory_space<vmem>>, vector<22x32xbf16>
    %c0_343 = arith.constant 0 : index
    %c8_344 = arith.constant 8 : index
    %c0_345 = arith.constant 0 : index
    %c0_346 = arith.constant 0 : index
    %269 = vector.load %arg5[%c0_343, %c8_344, %c0_345, %c0_346] : memref<5x9x32x32xbf16, #tpu.memory_space<vmem>>, vector<1x1x32x32xbf16>
    %270 = vector.shape_cast %269 : vector<1x1x32x32xbf16> to vector<32x32xbf16>
    %cst_347 = arith.constant dense<0.000000e+00> : vector<22x32xf32>
    %271 = tpu.matmul %268, %270, %cst_347 {dimension_numbers = #tpu.dot_dimension_numbers<[1], [0], [0], [1], [0, 0, 1, 1], [], []>} : vector<22x32xbf16>, vector<32x32xbf16>, vector<22x32xf32> -> vector<22x32xf32>
    %272 = arith.addf %267, %271 : vector<22x32xf32>
    %c0_348 = arith.constant 0 : index
    %c0_349 = arith.constant 0 : index
    %273 = vector.load %arg15[%c0_348, %c0_349] : memref<100x16xbf16, #tpu.memory_space<vmem>>, vector<78x16xbf16>
    %c1_350 = arith.constant 1 : index
    %c0_351 = arith.constant 0 : index
    %c0_352 = arith.constant 0 : index
    %c0_353 = arith.constant 0 : index
    %274 = vector.load %arg4[%c1_350, %c0_351, %c0_352, %c0_353] : memref<2x9x16x32xbf16, #tpu.memory_space<vmem>>, vector<1x1x16x32xbf16>
    %275 = vector.shape_cast %274 : vector<1x1x16x32xbf16> to vector<16x32xbf16>
    %cst_354 = arith.constant dense<0.000000e+00> : vector<78x32xf32>
    %276 = tpu.matmul %273, %275, %cst_354 {dimension_numbers = #tpu.dot_dimension_numbers<[1], [0], [0], [1], [0, 0, 1, 1], [], []>} : vector<78x16xbf16>, vector<16x32xbf16>, vector<78x32xf32> -> vector<78x32xf32>
    %c1_355 = arith.constant 1 : index
    %c0_356 = arith.constant 0 : index
    %277 = vector.load %arg15[%c1_355, %c0_356] : memref<100x16xbf16, #tpu.memory_space<vmem>>, vector<78x16xbf16>
    %c1_357 = arith.constant 1 : index
    %c1_358 = arith.constant 1 : index
    %c0_359 = arith.constant 0 : index
    %c0_360 = arith.constant 0 : index
    %278 = vector.load %arg4[%c1_357, %c1_358, %c0_359, %c0_360] : memref<2x9x16x32xbf16, #tpu.memory_space<vmem>>, vector<1x1x16x32xbf16>
    %279 = vector.shape_cast %278 : vector<1x1x16x32xbf16> to vector<16x32xbf16>
    %cst_361 = arith.constant dense<0.000000e+00> : vector<78x32xf32>
    %280 = tpu.matmul %277, %279, %cst_361 {dimension_numbers = #tpu.dot_dimension_numbers<[1], [0], [0], [1], [0, 0, 1, 1], [], []>} : vector<78x16xbf16>, vector<16x32xbf16>, vector<78x32xf32> -> vector<78x32xf32>
    %281 = arith.addf %276, %280 : vector<78x32xf32>
    %c2_362 = arith.constant 2 : index
    %c0_363 = arith.constant 0 : index
    %282 = vector.load %arg15[%c2_362, %c0_363] : memref<100x16xbf16, #tpu.memory_space<vmem>>, vector<78x16xbf16>
    %c1_364 = arith.constant 1 : index
    %c2_365 = arith.constant 2 : index
    %c0_366 = arith.constant 0 : index
    %c0_367 = arith.constant 0 : index
    %283 = vector.load %arg4[%c1_364, %c2_365, %c0_366, %c0_367] : memref<2x9x16x32xbf16, #tpu.memory_space<vmem>>, vector<1x1x16x32xbf16>
    %284 = vector.shape_cast %283 : vector<1x1x16x32xbf16> to vector<16x32xbf16>
    %cst_368 = arith.constant dense<0.000000e+00> : vector<78x32xf32>
    %285 = tpu.matmul %282, %284, %cst_368 {dimension_numbers = #tpu.dot_dimension_numbers<[1], [0], [0], [1], [0, 0, 1, 1], [], []>} : vector<78x16xbf16>, vector<16x32xbf16>, vector<78x32xf32> -> vector<78x32xf32>
    %286 = arith.addf %281, %285 : vector<78x32xf32>
    %c10_369 = arith.constant 10 : index
    %c0_370 = arith.constant 0 : index
    %287 = vector.load %arg15[%c10_369, %c0_370] : memref<100x16xbf16, #tpu.memory_space<vmem>>, vector<78x16xbf16>
    %c1_371 = arith.constant 1 : index
    %c3_372 = arith.constant 3 : index
    %c0_373 = arith.constant 0 : index
    %c0_374 = arith.constant 0 : index
    %288 = vector.load %arg4[%c1_371, %c3_372, %c0_373, %c0_374] : memref<2x9x16x32xbf16, #tpu.memory_space<vmem>>, vector<1x1x16x32xbf16>
    %289 = vector.shape_cast %288 : vector<1x1x16x32xbf16> to vector<16x32xbf16>
    %cst_375 = arith.constant dense<0.000000e+00> : vector<78x32xf32>
    %290 = tpu.matmul %287, %289, %cst_375 {dimension_numbers = #tpu.dot_dimension_numbers<[1], [0], [0], [1], [0, 0, 1, 1], [], []>} : vector<78x16xbf16>, vector<16x32xbf16>, vector<78x32xf32> -> vector<78x32xf32>
    %291 = arith.addf %286, %290 : vector<78x32xf32>
    %c11_376 = arith.constant 11 : index
    %c0_377 = arith.constant 0 : index
    %292 = vector.load %arg15[%c11_376, %c0_377] : memref<100x16xbf16, #tpu.memory_space<vmem>>, vector<78x16xbf16>
    %c1_378 = arith.constant 1 : index
    %c4_379 = arith.constant 4 : index
    %c0_380 = arith.constant 0 : index
    %c0_381 = arith.constant 0 : index
    %293 = vector.load %arg4[%c1_378, %c4_379, %c0_380, %c0_381] : memref<2x9x16x32xbf16, #tpu.memory_space<vmem>>, vector<1x1x16x32xbf16>
    %294 = vector.shape_cast %293 : vector<1x1x16x32xbf16> to vector<16x32xbf16>
    %cst_382 = arith.constant dense<0.000000e+00> : vector<78x32xf32>
    %295 = tpu.matmul %292, %294, %cst_382 {dimension_numbers = #tpu.dot_dimension_numbers<[1], [0], [0], [1], [0, 0, 1, 1], [], []>} : vector<78x16xbf16>, vector<16x32xbf16>, vector<78x32xf32> -> vector<78x32xf32>
    %296 = arith.addf %291, %295 : vector<78x32xf32>
    %c12_383 = arith.constant 12 : index
    %c0_384 = arith.constant 0 : index
    %297 = vector.load %arg15[%c12_383, %c0_384] : memref<100x16xbf16, #tpu.memory_space<vmem>>, vector<78x16xbf16>
    %c1_385 = arith.constant 1 : index
    %c5_386 = arith.constant 5 : index
    %c0_387 = arith.constant 0 : index
    %c0_388 = arith.constant 0 : index
    %298 = vector.load %arg4[%c1_385, %c5_386, %c0_387, %c0_388] : memref<2x9x16x32xbf16, #tpu.memory_space<vmem>>, vector<1x1x16x32xbf16>
    %299 = vector.shape_cast %298 : vector<1x1x16x32xbf16> to vector<16x32xbf16>
    %cst_389 = arith.constant dense<0.000000e+00> : vector<78x32xf32>
    %300 = tpu.matmul %297, %299, %cst_389 {dimension_numbers = #tpu.dot_dimension_numbers<[1], [0], [0], [1], [0, 0, 1, 1], [], []>} : vector<78x16xbf16>, vector<16x32xbf16>, vector<78x32xf32> -> vector<78x32xf32>
    %301 = arith.addf %296, %300 : vector<78x32xf32>
    %c20_390 = arith.constant 20 : index
    %c0_391 = arith.constant 0 : index
    %302 = vector.load %arg15[%c20_390, %c0_391] : memref<100x16xbf16, #tpu.memory_space<vmem>>, vector<78x16xbf16>
    %c1_392 = arith.constant 1 : index
    %c6_393 = arith.constant 6 : index
    %c0_394 = arith.constant 0 : index
    %c0_395 = arith.constant 0 : index
    %303 = vector.load %arg4[%c1_392, %c6_393, %c0_394, %c0_395] : memref<2x9x16x32xbf16, #tpu.memory_space<vmem>>, vector<1x1x16x32xbf16>
    %304 = vector.shape_cast %303 : vector<1x1x16x32xbf16> to vector<16x32xbf16>
    %cst_396 = arith.constant dense<0.000000e+00> : vector<78x32xf32>
    %305 = tpu.matmul %302, %304, %cst_396 {dimension_numbers = #tpu.dot_dimension_numbers<[1], [0], [0], [1], [0, 0, 1, 1], [], []>} : vector<78x16xbf16>, vector<16x32xbf16>, vector<78x32xf32> -> vector<78x32xf32>
    %306 = arith.addf %301, %305 : vector<78x32xf32>
    %c21_397 = arith.constant 21 : index
    %c0_398 = arith.constant 0 : index
    %307 = vector.load %arg15[%c21_397, %c0_398] : memref<100x16xbf16, #tpu.memory_space<vmem>>, vector<78x16xbf16>
    %c1_399 = arith.constant 1 : index
    %c7_400 = arith.constant 7 : index
    %c0_401 = arith.constant 0 : index
    %c0_402 = arith.constant 0 : index
    %308 = vector.load %arg4[%c1_399, %c7_400, %c0_401, %c0_402] : memref<2x9x16x32xbf16, #tpu.memory_space<vmem>>, vector<1x1x16x32xbf16>
    %309 = vector.shape_cast %308 : vector<1x1x16x32xbf16> to vector<16x32xbf16>
    %cst_403 = arith.constant dense<0.000000e+00> : vector<78x32xf32>
    %310 = tpu.matmul %307, %309, %cst_403 {dimension_numbers = #tpu.dot_dimension_numbers<[1], [0], [0], [1], [0, 0, 1, 1], [], []>} : vector<78x16xbf16>, vector<16x32xbf16>, vector<78x32xf32> -> vector<78x32xf32>
    %311 = arith.addf %306, %310 : vector<78x32xf32>
    %c22_404 = arith.constant 22 : index
    %c0_405 = arith.constant 0 : index
    %312 = vector.load %arg15[%c22_404, %c0_405] : memref<100x16xbf16, #tpu.memory_space<vmem>>, vector<78x16xbf16>
    %c1_406 = arith.constant 1 : index
    %c8_407 = arith.constant 8 : index
    %c0_408 = arith.constant 0 : index
    %c0_409 = arith.constant 0 : index
    %313 = vector.load %arg4[%c1_406, %c8_407, %c0_408, %c0_409] : memref<2x9x16x32xbf16, #tpu.memory_space<vmem>>, vector<1x1x16x32xbf16>
    %314 = vector.shape_cast %313 : vector<1x1x16x32xbf16> to vector<16x32xbf16>
    %cst_410 = arith.constant dense<0.000000e+00> : vector<78x32xf32>
    %315 = tpu.matmul %312, %314, %cst_410 {dimension_numbers = #tpu.dot_dimension_numbers<[1], [0], [0], [1], [0, 0, 1, 1], [], []>} : vector<78x16xbf16>, vector<16x32xbf16>, vector<78x32xf32> -> vector<78x32xf32>
    %316 = arith.addf %311, %315 : vector<78x32xf32>
    %c0_411 = arith.constant 0 : index
    %c0_412 = arith.constant 0 : index
    %317 = vector.load %arg8[%c0_411, %c0_412] : memref<36x78xbf16, #tpu.memory_space<vmem>>, vector<36x78xbf16>
    %318 = arith.truncf %316 : vector<78x32xf32> to vector<78x32xbf16>
    %cst_413 = arith.constant dense<0.000000e+00> : vector<36x32xf32>
    %319 = tpu.matmul %317, %318, %cst_413 {dimension_numbers = #tpu.dot_dimension_numbers<[1], [0], [0], [1], [0, 0, 1, 1], [], []>} : vector<36x78xbf16>, vector<78x32xbf16>, vector<36x32xf32> -> vector<36x32xf32>
    %320 = arith.truncf %319 : vector<36x32xf32> to vector<36x32xbf16>
    %c0_414 = arith.constant 0 : index
    %c0_415 = arith.constant 0 : index
    %321 = vector.load %arg18[%c0_414, %c0_415] : memref<36x32xbf16, #tpu.memory_space<vmem>>, vector<36x32xbf16>
    tpu.vector_store %arg18[%c0_414, %c0_415], %320 {strides = array<i32>} : memref<36x32xbf16, #tpu.memory_space<vmem>>, vector<36x32xbf16>,
    %c7_416 = arith.constant 7 : index
    %c0_417 = arith.constant 0 : index
    %322 = vector.load %arg18[%c7_416, %c0_417] : memref<36x32xbf16, #tpu.memory_space<vmem>>, vector<22x32xbf16>
    %323 = arith.extf %322 : vector<22x32xbf16> to vector<22x32xf32>
    %324 = arith.addf %272, %323 : vector<22x32xf32>
    %cst_418 = arith.constant 0.000000e+00 : f32
    %325 = vector.broadcast %cst_418 : f32 to vector<22x32xf32>
    %326 = arith.maximumf %324, %325 : vector<22x32xf32>
    %c0_419 = arith.constant 0 : index
    %c0_420 = arith.constant 0 : index
    %327 = vector.load %arg11[%c0_419, %c0_420] : memref<22x1xf32, #tpu.memory_space<vmem>>, vector<22x1xf32>
    %328 = vector.broadcast %327 : vector<22x1xf32> to vector<22x32xf32>
    %329 = arith.mulf %326, %328 : vector<22x32xf32>
    %330 = arith.truncf %329 : vector<22x32xf32> to vector<22x32xbf16>
    %c7_421 = arith.constant 7 : index
    %c0_422 = arith.constant 0 : index
    %331 = vector.load %arg17[%c7_421, %c0_422] : memref<36x32xbf16, #tpu.memory_space<vmem>>, vector<22x32xbf16>
    tpu.vector_store %arg17[%c7_421, %c0_422], %330 {strides = array<i32>} : memref<36x32xbf16, #tpu.memory_space<vmem>>, vector<22x32xbf16>,
    %c0_423 = arith.constant 0 : index
    %c0_424 = arith.constant 0 : index
    %332 = vector.load %arg17[%c0_423, %c0_424] : memref<36x32xbf16, #tpu.memory_space<vmem>>, vector<22x32xbf16>
    %c1_425 = arith.constant 1 : index
    %c0_426 = arith.constant 0 : index
    %c0_427 = arith.constant 0 : index
    %c0_428 = arith.constant 0 : index
    %333 = vector.load %arg5[%c1_425, %c0_426, %c0_427, %c0_428] : memref<5x9x32x32xbf16, #tpu.memory_space<vmem>>, vector<1x1x32x32xbf16>
    %334 = vector.shape_cast %333 : vector<1x1x32x32xbf16> to vector<32x32xbf16>
    %cst_429 = arith.constant dense<0.000000e+00> : vector<22x32xf32>
    %335 = tpu.matmul %332, %334, %cst_429 {dimension_numbers = #tpu.dot_dimension_numbers<[1], [0], [0], [1], [0, 0, 1, 1], [], []>} : vector<22x32xbf16>, vector<32x32xbf16>, vector<22x32xf32> -> vector<22x32xf32>
    %c1_430 = arith.constant 1 : index
    %c0_431 = arith.constant 0 : index
    %336 = vector.load %arg17[%c1_430, %c0_431] : memref<36x32xbf16, #tpu.memory_space<vmem>>, vector<22x32xbf16>
    %c1_432 = arith.constant 1 : index
    %c1_433 = arith.constant 1 : index
    %c0_434 = arith.constant 0 : index
    %c0_435 = arith.constant 0 : index
    %337 = vector.load %arg5[%c1_432, %c1_433, %c0_434, %c0_435] : memref<5x9x32x32xbf16, #tpu.memory_space<vmem>>, vector<1x1x32x32xbf16>
    %338 = vector.shape_cast %337 : vector<1x1x32x32xbf16> to vector<32x32xbf16>
    %cst_436 = arith.constant dense<0.000000e+00> : vector<22x32xf32>
    %339 = tpu.matmul %336, %338, %cst_436 {dimension_numbers = #tpu.dot_dimension_numbers<[1], [0], [0], [1], [0, 0, 1, 1], [], []>} : vector<22x32xbf16>, vector<32x32xbf16>, vector<22x32xf32> -> vector<22x32xf32>
    %340 = arith.addf %335, %339 : vector<22x32xf32>
    %c2_437 = arith.constant 2 : index
    %c0_438 = arith.constant 0 : index
    %341 = vector.load %arg17[%c2_437, %c0_438] : memref<36x32xbf16, #tpu.memory_space<vmem>>, vector<22x32xbf16>
    %c1_439 = arith.constant 1 : index
    %c2_440 = arith.constant 2 : index
    %c0_441 = arith.constant 0 : index
    %c0_442 = arith.constant 0 : index
    %342 = vector.load %arg5[%c1_439, %c2_440, %c0_441, %c0_442] : memref<5x9x32x32xbf16, #tpu.memory_space<vmem>>, vector<1x1x32x32xbf16>
    %343 = vector.shape_cast %342 : vector<1x1x32x32xbf16> to vector<32x32xbf16>
    %cst_443 = arith.constant dense<0.000000e+00> : vector<22x32xf32>
    %344 = tpu.matmul %341, %343, %cst_443 {dimension_numbers = #tpu.dot_dimension_numbers<[1], [0], [0], [1], [0, 0, 1, 1], [], []>} : vector<22x32xbf16>, vector<32x32xbf16>, vector<22x32xf32> -> vector<22x32xf32>
    %345 = arith.addf %340, %344 : vector<22x32xf32>
    %c6_444 = arith.constant 6 : index
    %c0_445 = arith.constant 0 : index
    %346 = vector.load %arg17[%c6_444, %c0_445] : memref<36x32xbf16, #tpu.memory_space<vmem>>, vector<22x32xbf16>
    %c1_446 = arith.constant 1 : index
    %c3_447 = arith.constant 3 : index
    %c0_448 = arith.constant 0 : index
    %c0_449 = arith.constant 0 : index
    %347 = vector.load %arg5[%c1_446, %c3_447, %c0_448, %c0_449] : memref<5x9x32x32xbf16, #tpu.memory_space<vmem>>, vector<1x1x32x32xbf16>
    %348 = vector.shape_cast %347 : vector<1x1x32x32xbf16> to vector<32x32xbf16>
    %cst_450 = arith.constant dense<0.000000e+00> : vector<22x32xf32>
    %349 = tpu.matmul %346, %348, %cst_450 {dimension_numbers = #tpu.dot_dimension_numbers<[1], [0], [0], [1], [0, 0, 1, 1], [], []>} : vector<22x32xbf16>, vector<32x32xbf16>, vector<22x32xf32> -> vector<22x32xf32>
    %350 = arith.addf %345, %349 : vector<22x32xf32>
    %c7_451 = arith.constant 7 : index
    %c0_452 = arith.constant 0 : index
    %351 = vector.load %arg17[%c7_451, %c0_452] : memref<36x32xbf16, #tpu.memory_space<vmem>>, vector<22x32xbf16>
    %c1_453 = arith.constant 1 : index
    %c4_454 = arith.constant 4 : index
    %c0_455 = arith.constant 0 : index
    %c0_456 = arith.constant 0 : index
    %352 = vector.load %arg5[%c1_453, %c4_454, %c0_455, %c0_456] : memref<5x9x32x32xbf16, #tpu.memory_space<vmem>>, vector<1x1x32x32xbf16>
    %353 = vector.shape_cast %352 : vector<1x1x32x32xbf16> to vector<32x32xbf16>
    %cst_457 = arith.constant dense<0.000000e+00> : vector<22x32xf32>
    %354 = tpu.matmul %351, %353, %cst_457 {dimension_numbers = #tpu.dot_dimension_numbers<[1], [0], [0], [1], [0, 0, 1, 1], [], []>} : vector<22x32xbf16>, vector<32x32xbf16>, vector<22x32xf32> -> vector<22x32xf32>
    %355 = arith.addf %350, %354 : vector<22x32xf32>
    %c8_458 = arith.constant 8 : index
    %c0_459 = arith.constant 0 : index
    %356 = vector.load %arg17[%c8_458, %c0_459] : memref<36x32xbf16, #tpu.memory_space<vmem>>, vector<22x32xbf16>
    %c1_460 = arith.constant 1 : index
    %c5_461 = arith.constant 5 : index
    %c0_462 = arith.constant 0 : index
    %c0_463 = arith.constant 0 : index
    %357 = vector.load %arg5[%c1_460, %c5_461, %c0_462, %c0_463] : memref<5x9x32x32xbf16, #tpu.memory_space<vmem>>, vector<1x1x32x32xbf16>
    %358 = vector.shape_cast %357 : vector<1x1x32x32xbf16> to vector<32x32xbf16>
    %cst_464 = arith.constant dense<0.000000e+00> : vector<22x32xf32>
    %359 = tpu.matmul %356, %358, %cst_464 {dimension_numbers = #tpu.dot_dimension_numbers<[1], [0], [0], [1], [0, 0, 1, 1], [], []>} : vector<22x32xbf16>, vector<32x32xbf16>, vector<22x32xf32> -> vector<22x32xf32>
    %360 = arith.addf %355, %359 : vector<22x32xf32>
    %c12_465 = arith.constant 12 : index
    %c0_466 = arith.constant 0 : index
    %361 = vector.load %arg17[%c12_465, %c0_466] : memref<36x32xbf16, #tpu.memory_space<vmem>>, vector<22x32xbf16>
    %c1_467 = arith.constant 1 : index
    %c6_468 = arith.constant 6 : index
    %c0_469 = arith.constant 0 : index
    %c0_470 = arith.constant 0 : index
    %362 = vector.load %arg5[%c1_467, %c6_468, %c0_469, %c0_470] : memref<5x9x32x32xbf16, #tpu.memory_space<vmem>>, vector<1x1x32x32xbf16>
    %363 = vector.shape_cast %362 : vector<1x1x32x32xbf16> to vector<32x32xbf16>
    %cst_471 = arith.constant dense<0.000000e+00> : vector<22x32xf32>
    %364 = tpu.matmul %361, %363, %cst_471 {dimension_numbers = #tpu.dot_dimension_numbers<[1], [0], [0], [1], [0, 0, 1, 1], [], []>} : vector<22x32xbf16>, vector<32x32xbf16>, vector<22x32xf32> -> vector<22x32xf32>
    %365 = arith.addf %360, %364 : vector<22x32xf32>
    %c13_472 = arith.constant 13 : index
    %c0_473 = arith.constant 0 : index
    %366 = vector.load %arg17[%c13_472, %c0_473] : memref<36x32xbf16, #tpu.memory_space<vmem>>, vector<22x32xbf16>
    %c1_474 = arith.constant 1 : index
    %c7_475 = arith.constant 7 : index
    %c0_476 = arith.constant 0 : index
    %c0_477 = arith.constant 0 : index
    %367 = vector.load %arg5[%c1_474, %c7_475, %c0_476, %c0_477] : memref<5x9x32x32xbf16, #tpu.memory_space<vmem>>, vector<1x1x32x32xbf16>
    %368 = vector.shape_cast %367 : vector<1x1x32x32xbf16> to vector<32x32xbf16>
    %cst_478 = arith.constant dense<0.000000e+00> : vector<22x32xf32>
    %369 = tpu.matmul %366, %368, %cst_478 {dimension_numbers = #tpu.dot_dimension_numbers<[1], [0], [0], [1], [0, 0, 1, 1], [], []>} : vector<22x32xbf16>, vector<32x32xbf16>, vector<22x32xf32> -> vector<22x32xf32>
    %370 = arith.addf %365, %369 : vector<22x32xf32>
    %c14_479 = arith.constant 14 : index
    %c0_480 = arith.constant 0 : index
    %371 = vector.load %arg17[%c14_479, %c0_480] : memref<36x32xbf16, #tpu.memory_space<vmem>>, vector<22x32xbf16>
    %c1_481 = arith.constant 1 : index
    %c8_482 = arith.constant 8 : index
    %c0_483 = arith.constant 0 : index
    %c0_484 = arith.constant 0 : index
    %372 = vector.load %arg5[%c1_481, %c8_482, %c0_483, %c0_484] : memref<5x9x32x32xbf16, #tpu.memory_space<vmem>>, vector<1x1x32x32xbf16>
    %373 = vector.shape_cast %372 : vector<1x1x32x32xbf16> to vector<32x32xbf16>
    %cst_485 = arith.constant dense<0.000000e+00> : vector<22x32xf32>
    %374 = tpu.matmul %371, %373, %cst_485 {dimension_numbers = #tpu.dot_dimension_numbers<[1], [0], [0], [1], [0, 0, 1, 1], [], []>} : vector<22x32xbf16>, vector<32x32xbf16>, vector<22x32xf32> -> vector<22x32xf32>
    %375 = arith.addf %370, %374 : vector<22x32xf32>
    %cst_486 = arith.constant 0.000000e+00 : f32
    %376 = vector.broadcast %cst_486 : f32 to vector<22x32xf32>
    %377 = arith.maximumf %375, %376 : vector<22x32xf32>
    %c0_487 = arith.constant 0 : index
    %c0_488 = arith.constant 0 : index
    %378 = vector.load %arg11[%c0_487, %c0_488] : memref<22x1xf32, #tpu.memory_space<vmem>>, vector<22x1xf32>
    %379 = vector.broadcast %378 : vector<22x1xf32> to vector<22x32xf32>
    %380 = arith.mulf %377, %379 : vector<22x32xf32>
    %381 = arith.truncf %380 : vector<22x32xf32> to vector<22x32xbf16>
    %c7_489 = arith.constant 7 : index
    %c0_490 = arith.constant 0 : index
    %382 = vector.load %arg18[%c7_489, %c0_490] : memref<36x32xbf16, #tpu.memory_space<vmem>>, vector<22x32xbf16>
    tpu.vector_store %arg18[%c7_489, %c0_490], %381 {strides = array<i32>} : memref<36x32xbf16, #tpu.memory_space<vmem>>, vector<22x32xbf16>,
    %c0_491 = arith.constant 0 : index
    %c0_492 = arith.constant 0 : index
    %383 = vector.load %arg18[%c0_491, %c0_492] : memref<36x32xbf16, #tpu.memory_space<vmem>>, vector<22x32xbf16>
    %c2_493 = arith.constant 2 : index
    %c0_494 = arith.constant 0 : index
    %c0_495 = arith.constant 0 : index
    %c0_496 = arith.constant 0 : index
    %384 = vector.load %arg5[%c2_493, %c0_494, %c0_495, %c0_496] : memref<5x9x32x32xbf16, #tpu.memory_space<vmem>>, vector<1x1x32x32xbf16>
    %385 = vector.shape_cast %384 : vector<1x1x32x32xbf16> to vector<32x32xbf16>
    %cst_497 = arith.constant dense<0.000000e+00> : vector<22x32xf32>
    %386 = tpu.matmul %383, %385, %cst_497 {dimension_numbers = #tpu.dot_dimension_numbers<[1], [0], [0], [1], [0, 0, 1, 1], [], []>} : vector<22x32xbf16>, vector<32x32xbf16>, vector<22x32xf32> -> vector<22x32xf32>
    %c1_498 = arith.constant 1 : index
    %c0_499 = arith.constant 0 : index
    %387 = vector.load %arg18[%c1_498, %c0_499] : memref<36x32xbf16, #tpu.memory_space<vmem>>, vector<22x32xbf16>
    %c2_500 = arith.constant 2 : index
    %c1_501 = arith.constant 1 : index
    %c0_502 = arith.constant 0 : index
    %c0_503 = arith.constant 0 : index
    %388 = vector.load %arg5[%c2_500, %c1_501, %c0_502, %c0_503] : memref<5x9x32x32xbf16, #tpu.memory_space<vmem>>, vector<1x1x32x32xbf16>
    %389 = vector.shape_cast %388 : vector<1x1x32x32xbf16> to vector<32x32xbf16>
    %cst_504 = arith.constant dense<0.000000e+00> : vector<22x32xf32>
    %390 = tpu.matmul %387, %389, %cst_504 {dimension_numbers = #tpu.dot_dimension_numbers<[1], [0], [0], [1], [0, 0, 1, 1], [], []>} : vector<22x32xbf16>, vector<32x32xbf16>, vector<22x32xf32> -> vector<22x32xf32>
    %391 = arith.addf %386, %390 : vector<22x32xf32>
    %c2_505 = arith.constant 2 : index
    %c0_506 = arith.constant 0 : index
    %392 = vector.load %arg18[%c2_505, %c0_506] : memref<36x32xbf16, #tpu.memory_space<vmem>>, vector<22x32xbf16>
    %c2_507 = arith.constant 2 : index
    %c2_508 = arith.constant 2 : index
    %c0_509 = arith.constant 0 : index
    %c0_510 = arith.constant 0 : index
    %393 = vector.load %arg5[%c2_507, %c2_508, %c0_509, %c0_510] : memref<5x9x32x32xbf16, #tpu.memory_space<vmem>>, vector<1x1x32x32xbf16>
    %394 = vector.shape_cast %393 : vector<1x1x32x32xbf16> to vector<32x32xbf16>
    %cst_511 = arith.constant dense<0.000000e+00> : vector<22x32xf32>
    %395 = tpu.matmul %392, %394, %cst_511 {dimension_numbers = #tpu.dot_dimension_numbers<[1], [0], [0], [1], [0, 0, 1, 1], [], []>} : vector<22x32xbf16>, vector<32x32xbf16>, vector<22x32xf32> -> vector<22x32xf32>
    %396 = arith.addf %391, %395 : vector<22x32xf32>
    %c6_512 = arith.constant 6 : index
    %c0_513 = arith.constant 0 : index
    %397 = vector.load %arg18[%c6_512, %c0_513] : memref<36x32xbf16, #tpu.memory_space<vmem>>, vector<22x32xbf16>
    %c2_514 = arith.constant 2 : index
    %c3_515 = arith.constant 3 : index
    %c0_516 = arith.constant 0 : index
    %c0_517 = arith.constant 0 : index
    %398 = vector.load %arg5[%c2_514, %c3_515, %c0_516, %c0_517] : memref<5x9x32x32xbf16, #tpu.memory_space<vmem>>, vector<1x1x32x32xbf16>
    %399 = vector.shape_cast %398 : vector<1x1x32x32xbf16> to vector<32x32xbf16>
    %cst_518 = arith.constant dense<0.000000e+00> : vector<22x32xf32>
    %400 = tpu.matmul %397, %399, %cst_518 {dimension_numbers = #tpu.dot_dimension_numbers<[1], [0], [0], [1], [0, 0, 1, 1], [], []>} : vector<22x32xbf16>, vector<32x32xbf16>, vector<22x32xf32> -> vector<22x32xf32>
    %401 = arith.addf %396, %400 : vector<22x32xf32>
    %c7_519 = arith.constant 7 : index
    %c0_520 = arith.constant 0 : index
    %402 = vector.load %arg18[%c7_519, %c0_520] : memref<36x32xbf16, #tpu.memory_space<vmem>>, vector<22x32xbf16>
    %c2_521 = arith.constant 2 : index
    %c4_522 = arith.constant 4 : index
    %c0_523 = arith.constant 0 : index
    %c0_524 = arith.constant 0 : index
    %403 = vector.load %arg5[%c2_521, %c4_522, %c0_523, %c0_524] : memref<5x9x32x32xbf16, #tpu.memory_space<vmem>>, vector<1x1x32x32xbf16>
    %404 = vector.shape_cast %403 : vector<1x1x32x32xbf16> to vector<32x32xbf16>
    %cst_525 = arith.constant dense<0.000000e+00> : vector<22x32xf32>
    %405 = tpu.matmul %402, %404, %cst_525 {dimension_numbers = #tpu.dot_dimension_numbers<[1], [0], [0], [1], [0, 0, 1, 1], [], []>} : vector<22x32xbf16>, vector<32x32xbf16>, vector<22x32xf32> -> vector<22x32xf32>
    %406 = arith.addf %401, %405 : vector<22x32xf32>
    %c8_526 = arith.constant 8 : index
    %c0_527 = arith.constant 0 : index
    %407 = vector.load %arg18[%c8_526, %c0_527] : memref<36x32xbf16, #tpu.memory_space<vmem>>, vector<22x32xbf16>
    %c2_528 = arith.constant 2 : index
    %c5_529 = arith.constant 5 : index
    %c0_530 = arith.constant 0 : index
    %c0_531 = arith.constant 0 : index
    %408 = vector.load %arg5[%c2_528, %c5_529, %c0_530, %c0_531] : memref<5x9x32x32xbf16, #tpu.memory_space<vmem>>, vector<1x1x32x32xbf16>
    %409 = vector.shape_cast %408 : vector<1x1x32x32xbf16> to vector<32x32xbf16>
    %cst_532 = arith.constant dense<0.000000e+00> : vector<22x32xf32>
    %410 = tpu.matmul %407, %409, %cst_532 {dimension_numbers = #tpu.dot_dimension_numbers<[1], [0], [0], [1], [0, 0, 1, 1], [], []>} : vector<22x32xbf16>, vector<32x32xbf16>, vector<22x32xf32> -> vector<22x32xf32>
    %411 = arith.addf %406, %410 : vector<22x32xf32>
    %c12_533 = arith.constant 12 : index
    %c0_534 = arith.constant 0 : index
    %412 = vector.load %arg18[%c12_533, %c0_534] : memref<36x32xbf16, #tpu.memory_space<vmem>>, vector<22x32xbf16>
    %c2_535 = arith.constant 2 : index
    %c6_536 = arith.constant 6 : index
    %c0_537 = arith.constant 0 : index
    %c0_538 = arith.constant 0 : index
    %413 = vector.load %arg5[%c2_535, %c6_536, %c0_537, %c0_538] : memref<5x9x32x32xbf16, #tpu.memory_space<vmem>>, vector<1x1x32x32xbf16>
    %414 = vector.shape_cast %413 : vector<1x1x32x32xbf16> to vector<32x32xbf16>
    %cst_539 = arith.constant dense<0.000000e+00> : vector<22x32xf32>
    %415 = tpu.matmul %412, %414, %cst_539 {dimension_numbers = #tpu.dot_dimension_numbers<[1], [0], [0], [1], [0, 0, 1, 1], [], []>} : vector<22x32xbf16>, vector<32x32xbf16>, vector<22x32xf32> -> vector<22x32xf32>
    %416 = arith.addf %411, %415 : vector<22x32xf32>
    %c13_540 = arith.constant 13 : index
    %c0_541 = arith.constant 0 : index
    %417 = vector.load %arg18[%c13_540, %c0_541] : memref<36x32xbf16, #tpu.memory_space<vmem>>, vector<22x32xbf16>
    %c2_542 = arith.constant 2 : index
    %c7_543 = arith.constant 7 : index
    %c0_544 = arith.constant 0 : index
    %c0_545 = arith.constant 0 : index
    %418 = vector.load %arg5[%c2_542, %c7_543, %c0_544, %c0_545] : memref<5x9x32x32xbf16, #tpu.memory_space<vmem>>, vector<1x1x32x32xbf16>
    %419 = vector.shape_cast %418 : vector<1x1x32x32xbf16> to vector<32x32xbf16>
    %cst_546 = arith.constant dense<0.000000e+00> : vector<22x32xf32>
    %420 = tpu.matmul %417, %419, %cst_546 {dimension_numbers = #tpu.dot_dimension_numbers<[1], [0], [0], [1], [0, 0, 1, 1], [], []>} : vector<22x32xbf16>, vector<32x32xbf16>, vector<22x32xf32> -> vector<22x32xf32>
    %421 = arith.addf %416, %420 : vector<22x32xf32>
    %c14_547 = arith.constant 14 : index
    %c0_548 = arith.constant 0 : index
    %422 = vector.load %arg18[%c14_547, %c0_548] : memref<36x32xbf16, #tpu.memory_space<vmem>>, vector<22x32xbf16>
    %c2_549 = arith.constant 2 : index
    %c8_550 = arith.constant 8 : index
    %c0_551 = arith.constant 0 : index
    %c0_552 = arith.constant 0 : index
    %423 = vector.load %arg5[%c2_549, %c8_550, %c0_551, %c0_552] : memref<5x9x32x32xbf16, #tpu.memory_space<vmem>>, vector<1x1x32x32xbf16>
    %424 = vector.shape_cast %423 : vector<1x1x32x32xbf16> to vector<32x32xbf16>
    %cst_553 = arith.constant dense<0.000000e+00> : vector<22x32xf32>
    %425 = tpu.matmul %422, %424, %cst_553 {dimension_numbers = #tpu.dot_dimension_numbers<[1], [0], [0], [1], [0, 0, 1, 1], [], []>} : vector<22x32xbf16>, vector<32x32xbf16>, vector<22x32xf32> -> vector<22x32xf32>
    %426 = arith.addf %421, %425 : vector<22x32xf32>
    %c7_554 = arith.constant 7 : index
    %c0_555 = arith.constant 0 : index
    %427 = vector.load %arg17[%c7_554, %c0_555] : memref<36x32xbf16, #tpu.memory_space<vmem>>, vector<22x32xbf16>
    %428 = arith.extf %427 : vector<22x32xbf16> to vector<22x32xf32>
    %429 = arith.addf %426, %428 : vector<22x32xf32>
    %cst_556 = arith.constant 0.000000e+00 : f32
    %430 = vector.broadcast %cst_556 : f32 to vector<22x32xf32>
    %431 = arith.maximumf %429, %430 : vector<22x32xf32>
    %c0_557 = arith.constant 0 : index
    %c0_558 = arith.constant 0 : index
    %432 = vector.load %arg11[%c0_557, %c0_558] : memref<22x1xf32, #tpu.memory_space<vmem>>, vector<22x1xf32>
    %433 = vector.broadcast %432 : vector<22x1xf32> to vector<22x32xf32>
    %434 = arith.mulf %431, %433 : vector<22x32xf32>
    %435 = arith.truncf %434 : vector<22x32xf32> to vector<22x32xbf16>
    %c7_559 = arith.constant 7 : index
    %c0_560 = arith.constant 0 : index
    %436 = vector.load %arg17[%c7_559, %c0_560] : memref<36x32xbf16, #tpu.memory_space<vmem>>, vector<22x32xbf16>
    tpu.vector_store %arg17[%c7_559, %c0_560], %435 {strides = array<i32>} : memref<36x32xbf16, #tpu.memory_space<vmem>>, vector<22x32xbf16>,
    %c0_561 = arith.constant 0 : index
    %c0_562 = arith.constant 0 : index
    %437 = vector.load %arg17[%c0_561, %c0_562] : memref<36x32xbf16, #tpu.memory_space<vmem>>, vector<22x32xbf16>
    %438 = arith.extf %437 : vector<22x32xbf16> to vector<22x32xf32>
    %c1_563 = arith.constant 1 : index
    %c0_564 = arith.constant 0 : index
    %439 = vector.load %arg17[%c1_563, %c0_564] : memref<36x32xbf16, #tpu.memory_space<vmem>>, vector<22x32xbf16>
    %440 = arith.extf %439 : vector<22x32xbf16> to vector<22x32xf32>
    %441 = arith.addf %438, %440 : vector<22x32xf32>
    %c2_565 = arith.constant 2 : index
    %c0_566 = arith.constant 0 : index
    %442 = vector.load %arg17[%c2_565, %c0_566] : memref<36x32xbf16, #tpu.memory_space<vmem>>, vector<22x32xbf16>
    %443 = arith.extf %442 : vector<22x32xbf16> to vector<22x32xf32>
    %444 = arith.addf %441, %443 : vector<22x32xf32>
    %c6_567 = arith.constant 6 : index
    %c0_568 = arith.constant 0 : index
    %445 = vector.load %arg17[%c6_567, %c0_568] : memref<36x32xbf16, #tpu.memory_space<vmem>>, vector<22x32xbf16>
    %446 = arith.extf %445 : vector<22x32xbf16> to vector<22x32xf32>
    %447 = arith.addf %444, %446 : vector<22x32xf32>
    %c7_569 = arith.constant 7 : index
    %c0_570 = arith.constant 0 : index
    %448 = vector.load %arg17[%c7_569, %c0_570] : memref<36x32xbf16, #tpu.memory_space<vmem>>, vector<22x32xbf16>
    %449 = arith.extf %448 : vector<22x32xbf16> to vector<22x32xf32>
    %450 = arith.addf %447, %449 : vector<22x32xf32>
    %c8_571 = arith.constant 8 : index
    %c0_572 = arith.constant 0 : index
    %451 = vector.load %arg17[%c8_571, %c0_572] : memref<36x32xbf16, #tpu.memory_space<vmem>>, vector<22x32xbf16>
    %452 = arith.extf %451 : vector<22x32xbf16> to vector<22x32xf32>
    %453 = arith.addf %450, %452 : vector<22x32xf32>
    %c12_573 = arith.constant 12 : index
    %c0_574 = arith.constant 0 : index
    %454 = vector.load %arg17[%c12_573, %c0_574] : memref<36x32xbf16, #tpu.memory_space<vmem>>, vector<22x32xbf16>
    %455 = arith.extf %454 : vector<22x32xbf16> to vector<22x32xf32>
    %456 = arith.addf %453, %455 : vector<22x32xf32>
    %c13_575 = arith.constant 13 : index
    %c0_576 = arith.constant 0 : index
    %457 = vector.load %arg17[%c13_575, %c0_576] : memref<36x32xbf16, #tpu.memory_space<vmem>>, vector<22x32xbf16>
    %458 = arith.extf %457 : vector<22x32xbf16> to vector<22x32xf32>
    %459 = arith.addf %456, %458 : vector<22x32xf32>
    %c14_577 = arith.constant 14 : index
    %c0_578 = arith.constant 0 : index
    %460 = vector.load %arg17[%c14_577, %c0_578] : memref<36x32xbf16, #tpu.memory_space<vmem>>, vector<22x32xbf16>
    %461 = arith.extf %460 : vector<22x32xbf16> to vector<22x32xf32>
    %462 = arith.addf %459, %461 : vector<22x32xf32>
    %cst_579 = arith.constant 0.111111112 : f32
    %463 = vector.broadcast %cst_579 : f32 to vector<22x32xf32>
    %464 = arith.mulf %462, %463 : vector<22x32xf32>
    %c0_580 = arith.constant 0 : index
    %c0_581 = arith.constant 0 : index
    %465 = vector.load %arg9[%c0_580, %c0_581] : memref<16x22xbf16, #tpu.memory_space<vmem>>, vector<16x22xbf16>
    %466 = arith.truncf %464 : vector<22x32xf32> to vector<22x32xbf16>
    %cst_582 = arith.constant dense<0.000000e+00> : vector<16x32xf32>
    %467 = tpu.matmul %465, %466, %cst_582 {dimension_numbers = #tpu.dot_dimension_numbers<[1], [0], [0], [1], [0, 0, 1, 1], [], []>} : vector<16x22xbf16>, vector<22x32xbf16>, vector<16x32xf32> -> vector<16x32xf32>
    %468 = arith.truncf %467 : vector<16x32xf32> to vector<16x32xbf16>
    %c0_583 = arith.constant 0 : index
    %c0_584 = arith.constant 0 : index
    %469 = vector.load %arg19[%c0_583, %c0_584] : memref<16x32xbf16, #tpu.memory_space<vmem>>, vector<16x32xbf16>
    tpu.vector_store %arg19[%c0_583, %c0_584], %468 {strides = array<i32>} : memref<16x32xbf16, #tpu.memory_space<vmem>>, vector<16x32xbf16>,
    %c0_585 = arith.constant 0 : index
    %c0_586 = arith.constant 0 : index
    %470 = vector.load %arg19[%c0_585, %c0_586] : memref<16x32xbf16, #tpu.memory_space<vmem>>, vector<6x32xbf16>
    %c3_587 = arith.constant 3 : index
    %c0_588 = arith.constant 0 : index
    %c0_589 = arith.constant 0 : index
    %c0_590 = arith.constant 0 : index
    %471 = vector.load %arg5[%c3_587, %c0_588, %c0_589, %c0_590] : memref<5x9x32x32xbf16, #tpu.memory_space<vmem>>, vector<1x1x32x32xbf16>
    %472 = vector.shape_cast %471 : vector<1x1x32x32xbf16> to vector<32x32xbf16>
    %cst_591 = arith.constant dense<0.000000e+00> : vector<6x32xf32>
    %473 = tpu.matmul %470, %472, %cst_591 {dimension_numbers = #tpu.dot_dimension_numbers<[1], [0], [0], [1], [0, 0, 1, 1], [], []>} : vector<6x32xbf16>, vector<32x32xbf16>, vector<6x32xf32> -> vector<6x32xf32>
    %c1_592 = arith.constant 1 : index
    %c0_593 = arith.constant 0 : index
    %474 = vector.load %arg19[%c1_592, %c0_593] : memref<16x32xbf16, #tpu.memory_space<vmem>>, vector<6x32xbf16>
    %c3_594 = arith.constant 3 : index
    %c1_595 = arith.constant 1 : index
    %c0_596 = arith.constant 0 : index
    %c0_597 = arith.constant 0 : index
    %475 = vector.load %arg5[%c3_594, %c1_595, %c0_596, %c0_597] : memref<5x9x32x32xbf16, #tpu.memory_space<vmem>>, vector<1x1x32x32xbf16>
    %476 = vector.shape_cast %475 : vector<1x1x32x32xbf16> to vector<32x32xbf16>
    %cst_598 = arith.constant dense<0.000000e+00> : vector<6x32xf32>
    %477 = tpu.matmul %474, %476, %cst_598 {dimension_numbers = #tpu.dot_dimension_numbers<[1], [0], [0], [1], [0, 0, 1, 1], [], []>} : vector<6x32xbf16>, vector<32x32xbf16>, vector<6x32xf32> -> vector<6x32xf32>
    %478 = arith.addf %473, %477 : vector<6x32xf32>
    %c2_599 = arith.constant 2 : index
    %c0_600 = arith.constant 0 : index
    %479 = vector.load %arg19[%c2_599, %c0_600] : memref<16x32xbf16, #tpu.memory_space<vmem>>, vector<6x32xbf16>
    %c3_601 = arith.constant 3 : index
    %c2_602 = arith.constant 2 : index
    %c0_603 = arith.constant 0 : index
    %c0_604 = arith.constant 0 : index
    %480 = vector.load %arg5[%c3_601, %c2_602, %c0_603, %c0_604] : memref<5x9x32x32xbf16, #tpu.memory_space<vmem>>, vector<1x1x32x32xbf16>
    %481 = vector.shape_cast %480 : vector<1x1x32x32xbf16> to vector<32x32xbf16>
    %cst_605 = arith.constant dense<0.000000e+00> : vector<6x32xf32>
    %482 = tpu.matmul %479, %481, %cst_605 {dimension_numbers = #tpu.dot_dimension_numbers<[1], [0], [0], [1], [0, 0, 1, 1], [], []>} : vector<6x32xbf16>, vector<32x32xbf16>, vector<6x32xf32> -> vector<6x32xf32>
    %483 = arith.addf %478, %482 : vector<6x32xf32>
    %c4_606 = arith.constant 4 : index
    %c0_607 = arith.constant 0 : index
    %484 = vector.load %arg19[%c4_606, %c0_607] : memref<16x32xbf16, #tpu.memory_space<vmem>>, vector<6x32xbf16>
    %c3_608 = arith.constant 3 : index
    %c3_609 = arith.constant 3 : index
    %c0_610 = arith.constant 0 : index
    %c0_611 = arith.constant 0 : index
    %485 = vector.load %arg5[%c3_608, %c3_609, %c0_610, %c0_611] : memref<5x9x32x32xbf16, #tpu.memory_space<vmem>>, vector<1x1x32x32xbf16>
    %486 = vector.shape_cast %485 : vector<1x1x32x32xbf16> to vector<32x32xbf16>
    %cst_612 = arith.constant dense<0.000000e+00> : vector<6x32xf32>
    %487 = tpu.matmul %484, %486, %cst_612 {dimension_numbers = #tpu.dot_dimension_numbers<[1], [0], [0], [1], [0, 0, 1, 1], [], []>} : vector<6x32xbf16>, vector<32x32xbf16>, vector<6x32xf32> -> vector<6x32xf32>
    %488 = arith.addf %483, %487 : vector<6x32xf32>
    %c5_613 = arith.constant 5 : index
    %c0_614 = arith.constant 0 : index
    %489 = vector.load %arg19[%c5_613, %c0_614] : memref<16x32xbf16, #tpu.memory_space<vmem>>, vector<6x32xbf16>
    %c3_615 = arith.constant 3 : index
    %c4_616 = arith.constant 4 : index
    %c0_617 = arith.constant 0 : index
    %c0_618 = arith.constant 0 : index
    %490 = vector.load %arg5[%c3_615, %c4_616, %c0_617, %c0_618] : memref<5x9x32x32xbf16, #tpu.memory_space<vmem>>, vector<1x1x32x32xbf16>
    %491 = vector.shape_cast %490 : vector<1x1x32x32xbf16> to vector<32x32xbf16>
    %cst_619 = arith.constant dense<0.000000e+00> : vector<6x32xf32>
    %492 = tpu.matmul %489, %491, %cst_619 {dimension_numbers = #tpu.dot_dimension_numbers<[1], [0], [0], [1], [0, 0, 1, 1], [], []>} : vector<6x32xbf16>, vector<32x32xbf16>, vector<6x32xf32> -> vector<6x32xf32>
    %493 = arith.addf %488, %492 : vector<6x32xf32>
    %c6_620 = arith.constant 6 : index
    %c0_621 = arith.constant 0 : index
    %494 = vector.load %arg19[%c6_620, %c0_621] : memref<16x32xbf16, #tpu.memory_space<vmem>>, vector<6x32xbf16>
    %c3_622 = arith.constant 3 : index
    %c5_623 = arith.constant 5 : index
    %c0_624 = arith.constant 0 : index
    %c0_625 = arith.constant 0 : index
    %495 = vector.load %arg5[%c3_622, %c5_623, %c0_624, %c0_625] : memref<5x9x32x32xbf16, #tpu.memory_space<vmem>>, vector<1x1x32x32xbf16>
    %496 = vector.shape_cast %495 : vector<1x1x32x32xbf16> to vector<32x32xbf16>
    %cst_626 = arith.constant dense<0.000000e+00> : vector<6x32xf32>
    %497 = tpu.matmul %494, %496, %cst_626 {dimension_numbers = #tpu.dot_dimension_numbers<[1], [0], [0], [1], [0, 0, 1, 1], [], []>} : vector<6x32xbf16>, vector<32x32xbf16>, vector<6x32xf32> -> vector<6x32xf32>
    %498 = arith.addf %493, %497 : vector<6x32xf32>
    %c8_627 = arith.constant 8 : index
    %c0_628 = arith.constant 0 : index
    %499 = vector.load %arg19[%c8_627, %c0_628] : memref<16x32xbf16, #tpu.memory_space<vmem>>, vector<6x32xbf16>
    %c3_629 = arith.constant 3 : index
    %c6_630 = arith.constant 6 : index
    %c0_631 = arith.constant 0 : index
    %c0_632 = arith.constant 0 : index
    %500 = vector.load %arg5[%c3_629, %c6_630, %c0_631, %c0_632] : memref<5x9x32x32xbf16, #tpu.memory_space<vmem>>, vector<1x1x32x32xbf16>
    %501 = vector.shape_cast %500 : vector<1x1x32x32xbf16> to vector<32x32xbf16>
    %cst_633 = arith.constant dense<0.000000e+00> : vector<6x32xf32>
    %502 = tpu.matmul %499, %501, %cst_633 {dimension_numbers = #tpu.dot_dimension_numbers<[1], [0], [0], [1], [0, 0, 1, 1], [], []>} : vector<6x32xbf16>, vector<32x32xbf16>, vector<6x32xf32> -> vector<6x32xf32>
    %503 = arith.addf %498, %502 : vector<6x32xf32>
    %c9 = arith.constant 9 : index
    %c0_634 = arith.constant 0 : index
    %504 = vector.load %arg19[%c9, %c0_634] : memref<16x32xbf16, #tpu.memory_space<vmem>>, vector<6x32xbf16>
    %c3_635 = arith.constant 3 : index
    %c7_636 = arith.constant 7 : index
    %c0_637 = arith.constant 0 : index
    %c0_638 = arith.constant 0 : index
    %505 = vector.load %arg5[%c3_635, %c7_636, %c0_637, %c0_638] : memref<5x9x32x32xbf16, #tpu.memory_space<vmem>>, vector<1x1x32x32xbf16>
    %506 = vector.shape_cast %505 : vector<1x1x32x32xbf16> to vector<32x32xbf16>
    %cst_639 = arith.constant dense<0.000000e+00> : vector<6x32xf32>
    %507 = tpu.matmul %504, %506, %cst_639 {dimension_numbers = #tpu.dot_dimension_numbers<[1], [0], [0], [1], [0, 0, 1, 1], [], []>} : vector<6x32xbf16>, vector<32x32xbf16>, vector<6x32xf32> -> vector<6x32xf32>
    %508 = arith.addf %503, %507 : vector<6x32xf32>
    %c10_640 = arith.constant 10 : index
    %c0_641 = arith.constant 0 : index
    %509 = vector.load %arg19[%c10_640, %c0_641] : memref<16x32xbf16, #tpu.memory_space<vmem>>, vector<6x32xbf16>
    %c3_642 = arith.constant 3 : index
    %c8_643 = arith.constant 8 : index
    %c0_644 = arith.constant 0 : index
    %c0_645 = arith.constant 0 : index
    %510 = vector.load %arg5[%c3_642, %c8_643, %c0_644, %c0_645] : memref<5x9x32x32xbf16, #tpu.memory_space<vmem>>, vector<1x1x32x32xbf16>
    %511 = vector.shape_cast %510 : vector<1x1x32x32xbf16> to vector<32x32xbf16>
    %cst_646 = arith.constant dense<0.000000e+00> : vector<6x32xf32>
    %512 = tpu.matmul %509, %511, %cst_646 {dimension_numbers = #tpu.dot_dimension_numbers<[1], [0], [0], [1], [0, 0, 1, 1], [], []>} : vector<6x32xbf16>, vector<32x32xbf16>, vector<6x32xf32> -> vector<6x32xf32>
    %513 = arith.addf %508, %512 : vector<6x32xf32>
    %cst_647 = arith.constant 0.000000e+00 : f32
    %514 = vector.broadcast %cst_647 : f32 to vector<6x32xf32>
    %515 = arith.maximumf %513, %514 : vector<6x32xf32>
    %c0_648 = arith.constant 0 : index
    %c0_649 = arith.constant 0 : index
    %516 = vector.load %arg12[%c0_648, %c0_649] : memref<6x1xf32, #tpu.memory_space<vmem>>, vector<6x1xf32>
    %517 = vector.broadcast %516 : vector<6x1xf32> to vector<6x32xf32>
    %518 = arith.mulf %515, %517 : vector<6x32xf32>
    %519 = arith.truncf %518 : vector<6x32xf32> to vector<6x32xbf16>
    %c5_650 = arith.constant 5 : index
    %c0_651 = arith.constant 0 : index
    %520 = vector.load %arg20[%c5_650, %c0_651] : memref<16x32xbf16, #tpu.memory_space<vmem>>, vector<6x32xbf16>
    tpu.vector_store %arg20[%c5_650, %c0_651], %519 {strides = array<i32>} : memref<16x32xbf16, #tpu.memory_space<vmem>>, vector<6x32xbf16>,
    %c0_652 = arith.constant 0 : index
    %c0_653 = arith.constant 0 : index
    %521 = vector.load %arg20[%c0_652, %c0_653] : memref<16x32xbf16, #tpu.memory_space<vmem>>, vector<6x32xbf16>
    %c4_654 = arith.constant 4 : index
    %c0_655 = arith.constant 0 : index
    %c0_656 = arith.constant 0 : index
    %c0_657 = arith.constant 0 : index
    %522 = vector.load %arg5[%c4_654, %c0_655, %c0_656, %c0_657] : memref<5x9x32x32xbf16, #tpu.memory_space<vmem>>, vector<1x1x32x32xbf16>
    %523 = vector.shape_cast %522 : vector<1x1x32x32xbf16> to vector<32x32xbf16>
    %cst_658 = arith.constant dense<0.000000e+00> : vector<6x32xf32>
    %524 = tpu.matmul %521, %523, %cst_658 {dimension_numbers = #tpu.dot_dimension_numbers<[1], [0], [0], [1], [0, 0, 1, 1], [], []>} : vector<6x32xbf16>, vector<32x32xbf16>, vector<6x32xf32> -> vector<6x32xf32>
    %c1_659 = arith.constant 1 : index
    %c0_660 = arith.constant 0 : index
    %525 = vector.load %arg20[%c1_659, %c0_660] : memref<16x32xbf16, #tpu.memory_space<vmem>>, vector<6x32xbf16>
    %c4_661 = arith.constant 4 : index
    %c1_662 = arith.constant 1 : index
    %c0_663 = arith.constant 0 : index
    %c0_664 = arith.constant 0 : index
    %526 = vector.load %arg5[%c4_661, %c1_662, %c0_663, %c0_664] : memref<5x9x32x32xbf16, #tpu.memory_space<vmem>>, vector<1x1x32x32xbf16>
    %527 = vector.shape_cast %526 : vector<1x1x32x32xbf16> to vector<32x32xbf16>
    %cst_665 = arith.constant dense<0.000000e+00> : vector<6x32xf32>
    %528 = tpu.matmul %525, %527, %cst_665 {dimension_numbers = #tpu.dot_dimension_numbers<[1], [0], [0], [1], [0, 0, 1, 1], [], []>} : vector<6x32xbf16>, vector<32x32xbf16>, vector<6x32xf32> -> vector<6x32xf32>
    %529 = arith.addf %524, %528 : vector<6x32xf32>
    %c2_666 = arith.constant 2 : index
    %c0_667 = arith.constant 0 : index
    %530 = vector.load %arg20[%c2_666, %c0_667] : memref<16x32xbf16, #tpu.memory_space<vmem>>, vector<6x32xbf16>
    %c4_668 = arith.constant 4 : index
    %c2_669 = arith.constant 2 : index
    %c0_670 = arith.constant 0 : index
    %c0_671 = arith.constant 0 : index
    %531 = vector.load %arg5[%c4_668, %c2_669, %c0_670, %c0_671] : memref<5x9x32x32xbf16, #tpu.memory_space<vmem>>, vector<1x1x32x32xbf16>
    %532 = vector.shape_cast %531 : vector<1x1x32x32xbf16> to vector<32x32xbf16>
    %cst_672 = arith.constant dense<0.000000e+00> : vector<6x32xf32>
    %533 = tpu.matmul %530, %532, %cst_672 {dimension_numbers = #tpu.dot_dimension_numbers<[1], [0], [0], [1], [0, 0, 1, 1], [], []>} : vector<6x32xbf16>, vector<32x32xbf16>, vector<6x32xf32> -> vector<6x32xf32>
    %534 = arith.addf %529, %533 : vector<6x32xf32>
    %c4_673 = arith.constant 4 : index
    %c0_674 = arith.constant 0 : index
    %535 = vector.load %arg20[%c4_673, %c0_674] : memref<16x32xbf16, #tpu.memory_space<vmem>>, vector<6x32xbf16>
    %c4_675 = arith.constant 4 : index
    %c3_676 = arith.constant 3 : index
    %c0_677 = arith.constant 0 : index
    %c0_678 = arith.constant 0 : index
    %536 = vector.load %arg5[%c4_675, %c3_676, %c0_677, %c0_678] : memref<5x9x32x32xbf16, #tpu.memory_space<vmem>>, vector<1x1x32x32xbf16>
    %537 = vector.shape_cast %536 : vector<1x1x32x32xbf16> to vector<32x32xbf16>
    %cst_679 = arith.constant dense<0.000000e+00> : vector<6x32xf32>
    %538 = tpu.matmul %535, %537, %cst_679 {dimension_numbers = #tpu.dot_dimension_numbers<[1], [0], [0], [1], [0, 0, 1, 1], [], []>} : vector<6x32xbf16>, vector<32x32xbf16>, vector<6x32xf32> -> vector<6x32xf32>
    %539 = arith.addf %534, %538 : vector<6x32xf32>
    %c5_680 = arith.constant 5 : index
    %c0_681 = arith.constant 0 : index
    %540 = vector.load %arg20[%c5_680, %c0_681] : memref<16x32xbf16, #tpu.memory_space<vmem>>, vector<6x32xbf16>
    %c4_682 = arith.constant 4 : index
    %c4_683 = arith.constant 4 : index
    %c0_684 = arith.constant 0 : index
    %c0_685 = arith.constant 0 : index
    %541 = vector.load %arg5[%c4_682, %c4_683, %c0_684, %c0_685] : memref<5x9x32x32xbf16, #tpu.memory_space<vmem>>, vector<1x1x32x32xbf16>
    %542 = vector.shape_cast %541 : vector<1x1x32x32xbf16> to vector<32x32xbf16>
    %cst_686 = arith.constant dense<0.000000e+00> : vector<6x32xf32>
    %543 = tpu.matmul %540, %542, %cst_686 {dimension_numbers = #tpu.dot_dimension_numbers<[1], [0], [0], [1], [0, 0, 1, 1], [], []>} : vector<6x32xbf16>, vector<32x32xbf16>, vector<6x32xf32> -> vector<6x32xf32>
    %544 = arith.addf %539, %543 : vector<6x32xf32>
    %c6_687 = arith.constant 6 : index
    %c0_688 = arith.constant 0 : index
    %545 = vector.load %arg20[%c6_687, %c0_688] : memref<16x32xbf16, #tpu.memory_space<vmem>>, vector<6x32xbf16>
    %c4_689 = arith.constant 4 : index
    %c5_690 = arith.constant 5 : index
    %c0_691 = arith.constant 0 : index
    %c0_692 = arith.constant 0 : index
    %546 = vector.load %arg5[%c4_689, %c5_690, %c0_691, %c0_692] : memref<5x9x32x32xbf16, #tpu.memory_space<vmem>>, vector<1x1x32x32xbf16>
    %547 = vector.shape_cast %546 : vector<1x1x32x32xbf16> to vector<32x32xbf16>
    %cst_693 = arith.constant dense<0.000000e+00> : vector<6x32xf32>
    %548 = tpu.matmul %545, %547, %cst_693 {dimension_numbers = #tpu.dot_dimension_numbers<[1], [0], [0], [1], [0, 0, 1, 1], [], []>} : vector<6x32xbf16>, vector<32x32xbf16>, vector<6x32xf32> -> vector<6x32xf32>
    %549 = arith.addf %544, %548 : vector<6x32xf32>
    %c8_694 = arith.constant 8 : index
    %c0_695 = arith.constant 0 : index
    %550 = vector.load %arg20[%c8_694, %c0_695] : memref<16x32xbf16, #tpu.memory_space<vmem>>, vector<6x32xbf16>
    %c4_696 = arith.constant 4 : index
    %c6_697 = arith.constant 6 : index
    %c0_698 = arith.constant 0 : index
    %c0_699 = arith.constant 0 : index
    %551 = vector.load %arg5[%c4_696, %c6_697, %c0_698, %c0_699] : memref<5x9x32x32xbf16, #tpu.memory_space<vmem>>, vector<1x1x32x32xbf16>
    %552 = vector.shape_cast %551 : vector<1x1x32x32xbf16> to vector<32x32xbf16>
    %cst_700 = arith.constant dense<0.000000e+00> : vector<6x32xf32>
    %553 = tpu.matmul %550, %552, %cst_700 {dimension_numbers = #tpu.dot_dimension_numbers<[1], [0], [0], [1], [0, 0, 1, 1], [], []>} : vector<6x32xbf16>, vector<32x32xbf16>, vector<6x32xf32> -> vector<6x32xf32>
    %554 = arith.addf %549, %553 : vector<6x32xf32>
    %c9_701 = arith.constant 9 : index
    %c0_702 = arith.constant 0 : index
    %555 = vector.load %arg20[%c9_701, %c0_702] : memref<16x32xbf16, #tpu.memory_space<vmem>>, vector<6x32xbf16>
    %c4_703 = arith.constant 4 : index
    %c7_704 = arith.constant 7 : index
    %c0_705 = arith.constant 0 : index
    %c0_706 = arith.constant 0 : index
    %556 = vector.load %arg5[%c4_703, %c7_704, %c0_705, %c0_706] : memref<5x9x32x32xbf16, #tpu.memory_space<vmem>>, vector<1x1x32x32xbf16>
    %557 = vector.shape_cast %556 : vector<1x1x32x32xbf16> to vector<32x32xbf16>
    %cst_707 = arith.constant dense<0.000000e+00> : vector<6x32xf32>
    %558 = tpu.matmul %555, %557, %cst_707 {dimension_numbers = #tpu.dot_dimension_numbers<[1], [0], [0], [1], [0, 0, 1, 1], [], []>} : vector<6x32xbf16>, vector<32x32xbf16>, vector<6x32xf32> -> vector<6x32xf32>
    %559 = arith.addf %554, %558 : vector<6x32xf32>
    %c10_708 = arith.constant 10 : index
    %c0_709 = arith.constant 0 : index
    %560 = vector.load %arg20[%c10_708, %c0_709] : memref<16x32xbf16, #tpu.memory_space<vmem>>, vector<6x32xbf16>
    %c4_710 = arith.constant 4 : index
    %c8_711 = arith.constant 8 : index
    %c0_712 = arith.constant 0 : index
    %c0_713 = arith.constant 0 : index
    %561 = vector.load %arg5[%c4_710, %c8_711, %c0_712, %c0_713] : memref<5x9x32x32xbf16, #tpu.memory_space<vmem>>, vector<1x1x32x32xbf16>
    %562 = vector.shape_cast %561 : vector<1x1x32x32xbf16> to vector<32x32xbf16>
    %cst_714 = arith.constant dense<0.000000e+00> : vector<6x32xf32>
    %563 = tpu.matmul %560, %562, %cst_714 {dimension_numbers = #tpu.dot_dimension_numbers<[1], [0], [0], [1], [0, 0, 1, 1], [], []>} : vector<6x32xbf16>, vector<32x32xbf16>, vector<6x32xf32> -> vector<6x32xf32>
    %564 = arith.addf %559, %563 : vector<6x32xf32>
    %c5_715 = arith.constant 5 : index
    %c0_716 = arith.constant 0 : index
    %565 = vector.load %arg19[%c5_715, %c0_716] : memref<16x32xbf16, #tpu.memory_space<vmem>>, vector<6x32xbf16>
    %566 = arith.extf %565 : vector<6x32xbf16> to vector<6x32xf32>
    %567 = arith.addf %564, %566 : vector<6x32xf32>
    %cst_717 = arith.constant 0.000000e+00 : f32
    %568 = vector.broadcast %cst_717 : f32 to vector<6x32xf32>
    %569 = arith.maximumf %567, %568 : vector<6x32xf32>
    %c0_718 = arith.constant 0 : index
    %c0_719 = arith.constant 0 : index
    %570 = vector.load %arg12[%c0_718, %c0_719] : memref<6x1xf32, #tpu.memory_space<vmem>>, vector<6x1xf32>
    %571 = vector.broadcast %570 : vector<6x1xf32> to vector<6x32xf32>
    %572 = arith.mulf %569, %571 : vector<6x32xf32>
    %573 = arith.truncf %572 : vector<6x32xf32> to vector<6x32xbf16>
    %c5_720 = arith.constant 5 : index
    %c0_721 = arith.constant 0 : index
    %574 = vector.load %arg19[%c5_720, %c0_721] : memref<16x32xbf16, #tpu.memory_space<vmem>>, vector<6x32xbf16>
    tpu.vector_store %arg19[%c5_720, %c0_721], %573 {strides = array<i32>} : memref<16x32xbf16, #tpu.memory_space<vmem>>, vector<6x32xbf16>,
    %c0_722 = arith.constant 0 : index
    %c0_723 = arith.constant 0 : index
    %575 = vector.load %arg19[%c0_722, %c0_723] : memref<16x32xbf16, #tpu.memory_space<vmem>>, vector<6x32xbf16>
    %576 = arith.extf %575 : vector<6x32xbf16> to vector<6x32xf32>
    %c1_724 = arith.constant 1 : index
    %c0_725 = arith.constant 0 : index
    %577 = vector.load %arg19[%c1_724, %c0_725] : memref<16x32xbf16, #tpu.memory_space<vmem>>, vector<6x32xbf16>
    %578 = arith.extf %577 : vector<6x32xbf16> to vector<6x32xf32>
    %579 = arith.addf %576, %578 : vector<6x32xf32>
    %c2_726 = arith.constant 2 : index
    %c0_727 = arith.constant 0 : index
    %580 = vector.load %arg19[%c2_726, %c0_727] : memref<16x32xbf16, #tpu.memory_space<vmem>>, vector<6x32xbf16>
    %581 = arith.extf %580 : vector<6x32xbf16> to vector<6x32xf32>
    %582 = arith.addf %579, %581 : vector<6x32xf32>
    %c4_728 = arith.constant 4 : index
    %c0_729 = arith.constant 0 : index
    %583 = vector.load %arg19[%c4_728, %c0_729] : memref<16x32xbf16, #tpu.memory_space<vmem>>, vector<6x32xbf16>
    %584 = arith.extf %583 : vector<6x32xbf16> to vector<6x32xf32>
    %585 = arith.addf %582, %584 : vector<6x32xf32>
    %c5_730 = arith.constant 5 : index
    %c0_731 = arith.constant 0 : index
    %586 = vector.load %arg19[%c5_730, %c0_731] : memref<16x32xbf16, #tpu.memory_space<vmem>>, vector<6x32xbf16>
    %587 = arith.extf %586 : vector<6x32xbf16> to vector<6x32xf32>
    %588 = arith.addf %585, %587 : vector<6x32xf32>
    %c6_732 = arith.constant 6 : index
    %c0_733 = arith.constant 0 : index
    %589 = vector.load %arg19[%c6_732, %c0_733] : memref<16x32xbf16, #tpu.memory_space<vmem>>, vector<6x32xbf16>
    %590 = arith.extf %589 : vector<6x32xbf16> to vector<6x32xf32>
    %591 = arith.addf %588, %590 : vector<6x32xf32>
    %c8_734 = arith.constant 8 : index
    %c0_735 = arith.constant 0 : index
    %592 = vector.load %arg19[%c8_734, %c0_735] : memref<16x32xbf16, #tpu.memory_space<vmem>>, vector<6x32xbf16>
    %593 = arith.extf %592 : vector<6x32xbf16> to vector<6x32xf32>
    %594 = arith.addf %591, %593 : vector<6x32xf32>
    %c9_736 = arith.constant 9 : index
    %c0_737 = arith.constant 0 : index
    %595 = vector.load %arg19[%c9_736, %c0_737] : memref<16x32xbf16, #tpu.memory_space<vmem>>, vector<6x32xbf16>
    %596 = arith.extf %595 : vector<6x32xbf16> to vector<6x32xf32>
    %597 = arith.addf %594, %596 : vector<6x32xf32>
    %c10_738 = arith.constant 10 : index
    %c0_739 = arith.constant 0 : index
    %598 = vector.load %arg19[%c10_738, %c0_739] : memref<16x32xbf16, #tpu.memory_space<vmem>>, vector<6x32xbf16>
    %599 = arith.extf %598 : vector<6x32xbf16> to vector<6x32xf32>
    %600 = arith.addf %597, %599 : vector<6x32xf32>
    %cst_740 = arith.constant 0.111111112 : f32
    %601 = vector.broadcast %cst_740 : f32 to vector<6x32xf32>
    %602 = arith.mulf %600, %601 : vector<6x32xf32>
    %c0_741 = arith.constant 0 : index
    %c0_742 = arith.constant 0 : index
    %603 = vector.load %arg13[%c0_741, %c0_742] : memref<1x6xbf16, #tpu.memory_space<vmem>>, vector<1x6xbf16>
    %604 = arith.truncf %602 : vector<6x32xf32> to vector<6x32xbf16>
    %cst_743 = arith.constant dense<0.000000e+00> : vector<1x32xf32>
    %605 = tpu.matmul %603, %604, %cst_743 {dimension_numbers = #tpu.dot_dimension_numbers<[1], [0], [0], [1], [0, 0, 1, 1], [], []>} : vector<1x6xbf16>, vector<6x32xbf16>, vector<1x32xf32> -> vector<1x32xf32>
    %606 = arith.truncf %605 : vector<1x32xf32> to vector<1x32xbf16>
    %c0_744 = arith.constant 0 : index
    %c0_745 = arith.constant 0 : index
    %c0_746 = arith.constant 0 : index
    %607 = vector.load %arg6[%c0_744, %c0_745, %c0_746] : memref<2x32x32xbf16, #tpu.memory_space<vmem>>, vector<1x32x32xbf16>
    %608 = vector.shape_cast %607 : vector<1x32x32xbf16> to vector<32x32xbf16>
    %cst_747 = arith.constant dense<0.000000e+00> : vector<1x32xf32>
    %609 = tpu.matmul %606, %608, %cst_747 {dimension_numbers = #tpu.dot_dimension_numbers<[1], [0], [0], [1], [0, 0, 1, 1], [], []>} : vector<1x32xbf16>, vector<32x32xbf16>, vector<1x32xf32> -> vector<1x32xf32>
    %cst_748 = arith.constant 0.000000e+00 : f32
    %610 = vector.broadcast %cst_748 : f32 to vector<1x32xf32>
    %611 = arith.maximumf %609, %610 : vector<1x32xf32>
    %612 = arith.truncf %611 : vector<1x32xf32> to vector<1x32xbf16>
    %c1_749 = arith.constant 1 : index
    %c0_750 = arith.constant 0 : index
    %c0_751 = arith.constant 0 : index
    %613 = vector.load %arg6[%c1_749, %c0_750, %c0_751] : memref<2x32x32xbf16, #tpu.memory_space<vmem>>, vector<1x32x32xbf16>
    %614 = vector.shape_cast %613 : vector<1x32x32xbf16> to vector<32x32xbf16>
    %cst_752 = arith.constant dense<0.000000e+00> : vector<1x32xf32>
    %615 = tpu.matmul %612, %614, %cst_752 {dimension_numbers = #tpu.dot_dimension_numbers<[1], [0], [0], [1], [0, 0, 1, 1], [], []>} : vector<1x32xbf16>, vector<32x32xbf16>, vector<1x32xf32> -> vector<1x32xf32>
    %616 = arith.addf %615, %605 : vector<1x32xf32>
    %cst_753 = arith.constant 0.000000e+00 : f32
    %617 = vector.broadcast %cst_753 : f32 to vector<1x32xf32>
    %618 = arith.maximumf %616, %617 : vector<1x32xf32>
    %c0_754 = arith.constant 0 : index
    %c0_755 = arith.constant 0 : index
    %c0_756 = arith.constant 0 : index
    %619 = vector.load %arg14[%c0_754, %c0_755, %c0_756] : memref<1x1x32xf32, #tpu.memory_space<vmem>>, vector<1x1x32xf32>
    %620 = vector.shape_cast %619 : vector<1x1x32xf32> to vector<1x32xf32>
    %621 = vector.shape_cast %618 : vector<1x32xf32> to vector<1x1x32xf32>
    tpu.vector_store %arg14[%c0_754, %c0_755, %c0_756], %621 {strides = array<i32>} : memref<1x1x32xf32, #tpu.memory_space<vmem>>, vector<1x1x32xf32>,
    return
  }
  func.func @transform_0(%arg0: i32) -> (i32, i32, i32) {
    %c0_i32 = arith.constant 0 : i32
    %c0_i32_0 = arith.constant 0 : i32
    %c0_i32_1 = arith.constant 0 : i32
    return %arg0, %c0_i32, %c0_i32_0 : i32, i32, i32
  }
  func.func @transform_1(%arg0: i32) -> (i32, i32, i32, i32) {
    %c0_i32 = arith.constant 0 : i32
    %c0_i32_0 = arith.constant 0 : i32
    %c0_i32_1 = arith.constant 0 : i32
    %c0_i32_2 = arith.constant 0 : i32
    %c0_i32_3 = arith.constant 0 : i32
    return %c0_i32, %c0_i32_0, %c0_i32_1, %c0_i32_2 : i32, i32, i32, i32
  }
  func.func @transform_2(%arg0: i32) -> (i32, i32, i32, i32) {
    %c0_i32 = arith.constant 0 : i32
    %c0_i32_0 = arith.constant 0 : i32
    %c0_i32_1 = arith.constant 0 : i32
    %c0_i32_2 = arith.constant 0 : i32
    %c0_i32_3 = arith.constant 0 : i32
    return %c0_i32, %c0_i32_0, %c0_i32_1, %c0_i32_2 : i32, i32, i32, i32
  }
  func.func @transform_3(%arg0: i32) -> (i32, i32, i32, i32) {
    %c0_i32 = arith.constant 0 : i32
    %c0_i32_0 = arith.constant 0 : i32
    %c0_i32_1 = arith.constant 0 : i32
    %c0_i32_2 = arith.constant 0 : i32
    %c0_i32_3 = arith.constant 0 : i32
    return %c0_i32, %c0_i32_0, %c0_i32_1, %c0_i32_2 : i32, i32, i32, i32
  }
  func.func @transform_4(%arg0: i32) -> (i32, i32, i32, i32) {
    %c0_i32 = arith.constant 0 : i32
    %c0_i32_0 = arith.constant 0 : i32
    %c0_i32_1 = arith.constant 0 : i32
    %c0_i32_2 = arith.constant 0 : i32
    %c0_i32_3 = arith.constant 0 : i32
    return %c0_i32, %c0_i32_0, %c0_i32_1, %c0_i32_2 : i32, i32, i32, i32
  }
  func.func @transform_5(%arg0: i32) -> (i32, i32, i32) {
    %c0_i32 = arith.constant 0 : i32
    %c0_i32_0 = arith.constant 0 : i32
    %c0_i32_1 = arith.constant 0 : i32
    %c0_i32_2 = arith.constant 0 : i32
    return %c0_i32, %c0_i32_0, %c0_i32_1 : i32, i32, i32
  }
  func.func @transform_6(%arg0: i32) -> (i32, i32) {
    %c0_i32 = arith.constant 0 : i32
    %c0_i32_0 = arith.constant 0 : i32
    %c0_i32_1 = arith.constant 0 : i32
    return %c0_i32, %c0_i32_0 : i32, i32
  }
  func.func @transform_7(%arg0: i32) -> (i32, i32) {
    %c0_i32 = arith.constant 0 : i32
    %c0_i32_0 = arith.constant 0 : i32
    %c0_i32_1 = arith.constant 0 : i32
    return %c0_i32, %c0_i32_0 : i32, i32
  }
  func.func @transform_8(%arg0: i32) -> (i32, i32) {
    %c0_i32 = arith.constant 0 : i32
    %c0_i32_0 = arith.constant 0 : i32
    %c0_i32_1 = arith.constant 0 : i32
    return %c0_i32, %c0_i32_0 : i32, i32
  }
  func.func @transform_9(%arg0: i32) -> (i32, i32) {
    %c0_i32 = arith.constant 0 : i32
    %c0_i32_0 = arith.constant 0 : i32
    %c0_i32_1 = arith.constant 0 : i32
    return %c0_i32, %c0_i32_0 : i32, i32
  }
  func.func @transform_10(%arg0: i32) -> (i32, i32) {
    %c0_i32 = arith.constant 0 : i32
    %c0_i32_0 = arith.constant 0 : i32
    %c0_i32_1 = arith.constant 0 : i32
    return %c0_i32, %c0_i32_0 : i32, i32
  }
  func.func @transform_11(%arg0: i32) -> (i32, i32) {
    %c0_i32 = arith.constant 0 : i32
    %c0_i32_0 = arith.constant 0 : i32
    %c0_i32_1 = arith.constant 0 : i32
    return %c0_i32, %c0_i32_0 : i32, i32
  }
  func.func @transform_12(%arg0: i32) -> (i32, i32) {
    %c0_i32 = arith.constant 0 : i32
    %c0_i32_0 = arith.constant 0 : i32
    %c0_i32_1 = arith.constant 0 : i32
    return %c0_i32, %c0_i32_0 : i32, i32
  }
  func.func @transform_13(%arg0: i32) -> (i32, i32, i32) {
    %c0_i32 = arith.constant 0 : i32
    %c0_i32_0 = arith.constant 0 : i32
    %c0_i32_1 = arith.constant 0 : i32
    return %arg0, %c0_i32, %c0_i32_0 : i32, i32, i32
  }
}

</mosaic_0001>

<bundles_post_ra>
// kernel: forward.1
= control target key start
LH: loop header
LB: loop body
LE: loop exit
PB: predicated region body
PF: predicated region fallthrough
CT: control target
= control target key end

     0   :  { %s22857_s0 = inlined_call_operand.vmem [shape: bf16[2,324,4], index: 0, kind: input, shape index: {}]   ;;  %s22858_s1 = inlined_call_operand.vmem [shape: bf16[1,9,4,16], index: 1, kind: input, shape index: {}]   ;;  %s22859_s2 = inlined_call_operand.vmem [shape: bf16[2,9,16,16], index: 2, kind: input, shape index: {}]   ;;  %s22860_s3 = inlined_call_operand.vmem [shape: bf16[2,9,16,32], index: 3, kind: input, shape index: {}]   ;;  %s22861_s4 = inlined_call_operand.vmem [shape: bf16[5,9,32,32], index: 4, kind: input, shape index: {}]   ;;  %s22862_s5 = inlined_call_operand.vmem [shape: bf16[2,32,32], index: 5, kind: input, shape index: {}]   ;;  %s22863_s6 = inlined_call_operand.vmem [shape: bf16[100,286], index: 6, kind: input, shape index: {}]   ;;  %s22864_s7 = inlined_call_operand.vmem [shape: bf16[36,78], index: 7, kind: input, shape index: {}]   ;;  %s22865_s8 = inlined_call_operand.vmem [shape: bf16[16,22], index: 8, kind: input, shape index: {}]   ;;  %s22866_s9 = inlined_call_operand.vmem [shape: f32[78,1], index: 9, kind: input, shape index: {}]   ;;  %s22867_s10 = inlined_call_operand.vmem [shape: f32[22,1], index: 10, kind: input, shape index: {}]   ;;  %s22868_s11 = inlined_call_operand.vmem [shape: f32[6,1], index: 11, kind: input, shape index: {}]   ;;  %s22869_s12 = inlined_call_operand.vmem [shape: bf16[1,6], index: 12, kind: input, shape index: {}]   ;;  %s22870_s13 = inlined_call_operand.hbm [shape: f32[2,1,32], index: 13, kind: output, shape index: {}]  }
   0x1   :  { %22873 = sst [smem:[#allocation11_spill]] %s22857_s0 }
   0x2   :  { %22874 = sst [smem:[#allocation12_spill]] %s22858_s1 }
   0x3   :  { %22875 = sst [smem:[#allocation13_spill]] %s22859_s2 }
   0x4   :  { %18 = vsyncpa [#allocation9], 0 }
   0x5   :  { %20 = vsyncpa [#allocation9 + $0x1], 0  ;;  %s19697_s25 = smov 0   ;;  %s19699_s26 = smov 0  }
   0x6   :  { %s19701_s27 = smov 0   ;;  %s19703_s28 = smov 0  }
   0x7 LB: > { %s19718_s29 = sadd.s32 4294967295, %s19621_s28   ;;  %s14819_s30 = sadd.s32 4294967294, %s19621_s28   ;;  %s19621_s28 = sphi %s19703_s28, %s22911_s28   ;;  %s19617_s27 = sphi %s19701_s27, %s22910_s27   ;;  %s19613_s26 = sphi %s19699_s26, %s22909_s26   ;;  %s19609_s25 = sphi %s19697_s25, %s22908_s25  }
   0x8   : > { %s19722_s14 = sadd.s32 1, %s19621_s28   ;;  %s311_s15 = sadd.s32 1, %s19617_s27 }
   0x9   : > { %s308_s16 = ssub.s32 %s19621_s28, %s19722_s14  ;;  %p321_p0 = scmp.ne.s32.totalorder %s19617_s27, %s19613_s26 }
   0xa   : > { %p309_p1 = scmp.eq.s32.totalorder %s308_s16, 0  ;;  %p322_p2 = scmp.eq.s32.totalorder %s19718_s29, 1 }
   0xb   : > { %p327_p3 = scmp.ne.s32.totalorder %s19613_s26, %s19609_s25  ;;  %p328_p4 = scmp.eq.s32.totalorder %s14819_s30, 1 }
   0xc   : > { %s19733_s17 = scalar_select %p309_p1, %s19617_s27, %s311_s15  }
   0xd   : > { %p19735_p5 = por %p322_p2, %p321_p0  ;;  %p19739_p6 = por %p328_p4, %p327_p3 }
   0xe   : > { %p14822_p7 = scmp.ge.s32.totalorder %s19621_s28, 1  ;;  %p390_p8 = scmp.lt.s32.totalorder %s19621_s28, 3 }
  0x10   : > { %p391_p9 = pnand %p14822_p7, %p390_p8 }
  0x11   : > { %s22878_s1 = sld [smem:[#allocation12_spill]] (!%p391_p9)  ;;  %vm22871_vm0 = vcmask (!%p391_p9), 1041408   ;;  %p433_p10 = scmp.lt.s32.totalorder (!%p391_p9), %s19718_s29, 1  ;;  %vm586_vm1 = vsmask.f32 (!%p391_p9), 7424  ;;  %vm730_vm2 = vcmask (!%p391_p9), 31744  }
  0x12   : > { %394 = sbr.rel (%p391_p9) target bundleno = 6154 (0x180a), region = 72  ;;  %s22879_s0 = sld [smem:[#allocation11_spill]] (!%p391_p9)  ;;  %vm1192_vm3 = vcmask (!%p391_p9), 1046528   ;;  %vm2063_vm4 = vsmask.f32 (!%p391_p9), 6400  ;;  %vm2506_vm5 = vcmask (!%p391_p9), 1045504  }
  0x13   : > { %vm3259_vm6 = vsmask.f32 (!%p391_p9), 5376  ;;  %vm3706_vm7 = vcmask (!%p391_p9), 1044480   ;;  %vm19624_vm8 = vmmov (!%p391_p9), 0   ;;  %vm4194_vm9 = vcmask (!%p391_p9), 244736   ;;  %s22880_s2 = sld [smem:[#allocation13_spill]] (!%p391_p9) }
  0x14   : > { %vm439_vm10 = vcmask (!%p391_p9), 125952   ;;  %vm452_vm11 = vcmask (!%p391_p9), 123904   ;;  %vm4548_vm12 = vcmask (!%p391_p9), 130048   ;;  %vm5984_vm13 = vcmask (!%p391_p9), 125953   ;;  %s19626_s22 = smov (!%p391_p9), [#allocation8]  }
  0x15   : > { %vm5985_vm14 = vsmask.f32 (!%p391_p9), 7942  ;;  %vm5871_vm15 = vsmask.f32 (!%p391_p9), 1280  ;;  %s19563_s23 = sshll.u32 (!%p391_p9), %s19626_s22, 4  ;;  %s19564_s23 = int_to_ptr.vmem [resolvable:$false] %s19563_s23 }
  0x17   : > { %v14824_v0 = vld [vmem:[%s22878_s1 + $0x2] sm:$0x3] (!%p391_p9)  ;;  %v492_v2 = vld [vmem:[%s22878_s1] sm:$0x3] (!%p391_p9)  ;;  %v19802_v33 = vld [vmem:[%s22878_s1 + $0x4] sm:$0x3] (!%p391_p9) }
  0x18   : > { %19101 = vmatprep.subr.msk.bf16.mxu0 (!%p391_p9), %vm22871_vm0, %v14824_v0  ;;  %v787_v1 = vsel (!%p391_p9), %vm22871_vm0, %v14824_v0, 0  ;;  %v1007_v24 = vsel (!%p391_p9), %vm22871_vm0, %v492_v2, 0 }
  0x19   : > { %16670 = vmatpush3.bf16.msra.mxu0 %v787_v1  ;;  %s434_s24 = scalar_select %p433_p10, %s19718_s29, 1 }
  0x1a   : > { %19102 = vmatprep.subr.msk.bf16.mxu0 %vm22871_vm0, %v492_v2 }
  0x1b   : > { %s19110_s30 = smul.u32 164, %s434_s24  ;;  %s431_s24 = sand.u32 1, %s19613_s26  }
  0x1c   : > { %s432_s15 = scalar_lea.vmem [#allocation8], %s431_s24 }
  0x1d   : > { %s19759_s20 = scalar_lea.vmem %s22879_s0, %s19110_s30  ;;  %s15947_s30 = sshll.u32 %s19718_s29, 4 }
  0x1e   : > { %v456_v3 = vld [vmem:[%s19759_s20] sm:$0xf]  ;;  %v19763_v4 = vld [vmem:[%s19759_s20 + $0x4] sm:$0xf]  ;;  %v19769_v6 = vld [vmem:[%s19759_s20 + $0x8] sm:$0xff]   ;;  %s14764_s16 = sshll.u32 %s432_s15, 4  ;;  %s22817_s16 = int_to_ptr.vmem [resolvable:$true] %s14764_s16 }
  0x1f   : > { %v19766_v5 = vcombine.low %v456_v3, %v19763_v4  ;;  %v19772_v7 = vld [vmem:[%s19759_s20 + $0x10] sm:$0xff]   ;;  %v595_v10 = vshll.u32 %v19769_v6, 16  ;;  %v599_v11 = vshrl.u32 %v19769_v6, 16  ;;  %v19780_v13 = vld [vmem:[%s19759_s20 + $0x18] sm:$0xff]   ;;  %v19784_v15 = vld [vmem:[%s19759_s20 + $0x20] sm:$0xff]   ;;  %s14752_s29 = scalar_lea.sflag [#allocation9], %s431_s24  ;;  %p19566_p0 = scmp.lt.s32.totalorder %s22817_s16, %s19564_s23 }
  0x20   : > { %v603_v12 = vshll.u32 %v19772_v7, 16  ;;  %v607_v14 = vshrl.u32 %v19772_v7, 16  ;;  %v611_v19 = vshll.u32 %v19780_v13, 16  ;;  %v619_v22 = vshll.u32 %v19784_v15, 16  ;;  %v19789_v23 = vld [vmem:[%s19759_s20 + $0x28] sm:$0xff]   ;;  %v19806_v35 = vld [vmem:[%s19759_s20 + $0x30] sm:$0xff]  }
  0x21   : > { %v588_v8 = vshrl.u32 %v19766_v5, 16  ;;  %v590_v9 = vshll.u32 %v19766_v5, 16  ;;  %v597_v17 = vrot.slane %v595_v10, 1  ;;  %v615_v27 = vshrl.u32 %v19780_v13, 16  ;;  %v19810_v39 = vld [vmem:[%s19759_s20 + $0x38] sm:$0xff]   ;;  %v19821_v46 = vld [vmem:[%s19759_s20 + $0x40] sm:$0xff]  }
  0x22   : > { %v605_v18 = vrot.slane %v603_v12, 1  ;;  %v613_v26 = vrot.slane %v611_v19, 1  ;;  %v623_v30 = vshrl.u32 %v19784_v15, 16  ;;  %v627_v31 = vshll.u32 %v19789_v23, 16  ;;  %v19824_v47 = vld [vmem:[%s19759_s20 + $0x48] sm:$0xff]   ;;  %v19828_v49 = vld [vmem:[%s19759_s20 + $0x50] sm:$0xff]  }
  0x23   : > { %v592_v16 = vrot.slane %v590_v9, 1  ;;  %v601_v21 = vor.u32 %v599_v11, %v597_v17  ;;  %v621_v34 = vrot.slane %v619_v22, 1  ;;  %v635_v40 = vshll.u32 %v19806_v35, 16  ;;  %v19831_v50 = vld [vmem:[%s19759_s20 + $0x58] sm:$0xff]   ;;  %v19835_v52 = vld [vmem:[%s19759_s20 + $0x60] sm:$0xff]   ;;  %v19838_v55 = vld [vmem:[%s19759_s20 + $0x68] sm:$0xff]  }
  0x24   : > { %v609_v25 = vor.u32 %v607_v14, %v605_v18  ;;  %v617_v36 = vor.u32 %v615_v27, %v613_v26  ;;  %v629_v38 = vrot.slane %v627_v31, 1  ;;  %v631_v42 = vshrl.u32 %v19789_v23, 16  ;;  %v19851_v2 = vld [vmem:[%s19759_s20 + $0x70] sm:$0xff]   ;;  %s19559_s21 = scalar_lea.vmem %s22817_s16, 16 }
  0x25   : > { %v593_v20 = vor.u32 %v592_v16, %v588_v8  ;;  %v606_v29 = vsel %vm586_vm1, %v601_v21, %v605_v18  ;;  %v625_v37 = vor.u32 %v623_v30, %v621_v34  ;;  %v639_v44 = vshrl.u32 %v19806_v35, 16  ;;  %p19560_p11 = scmp.ne.s32.totalorder %s22817_s16, %s19559_s21 }
  0x26   : > { %v614_v32 = vsel %vm586_vm1, %v609_v25, %v613_v26  ;;  %v622_v41 = vsel %vm586_vm1, %v617_v36, %v621_v34  ;;  %v643_v45 = vshll.u32 %v19810_v39, 16  ;;  %v637_v48 = vrot.slane %v635_v40, 1  ;;  %v493_v40 = vld [vmem:[%s19759_s20 + $0x8c] sm:$0xf] }
  0x27   : > { %v598_v28 = vsel %vm586_vm1, %v593_v20, %v597_v17  ;;  %v630_v43 = vsel %vm586_vm1, %v625_v37, %v629_v38  ;;  %v633_v51 = vor.u32 %v631_v42, %v629_v38  ;;  %v647_v56 = vshrl.u32 %v19810_v39, 16  ;;  %v490_v37 = vld [vmem:[%s19759_s20 + $0x88] sm:$0xf]  ;;  %v19878_v42 = vld [vmem:[%s19759_s20 + $0x80] sm:$0xff]   ;;  %p19561_p12 = pnand %p19560_p11, %p19735_p5 }
  0x28   : > { %16671 = vmatprep.mubr.msk.bf16.mxu0 %vm730_vm2, %v598_v28  ;;  %v641_v53 = vor.u32 %v639_v44, %v637_v48  ;;  %v645_v54 = vrot.slane %v643_v45, 1  ;;  %v651_v57 = vshll.u32 %v19821_v46, 16  ;;  %v655_v58 = vshrl.u32 %v19821_v46, 16 }
  0x29   : > { %16672 = vmatmul.mubr.msk.bf16.vlgmr.msra.gmra.mrb[0].mxu0 %vm730_vm2, %v606_v29  ;;  %v659_v59 = vshll.u32 %v19824_v47, 16  ;;  %v667_v60 = vshll.u32 %v19828_v49, 16  ;;  %v638_v61 = vsel %vm586_vm1, %v633_v51, %v637_v48  ;;  %v675_v62 = vshll.u32 %v19831_v50, 16  ;;  %p19562_p13 = pneg %p19561_p12 }
  0x2a   : > { %16708 = vmatpush3.bf16.msra.mxu0 %v1007_v24  ;;  %16675 = vmatprep.mubr.msk.bf16.mxu0 %vm730_vm2, %v614_v32  ;;  %v683_v63 = vshll.u32 %v19835_v52, 16  ;;  %v646_v0 = vsel %vm586_vm1, %v641_v53, %v645_v54  ;;  %v691_v1 = vshll.u32 %v19838_v55, 16  ;;  %v649_v3 = vor.u32 %v647_v56, %v645_v54  ;;  %v19862_v24 = vld [vmem:[%s19759_s20 + $0x78] sm:$0xff]  }
  0x2b   : > { %19103 = vmatprep.subr.msk.bf16.mxu0 %vm22871_vm0, %v19802_v33  ;;  %v653_v8 = vrot.slane %v651_v57, 1  ;;  %v663_v9 = vshrl.u32 %v19824_v47, 16  ;;  %v661_v10 = vrot.slane %v659_v59, 1  ;;  %v669_v11 = vrot.slane %v667_v60, 1 }
  0x2c   : > { %v671_v12 = vshrl.u32 %v19828_v49, 16  ;;  %v679_v14 = vshrl.u32 %v19831_v50, 16  ;;  %v677_v16 = vrot.slane %v675_v62, 1  ;;  %v685_v17 = vrot.slane %v683_v63, 1 }
  0x2d   : > { %v687_v18 = vshrl.u32 %v19835_v52, 16  ;;  %v695_v19 = vshrl.u32 %v19838_v55, 16  ;;  %v657_v20 = vor.u32 %v655_v58, %v653_v8  ;;  %v693_v21 = vrot.slane %v691_v1, 1 }
  0x2e   : > { %v699_v22 = vshll.u32 %v19851_v2, 16  ;;  %v654_v25 = vsel %vm586_vm1, %v649_v3, %v653_v8  ;;  %v703_v27 = vshrl.u32 %v19851_v2, 16  ;;  %v707_v28 = vshll.u32 %v19862_v24, 16 }
  0x2f   : > { %v662_v26 = vsel %vm586_vm1, %v657_v20, %v661_v10  ;;  %v665_v29 = vor.u32 %v663_v9, %v661_v10  ;;  %v711_v31 = vshrl.u32 %v19862_v24, 16  ;;  %v673_v32 = vor.u32 %v671_v12, %v669_v11  ;;  %v14900_v10 = vld [vmem:[%s22878_s1 + $0x6] sm:$0x3] }
  0x30   : > { %v701_v30 = vrot.slane %v699_v22, 1  ;;  %v681_v38 = vor.u32 %v679_v14, %v677_v16  ;;  %v19881_v44 = vcombine.low %v490_v37, %v493_v40  ;;  %v709_v48 = vrot.slane %v707_v28, 1  ;;  %v19545_v14 = vld [vmem:[%s19759_s20 + $0x30] sm:$0xff]   ;;  %v19552_v40 = vld [vmem:[%s19759_s20 + $0x68] sm:$0xff]  }
  0x31   : > { %16676 = vmatmul.mubr.msk.bf16.gmra.mrb[4].mxu0 %vm730_vm2, %v622_v41  ;;  %v670_v34 = vsel %vm586_vm1, %v665_v29, %v669_v11  ;;  %v678_v36 = vsel %vm586_vm1, %v673_v32, %v677_v16  ;;  %v689_v41 = vor.u32 %v687_v18, %v685_v17  ;;  %v715_v51 = vshll.u32 %v19878_v42, 16  ;;  %v19549_v29 = vld [vmem:[%s19759_s20 + $0x50] sm:$0xff]  }
  0x32   : > { %16679 = vmatprep.mubr.msk.bf16.mxu0 %vm730_vm2, %v630_v43  ;;  %v686_v43 = vsel %vm586_vm1, %v681_v38, %v685_v17  ;;  %v697_v53 = vor.u32 %v695_v19, %v693_v21  ;;  %v719_v54 = vshrl.u32 %v19878_v42, 16  ;;  %v723_v56 = vshll.u32 %v19881_v44, 16  ;;  %v19546_v17 = vld [vmem:[%s19759_s20 + $0x38] sm:$0xff]  }
  0x33   : > { %v694_v45 = vsel %vm586_vm1, %v689_v41, %v693_v21  ;;  %v705_v57 = vor.u32 %v703_v27, %v701_v30  ;;  %v717_v60 = vrot.slane %v715_v51, 1  ;;  %v727_v3 = vshrl.u32 %v19881_v44, 16  ;;  %v19547_v21 = vld [vmem:[%s19759_s20 + $0x40] sm:$0xff]  }
  0x34   : > { %v702_v58 = vsel %vm586_vm1, %v697_v53, %v701_v30  ;;  %v725_v62 = vrot.slane %v723_v56, 1  ;;  %v1283_v9 = vsel %vm22871_vm0, %v19802_v33, 0  ;;  %v1204_v16 = vrot.slane %v19545_v14, 1 }
  0x35   : > { %v710_v59 = vsel %vm586_vm1, %v705_v57, %v709_v48  ;;  %v721_v63 = vor.u32 %v719_v54, %v717_v60  ;;  %v1206_v18 = vrot.slane %v19546_v17, 1  ;;  %v1208_v22 = vrot.slane %v19547_v21, 1 }
  0x36   : > { %v729_v8 = vor.u32 %v727_v3, %v725_v62  ;;  %v1212_v30 = vrot.slane %v19549_v29, 1  ;;  %v1218_v41 = vrot.slane %v19552_v40, 1  ;;  %v1222_v53 = vrot.slane %v19862_v24, 1  ;;  %v19192_v40 = vld [vmem:[%s19759_s20 + $0x90] sm:$0xff]  }
  0x37   : > { %v726_v1 = vsel %vm586_vm1, %v721_v63, %v725_v62  ;;  %v1207_v20 = vsel %vm1192_vm3, %v1204_v16, %v1206_v18  ;;  %v1209_v27 = vsel %vm1192_vm3, %v1206_v18, %v1208_v22  ;;  %v1224_v57 = vrot.slane %v19878_v42, 1 }
  0x39   : > { %16680 = vmatmul.mubr.msk.bf16.gmra.mrb[8].mxu0 %vm730_vm2, %v638_v61  ;;  %v713_v61 = vor.u32 %v711_v31, %v709_v48  ;;  %v19550_v31 = vld [vmem:[%s19759_s20 + $0x58] sm:$0xff]   ;;  %v19553_v48 = vld [vmem:[%s19759_s20 + $0x70] sm:$0xff]  }
  0x3a   : > { %16683 = vmatprep.mubr.msk.bf16.mxu0 %vm730_vm2, %v646_v0  ;;  %v1214_v32 = vrot.slane %v19550_v31, 1  ;;  %v1220_v51 = vrot.slane %v19553_v48, 1 }
  0x3b   : > { %v718_v0 = vsel %vm586_vm1, %v713_v61, %v717_v60  ;;  %v19175_v61 = vld [vmem:[%s19759_s20 + $0x8] sm:$0xfe]  }
  0x3c   : > { %v1221_v54 = vsel %vm1192_vm3, %v1218_v41, %v1220_v51  ;;  %v1223_v56 = vsel %vm1192_vm3, %v1220_v51, %v1222_v53  ;;  %v1626_v62 = vrot.slane %v19175_v61, 1  ;;  %v1659_v51 = vrot.slane %v19192_v40, 1 }
  0x41   : > { %16684 = vmatmul.mubr.msk.bf16.gmra.mrb[12].mxu0 %vm730_vm2, %v654_v25  ;;  %v19548_v25 = vld [vmem:[%s19759_s20 + $0x48] sm:$0xff]  }
  0x42   : > { %16687 = vmatprep.mubr.msk.bf16.mxu0 %vm730_vm2, %v662_v26  ;;  %v1210_v26 = vrot.slane %v19548_v25, 1 }
  0x44   : > { %v1211_v28 = vsel %vm1192_vm3, %v1208_v22, %v1210_v26  ;;  %v19188_v22 = vld [vmem:[%s19759_s20 + $0x70] sm:$0xff]  }
  0x49   : > { %16688 = vmatmul.mubr.msk.bf16.gmra.mrb[16].mxu0 %vm730_vm2, %v670_v34  ;;  %v1213_v34 = vsel %vm1192_vm3, %v1210_v26, %v1212_v30  ;;  %v1651_v26 = vrot.slane %v19188_v22, 1 }
  0x4a   : > { %16691 = vmatprep.mubr.msk.bf16.mxu0 %vm730_vm2, %v678_v36  ;;  %v1215_v36 = vsel %vm1192_vm3, %v1212_v30, %v1214_v32  ;;  %v19190_v30 = vld [vmem:[%s19759_s20 + $0x80] sm:$0xff]  }
  0x51   : > { %16692 = vmatmul.mubr.msk.bf16.gmra.mrb[20].mxu0 %vm730_vm2, %v686_v43 }
  0x52   : > { %16695 = vmatprep.mubr.msk.bf16.mxu0 %vm730_vm2, %v694_v45 }
  0x59   : > { %16696 = vmatmul.mubr.msk.bf16.gmra.mrb[24].mxu0 %vm730_vm2, %v702_v58  ;;  %v1226_v58 = vrot.slane %v19881_v44, 1 }
  0x5a   : > { %16699 = vmatprep.mubr.msk.bf16.mxu0 %vm730_vm2, %v710_v59  ;;  %v1225_v59 = vsel %vm1192_vm3, %v1222_v53, %v1224_v57 }
  0x5b   : > { %v1227_v60 = vsel %vm1192_vm3, %v1224_v57, %v1226_v58 }
  0x61   : > { %16700 = vmatmul.mubr.msk.bf16.gmra.mrb[28].mxu0 %vm730_vm2, %v718_v0  ;;  %v19177_v0 = vld [vmem:[%s19759_s20 + $0x18] sm:$0xff]  }
  0x62   : > { %16703 = vmatprep.mubr.msk.bf16.mxu0 %vm730_vm2, %v726_v1  ;;  %v1629_v44 = vrot.slane %v19177_v0, 1  ;;  %v20076_v0 = vld [vmem:[%s19759_s20 + $0x20] sm:$0xff]  }
  0x69   : > { %16704 = vmatmul.mubr.msk.bf16.gmra.mrb[32].mxu0 %vm730_vm2, %v729_v8 }
  0x6a   : > { %16709 = vmatprep.mubr.msk.bf16.mxu0 %vm730_vm2, %v19766_v5  ;;  %v1186_v5 = vld [vmem:[%s19759_s20] sm:$0xe] }
  0x71   : > { %16710 = vmatmul.mubr.msk.bf16.vlgmr.msra.gmra.mrb[0].mxu0 %vm730_vm2, %v19769_v6 }
  0x72   : > { %16746 = vmatpush3.bf16.msra.mxu0 %v1283_v9  ;;  %16713 = vmatprep.mubr.msk.bf16.mxu0 %vm730_vm2, %v19772_v7  ;;  %v19179_v9 = vld [vmem:[%s19759_s20 + $0x28] sm:$0xff]  }
  0x73   : > { %19104 = vmatprep.subr.msk.bf16.mxu0 %vm22871_vm0, %v14900_v10 }
  0x79   : > { %16714 = vmatmul.mubr.msk.bf16.gmra.mrb[4].mxu0 %vm730_vm2, %v19780_v13 }
  0x7a   : > { %16717 = vmatprep.mubr.msk.bf16.mxu0 %vm730_vm2, %v19784_v15  ;;  %v14881_v15 = vcombine.low %v1186_v5, %v19763_v4  ;;  %v1196_v4 = vrot.slane %v19772_v7, 1  ;;  %v19544_v7 = vld [vmem:[%s19759_s20 + $0x28] sm:$0xff]  }
  0x7c   : > { %v1193_v33 = vrot.slane %v14881_v15, 1  ;;  %v19180_v15 = vld [vmem:[%s19759_s20 + $0x30] sm:$0xff]  }
  0x81   : > { %16718 = vmatmul.mubr.msk.bf16.gmra.mrb[8].mxu0 %vm730_vm2, %v19789_v23  ;;  %v491_v23 = vld [vmem:[%s19759_s20 + $0x8c] sm:$0x7] }
  0x82   : > { %16721 = vmatprep.mubr.msk.bf16.mxu0 %vm730_vm2, %v19806_v35  ;;  %v1194_v35 = vrot.slane %v19769_v6, 1  ;;  %v19953_v6 = vld [vmem:[%s22878_s1 + $0x8] sm:$0x3] }
  0x89   : > { %16722 = vmatmul.mubr.msk.bf16.gmra.mrb[12].mxu0 %vm730_vm2, %v19810_v39  ;;  %v14861_v39 = vcombine.low %v490_v37, %v491_v23  ;;  %v19551_v37 = vld [vmem:[%s19759_s20 + $0x60] sm:$0xff]   ;;  %v20018_v23 = vld [vmem:[%s22878_s1 + $0xa] sm:$0x3] }
  0x8a   : > { %16725 = vmatprep.mubr.msk.bf16.mxu0 %vm730_vm2, %v19821_v46  ;;  %v1195_v46 = vsel %vm1192_vm3, %v1193_v33, %v1194_v35  ;;  %v1216_v38 = vrot.slane %v19551_v37, 1  ;;  %v1633_v33 = vrot.slane %v19179_v9, 1  ;;  %v2094_v9 = vshll.u32 %v20076_v0, 16 }
  0x8c   : > { %v1217_v43 = vsel %vm1192_vm3, %v1214_v32, %v1216_v38  ;;  %v1219_v45 = vsel %vm1192_vm3, %v1216_v38, %v1218_v41  ;;  %v1655_v32 = vrot.slane %v19190_v30, 1  ;;  %v19191_v38 = vld [vmem:[%s19759_s20 + $0x88] sm:$0xff]  }
  0x8d   : > { %v1657_v48 = vrot.slane %v19191_v38, 1 }
  0x91   : > { %16726 = vmatmul.mubr.msk.bf16.gmra.mrb[16].mxu0 %vm730_vm2, %v19824_v47  ;;  %v1198_v47 = vrot.slane %v19780_v13, 1  ;;  %v1202_v13 = vrot.slane %v19544_v7, 1 }
  0x92   : > { %16729 = vmatprep.mubr.msk.bf16.mxu0 %vm730_vm2, %v19828_v49  ;;  %v1716_v49 = vsel %vm22871_vm0, %v14900_v10, 0  ;;  %v2285_v10 = vsel %vm22871_vm0, %v19953_v6, 0 }
  0x93   : > { %v1205_v19 = vsel %vm1192_vm3, %v1202_v13, %v1204_v16  ;;  %v19186_v16 = vld [vmem:[%s19759_s20 + $0x60] sm:$0xff]  }
  0x94   : > { %v1647_v18 = vrot.slane %v19186_v16, 1 }
  0x99   : > { %16730 = vmatmul.mubr.msk.bf16.gmra.mrb[20].mxu0 %vm730_vm2, %v19831_v50  ;;  %v1197_v50 = vsel %vm1192_vm3, %v1194_v35, %v1196_v4  ;;  %v1635_v35 = vrot.slane %v19180_v15, 1  ;;  %v20085_v15 = vld [vmem:[%s19759_s20 + $0x28] sm:$0xff]  }
  0x9a   : > { %16733 = vmatprep.mubr.msk.bf16.mxu0 %vm730_vm2, %v19835_v52  ;;  %v1199_v52 = vsel %vm1192_vm3, %v1196_v4, %v1198_v47 }
  0x9b   : > { %v1636_v4 = vsel %vm1192_vm3, %v1633_v33, %v1635_v35 }
  0xa1   : > { %16734 = vmatmul.mubr.msk.bf16.gmra.mrb[24].mxu0 %vm730_vm2, %v19838_v55  ;;  %v19543_v55 = vld [vmem:[%s19759_s20 + $0x20] sm:$0xff]  }
  0xa2   : > { %16737 = vmatprep.mubr.msk.bf16.mxu0 %vm730_vm2, %v19851_v2  ;;  %v1200_v2 = vrot.slane %v19543_v55, 1 }
  0xa4   : > { %v1201_v11 = vsel %vm1192_vm3, %v1198_v47, %v1200_v2  ;;  %v1203_v12 = vsel %vm1192_vm3, %v1200_v2, %v1202_v13  ;;  %v19182_v47 = vld [vmem:[%s19759_s20 + $0x40] sm:$0xff]   ;;  %v19184_v2 = vld [vmem:[%s19759_s20 + $0x50] sm:$0xff]  }
  0xa5   : > { %v1643_v13 = vrot.slane %v19184_v2, 1 }
  0xa9   : > { %16738 = vmatmul.mubr.msk.bf16.gmra.mrb[28].mxu0 %vm730_vm2, %v19862_v24  ;;  %v19176_v24 = vld [vmem:[%s19759_s20 + $0x10] sm:$0xff]  }
  0xaa   : > { %16741 = vmatprep.mubr.msk.bf16.mxu0 %vm730_vm2, %v19878_v42  ;;  %v1627_v63 = vrot.slane %v19176_v24, 1  ;;  %v19178_v42 = vld [vmem:[%s19759_s20 + $0x20] sm:$0xff]  }
  0xab   : > { %v1631_v3 = vrot.slane %v19178_v42, 1 }
  0xac   : > { %v1628_v1 = vsel %vm1192_vm3, %v1626_v62, %v1627_v63  ;;  %v1630_v8 = vsel %vm1192_vm3, %v1627_v63, %v1629_v44 }
  0xad   : > { %v1632_v5 = vsel %vm1192_vm3, %v1629_v44, %v1631_v3 }
  0xb1   : > { %16742 = vmatmul.mubr.msk.bf16.gmra.mrb[32].mxu0 %vm730_vm2, %v14861_v39  ;;  %v1634_v39 = vsel %vm1192_vm3, %v1631_v3, %v1633_v33 }
  0xb2   : > { %16747 = vmatprep.mubr.msk.bf16.mxu0 %vm730_vm2, %v1195_v46  ;;  %v19181_v46 = vld [vmem:[%s19759_s20 + $0x38] sm:$0xff]  }
  0xb9   : > { %16748 = vmatmul.mubr.msk.bf16.vlgmr.msra.gmra.mrb[0].mxu0 %vm730_vm2, %v1197_v50  ;;  %v1639_v50 = vrot.slane %v19182_v47, 1  ;;  %v2100_v47 = vshrl.u32 %v20085_v15, 16 }
  0xba   : > { %16784 = vmatpush3.bf16.msra.mxu0 %v1716_v49  ;;  %16751 = vmatprep.mubr.msk.bf16.mxu0 %vm730_vm2, %v1199_v52  ;;  %v1637_v49 = vrot.slane %v19181_v46, 1  ;;  %v19183_v52 = vld [vmem:[%s19759_s20 + $0x48] sm:$0xff]   ;;  %v20089_v46 = vld [vmem:[%s19759_s20 + $0x30] sm:$0xff]  }
  0xbb   : > { %19105 = vmatprep.subr.msk.bf16.mxu0 %vm22871_vm0, %v19953_v6  ;;  %v1641_v7 = vrot.slane %v19183_v52, 1  ;;  %v2112_v52 = vshll.u32 %v20089_v46, 16  ;;  %v2102_v2 = vrot.slane %v2100_v47, 1 }
  0xbc   : > { %v1638_v6 = vsel %vm1192_vm3, %v1635_v35, %v1637_v49  ;;  %v1640_v55 = vsel %vm1192_vm3, %v1637_v49, %v1639_v50  ;;  %v2103_v49 = vshll.u32 %v20085_v15, 16 }
  0xbd   : > { %v1644_v14 = vsel %vm1192_vm3, %v1641_v7, %v1643_v13  ;;  %v2114_v16 = vrot.slane %v2112_v52, 2 }
  0xc1   : > { %16752 = vmatmul.mubr.msk.bf16.gmra.mrb[4].mxu0 %vm730_vm2, %v1201_v11  ;;  %v1642_v11 = vsel %vm1192_vm3, %v1639_v50, %v1641_v7  ;;  %v2105_v7 = vrot.slane %v2103_v49, 2 }
  0xc2   : > { %16755 = vmatprep.mubr.msk.bf16.mxu0 %vm730_vm2, %v1203_v12  ;;  %v19185_v12 = vld [vmem:[%s19759_s20 + $0x58] sm:$0xff]  }
  0xc3   : > { %v1645_v17 = vrot.slane %v19185_v12, 1 }
  0xc5   : > { %v1648_v21 = vsel %vm1192_vm3, %v1645_v17, %v1647_v18 }
  0xc9   : > { %16756 = vmatmul.mubr.msk.bf16.gmra.mrb[8].mxu0 %vm730_vm2, %v1205_v19  ;;  %v1646_v19 = vsel %vm1192_vm3, %v1643_v13, %v1645_v17  ;;  %v20099_v13 = vld [vmem:[%s19759_s20 + $0x38] sm:$0xff]   ;;  %v20105_v17 = vld [vmem:[%s19759_s20 + $0x40] sm:$0xff]  }
  0xca   : > { %16759 = vmatprep.mubr.msk.bf16.mxu0 %vm730_vm2, %v1207_v20  ;;  %v19187_v20 = vld [vmem:[%s19759_s20 + $0x68] sm:$0xff]   ;;  %v2127_v22 = vshrl.u32 %v20105_v17, 16 }
  0xcb   : > { %v1649_v25 = vrot.slane %v19187_v20, 1  ;;  %v2121_v20 = vshll.u32 %v20099_v13, 16 }
  0xcd   : > { %v1652_v29 = vsel %vm1192_vm3, %v1649_v25, %v1651_v26 }
  0xd1   : > { %16760 = vmatmul.mubr.msk.bf16.gmra.mrb[12].mxu0 %vm730_vm2, %v1209_v27  ;;  %v1650_v27 = vsel %vm1192_vm3, %v1647_v18, %v1649_v25  ;;  %v20110_v18 = vld [vmem:[%s22878_s1 + $0xc] sm:$0x3]  ;;  %v2130_v25 = vshll.u32 %v20105_v17, 16 }
  0xd2   : > { %16763 = vmatprep.mubr.msk.bf16.mxu0 %vm730_vm2, %v1211_v28  ;;  %v19189_v28 = vld [vmem:[%s19759_s20 + $0x78] sm:$0xff]  }
  0xd3   : > { %v1653_v31 = vrot.slane %v19189_v28, 1  ;;  %v2123_v28 = vrot.slane %v2121_v20, 2 }
  0xd5   : > { %v1654_v37 = vsel %vm1192_vm3, %v1651_v26, %v1653_v31  ;;  %v1656_v41 = vsel %vm1192_vm3, %v1653_v31, %v1655_v32  ;;  %v2129_v31 = vrot.slane %v2127_v22, 1 }
  0xd9   : > { %16764 = vmatmul.mubr.msk.bf16.gmra.mrb[16].mxu0 %vm730_vm2, %v1213_v34  ;;  %v1931_v34 = vld [vmem:[%s19759_s20 + $0x8] sm:$0xe] }
  0xda   : > { %16767 = vmatprep.mubr.msk.bf16.mxu0 %vm730_vm2, %v1215_v36  ;;  %v20056_v36 = vld [vmem:[%s19759_s20 + $0xc] sm:$0xf] }
  0xe1   : > { %16768 = vmatmul.mubr.msk.bf16.gmra.mrb[20].mxu0 %vm730_vm2, %v1217_v43  ;;  %v14938_v43 = vcombine.low %v1931_v34, %v20056_v36  ;;  %v20126_v34 = vld [vmem:[%s19759_s20 + $0x50] sm:$0xff]  }
  0xe2   : > { %16771 = vmatprep.mubr.msk.bf16.mxu0 %vm730_vm2, %v1219_v45  ;;  %v20064_v45 = vld [vmem:[%s19759_s20 + $0x10] sm:$0xff]  }
  0xe3   : > { %v2065_v53 = vshrl.u32 %v14938_v43, 16  ;;  %v2076_v57 = vshll.u32 %v20064_v45, 16 }
  0xe5   : > { %v2067_v61 = vrot.slane %v2065_v53, 1  ;;  %v2078_v63 = vrot.slane %v2076_v57, 2 }
  0xe9   : > { %16772 = vmatmul.mubr.msk.bf16.gmra.mrb[24].mxu0 %vm730_vm2, %v1221_v54  ;;  %v2068_v54 = vshll.u32 %v14938_v43, 16  ;;  %v2145_v43 = vshrl.u32 %v20126_v34, 16 }
  0xea   : > { %16775 = vmatprep.mubr.msk.bf16.mxu0 %vm730_vm2, %v1223_v56  ;;  %v2073_v56 = vshrl.u32 %v20064_v45, 16 }
  0xeb   : > { %v2070_v24 = vrot.slane %v2068_v54, 2 }
  0xec   : > { %v2075_v62 = vrot.slane %v2073_v56, 1  ;;  %v20136_v56 = vld [vmem:[%s19759_s20 + $0x58] sm:$0xff]  }
  0xed   : > { %v2071_v44 = vor.u32 %v2070_v24, %v2067_v61  ;;  %v20140_v61 = vld [vmem:[%s19759_s20 + $0x60] sm:$0xff]  }
  0xee   : > { %v2079_v3 = vor.u32 %v2078_v63, %v2075_v62  ;;  %v2154_v62 = vshrl.u32 %v20136_v56, 16  ;;  %v2157_v63 = vshll.u32 %v20136_v56, 16 }
  0xf0   : > { %v2080_v33 = vsel %vm2063_vm4, %v2071_v44, %v2079_v3  ;;  %v2166_v44 = vshll.u32 %v20140_v61, 16 }
  0xf1   : > { %16776 = vmatmul.mubr.msk.bf16.gmra.mrb[28].mxu0 %vm730_vm2, %v1225_v59  ;;  %v1660_v59 = vsel %vm1192_vm3, %v1657_v48, %v1659_v51 }
  0xf2   : > { %16779 = vmatprep.mubr.msk.bf16.mxu0 %vm730_vm2, %v1227_v60  ;;  %v20073_v60 = vld [vmem:[%s19759_s20 + $0x18] sm:$0xff]  }
  0xf3   : > { %v2085_v42 = vshll.u32 %v20073_v60, 16 }
  0xf9   : > { %16780 = vmatmul.mubr.msk.bf16.gmra.mrb[32].mxu0 %vm730_vm2, %v1226_v58  ;;  %v1658_v58 = vsel %vm1192_vm3, %v1655_v32, %v1657_v48  ;;  %v2132_v32 = vrot.slane %v2130_v25, 2  ;;  %v2148_v48 = vshll.u32 %v20126_v34, 16 }
  0xfa   : > { %16785 = vmatprep.mubr.msk.bf16.mxu0 %vm730_vm2, %v1628_v1  ;;  %v2082_v1 = vshrl.u32 %v20073_v60, 16 }
 0x101   : > { %16786 = vmatmul.mubr.msk.bf16.vlgmr.msra.gmra.mrb[0].mxu0 %vm730_vm2, %v1630_v8  ;;  %v2091_v8 = vshrl.u32 %v20076_v0, 16 }
 0x102   : > { %16822 = vmatpush3.bf16.msra.mxu0 %v2285_v10  ;;  %16789 = vmatprep.mubr.msk.bf16.mxu0 %vm730_vm2, %v1632_v5  ;;  %v2084_v10 = vrot.slane %v2082_v1, 1  ;;  %v2087_v5 = vrot.slane %v2085_v42, 2  ;;  %v2163_v42 = vshrl.u32 %v20140_v61, 16 }
 0x103   : > { %19106 = vmatprep.subr.msk.bf16.mxu0 %vm22871_vm0, %v20018_v23  ;;  %v2093_v35 = vrot.slane %v2091_v8, 1  ;;  %v2156_v8 = vrot.slane %v2154_v62, 1 }
 0x109   : > { %16790 = vmatmul.mubr.msk.bf16.gmra.mrb[4].mxu0 %vm730_vm2, %v1634_v39  ;;  %v2096_v39 = vrot.slane %v2094_v9, 2  ;;  %v2159_v9 = vrot.slane %v2157_v63, 2 }
 0x10a   : > { %16793 = vmatprep.mubr.msk.bf16.mxu0 %vm730_vm2, %v1636_v4  ;;  %v2088_v4 = vor.u32 %v2087_v5, %v2084_v10  ;;  %v20150_v10 = vld [vmem:[%s19759_s20 + $0x68] sm:$0xff]  }
 0x10b   : > { %v2097_v50 = vor.u32 %v2096_v39, %v2093_v35  ;;  %v2168_v35 = vrot.slane %v2166_v44, 2  ;;  %v20154_v39 = vld [vmem:[%s19759_s20 + $0x70] sm:$0xff]   ;;  %v2172_v47 = vshrl.u32 %v20150_v10, 16  ;;  %v2175_v49 = vshll.u32 %v20150_v10, 16 }
 0x10c   : > { %v2184_v52 = vshll.u32 %v20154_v39, 16 }
 0x10d   : > { %v2098_v12 = vsel %vm2063_vm4, %v2088_v4, %v2097_v50 }
 0x111   : > { %16794 = vmatmul.mubr.msk.bf16.gmra.mrb[8].mxu0 %vm730_vm2, %v1638_v6  ;;  %v2109_v6 = vshrl.u32 %v20089_v46, 16 }
 0x112   : > { %16797 = vmatprep.mubr.msk.bf16.mxu0 %vm730_vm2, %v1640_v55  ;;  %v2089_v55 = vsel %vm2063_vm4, %v2079_v3, %v2088_v4  ;;  %v2160_v4 = vor.u32 %v2159_v9, %v2156_v8 }
 0x119   : > { %16798 = vmatmul.mubr.msk.bf16.gmra.mrb[12].mxu0 %vm730_vm2, %v1642_v11  ;;  %v2599_v11 = vsel %vm22871_vm0, %v20018_v23, 0  ;;  %v2118_v23 = vshrl.u32 %v20099_v13, 16 }
 0x11a   : > { %16801 = vmatprep.mubr.msk.bf16.mxu0 %vm730_vm2, %v1644_v14  ;;  %v2111_v14 = vrot.slane %v2109_v6, 1  ;;  %v2181_v6 = vshrl.u32 %v20154_v39, 16 }
 0x121   : > { %16802 = vmatmul.mubr.msk.bf16.gmra.mrb[16].mxu0 %vm730_vm2, %v1646_v19  ;;  %v2106_v19 = vor.u32 %v2105_v7, %v2102_v2  ;;  %v2174_v2 = vrot.slane %v2172_v47, 1  ;;  %v2177_v7 = vrot.slane %v2175_v49, 2  ;;  %v2508_v47 = vrot.slane %v20064_v45, 2 }
 0x122   : > { %16805 = vmatprep.mubr.msk.bf16.mxu0 %vm730_vm2, %v1648_v21  ;;  %v2115_v21 = vor.u32 %v2114_v16, %v2111_v14  ;;  %v2183_v14 = vrot.slane %v2181_v6, 1  ;;  %v2186_v16 = vrot.slane %v2184_v52, 2  ;;  %v2510_v6 = vrot.slane %v20073_v60, 2 }
 0x123   : > { %v2107_v26 = vsel %vm2063_vm4, %v2097_v50, %v2106_v19  ;;  %v2514_v60 = vrot.slane %v20085_v15, 2 }
 0x124   : > { %v2116_v30 = vsel %vm2063_vm4, %v2106_v19, %v2115_v21  ;;  %v20168_v19 = vld [vmem:[%s19759_s20 + $0x80] sm:$0xff]   ;;  %v2187_v22 = vor.u32 %v2186_v16, %v2183_v14  ;;  %v2511_v52 = vsel %vm2506_vm5, %v2508_v47, %v2510_v6  ;;  %v2520_v14 = vrot.slane %v20105_v17, 2 }
 0x125   : > { %v2199_v25 = vshrl.u32 %v20168_v19, 16  ;;  %v2528_v17 = vrot.slane %v20140_v61, 2 }
 0x129   : > { %16806 = vmatmul.mubr.msk.bf16.gmra.mrb[20].mxu0 %vm730_vm2, %v1650_v27  ;;  %v2120_v27 = vrot.slane %v2118_v23, 1  ;;  %v2178_v23 = vor.u32 %v2177_v7, %v2174_v2  ;;  %v20218_v2 = vld [vmem:[%s22878_s1 + $0xe] sm:$0x3] }
 0x12a   : > { %16809 = vmatprep.mubr.msk.bf16.mxu0 %vm730_vm2, %v1652_v29  ;;  %v20122_v29 = vld [vmem:[%s19759_s20 + $0x48] sm:$0xff]  }
 0x12b   : > { %v2136_v38 = vshrl.u32 %v20122_v29, 16  ;;  %v2139_v40 = vshll.u32 %v20122_v29, 16 }
 0x12d   : > { %v2138_v53 = vrot.slane %v2136_v38, 1  ;;  %v2141_v54 = vrot.slane %v2139_v40, 2  ;;  %v20182_v40 = vld [vmem:[%s19759_s20 + $0x90] sm:$0xff]  }
 0x12f   : > { %v2142_v24 = vor.u32 %v2141_v54, %v2138_v53  ;;  %v2217_v53 = vshrl.u32 %v20182_v40, 16  ;;  %v2220_v54 = vshll.u32 %v20182_v40, 16 }
 0x131   : > { %16810 = vmatmul.mubr.msk.bf16.gmra.mrb[24].mxu0 %vm730_vm2, %v1654_v37  ;;  %v2124_v37 = vor.u32 %v2123_v28, %v2120_v27  ;;  %v2219_v62 = vrot.slane %v2217_v53, 1  ;;  %v2222_v63 = vrot.slane %v2220_v54, 2  ;;  %v20285_v54 = vld [vmem:[%s19759_s20 + $0x28] sm:$0xff]  }
 0x132   : > { %16813 = vmatprep.mubr.msk.bf16.mxu0 %vm730_vm2, %v1656_v41  ;;  %v2133_v41 = vor.u32 %v2132_v32, %v2129_v31  ;;  %v20178_v31 = vld [vmem:[%s19759_s20 + $0x88] sm:$0xff]   ;;  %v2188_v32 = vsel %vm2063_vm4, %v2178_v23, %v2187_v22 }
 0x133   : > { %v2223_v44 = vor.u32 %v2222_v63, %v2219_v62  ;;  %v3485_v62 = vsel %vm22871_vm0, %v20218_v2, 0 }
 0x134   : > { %v2134_v57 = vsel %vm2063_vm4, %v2124_v37, %v2133_v41  ;;  %v2143_v3 = vsel %vm2063_vm4, %v2133_v41, %v2142_v24 }
 0x139   : > { %16814 = vmatmul.mubr.msk.bf16.gmra.mrb[28].mxu0 %vm730_vm2, %v1658_v58  ;;  %v2147_v58 = vrot.slane %v2145_v43, 1  ;;  %v2208_v43 = vshrl.u32 %v20178_v31, 16 }
 0x13a   : > { %16817 = vmatprep.mubr.msk.bf16.mxu0 %vm730_vm2, %v1660_v59  ;;  %v2150_v59 = vrot.slane %v2148_v48, 2  ;;  %v2211_v48 = vshll.u32 %v20178_v31, 16 }
 0x13c   : > { %v2151_v1 = vor.u32 %v2150_v59, %v2147_v58  ;;  %v2210_v58 = vrot.slane %v2208_v43, 1  ;;  %v2213_v59 = vrot.slane %v2211_v48, 2 }
 0x13e   : > { %v2152_v5 = vsel %vm2063_vm4, %v2142_v24, %v2151_v1 }
 0x141   : > { %16818 = vmatmul.mubr.msk.bf16.gmra.mrb[32].mxu0 %vm730_vm2, %v1659_v51  ;;  %v2125_v51 = vsel %vm2063_vm4, %v2115_v21, %v2124_v37  ;;  %v2201_v37 = vrot.slane %v2199_v25, 1 }
 0x142   : > { %16823 = vmatprep.mubr.msk.bf16.mxu0 %vm730_vm2, %v2080_v33  ;;  %v2165_v33 = vrot.slane %v2163_v42, 1  ;;  %v20195_v42 = vld [vmem:[%s19759_s20 + $0x98] ss:$0 sps:$4 sm:$0x11]  }
 0x143   : > { %v2226_v9 = vshll.u32 %v20195_v42, 16 }
 0x144   : > { %v2169_v50 = vor.u32 %v2168_v35, %v2165_v33 }
 0x145   : > { %v2228_v35 = vrot.slane %v2226_v9, 2  ;;  %v20314_v9 = vld [vmem:[%s19759_s20 + $0x40] sm:$0xff]  }
 0x146   : > { %v2179_v27 = vsel %vm2063_vm4, %v2169_v50, %v2178_v23  ;;  %v2524_v23 = vrot.slane %v20126_v34, 2  ;;  %v2532_v34 = vrot.slane %v20154_v39, 2  ;;  %v2540_v39 = vrot.slane %v20182_v40, 2 }
 0x147   : > { %v2229_v49 = vsel %vm2063_vm4, %v2223_v44, %v2228_v35  ;;  %v2957_v35 = vrot.slane %v20314_v9, 2 }
 0x149   : > { %16824 = vmatmul.mubr.msk.bf16.vlgmr.msra.gmra.mrb[0].mxu0 %vm730_vm2, %v2089_v55  ;;  %v2161_v55 = vsel %vm2063_vm4, %v2151_v1, %v2160_v4  ;;  %v2214_v1 = vor.u32 %v2213_v59, %v2210_v58  ;;  %v2951_v58 = vrot.slane %v20285_v54, 2 }
 0x14a   : > { %16860 = vmatpush3.bf16.msra.mxu0 %v2599_v11  ;;  %16827 = vmatprep.mubr.msk.bf16.mxu0 %vm730_vm2, %v2098_v12  ;;  %v20164_v11 = vld [vmem:[%s19759_s20 + $0x78] sm:$0xff]   ;;  %v2170_v12 = vsel %vm2063_vm4, %v2160_v4, %v2169_v50 }
 0x14b   : > { %19107 = vmatprep.subr.msk.bf16.mxu0 %vm22871_vm0, %v20110_v18  ;;  %v2190_v20 = vshrl.u32 %v20164_v11, 16  ;;  %v2193_v21 = vshll.u32 %v20164_v11, 16  ;;  %v2534_v61 = vrot.slane %v20164_v11, 2 }
 0x14d   : > { %v2192_v28 = vrot.slane %v2190_v20, 1 }
 0x151   : > { %16828 = vmatmul.mubr.msk.bf16.gmra.mrb[4].mxu0 %vm730_vm2, %v2107_v26  ;;  %v2202_v26 = vshll.u32 %v20168_v19, 16 }
 0x152   : > { %16831 = vmatprep.mubr.msk.bf16.mxu0 %vm730_vm2, %v2116_v30  ;;  %v2195_v30 = vrot.slane %v2193_v21, 2 }
 0x153   : > { %v2204_v38 = vrot.slane %v2202_v26, 2 }
 0x154   : > { %v2196_v41 = vor.u32 %v2195_v30, %v2192_v28  ;;  %v2535_v28 = vsel %vm2506_vm5, %v2532_v34, %v2534_v61 }
 0x159   : > { %16832 = vmatmul.mubr.msk.bf16.gmra.mrb[8].mxu0 %vm730_vm2, %v2125_v51  ;;  %v2205_v51 = vor.u32 %v2204_v38, %v2201_v37  ;;  %v20264_v37 = vld [vmem:[%s19759_s20 + $0x14] sm:$0xf] }
 0x15a   : > { %16835 = vmatprep.mubr.msk.bf16.mxu0 %vm730_vm2, %v2134_v57  ;;  %v2197_v57 = vsel %vm2063_vm4, %v2187_v22, %v2196_v41 }
 0x15b   : > { %v2206_v24 = vsel %vm2063_vm4, %v2196_v41, %v2205_v51  ;;  %v2215_v8 = vsel %vm2063_vm4, %v2205_v51, %v2214_v1  ;;  %v20272_v41 = vld [vmem:[%s19759_s20 + $0x18] sm:$0xff]   ;;  %v20281_v51 = vld [vmem:[%s19759_s20 + $0x20] sm:$0xff]  }
 0x15c   : > { %v2947_v43 = vrot.slane %v20272_v41, 2 }
 0x161   : > { %16836 = vmatmul.mubr.msk.bf16.gmra.mrb[12].mxu0 %vm730_vm2, %v2143_v3  ;;  %v2500_v3 = vld [vmem:[%s19759_s20 + $0x8] sm:$0xc] }
 0x162   : > { %16839 = vmatprep.mubr.msk.bf16.mxu0 %vm730_vm2, %v2152_v5  ;;  %v2224_v5 = vsel %vm2063_vm4, %v2214_v1, %v2223_v44  ;;  %v14976_v33 = vcombine.low %v2500_v3, %v20056_v36  ;;  %v2512_v36 = vrot.slane %v20076_v0, 2  ;;  %v2516_v0 = vrot.slane %v20089_v46, 2  ;;  %v20299_v1 = vld [vmem:[%s19759_s20 + $0x38] sm:$0xff]  }
 0x163   : > { %v2522_v46 = vrot.slane %v20122_v29, 2  ;;  %v2530_v29 = vrot.slane %v20150_v10, 2  ;;  %v2538_v10 = vrot.slane %v20178_v31, 2  ;;  %v2542_v31 = vrot.slane %v20195_v42, 2  ;;  %v20304_v42 = vld [vmem:[%s22878_s1 + $0x10] sm:$0x3] }
 0x164   : > { %v2507_v4 = vrot.slane %v14976_v33, 2  ;;  %v2513_v45 = vsel %vm2506_vm5, %v2510_v6, %v2512_v36  ;;  %v2517_v7 = vsel %vm2506_vm5, %v2514_v60, %v2516_v0  ;;  %v2955_v3 = vrot.slane %v20299_v1, 2  ;;  %v20318_v33 = vld [vmem:[%s19759_s20 + $0x48] sm:$0xff]   ;;  %v20330_v6 = vld [vmem:[%s19759_s20 + $0x58] sm:$0xff]  }
 0x165   : > { %v2523_v20 = vsel %vm2506_vm5, %v2520_v14, %v2522_v46  ;;  %v2525_v21 = vsel %vm2506_vm5, %v2522_v46, %v2524_v23  ;;  %v2531_v26 = vsel %vm2506_vm5, %v2528_v17, %v2530_v29  ;;  %v2543_v48 = vsel %vm2506_vm5, %v2540_v39, %v2542_v31 }
 0x166   : > { %v2509_v50 = vsel %vm2506_vm5, %v2507_v4, %v2508_v47  ;;  %v2959_v4 = vrot.slane %v20318_v33, 2  ;;  %v2958_v47 = vsel %vm2506_vm5, %v2955_v3, %v2957_v35 }
 0x169   : > { %16840 = vmatmul.mubr.msk.bf16.gmra.mrb[16].mxu0 %vm730_vm2, %v2161_v55  ;;  %v3038_v55 = vsel %vm22871_vm0, %v20110_v18, 0  ;;  %v2515_v18 = vsel %vm2506_vm5, %v2512_v36, %v2514_v60  ;;  %v20342_v60 = vld [vmem:[%s19759_s20 + $0x68] sm:$0xff]  }
 0x16a   : > { %16843 = vmatprep.mubr.msk.bf16.mxu0 %vm730_vm2, %v2170_v12  ;;  %v2518_v12 = vrot.slane %v20099_v13, 2  ;;  %v2526_v13 = vrot.slane %v20136_v56, 2  ;;  %v2533_v56 = vsel %vm2506_vm5, %v2530_v29, %v2532_v34  ;;  %v20374_v29 = vld [vmem:[%s19759_s20 + $0x90] sm:$0xff]   ;;  %v20377_v34 = vld [vmem:[%s19759_s20 + $0x98] sm:$0xff]  }
 0x16c   : > { %v2519_v16 = vsel %vm2506_vm5, %v2516_v0, %v2518_v12  ;;  %v2521_v15 = vsel %vm2506_vm5, %v2518_v12, %v2520_v14  ;;  %v2527_v22 = vsel %vm2506_vm5, %v2524_v23, %v2526_v13  ;;  %v2529_v25 = vsel %vm2506_vm5, %v2526_v13, %v2528_v17  ;;  %v20350_v12 = vld [vmem:[%s19759_s20 + $0x70] sm:$0xff]   ;;  %v20366_v13 = vld [vmem:[%s19759_s20 + $0x88] sm:$0xff]  }
 0x171   : > { %16844 = vmatmul.mubr.msk.bf16.gmra.mrb[20].mxu0 %vm730_vm2, %v2179_v27  ;;  %v2536_v27 = vrot.slane %v20168_v19, 2  ;;  %v2541_v19 = vsel %vm2506_vm5, %v2538_v10, %v2540_v39 }
 0x172   : > { %16847 = vmatprep.mubr.msk.bf16.mxu0 %vm730_vm2, %v2188_v32  ;;  %v2814_v32 = vld [vmem:[%s19759_s20 + $0x10] sm:$0xc] }
 0x173   : > { %v2537_v30 = vsel %vm2506_vm5, %v2534_v61, %v2536_v27  ;;  %v2539_v11 = vsel %vm2506_vm5, %v2536_v27, %v2538_v10  ;;  %v20269_v38 = vcombine.low %v2814_v32, %v20264_v37  ;;  %v2979_v61 = vrot.slane %v20377_v34, 2 }
 0x174   : > { %v3272_v10 = vshll.u32 %v20272_v41, 16 }
 0x175   : > { %v2946_v40 = vrot.slane %v20269_v38, 2  ;;  %v3261_v27 = vshrl.u32 %v20269_v38, 16 }
 0x177   : > { %v2948_v53 = vsel %vm2506_vm5, %v2946_v40, %v2947_v43 }
 0x179   : > { %16848 = vmatmul.mubr.msk.bf16.gmra.mrb[24].mxu0 %vm730_vm2, %v2197_v57  ;;  %v2949_v57 = vrot.slane %v20281_v51, 2 }
 0x17a   : > { %16851 = vmatprep.mubr.msk.bf16.mxu0 %vm730_vm2, %v2206_v24  ;;  %v20293_v24 = vld [vmem:[%s19759_s20 + $0x30] sm:$0xff]  }
 0x17b   : > { %v2950_v59 = vsel %vm2506_vm5, %v2947_v43, %v2949_v57  ;;  %v2952_v63 = vsel %vm2506_vm5, %v2949_v57, %v2951_v58  ;;  %v2953_v44 = vrot.slane %v20293_v24, 2  ;;  %v3274_v43 = vrot.slane %v3272_v10, 3 }
 0x181   : > { %16852 = vmatmul.mubr.msk.bf16.gmra.mrb[28].mxu0 %vm730_vm2, %v2215_v8  ;;  %v2954_v8 = vsel %vm2506_vm5, %v2951_v58, %v2953_v44 }
 0x182   : > { %16855 = vmatprep.mubr.msk.bf16.mxu0 %vm730_vm2, %v2224_v5  ;;  %v2956_v5 = vsel %vm2506_vm5, %v2953_v44, %v2955_v3 }
 0x189   : > { %16856 = vmatmul.mubr.msk.bf16.gmra.mrb[32].mxu0 %vm730_vm2, %v2229_v49  ;;  %v20326_v49 = vld [vmem:[%s19759_s20 + $0x50] sm:$0xff]  }
 0x18a   : > { %16861 = vmatprep.mubr.msk.bf16.mxu0 %vm730_vm2, %v2509_v50  ;;  %v2960_v50 = vsel %vm2506_vm5, %v2957_v35, %v2959_v4  ;;  %v2961_v36 = vrot.slane %v20326_v49, 2 }
 0x191   : > { %16862 = vmatmul.mubr.msk.bf16.vlgmr.msra.gmra.mrb[0].mxu0 %vm730_vm2, %v2511_v52  ;;  %v2963_v52 = vrot.slane %v20330_v6, 2 }
 0x192   : > { %16898 = vmatpush3.bf16.msra.mxu0 %v3038_v55  ;;  %16865 = vmatprep.mubr.msk.bf16.mxu0 %vm730_vm2, %v2513_v45  ;;  %v2962_v55 = vsel %vm2506_vm5, %v2959_v4, %v2961_v36  ;;  %v20338_v45 = vld [vmem:[%s19759_s20 + $0x60] sm:$0xff]  }
 0x193   : > { %19108 = vmatprep.subr.msk.bf16.mxu0 %vm22871_vm0, %v20218_v2  ;;  %v2964_v2 = vsel %vm2506_vm5, %v2961_v36, %v2963_v52  ;;  %v2965_v0 = vrot.slane %v20338_v45, 2 }
 0x199   : > { %16866 = vmatmul.mubr.msk.bf16.gmra.mrb[4].mxu0 %vm730_vm2, %v2515_v18  ;;  %v2967_v18 = vrot.slane %v20342_v60, 2 }
 0x19a   : > { %16869 = vmatprep.mubr.msk.bf16.mxu0 %vm730_vm2, %v2517_v7  ;;  %v2966_v7 = vsel %vm2506_vm5, %v2963_v52, %v2965_v0  ;;  %v3305_v52 = vshrl.u32 %v20299_v1, 16 }
 0x19b   : > { %v2968_v14 = vsel %vm2506_vm5, %v2965_v0, %v2967_v18 }
 0x1a1   : > { %16870 = vmatmul.mubr.msk.bf16.gmra.mrb[8].mxu0 %vm730_vm2, %v2519_v16  ;;  %v20354_v16 = vld [vmem:[%s19759_s20 + $0x78] sm:$0xff]  }
 0x1a2   : > { %16873 = vmatprep.mubr.msk.bf16.mxu0 %vm730_vm2, %v2521_v15  ;;  %v2969_v15 = vrot.slane %v20350_v12, 2  ;;  %v2971_v46 = vrot.slane %v20354_v16, 2 }
 0x1a4   : > { %v2970_v23 = vsel %vm2506_vm5, %v2967_v18, %v2969_v15 }
 0x1a9   : > { %16874 = vmatmul.mubr.msk.bf16.gmra.mrb[12].mxu0 %vm730_vm2, %v2523_v20  ;;  %v20362_v20 = vld [vmem:[%s19759_s20 + $0x80] sm:$0xff]  }
 0x1aa   : > { %16877 = vmatprep.mubr.msk.bf16.mxu0 %vm730_vm2, %v2525_v21  ;;  %v2972_v21 = vsel %vm2506_vm5, %v2969_v15, %v2971_v46  ;;  %v2973_v17 = vrot.slane %v20362_v20, 2  ;;  %v3307_v15 = vrot.slane %v3305_v52, 2  ;;  %v3368_v52 = vshrl.u32 %v20350_v12, 16 }
 0x1b1   : > { %16878 = vmatmul.mubr.msk.bf16.gmra.mrb[16].mxu0 %vm730_vm2, %v2527_v22  ;;  %v2975_v22 = vrot.slane %v20366_v13, 2 }
 0x1b2   : > { %16881 = vmatprep.mubr.msk.bf16.mxu0 %vm730_vm2, %v2529_v25  ;;  %v2974_v25 = vsel %vm2506_vm5, %v2971_v46, %v2973_v17 }
 0x1b9   : > { %16882 = vmatmul.mubr.msk.bf16.gmra.mrb[20].mxu0 %vm730_vm2, %v2531_v26  ;;  %v2976_v26 = vsel %vm2506_vm5, %v2973_v17, %v2975_v22  ;;  %v3317_v17 = vshll.u32 %v20314_v9, 16 }
 0x1ba   : > { %16885 = vmatprep.mubr.msk.bf16.mxu0 %vm730_vm2, %v2533_v56  ;;  %v2977_v56 = vrot.slane %v20374_v29, 2 }
 0x1bc   : > { %v2978_v39 = vsel %vm2506_vm5, %v2975_v22, %v2977_v56  ;;  %v2980_v32 = vsel %vm2506_vm5, %v2977_v56, %v2979_v61 }
 0x1c1   : > { %16886 = vmatmul.mubr.msk.bf16.gmra.mrb[24].mxu0 %vm730_vm2, %v2535_v28  ;;  %v3264_v28 = vshll.u32 %v20269_v38, 16  ;;  %v3278_v38 = vshrl.u32 %v20281_v51, 16 }
 0x1c2   : > { %16889 = vmatprep.mubr.msk.bf16.mxu0 %vm730_vm2, %v2537_v30  ;;  %v3269_v30 = vshrl.u32 %v20272_v41, 16 }
 0x1c3   : > { %v3266_v31 = vrot.slane %v3264_v28, 3  ;;  %v3280_v44 = vrot.slane %v3278_v38, 2 }
 0x1c4   : > { %v3271_v40 = vrot.slane %v3269_v30, 2 }
 0x1c6   : > { %v3275_v58 = vor.u32 %v3274_v43, %v3271_v40 }
 0x1c9   : > { %16890 = vmatmul.mubr.msk.bf16.gmra.mrb[28].mxu0 %vm730_vm2, %v2539_v11  ;;  %v19231_v11 = vld [vmem:[%s19759_s20 + $0xa0] ss:$0 sps:$4 sm:$0x11]  }
 0x1ca   : > { %16893 = vmatprep.mubr.msk.bf16.mxu0 %vm730_vm2, %v2541_v19  ;;  %v3263_v19 = vrot.slane %v3261_v27, 2 }
 0x1cc   : > { %v3267_v57 = vor.u32 %v3266_v31, %v3263_v19  ;;  %v3341_v19 = vshrl.u32 %v20330_v6, 16  ;;  %v3344_v31 = vshll.u32 %v20330_v6, 16 }
 0x1d1   : > { %16894 = vmatmul.mubr.msk.bf16.gmra.mrb[32].mxu0 %vm730_vm2, %v2543_v48  ;;  %v2981_v48 = vrot.slane %v19231_v11, 2 }
 0x1d2   : > { %16899 = vmatprep.mubr.msk.bf16.mxu0 %vm730_vm2, %v2948_v53  ;;  %v3281_v53 = vshll.u32 %v20281_v51, 16 }
 0x1d4   : > { %v3283_v3 = vrot.slane %v3281_v53, 3  ;;  %v3343_v53 = vrot.slane %v3341_v19, 2  ;;  %v3407_v19 = vshll.u32 %v20374_v29, 16 }
 0x1d6   : > { %v3284_v4 = vor.u32 %v3283_v3, %v3280_v44  ;;  %v3359_v44 = vshrl.u32 %v20342_v60, 16  ;;  %v3362_v3 = vshll.u32 %v20342_v60, 16 }
 0x1d9   : > { %16900 = vmatmul.mubr.msk.bf16.vlgmr.msra.gmra.mrb[0].mxu0 %vm730_vm2, %v2950_v59  ;;  %v3287_v59 = vshrl.u32 %v20285_v54, 16 }
 0x1da   : > { %16936 = vmatpush3.bf16.msra.mxu0 %v3485_v62  ;;  %16903 = vmatprep.mubr.msk.bf16.mxu0 %vm730_vm2, %v2952_v63  ;;  %v3290_v62 = vshll.u32 %v20285_v54, 16  ;;  %v2982_v63 = vsel %vm2506_vm5, %v2979_v61, %v2981_v48  ;;  %v3319_v61 = vrot.slane %v3317_v17, 3 }
 0x1db   : > { %19109 = vmatprep.subr.msk.bf16.mxu0 %vm22871_vm0, %v20304_v42 }
 0x1dc   : > { %v3292_v35 = vrot.slane %v3290_v62, 3  ;;  %v3353_v62 = vshll.u32 %v20338_v45, 16 }
 0x1e1   : > { %16904 = vmatmul.mubr.msk.bf16.gmra.mrb[4].mxu0 %vm730_vm2, %v2954_v8  ;;  %v3276_v8 = vsel %vm3259_vm6, %v3267_v57, %v3275_v58  ;;  %v3346_v57 = vrot.slane %v3344_v31, 3 }
 0x1e2   : > { %16907 = vmatprep.mubr.msk.bf16.mxu0 %vm730_vm2, %v2956_v5  ;;  %v3289_v5 = vrot.slane %v3287_v59, 2  ;;  %v3350_v59 = vshrl.u32 %v20338_v45, 16 }
 0x1e4   : > { %v3293_v36 = vor.u32 %v3292_v35, %v3289_v5  ;;  %v3352_v5 = vrot.slane %v3350_v59, 2  ;;  %v3355_v35 = vrot.slane %v3353_v62, 3 }
 0x1e9   : > { %16908 = vmatmul.mubr.msk.bf16.gmra.mrb[8].mxu0 %vm730_vm2, %v2958_v47  ;;  %v3296_v47 = vshrl.u32 %v20293_v24, 16 }
 0x1ea   : > { %16911 = vmatprep.mubr.msk.bf16.mxu0 %vm730_vm2, %v2960_v50  ;;  %v3299_v50 = vshll.u32 %v20293_v24, 16 }
 0x1eb   : > { %v3298_v0 = vrot.slane %v3296_v47, 2  ;;  %v3361_v47 = vrot.slane %v3359_v44, 2 }
 0x1ec   : > { %v3301_v18 = vrot.slane %v3299_v50, 3  ;;  %v3364_v50 = vrot.slane %v3362_v3, 3 }
 0x1f1   : > { %16912 = vmatmul.mubr.msk.bf16.gmra.mrb[12].mxu0 %vm730_vm2, %v2962_v55  ;;  %v3308_v55 = vshll.u32 %v20299_v1, 16 }
 0x1f2   : > { %16915 = vmatprep.mubr.msk.bf16.mxu0 %vm730_vm2, %v2964_v2  ;;  %v3285_v2 = vsel %vm3259_vm6, %v3275_v58, %v3284_v4 }
 0x1f3   : > { %v3310_v46 = vrot.slane %v3308_v55, 3  ;;  %v3371_v55 = vshll.u32 %v20350_v12, 16 }
 0x1f5   : > { %v3311_v22 = vor.u32 %v3310_v46, %v3307_v15  ;;  %v3373_v15 = vrot.slane %v3371_v55, 3 }
 0x1f9   : > { %16916 = vmatmul.mubr.msk.bf16.gmra.mrb[16].mxu0 %vm730_vm2, %v2966_v7  ;;  %v3799_v7 = vsel %vm22871_vm0, %v20304_v42, 0  ;;  %vm11299_vm0 = vsmask.f32 7440 }
 0x1fa   : > { %16919 = vmatprep.mubr.msk.bf16.mxu0 %vm730_vm2, %v2968_v14  ;;  %v3294_v14 = vsel %vm3259_vm6, %v3284_v4, %v3293_v36 }
 0x201   : > { %16920 = vmatmul.mubr.msk.bf16.gmra.mrb[20].mxu0 %vm730_vm2, %v2970_v23  ;;  %v3302_v23 = vor.u32 %v3301_v18, %v3298_v0  ;;  %v3377_v0 = vshrl.u32 %v20354_v16, 16  ;;  %v3380_v18 = vshll.u32 %v20354_v16, 16 }
 0x202   : > { %16923 = vmatprep.mubr.msk.bf16.mxu0 %vm730_vm2, %v2972_v21  ;;  %v3314_v21 = vshrl.u32 %v20314_v9, 16 }
 0x203   : > { %v3303_v42 = vsel %vm3259_vm6, %v3293_v36, %v3302_v23  ;;  %v3312_v27 = vsel %vm3259_vm6, %v3302_v23, %v3311_v22  ;;  %v3356_v36 = vor.u32 %v3355_v35, %v3352_v5  ;;  %v3379_v23 = vrot.slane %v3377_v0, 2  ;;  %v3700_v5 = vld [vmem:[%s19759_s20 + $0x10] sm:$0x8] }
 0x204   : > { %v3316_v56 = vrot.slane %v3314_v21, 2  ;;  %v3382_v21 = vrot.slane %v3380_v18, 3 }
 0x206   : > { %v3320_v10 = vor.u32 %v3319_v61, %v3316_v56  ;;  %v3398_v56 = vshll.u32 %v20366_v13, 16 }
 0x208   : > { %v3321_v40 = vsel %vm3259_vm6, %v3311_v22, %v3320_v10  ;;  %v3386_v22 = vshrl.u32 %v20362_v20, 16 }
 0x209   : > { %16924 = vmatmul.mubr.msk.bf16.gmra.mrb[24].mxu0 %vm730_vm2, %v2974_v25  ;;  %v3323_v25 = vshrl.u32 %v20318_v33, 16 }
 0x20a   : > { %16927 = vmatprep.mubr.msk.bf16.mxu0 %vm730_vm2, %v2976_v26  ;;  %v3326_v26 = vshll.u32 %v20318_v33, 16 }
 0x20b   : > { %v3325_v28 = vrot.slane %v3323_v25, 2  ;;  %v3389_v25 = vshll.u32 %v20362_v20, 16 }
 0x20c   : > { %v3328_v30 = vrot.slane %v3326_v26, 3  ;;  %v3383_v26 = vor.u32 %v3382_v21, %v3379_v23 }
 0x20e   : > { %v3329_v11 = vor.u32 %v3328_v30, %v3325_v28  ;;  %v3391_v28 = vrot.slane %v3389_v25, 3 }
 0x210   : > { %v3330_v38 = vsel %vm3259_vm6, %v3320_v10, %v3329_v11 }
 0x211   : > { %16928 = vmatmul.mubr.msk.bf16.gmra.mrb[28].mxu0 %vm730_vm2, %v2978_v39  ;;  %v3332_v39 = vshrl.u32 %v20326_v49, 16 }
 0x212   : > { %16931 = vmatprep.mubr.msk.bf16.mxu0 %vm730_vm2, %v2980_v32  ;;  %v3335_v32 = vshll.u32 %v20326_v49, 16 }
 0x213   : > { %v3334_v43 = vrot.slane %v3332_v39, 2  ;;  %v3400_v39 = vrot.slane %v3398_v56, 3 }
 0x214   : > { %v3337_v48 = vrot.slane %v3335_v32, 3 }
 0x216   : > { %v3338_v58 = vor.u32 %v3337_v48, %v3334_v43  ;;  %v3416_v43 = vshll.u32 %v20377_v34, 16 }
 0x218   : > { %v3418_v62 = vrot.slane %v3416_v43, 3 }
 0x219   : > { %16932 = vmatmul.mubr.msk.bf16.gmra.mrb[32].mxu0 %vm730_vm2, %v2982_v63  ;;  %v3347_v63 = vor.u32 %v3346_v57, %v3343_v53  ;;  %v3409_v53 = vrot.slane %v3407_v19, 3  ;;  %v20457_v57 = vld [vmem:[%s19759_s20 + $0xa0] ss:$0 sps:$4 sm:$0x33]   ;;  %s22815_s20 = scalar_lea.hbm %s22870_s13, %s15947_s30 }
 0x21a   : > { %16937 = vmatprep.mubr.msk.bf16.mxu0 %vm730_vm2, %v3276_v8  ;;  %v3339_v8 = vsel %vm3259_vm6, %v3329_v11, %v3338_v58  ;;  %v3404_v11 = vshrl.u32 %v20374_v29, 16  ;;  %v3422_v44 = vshrl.u32 %v20457_v57, 16  ;;  %v3425_v3 = vshll.u32 %v20457_v57, 16 }
 0x21b   : > { %v3348_v4 = vsel %vm3259_vm6, %v3338_v58, %v3347_v63 }
 0x221   : > { %16938 = vmatmul.mubr.msk.bf16.vlgmr.msra.gmra.mrb[0].mxu0 %vm730_vm2, %v3285_v2  ;;  %v3365_v2 = vor.u32 %v3364_v50, %v3361_v47  ;;  %v3427_v47 = vrot.slane %v3425_v3, 3 }
 0x222   : > { %16974 = vmatpush3.bf16.msra.mxu0 %v3799_v7  ;;  %16941 = vmatprep.mubr.msk.bf16.mxu0 %vm730_vm2, %v3294_v14  ;;  %v3357_v7 = vsel %vm3259_vm6, %v3347_v63, %v3356_v36  ;;  %v3370_v14 = vrot.slane %v3368_v52, 2 }
 0x223   : > { %v3366_v46 = vsel %vm3259_vm6, %v3356_v36, %v3365_v2  ;;  %v15054_v36 = vcombine.low %v3700_v5, %v20264_v37  ;;  %v3712_v37 = vrot.slane %v20285_v54, 3  ;;  %v3720_v54 = vrot.slane %v20318_v33, 3 }
 0x224   : > { %v3374_v17 = vor.u32 %v3373_v15, %v3370_v14  ;;  %v3728_v33 = vrot.slane %v20342_v60, 3  ;;  %v3736_v60 = vrot.slane %v20366_v13, 3 }
 0x225   : > { %v3707_v55 = vrot.slane %v15054_v36, 3 }
 0x226   : > { %v3375_v61 = vsel %vm3259_vm6, %v3365_v2, %v3374_v17  ;;  %v3384_v30 = vsel %vm3259_vm6, %v3374_v17, %v3383_v26  ;;  %v3708_v2 = vrot.slane %v20272_v41, 3  ;;  %v3714_v41 = vrot.slane %v20293_v24, 3 }
 0x227   : > { %v3722_v24 = vrot.slane %v20326_v49, 3  ;;  %v3730_v49 = vrot.slane %v20350_v12, 3  ;;  %v3738_v12 = vrot.slane %v20374_v29, 3  ;;  %v19236_v29 = vld [vmem:[%s22863_s6 + $0x4] ss:$12 sps:$4 sm:$0xff]  }
 0x228   : > { %v3709_v18 = vsel %vm3706_vm7, %v3707_v55, %v3708_v2  ;;  %v3715_v23 = vsel %vm3706_vm7, %v3712_v37, %v3714_v41  ;;  %4252 = vmatprep.mubr.bf16.mxu1 %v19236_v29 }
 0x229   : > { %16942 = vmatmul.mubr.msk.bf16.gmra.mrb[4].mxu0 %vm730_vm2, %v3303_v42  ;;  %v3395_v42 = vshrl.u32 %v20366_v13, 16  ;;  %v3723_v25 = vsel %vm3706_vm7, %v3720_v54, %v3722_v24 }
 0x22a   : > { %16945 = vmatprep.mubr.msk.bf16.mxu0 %vm730_vm2, %v3312_v27  ;;  %v3388_v27 = vrot.slane %v3386_v22, 2 }
 0x22b   : > { %v3397_v10 = vrot.slane %v3395_v42, 2 }
 0x22c   : > { %v3392_v32 = vor.u32 %v3391_v28, %v3388_v27 }
 0x22d   : > { %v3401_v31 = vor.u32 %v3400_v39, %v3397_v10  ;;  %v3739_v10 = vsel %vm3706_vm7, %v3736_v60, %v3738_v12 }
 0x22e   : > { %v3393_v48 = vsel %vm3259_vm6, %v3383_v26, %v3392_v32 }
 0x22f   : > { %v3402_v58 = vsel %vm3259_vm6, %v3392_v32, %v3401_v31 }
 0x231   : > { %16946 = vmatmul.mubr.msk.bf16.gmra.mrb[8].mxu0 %vm730_vm2, %v3321_v40  ;;  %v3413_v40 = vshrl.u32 %v20377_v34, 16 }
 0x232   : > { %16949 = vmatprep.mubr.msk.bf16.mxu0 %vm730_vm2, %v3330_v38  ;;  %v3406_v38 = vrot.slane %v3404_v11, 2 }
 0x233   : > { %v3415_v59 = vrot.slane %v3413_v40, 2 }
 0x234   : > { %v3410_v63 = vor.u32 %v3409_v53, %v3406_v38 }
 0x236   : > { %v3411_v35 = vsel %vm3259_vm6, %v3401_v31, %v3410_v63 }
 0x239   : > { %16950 = vmatmul.mubr.msk.bf16.gmra.mrb[12].mxu0 %vm730_vm2, %v3339_v8  ;;  %v3419_v8 = vor.u32 %v3418_v62, %v3415_v59 }
 0x23a   : > { %16953 = vmatprep.mubr.msk.bf16.mxu0 %vm730_vm2, %v3348_v4  ;;  %v3424_v4 = vrot.slane %v3422_v44, 2 }
 0x23b   : > { %v3420_v50 = vsel %vm3259_vm6, %v3410_v63, %v3419_v8 }
 0x23c   : > { %v3428_v52 = vor.u32 %v3427_v47, %v3424_v4 }
 0x23e   : > { %v3429_v0 = vsel %vm3259_vm6, %v3419_v8, %v3428_v52 }
 0x241   : > { %16954 = vmatmul.mubr.msk.bf16.gmra.mrb[16].mxu0 %vm730_vm2, %v3357_v7  ;;  %v3710_v7 = vrot.slane %v20281_v51, 3  ;;  %v3718_v51 = vrot.slane %v20314_v9, 3  ;;  %v3726_v9 = vrot.slane %v20338_v45, 3  ;;  %v3734_v45 = vrot.slane %v20362_v20, 3 }
 0x242   : > { %16957 = vmatprep.mubr.msk.bf16.mxu0 %vm730_vm2, %v3366_v46  ;;  %v3716_v46 = vrot.slane %v20299_v1, 3  ;;  %v3724_v1 = vrot.slane %v20330_v6, 3  ;;  %v3732_v6 = vrot.slane %v20354_v16, 3  ;;  %v3740_v16 = vrot.slane %v20377_v34, 3 }
 0x243   : > { %v3711_v14 = vsel %vm3706_vm7, %v3708_v2, %v3710_v7  ;;  %v3713_v15 = vsel %vm3706_vm7, %v3710_v7, %v3712_v37  ;;  %v3721_v22 = vsel %vm3706_vm7, %v3718_v51, %v3720_v54  ;;  %v3729_v56 = vsel %vm3706_vm7, %v3726_v9, %v3728_v33 }
 0x244   : > { %v3717_v21 = vsel %vm3706_vm7, %v3714_v41, %v3716_v46  ;;  %v3719_v17 = vsel %vm3706_vm7, %v3716_v46, %v3718_v51  ;;  %v3725_v26 = vsel %vm3706_vm7, %v3722_v24, %v3724_v1  ;;  %v3727_v42 = vsel %vm3706_vm7, %v3724_v1, %v3726_v9 }
 0x245   : > { %v3733_v27 = vsel %vm3706_vm7, %v3730_v49, %v3732_v6  ;;  %v3735_v28 = vsel %vm3706_vm7, %v3732_v6, %v3734_v45  ;;  %v3741_v39 = vsel %vm3706_vm7, %v3738_v12, %v3740_v16  ;;  %v3742_v20 = vrot.slane %v20457_v57, 3 }
 0x246   : > { %v19623_v34 = vmov 0.0  }
 0x247   : > { %v3743_v13 = vsel %vm3706_vm7, %v3740_v16, %v3742_v20  ;;  %17329 = vmatprep.subr.bf16.mxu0 %v19623_v34 }
 0x249   : > { %16958 = vmatmul.mubr.msk.bf16.gmra.mrb[20].mxu0 %vm730_vm2, %v3375_v61  ;;  %v3731_v61 = vsel %vm3706_vm7, %v3728_v33, %v3730_v49 }
 0x24a   : > { %16961 = vmatprep.mubr.msk.bf16.mxu0 %vm730_vm2, %v3384_v30  ;;  %v3737_v30 = vsel %vm3706_vm7, %v3734_v45, %v3736_v60 }
 0x251   : > { %16962 = vmatmul.mubr.msk.bf16.gmra.mrb[24].mxu0 %vm730_vm2, %v3393_v48 }
 0x252   : > { %16965 = vmatprep.mubr.msk.bf16.mxu0 %vm730_vm2, %v3402_v58 }
 0x259   : > { %16966 = vmatmul.mubr.msk.bf16.gmra.mrb[28].mxu0 %vm730_vm2, %v3411_v35 }
 0x25a   : > { %16969 = vmatprep.mubr.msk.bf16.mxu0 %vm730_vm2, %v3420_v50 }
 0x261   : > { %16970 = vmatmul.mubr.msk.bf16.gmra.mrb[32].mxu0 %vm730_vm2, %v3429_v0 }
 0x262   : > { %16975 = vmatprep.mubr.msk.bf16.mxu0 %vm730_vm2, %v3709_v18 }
 0x269   : > { %16976 = vmatmul.mubr.msk.bf16.vlgmr.msra.gmra.mrb[0].mxu0 %vm730_vm2, %v3711_v14 }
 0x26a   : > { %16979 = vmatprep.mubr.msk.bf16.mxu0 %vm730_vm2, %v3713_v15 }
 0x271   : > { %16980 = vmatmul.mubr.msk.bf16.gmra.mrb[4].mxu0 %vm730_vm2, %v3715_v23 }
 0x272   : > { %16983 = vmatprep.mubr.msk.bf16.mxu0 %vm730_vm2, %v3717_v21 }
 0x279   : > { %16984 = vmatmul.mubr.msk.bf16.gmra.mrb[8].mxu0 %vm730_vm2, %v3719_v17 }
 0x27a   : > { %16987 = vmatprep.mubr.msk.bf16.mxu0 %vm730_vm2, %v3721_v22 }
 0x281   : > { %16988 = vmatmul.mubr.msk.bf16.gmra.mrb[12].mxu0 %vm730_vm2, %v3723_v25 }
 0x282   : > { %16991 = vmatprep.mubr.msk.bf16.mxu0 %vm730_vm2, %v3725_v26 }
 0x289   : > { %16992 = vmatmul.mubr.msk.bf16.gmra.mrb[16].mxu0 %vm730_vm2, %v3727_v42 }
 0x28a   : > { %16995 = vmatprep.mubr.msk.bf16.mxu0 %vm730_vm2, %v3729_v56 }
 0x291   : > { %16996 = vmatmul.mubr.msk.bf16.gmra.mrb[20].mxu0 %vm730_vm2, %v3731_v61 }
 0x292   : > { %16999 = vmatprep.mubr.msk.bf16.mxu0 %vm730_vm2, %v3733_v27 }
 0x299   : > { %17000 = vmatmul.mubr.msk.bf16.gmra.mrb[24].mxu0 %vm730_vm2, %v3735_v28 }
 0x29a   : > { %17003 = vmatprep.mubr.msk.bf16.mxu0 %vm730_vm2, %v3737_v30 }
 0x2a1   : > { %17004 = vmatmul.mubr.msk.bf16.gmra.mrb[28].mxu0 %vm730_vm2, %v3739_v10 }
 0x2a2   : > { %17007 = vmatprep.mubr.msk.bf16.mxu0 %vm730_vm2, %v3741_v39 }
 0x2a9   : > { %17008 = vmatmul.mubr.msk.bf16.gmra.mrb[32].mxu0 %vm730_vm2, %v3743_v13  ;;  %vm5872_vm2 = vsmask.f32 5392 }
 0x2aa   : > { %17331 = vmatprep.mubr.msk.bf16.mxu0 %vm19624_vm8, %v19623_v34 }
 0x33c   : > { %v16977_v32 = vpop.f32.mrb[0].mxu0 }
 0x33d   : > { %v3835_v11 = vpop.f32.mrb[1].mxu0  ;;  %v4016_v31 = vmax.f32 %v16977_v32, 0.0 }
 0x33e   : > { %v16978_v19 = vpop.f32.mrb[2].mxu0  ;;  %v4014_v48 = vmax.f32 %v3835_v11, 0.0 }
 0x33f   : > { %v4017_v40 = vmax.f32 %v16978_v19, 0.0  ;;  %v3838_v43 = vpop.f32.mrb[3].mxu0 }
 0x340   : > { %v4015_v38 = vmax.f32 %v3838_v43, 0.0 }
 0x341   : > { %v4077_v53 = vpack.c.bf16 %v4017_v40, %v4016_v31 }
 0x342   : > { %v4076_v57 = vpack.c.bf16 %v4015_v38, %v4014_v48 }
 0x344   : > { %v16981_v58 = vpop.f32.mrb[4].mxu0 }
 0x345   : > { %v3851_v59 = vpop.f32.mrb[5].mxu0  ;;  %v4020_v63 = vmax.f32 %v16981_v58, 0.0 }
 0x346   : > { %v16982_v62 = vpop.f32.mrb[6].mxu0  ;;  %v4018_v8 = vmax.f32 %v3851_v59, 0.0 }
 0x347   : > { %v4021_v44 = vmax.f32 %v16982_v62, 0.0  ;;  %v3854_v3 = vpop.f32.mrb[7].mxu0 }
 0x348   : > { %v4019_v5 = vmax.f32 %v3854_v3, 0.0 }
 0x349   : > { %v4079_v35 = vpack.c.bf16 %v4021_v44, %v4020_v63 }
 0x34a   : > { %v4078_v4 = vpack.c.bf16 %v4019_v5, %v4018_v8 }
 0x34c   : > { %v16985_v47 = vpop.f32.mrb[8].mxu0 }
 0x34d   : > { %v3867_v50 = vpop.f32.mrb[9].mxu0  ;;  %v4024_v52 = vmax.f32 %v16985_v47, 0.0 }
 0x34e   : > { %v16986_v36 = vpop.f32.mrb[10].mxu0  ;;  %v4022_v0 = vmax.f32 %v3867_v50, 0.0 }
 0x34f   : > { %v4025_v55 = vmax.f32 %v16986_v36, 0.0  ;;  %v3870_v2 = vpop.f32.mrb[11].mxu0 }
 0x350   : > { %v4023_v18 = vmax.f32 %v3870_v2, 0.0  ;;  %v19234_v2 = vld [vmem:[%s22863_s6] ss:$12 sps:$4 sm:$0xff]  }
 0x351   : > { %v4081_v7 = vpack.c.bf16 %v4025_v55, %v4024_v52 }
 0x352   : > { %v4080_v37 = vpack.c.bf16 %v4023_v18, %v4022_v0  ;;  %v19237_v18 = vld [vmem:[%s22863_s6 + $0x1c] ss:$12 sps:$4 sm:$0xff]  }
 0x354   : > { %v16989_v14 = vpop.f32.mrb[12].mxu0 }
 0x355   : > { %v3883_v15 = vpop.f32.mrb[13].mxu0  ;;  %v4028_v46 = vmax.f32 %v16989_v14, 0.0  ;;  %v19239_v14 = vld [vmem:[%s22863_s6 + $0x18] ss:$12 sps:$4 sm:$0xff]  }
 0x356   : > { %v16990_v41 = vpop.f32.mrb[14].mxu0  ;;  %v4026_v51 = vmax.f32 %v3883_v15, 0.0  ;;  %v19240_v15 = vld [vmem:[%s22863_s6 + $0x34] ss:$12 sps:$4 sm:$0xff]  }
 0x357   : > { %v4029_v23 = vmax.f32 %v16990_v41, 0.0  ;;  %v3886_v21 = vpop.f32.mrb[15].mxu0  ;;  %v19242_v41 = vld [vmem:[%s22863_s6 + $0x30] ss:$12 sps:$4 sm:$0xff]  }
 0x358   : > { %v4027_v54 = vmax.f32 %v3886_v21, 0.0  ;;  %v19246_v21 = vld [vmem:[%s22863_s6 + $0x64] ss:$12 sps:$4 sm:$0xff]  }
 0x359   : > { %v20532_v17 = vpack.c.bf16 %v4029_v23, %v4028_v46  ;;  %v19243_v46 = vld [vmem:[%s22863_s6 + $0x4c] ss:$12 sps:$4 sm:$0xff]   ;;  %v19245_v23 = vld [vmem:[%s22863_s6 + $0x48] ss:$12 sps:$4 sm:$0xff]  }
 0x35a   : > { %v4082_v22 = vpack.c.bf16 %v4027_v54, %v4026_v51  ;;  %v19248_v51 = vld [vmem:[%s22863_s6 + $0x60] ss:$12 sps:$4 sm:$0xff]   ;;  %v19249_v54 = vld [vmem:[%s22863_s6 + $0x7c] ss:$12 sps:$4 sm:$0xff]  }
 0x35c   : > { %v16993_v24 = vpop.f32.mrb[16].mxu0 }
 0x35d   : > { %v3899_v1 = vpop.f32.mrb[17].mxu0  ;;  %v4032_v26 = vmax.f32 %v16993_v24, 0.0 }
 0x35e   : > { %v16994_v25 = vpop.f32.mrb[18].mxu0  ;;  %v4030_v42 = vmax.f32 %v3899_v1, 0.0 }
 0x35f   : > { %v4033_v9 = vmax.f32 %v16994_v25, 0.0  ;;  %v3902_v33 = vpop.f32.mrb[19].mxu0  ;;  %v19254_v25 = vld [vmem:[%s22863_s6 + $0x8] ss:$12 sps:$4 sm:$0xff]  }
 0x360   : > { %v4031_v56 = vmax.f32 %v3902_v33, 0.0  ;;  %v19257_v33 = vld [vmem:[%s22863_s6 + $0x50] ss:$12 sps:$4 sm:$0xff]  }
 0x361   : > { %v4085_v49 = vpack.c.bf16 %v4033_v9, %v4032_v26  ;;  %v19255_v26 = vld [vmem:[%s22863_s6 + $0x20] ss:$12 sps:$4 sm:$0xff]   ;;  %v19256_v9 = vld [vmem:[%s22863_s6 + $0x38] ss:$12 sps:$4 sm:$0xff]  }
 0x362   : > { %v4084_v6 = vpack.c.bf16 %v4031_v56, %v4030_v42  ;;  %v19258_v42 = vld [vmem:[%s22863_s6 + $0x68] ss:$12 sps:$4 sm:$0xff]   ;;  %v19259_v56 = vld [vmem:[%s22863_s6 + $0x80] ss:$12 sps:$4 sm:$0xff]  }
 0x364   : > { %v16997_v61 = vpop.f32.mrb[20].mxu0  ;;  %16197 = vmatprep.subr.bf16.mxu1 %v4084_v6  ;;  %v19261_v6 = vld [vmem:[%s22880_s2 + $0x8] sm:$0xff]  }
 0x365   : > { %v3915_v27 = vpop.f32.mrb[21].mxu0  ;;  %16198 = vmatpush3.bf16.msra.mxu1 %v4076_v57  ;;  %v4036_v60 = vmax.f32 %v16997_v61, 0.0  ;;  %v19625_v61 = vmov 0  }
 0x366   : > { %v16998_v45 = vpop.f32.mrb[22].mxu0  ;;  %16199 = vmatprep.subr.bf16.mxu1 %v4085_v49  ;;  %v4034_v12 = vmax.f32 %v3915_v27, 0.0  ;;  %v19260_v49 = vld [vmem:[%s22863_s6 + $0x98] ss:$0 sps:$4 sm:$0x33]   ;;  %19153 = vset.pattern.permute.xlu0 %v19625_v61 }
 0x367   : > { %v4037_v28 = vmax.f32 %v16998_v45, 0.0  ;;  %v3918_v30 = vpop.f32.mrb[23].mxu0  ;;  %453 = vst.msk [vmem:[#allocation3 + $0x30] sm:$0x3] %vm452_vm11, %v19625_v61  ;;  %19154 = vset.pattern.permute.xlu1 %v19625_v61 }
 0x368   : > { %v4035_v16 = vmax.f32 %v3918_v30, 0.0  ;;  %440 = vst.msk [vmem:[#allocation3] sm:$0xf] %vm439_vm10, %v19625_v61  ;;  %441 = vst.msk [vmem:[#allocation3 + $0x4] sm:$0xf] %vm439_vm10, %v19625_v61 }
 0x369   : > { %v4087_v10 = vpack.c.bf16 %v4037_v28, %v4036_v60  ;;  %16200 = vmatpush3.bf16.msra.mxu1 %v4077_v53  ;;  %442 = vst.msk [vmem:[#allocation3 + $0x8] sm:$0xf] %vm439_vm10, %v19625_v61  ;;  %443 = vst.msk [vmem:[#allocation3 + $0xc] sm:$0xf] %vm439_vm10, %v19625_v61 }
 0x36a   : > { %v4086_v39 = vpack.c.bf16 %v4035_v16, %v4034_v12  ;;  %444 = vst.msk [vmem:[#allocation3 + $0x10] sm:$0xf] %vm439_vm10, %v19625_v61  ;;  %445 = vst.msk [vmem:[#allocation3 + $0x14] sm:$0xf] %vm439_vm10, %v19625_v61 }
 0x36b   : > { %446 = vst.msk [vmem:[#allocation3 + $0x18] sm:$0xf] %vm439_vm10, %v19625_v61  ;;  %447 = vst.msk [vmem:[#allocation3 + $0x1c] sm:$0xf] %vm439_vm10, %v19625_v61 }
 0x36c   : > { %v17001_v20 = vpop.f32.mrb[24].mxu0  ;;  %16201 = vmatprep.subr.bf16.mxu1 %v4086_v39  ;;  %448 = vst.msk [vmem:[#allocation3 + $0x20] sm:$0xf] %vm439_vm10, %v19625_v61  ;;  %449 = vst.msk [vmem:[#allocation3 + $0x24] sm:$0xf] %vm439_vm10, %v19625_v61 }
 0x36d   : > { %v3931_v13 = vpop.f32.mrb[25].mxu0  ;;  %16202 = vmatpush3.bf16.msra.mxu1 %v4078_v4  ;;  %v4040_v32 = vmax.f32 %v17001_v20, 0.0  ;;  %450 = vst.msk [vmem:[#allocation3 + $0x28] sm:$0xf] %vm439_vm10, %v19625_v61  ;;  %451 = vst.msk [vmem:[#allocation3 + $0x2c] sm:$0xf] %vm439_vm10, %v19625_v61 }
 0x36e   : > { %v17002_v29 = vpop.f32.mrb[26].mxu0  ;;  %16203 = vmatprep.subr.bf16.mxu1 %v4087_v10  ;;  %v4038_v31 = vmax.f32 %v3931_v13, 0.0 }
 0x36f   : > { %v4041_v11 = vmax.f32 %v17002_v29, 0.0  ;;  %v3934_v19 = vpop.f32.mrb[27].mxu0 }
 0x370   : > { %v4039_v40 = vmax.f32 %v3934_v19, 0.0 }
 0x371   : > { %v4089_v43 = vpack.c.bf16 %v4041_v11, %v4040_v32  ;;  %16204 = vmatpush3.bf16.msra.mxu1 %v4079_v35 }
 0x372   : > { %v4088_v48 = vpack.c.bf16 %v4039_v40, %v4038_v31 }
 0x374   : > { %v17005_v38 = vpop.f32.mrb[28].mxu0  ;;  %16205 = vmatprep.subr.bf16.mxu1 %v4088_v48 }
 0x375   : > { %v3947_v57 = vpop.f32.mrb[29].mxu0  ;;  %16206 = vmatpush3.bf16.msra.mxu1 %v4080_v37  ;;  %v4044_v58 = vmax.f32 %v17005_v38, 0.0 }
 0x376   : > { %v17006_v53 = vpop.f32.mrb[30].mxu0  ;;  %16207 = vmatprep.subr.bf16.mxu1 %v4089_v43  ;;  %v4042_v63 = vmax.f32 %v3947_v57, 0.0 }
 0x377   : > { %v4045_v59 = vmax.f32 %v17006_v53, 0.0  ;;  %v3950_v62 = vpop.f32.mrb[31].mxu0 }
 0x378   : > { %v4043_v44 = vmax.f32 %v3950_v62, 0.0 }
 0x379   : > { %v4091_v3 = vpack.c.bf16 %v4045_v59, %v4044_v58  ;;  %16208 = vmatpush3.bf16.msra.mxu1 %v4081_v7 }
 0x37a   : > { %v4090_v8 = vpack.c.bf16 %v4043_v44, %v4042_v63 }
 0x37c   : > { %v17009_v5 = vpop.f32.mrb[32].mxu0  ;;  %16209 = vmatprep.subr.bf16.mxu1 %v4090_v8 }
 0x37d   : > { %v3963_v4 = vpop.f32.mrb[33].mxu0  ;;  %16210 = vmatpush3.bf16.msra.mxu1 %v4082_v22  ;;  %v4048_v47 = vmax.f32 %v17009_v5, 0.0  ;;  %v19251_v22 = vld [vmem:[%s22863_s6 + $0x78] ss:$12 sps:$4 sm:$0xff]  }
 0x37e   : > { %v17010_v35 = vpop.f32.mrb[34].mxu0  ;;  %16211 = vmatprep.subr.bf16.mxu1 %v4091_v3  ;;  %v4046_v52 = vmax.f32 %v3963_v4, 0.0 }
 0x37f   : > { %v4049_v50 = vmax.f32 %v17010_v35, 0.0  ;;  %v3966_v36 = vpop.f32.mrb[35].mxu0 }
 0x380   : > { %v4047_v55 = vmax.f32 %v3966_v36, 0.0 }
 0x381   : > { %v4093_v0 = vpack.c.bf16 %v4049_v50, %v4048_v47  ;;  %16212 = vmatpush3.bf16.msra.mxu1 %v20532_v17  ;;  %v4074_v17 = vld [vmem:[%s22863_s6 + $0x90] sm:$0x33] }
 0x382   : > { %v4092_v7 = vpack.c.bf16 %v4047_v55, %v4046_v52  ;;  %17011 = vmatprep.subr.bf16.mxu1 %v19623_v34  ;;  %v15092_v24 = vcombine.high %v4074_v17, %v4074_v17  ;;  %v15091_v1 = vcombine.low %v4074_v17, %v4074_v17 }
 0x383   : > { %v4218_v37 = vsel %vm1192_vm3, %v4093_v0, 0 }
 0x384   : > { %4253 = vmatmul.mubr.bf16.vlgmr.msra.gmra.mrb[0].mxu1 %v19234_v2 }
 0x385   : > { %17012 = vmatpush3.bf16.msra.mxu1 %v4092_v7  ;;  %4260 = vmatprep.mubr.bf16.mxu1 %v19237_v18 }
 0x386   : > { %17013 = vmatprep.subr.bf16.mxu1 %v19623_v34 }
 0x389   : > { %17014 = vmatpush3.bf16.msra.mxu1 %v4218_v37 }
 0x38a   : > { %17043 = vmatprep.subr.bf16.mxu1 %v19623_v34 }
 0x38c   : > { %4261 = vmatmul.mubr.bf16.gmra.mrb[4].mxu1 %v19239_v14 }
 0x38d   : > { %4268 = vmatprep.mubr.bf16.mxu1 %v19240_v15 }
 0x394   : > { %4269 = vmatmul.mubr.bf16.gmra.mrb[8].mxu1 %v19242_v41 }
 0x395   : > { %4276 = vmatprep.mubr.bf16.mxu1 %v19243_v46 }
 0x39c   : > { %4277 = vmatmul.mubr.bf16.gmra.mrb[12].mxu1 %v19245_v23 }
 0x39d   : > { %4284 = vmatprep.mubr.bf16.mxu1 %v19246_v21 }
 0x3a4   : > { %4285 = vmatmul.mubr.bf16.gmra.mrb[16].mxu1 %v19248_v51 }
 0x3a5   : > { %4292 = vmatprep.mubr.bf16.mxu1 %v19249_v54 }
 0x3ac   : > { %4293 = vmatmul.mubr.bf16.gmra.mrb[20].mxu1 %v19251_v22 }
 0x3ad   : > { %4300 = vmatprep.mubr.bf16.mxu1 %v15092_v24 }
 0x3b4   : > { %4301 = vmatmul.mubr.bf16.gmra.mrb[24].mxu1 %v15091_v1 }
 0x3b5   : > { %17015 = vmatprep.mubr.msk.bf16.mxu1 %vm19624_vm8, %v19623_v34 }
 0x3bc   : > { %17016 = vmatmul.mubr.msk.bf16.vlgmr.msra.gmra.mrb[28].mxu1 %vm4194_vm9, %v19254_v25 }
 0x3bd   : > { %17019 = vmatprep.mubr.msk.bf16.mxu1 %vm19624_vm8, %v19623_v34  ;;  %17044 = vmatpush3.bf16.msra.mxu1 %v19261_v6 }
 0x3be   : > { %17065 = vmatprep.subr.bf16.mxu1 %v19623_v34 }
 0x3c4   : > { %17020 = vmatmul.mubr.msk.bf16.gmra.mrb[32].mxu1 %vm4194_vm9, %v19255_v26 }
 0x3c5   : > { %17023 = vmatprep.mubr.msk.bf16.mxu1 %vm19624_vm8, %v19623_v34 }
 0x3cc   : > { %17024 = vmatmul.mubr.msk.bf16.gmra.mrb[36].mxu1 %vm4194_vm9, %v19256_v9 }
 0x3cd   : > { %17027 = vmatprep.mubr.msk.bf16.mxu1 %vm19624_vm8, %v19623_v34 }
 0x3d4   : > { %17028 = vmatmul.mubr.msk.bf16.gmra.mrb[40].mxu1 %vm4194_vm9, %v19257_v33 }
 0x3d5   : > { %17031 = vmatprep.mubr.msk.bf16.mxu1 %vm19624_vm8, %v19623_v34 }
 0x3dc   : > { %17032 = vmatmul.mubr.msk.bf16.gmra.mrb[44].mxu1 %vm4194_vm9, %v19258_v42 }
 0x3dd   : > { %17035 = vmatprep.mubr.msk.bf16.mxu1 %vm19624_vm8, %v19623_v34 }
 0x3e4   : > { %17036 = vmatmul.mubr.msk.bf16.gmra.mrb[48].mxu1 %vm4194_vm9, %v19259_v56 }
 0x3e5   : > { %17039 = vmatprep.mubr.msk.bf16.mxu1 %vm19624_vm8, %v19623_v34 }
 0x3ec   : > { %17040 = vmatmul.mubr.msk.bf16.gmra.mrb[52].mxu1 %vm4194_vm9, %v19260_v49  ;;  %vm21013_vm9 = vmand %vm5984_vm13, %vm5985_vm14  ;;  %vm5999_vm13 = vcmask 122880   ;;  %vm6000_vm14 = vsmask.f32 256 }
 0x3ed   : > { %17045 = vmatprep.mubr.msk.bf16.mxu1 %vm19624_vm8, %v19623_v34 }
 0x457   : > { %v16213_v27 = vpop.f32.mrb[0].mxu1 }
 0x458   : > { %v16214_v45 = vpop.f32.mrb[1].mxu1 }
 0x459   : > { %v16215_v60 = vadd.f32 %v16214_v45, %v16213_v27  ;;  %v16216_v28 = vpop.f32.mrb[2].mxu1 }
 0x45a   : > { %v16217_v30 = vpop.f32.mrb[3].mxu1 }
 0x45b   : > { %v16218_v12 = vadd.f32 %v16217_v30, %v16216_v28 }
 0x45f   : > { %v16219_v16 = vpop.f32.mrb[4].mxu1 }
 0x460   : > { %v16220_v10 = vpop.f32.mrb[5].mxu1 }
 0x461   : > { %v16221_v39 = vadd.f32 %v16220_v10, %v16219_v16  ;;  %v16222_v20 = vpop.f32.mrb[6].mxu1 }
 0x462   : > { %v16223_v13 = vpop.f32.mrb[7].mxu1 }
 0x463   : > { %v16224_v29 = vadd.f32 %v16223_v13, %v16222_v20 }
 0x467   : > { %v16225_v32 = vpop.f32.mrb[8].mxu1 }
 0x468   : > { %v16226_v11 = vpop.f32.mrb[9].mxu1 }
 0x469   : > { %v16227_v19 = vadd.f32 %v16226_v11, %v16225_v32  ;;  %v16228_v31 = vpop.f32.mrb[10].mxu1 }
 0x46a   : > { %v16229_v40 = vpop.f32.mrb[11].mxu1 }
 0x46b   : > { %v16230_v43 = vadd.f32 %v16229_v40, %v16228_v31 }
 0x46f   : > { %v16231_v48 = vpop.f32.mrb[12].mxu1 }
 0x470   : > { %v16232_v38 = vpop.f32.mrb[13].mxu1 }
 0x471   : > { %v16233_v57 = vadd.f32 %v16232_v38, %v16231_v48  ;;  %v16234_v53 = vpop.f32.mrb[14].mxu1 }
 0x472   : > { %v16235_v58 = vpop.f32.mrb[15].mxu1 }
 0x473   : > { %v20651_v59 = vadd.f32 %v16235_v58, %v16234_v53 }
 0x477   : > { %v16237_v62 = vpop.f32.mrb[16].mxu1 }
 0x478   : > { %v16238_v63 = vpop.f32.mrb[17].mxu1 }
 0x479   : > { %v16240_v44 = vpop.f32.mrb[18].mxu1  ;;  %v20653_v3 = vadd.f32 %v16238_v63, %v16237_v62 }
 0x47a   : > { %v16241_v8 = vpop.f32.mrb[19].mxu1 }
 0x47b   : > { %v20655_v5 = vadd.f32 %v16241_v8, %v16240_v44 }
 0x47f   : > { %v16243_v4 = vpop.f32.mrb[20].mxu1 }
 0x480   : > { %v16244_v35 = vpop.f32.mrb[21].mxu1 }
 0x481   : > { %v16246_v47 = vpop.f32.mrb[22].mxu1  ;;  %v20657_v50 = vadd.f32 %v16244_v35, %v16243_v4 }
 0x482   : > { %v16247_v36 = vpop.f32.mrb[23].mxu1 }
 0x483   : > { %v20659_v52 = vadd.f32 %v16247_v36, %v16246_v47 }
 0x487   : > { %v16249_v55 = vpop.f32.mrb[24].mxu1 }
 0x488   : > { %v16250_v2 = vpop.f32.mrb[25].mxu1 }
 0x489   : > { %v16252_v0 = vpop.f32.mrb[26].mxu1  ;;  %v20661_v18 = vadd.f32 %v16250_v2, %v16249_v55 }
 0x48a   : > { %v16253_v7 = vpop.f32.mrb[27].mxu1 }
 0x48f   : > { %v4342_v37 = vpop.f32.mrb[28].mxu1 }
 0x490   : > { %v4343_v14 = vadd.f32 %v16215_v60, %v4342_v37  ;;  %v17017_v15 = vpop.f32.mrb[29].mxu1 }
 0x491   : > { %v4345_v41 = vpop.f32.mrb[30].mxu1 }
 0x492   : > { %v15950_v46 = vpack.c.bf16 %v4343_v14, %v4343_v14  ;;  %v4346_v23 = vadd.f32 %v16218_v12, %v4345_v41  ;;  %v17018_v21 = vpop.f32.mrb[31].mxu1 }
 0x494   : > { %4449 = vst.msk [vmem:[#allocation2] sm:$0xf] %vm439_vm10, %v15950_v46  ;;  %v15951_v51 = vpack.c.bf16 %v4346_v23, %v4346_v23 }
 0x496   : > { %4450 = vst.msk [vmem:[#allocation2 + $0x4] sm:$0xf] %vm439_vm10, %v15951_v51 }
 0x497   : > { %v4350_v54 = vpop.f32.mrb[32].mxu1 }
 0x498   : > { %v4351_v17 = vadd.f32 %v16221_v39, %v4350_v54  ;;  %v17021_v22 = vpop.f32.mrb[33].mxu1 }
 0x499   : > { %v4353_v24 = vpop.f32.mrb[34].mxu1 }
 0x49a   : > { %v15952_v1 = vpack.c.bf16 %v4351_v17, %v4351_v17  ;;  %v4354_v25 = vadd.f32 %v16224_v29, %v4353_v24  ;;  %v17022_v26 = vpop.f32.mrb[35].mxu1 }
 0x49b   : > { %v4462_v33 = vld [vmem:[#allocation2] sm:$0xf] }
 0x49c   : > { %4451 = vst.msk [vmem:[#allocation2 + $0x8] sm:$0xf] %vm439_vm10, %v15952_v1  ;;  %v15953_v9 = vpack.c.bf16 %v4354_v25, %v4354_v25 }
 0x49d   : > { %v20666_v42 = vld [vmem:[#allocation2 + $0x4] sm:$0xf] }
 0x49e   : > { %4452 = vst.msk [vmem:[#allocation2 + $0xc] sm:$0xf] %vm439_vm10, %v15953_v9  ;;  %v20670_v56 = vcombine.low %v4462_v33, %v20666_v42 }
 0x49f   : > { %v4358_v49 = vpop.f32.mrb[36].mxu1 }
 0x4a0   : > { %v4359_v6 = vadd.f32 %v16227_v19, %v4358_v49  ;;  %v17025_v27 = vpop.f32.mrb[37].mxu1  ;;  %v4506_v60 = vshll.u32 %v20670_v56, 16  ;;  %v4504_v13 = vshrl.u32 %v20670_v56, 16 }
 0x4a1   : > { %v4361_v45 = vpop.f32.mrb[38].mxu1 }
 0x4a2   : > { %v15954_v28 = vpack.c.bf16 %v4359_v6, %v4359_v6  ;;  %v4362_v30 = vadd.f32 %v16230_v43, %v4361_v45  ;;  %v17026_v12 = vpop.f32.mrb[39].mxu1  ;;  %v4508_v39 = vrot.slane %v4506_v60, 1  ;;  %v19264_v43 = vld [vmem:[%s22880_s2] sm:$0xff]  }
 0x4a4   : > { %4453 = vst.msk [vmem:[#allocation2 + $0x10] sm:$0xf] %vm439_vm10, %v15954_v28  ;;  %v15955_v16 = vpack.c.bf16 %v4362_v30, %v4362_v30  ;;  %v4509_v31 = vor.u32 %v4508_v39, %v4504_v13  ;;  %v19268_v39 = vld [vmem:[%s22880_s2 + $0x10] sm:$0xff]   ;;  %v4730_v13 = vld [vmem:[#allocation2] sm:$0xe] }
 0x4a5   : > { %v20674_v10 = vld [vmem:[#allocation2 + $0x8] sm:$0xff]  }
 0x4a6   : > { %4454 = vst.msk [vmem:[#allocation2 + $0x14] sm:$0xf] %vm439_vm10, %v15955_v16  ;;  %v4511_v29 = vshll.u32 %v20674_v10, 16 }
 0x4a7   : > { %v4366_v20 = vpop.f32.mrb[40].mxu1 }
 0x4a8   : > { %v4367_v32 = vadd.f32 %v16233_v57, %v4366_v20  ;;  %v17029_v11 = vpop.f32.mrb[41].mxu1  ;;  %v4513_v40 = vrot.slane %v4511_v29, 1  ;;  %v15136_v29 = vcombine.low %v4730_v13, %v20666_v42 }
 0x4a9   : > { %v4369_v19 = vpop.f32.mrb[42].mxu1 }
 0x4aa   : > { %v15956_v48 = vpack.c.bf16 %v4367_v32, %v4367_v32  ;;  %v4370_v38 = vadd.f32 %v20651_v59, %v4369_v19  ;;  %v17030_v53 = vpop.f32.mrb[43].mxu1  ;;  %v4514_v58 = vsel %vm586_vm1, %v4509_v31, %v4513_v40  ;;  %v4515_v59 = vshrl.u32 %v20674_v10, 16  ;;  %v19270_v19 = vld [vmem:[%s22880_s2 + $0x18] sm:$0xff]  }
 0x4ab   : > { %17046 = vmatmul.mubr.msk.bf16.vlgmr.msra.gmra.mrb[56].mxu1 %vm4548_vm12, %v4514_v58  ;;  %v4738_v32 = vrot.slane %v20674_v10, 1  ;;  %v4737_v11 = vrot.slane %v15136_v29, 1  ;;  %v19272_v53 = vld [vmem:[#allocation2 + $0xc] sm:$0xff]   ;;  %v19271_v58 = vld [vmem:[#allocation2 + $0x4] sm:$0xfe]  }
 0x4ac   : > { %4455 = vst.msk [vmem:[#allocation2 + $0x18] sm:$0xf] %vm439_vm10, %v15956_v48  ;;  %v15957_v62 = vpack.c.bf16 %v4370_v38, %v4370_v38  ;;  %17066 = vmatpush3.bf16.msra.mxu1 %v19264_v43  ;;  %17049 = vmatprep.mubr.msk.bf16.mxu1 %vm19624_vm8, %v19623_v34  ;;  %v4517_v47 = vor.u32 %v4515_v59, %v4513_v40 }
 0x4ad   : > { %v20688_v57 = vld [vmem:[#allocation2 + $0x10] sm:$0xff]   ;;  %17087 = vmatprep.subr.bf16.mxu1 %v19623_v34  ;;  %v4739_v31 = vsel %vm1192_vm3, %v4737_v11, %v4738_v32 }
 0x4ae   : > { %4456 = vst.msk [vmem:[#allocation2 + $0x1c] sm:$0xf] %vm439_vm10, %v15957_v62  ;;  %v4519_v44 = vshll.u32 %v20688_v57, 16  ;;  %v4523_v15 = vshrl.u32 %v20688_v57, 16  ;;  %v4740_v40 = vrot.slane %v20688_v57, 1  ;;  %v4889_v62 = vrot.slane %v19272_v53, 1 }
 0x4af   : > { %v4374_v63 = vpop.f32.mrb[44].mxu1 }
 0x4b0   : > { %v4375_v8 = vadd.f32 %v20653_v3, %v4374_v63  ;;  %v17033_v4 = vpop.f32.mrb[45].mxu1  ;;  %v4521_v36 = vrot.slane %v4519_v44, 1  ;;  %v4741_v42 = vsel %vm1192_vm3, %v4738_v32, %v4740_v40  ;;  %v19273_v63 = vld [vmem:[%s22880_s2 + $0x20] sm:$0xff]  }
 0x4b1   : > { %v4377_v35 = vpop.f32.mrb[46].mxu1 }
 0x4b2   : > { %v15958_v55 = vpack.c.bf16 %v4375_v8, %v4375_v8  ;;  %v4378_v2 = vadd.f32 %v20655_v5, %v4377_v35  ;;  %v17034_v0 = vpop.f32.mrb[47].mxu1  ;;  %v4522_v7 = vsel %vm586_vm1, %v4517_v47, %v4521_v36  ;;  %v4525_v21 = vor.u32 %v4523_v15, %v4521_v36 }
 0x4b3   : > { %17050 = vmatmul.mubr.msk.bf16.gmra.mrb[60].mxu1 %vm4548_vm12, %v4522_v7  ;;  %v19274_v44 = vld [vmem:[#allocation2 + $0x14] sm:$0xff]   ;;  %v5002_v0 = vld [vmem:[#allocation2 + $0x8] sm:$0xf] }
 0x4b4   : > { %4457 = vst.msk [vmem:[#allocation2 + $0x20] sm:$0xf] %vm439_vm10, %v15958_v55  ;;  %v15959_v37 = vpack.c.bf16 %v4378_v2, %v4378_v2  ;;  %17053 = vmatprep.mubr.msk.bf16.mxu1 %vm19624_vm8, %v19623_v34  ;;  %v4891_v8 = vrot.slane %v19274_v44, 1 }
 0x4b5   : > { %v20701_v14 = vld [vmem:[#allocation2 + $0x18] sm:$0xff]  }
 0x4b6   : > { %4458 = vst.msk [vmem:[#allocation2 + $0x24] sm:$0xf] %vm439_vm10, %v15959_v37  ;;  %v4527_v5 = vshll.u32 %v20701_v14, 16  ;;  %v4892_v4 = vsel %vm1192_vm3, %v4889_v62, %v4891_v8  ;;  %v20791_v37 = vld [vmem:[#allocation2 + $0xc] sm:$0xff]  }
 0x4b7   : > { %v4382_v3 = vpop.f32.mrb[48].mxu1  ;;  %v5052_v15 = vshrl.u32 %v20791_v37, 16 }
 0x4b8   : > { %v4383_v41 = vadd.f32 %v20657_v50, %v4382_v3  ;;  %v17037_v46 = vpop.f32.mrb[49].mxu1  ;;  %v4529_v51 = vrot.slane %v4527_v5, 1  ;;  %v5055_v5 = vshll.u32 %v20791_v37, 16 }
 0x4b9   : > { %v4385_v23 = vpop.f32.mrb[50].mxu1 }
 0x4ba   : > { %v15960_v54 = vpack.c.bf16 %v4383_v41, %v4383_v41  ;;  %v4386_v17 = vadd.f32 %v20659_v52, %v4385_v23  ;;  %v17038_v22 = vpop.f32.mrb[51].mxu1  ;;  %v4530_v24 = vsel %vm586_vm1, %v4525_v21, %v4529_v51  ;;  %v4531_v52 = vshrl.u32 %v20701_v14, 16 }
 0x4bb   : > { %17054 = vmatmul.mubr.msk.bf16.gmra.mrb[64].mxu1 %vm4548_vm12, %v4530_v24  ;;  %v4470_v25 = vld [vmem:[#allocation2 + $0x20] sm:$0xf]  ;;  %v5054_v23 = vrot.slane %v5052_v15, 1  ;;  %v5057_v21 = vrot.slane %v5055_v5, 2 }
 0x4bc   : > { %4459 = vst.msk [vmem:[#allocation2 + $0x28] sm:$0xf] %vm439_vm10, %v15960_v54  ;;  %v15961_v1 = vpack.c.bf16 %v4386_v17, %v4386_v17  ;;  %17057 = vmatprep.mubr.msk.bf16.mxu1 %vm19624_vm8, %v19623_v34  ;;  %v4533_v60 = vor.u32 %v4531_v52, %v4529_v51  ;;  %v19275_v35 = vld [vmem:[#allocation2 + $0x1c] sm:$0xff]   ;;  %v19280_v51 = vld [vmem:[#allocation2 + $0x14] sm:$0xff]  }
 0x4bd   : > { %v4474_v50 = vld [vmem:[#allocation2 + $0x24] sm:$0xf]  ;;  %v4893_v47 = vrot.slane %v19275_v35, 1  ;;  %v5058_v22 = vor.u32 %v5057_v21, %v5054_v23  ;;  %v5061_v24 = vshrl.u32 %v19280_v51, 16  ;;  %v19281_v52 = vld [vmem:[#allocation2 + $0x1c] sm:$0xff]   ;;  %v5206_v53 = vrot.slane %v19280_v51, 2 }
 0x4be   : > { %4460 = vst.msk [vmem:[#allocation2 + $0x2c] sm:$0xf] %vm439_vm10, %v15961_v1  ;;  %v15120_v26 = vcombine.low %v4470_v25, %v4474_v50  ;;  %v5064_v1 = vshll.u32 %v19280_v51, 16  ;;  %v19279_v50 = vld [vmem:[%s22880_s2 + $0x28] sm:$0xff]   ;;  %v5773_v35 = vld [vmem:[%s22866_s9 + $0x10] sm:$0xff]  ;;  %v19288_v23 = vld [vmem:[%s22880_s2 + $0x38] sm:$0xff]  }
 0x4bf   : > { %v4390_v9 = vpop.f32.mrb[52].mxu1  ;;  %v4894_v36 = vsel %vm1192_vm3, %v4891_v8, %v4893_v47  ;;  %5793 = vperm.xlu1 %19154, %v5773_v35   ;;  %v20890_v51 = vld [vmem:[#allocation2 + $0x18] sm:$0xff]  }
 0x4c0   : > { %v4391_v33 = vadd.f32 %v20661_v18, %v4390_v9  ;;  %v4535_v49 = vshll.u32 %v15120_v26, 16  ;;  %v17041_v6 = vpop.f32.mrb[53].mxu1  ;;  %v4539_v16 = vshrl.u32 %v15120_v26, 16  ;;  %v4744_v48 = vrot.slane %v15120_v26, 1 }
 0x4c1   : > { %v4393_v27 = vpop.f32.mrb[54].mxu1  ;;  %v5063_v9 = vrot.slane %v5061_v24, 1  ;;  %v5070_v6 = vshrl.u32 %v19281_v52, 16  ;;  %v20901_v24 = vld [vmem:[#allocation2 + $0x20] sm:$0xff]  }
 0x4c2   : > { %v15962_v45 = vpack.c.bf16 %v4391_v33, %v4391_v33  ;;  %v4537_v28 = vrot.slane %v4535_v49, 1  ;;  %v17042_v30 = vpop.f32.mrb[55].mxu1  ;;  %v5066_v33 = vrot.slane %v5064_v1, 2  ;;  %v5073_v27 = vshll.u32 %v19281_v52, 16 }
 0x4c3   : > { %v19276_v55 = vld [vmem:[#allocation2 + $0x24] sm:$0xff]   ;;  %v5365_v1 = vrot.slane %v20901_v24, 2 }
 0x4c4   : > { %4461 = vst.msk [vmem:[#allocation2 + $0x30] sm:$0x3] %vm452_vm11, %v15962_v45  ;;  %v4538_v12 = vsel %vm586_vm1, %v4533_v60, %v4537_v28  ;;  %v4541_v18 = vor.u32 %v4539_v16, %v4537_v28  ;;  %v4895_v2 = vrot.slane %v19276_v55, 1  ;;  %v5067_v49 = vor.u32 %v5066_v33, %v5063_v9  ;;  %v19282_v30 = vld [vmem:[#allocation2 + $0x24] sm:$0xff]   ;;  %v5774_v55 = vld [vmem:[%s22866_s9 + $0x18] sm:$0xff]  ;;  %vm21019_vm11 = vmor %vm5871_vm15, %vm5872_vm2 }
 0x4c5   : > { %17058 = vmatmul.mubr.msk.bf16.gmra.mrb[68].mxu1 %vm4548_vm12, %v4538_v12  ;;  %v5072_v60 = vrot.slane %v5070_v6, 1  ;;  %v5075_v28 = vrot.slane %v5073_v27, 2  ;;  %v5079_v16 = vshrl.u32 %v19282_v30, 16  ;;  %v19283_v29 = vld [vmem:[#allocation2 + $0x2c] ss:$0 sps:$4 sm:$0x11]   ;;  %5798 = vperm.xlu1 %19154, %v5774_v55   ;;  %vm21093_vm15 = vmand %vm5999_vm13, %vm6000_vm14 }
 0x4c6   : > { %17061 = vmatprep.mubr.msk.bf16.mxu1 %vm19624_vm8, %v19623_v34  ;;  %v4896_v7 = vsel %vm1192_vm3, %v4893_v47, %v4895_v2  ;;  %v5068_v45 = vsel %vm2063_vm4, %v5058_v22, %v5067_v49  ;;  %v5088_v11 = vshll.u32 %v19283_v29, 16  ;;  %v5210_v44 = vrot.slane %v19282_v30, 2  ;;  %v5777_v47 = vld [vmem:[%s22866_s9 + $0x30] sm:$0xff]  ;;  %v12133_v27 = vld [vmem:[%s22867_s10 + $0x8] sm:$0xff] }
 0x4c7   : > { %v5076_v12 = vor.u32 %v5075_v28, %v5072_v60  ;;  %v11269_v33 = vld [vmem:[%s22867_s10 + $0x10] sm:$0x3f]  ;;  %vm454_vm2 = vcmask 261120   ;;  %vm9392_vm13 = vsmask.f32 4352 }
 0x4c8   : > { %455 = vst.msk [vmem:[#allocation7] sm:$0xff] %vm454_vm2, %v19625_v61  ;;  %vm11335_vm14 = vsmask.f32 7950 }
 0x4cb   : > { %v19292_v6 = vld [vmem:[#allocation2 + $0x30] ss:$0 sps:$4 sm:$0x11]  }
 0x4cd   : > { %17062 = vmatmul.mubr.msk.bf16.gmra.mrb[72].mxu1 %vm4548_vm12, %v4541_v18  ;;  %v5082_v18 = vshll.u32 %v19282_v30, 16 }
 0x4ce   : > { %17067 = vmatprep.mubr.msk.bf16.mxu1 %vm19624_vm8, %v19623_v34 }
 0x4d5   : > { %17068 = vmatmul.mubr.msk.bf16.vlgmr.msra.gmra.mrb[56].mxu1 %vm4548_vm12, %v20670_v56  ;;  %v4471_v56 = vld [vmem:[#allocation2 + $0x24] sm:$0x7] }
 0x4d6   : > { %17088 = vmatpush3.bf16.msra.mxu1 %v19268_v39  ;;  %17071 = vmatprep.mubr.msk.bf16.mxu1 %vm19624_vm8, %v19623_v34  ;;  %v15127_v20 = vcombine.low %v4470_v25, %v4471_v56  ;;  %v5077_v39 = vsel %vm2063_vm4, %v5067_v49, %v5076_v12  ;;  %v5081_v56 = vrot.slane %v5079_v16, 1 }
 0x4d7   : > { %17109 = vmatprep.subr.bf16.mxu1 %v19623_v34 }
 0x4dd   : > { %17072 = vmatmul.mubr.msk.bf16.gmra.mrb[60].mxu1 %vm4548_vm12, %v20674_v10  ;;  %v4742_v10 = vrot.slane %v20701_v14, 1 }
 0x4de   : > { %17075 = vmatprep.mubr.msk.bf16.mxu1 %vm19624_vm8, %v19623_v34 }
 0x4df   : > { %v4743_v43 = vsel %vm1192_vm3, %v4740_v40, %v4742_v10  ;;  %v4745_v38 = vsel %vm1192_vm3, %v4742_v10, %v4744_v48  ;;  %v5196_v40 = vld [vmem:[#allocation2 + $0x4] sm:$0xc]  ;;  %v5204_v10 = vrot.slane %v20791_v37, 2  ;;  %v20870_v37 = vld [vmem:[#allocation2 + $0x10] sm:$0xff]  }
 0x4e0   : > { %v5361_v5 = vrot.slane %v20870_v37, 2  ;;  %v5491_v60 = vshrl.u32 %v20870_v37, 16  ;;  %v5494_v28 = vshll.u32 %v20870_v37, 16 }
 0x4e5   : > { %17076 = vmatmul.mubr.msk.bf16.gmra.mrb[64].mxu1 %vm4548_vm12, %v20688_v57  ;;  %v4888_v57 = vrot.slane %v19271_v58, 1  ;;  %v5207_v58 = vsel %vm2506_vm5, %v5204_v10, %v5206_v53 }
 0x4e6   : > { %17079 = vmatprep.mubr.msk.bf16.mxu1 %vm19624_vm8, %v19623_v34 }
 0x4e7   : > { %v4890_v59 = vsel %vm1192_vm3, %v4888_v57, %v4889_v62  ;;  %v5208_v62 = vrot.slane %v19281_v52, 2  ;;  %v7398_v52 = vld [vmem:[%s22866_s9 + $0x48] sm:$0x3f] }
 0x4e9   : > { %v5209_v57 = vsel %vm2506_vm5, %v5206_v53, %v5208_v62  ;;  %v5211_v8 = vsel %vm2506_vm5, %v5208_v62, %v5210_v44  ;;  %v5512_v62 = vshll.u32 %v20901_v24, 16 }
 0x4ed   : > { %17080 = vmatmul.mubr.msk.bf16.gmra.mrb[68].mxu1 %vm4548_vm12, %v20701_v14  ;;  %v5001_v14 = vld [vmem:[#allocation2 + $0x4] sm:$0xe] }
 0x4ee   : > { %17083 = vmatprep.mubr.msk.bf16.mxu1 %vm19624_vm8, %v19623_v34  ;;  %v15158_v3 = vcombine.low %v5001_v14, %v5002_v0  ;;  %v5776_v14 = vld [vmem:[%s22866_s9 + $0x28] sm:$0xff] }
 0x4ef   : > { %5808 = vperm.xlu1 %19154, %v5776_v14  }
 0x4f0   : > { %v5044_v41 = vshrl.u32 %v15158_v3, 16  ;;  %v5047_v46 = vshll.u32 %v15158_v3, 16  ;;  %v5318_v3 = vld [vmem:[#allocation2 + $0x8] sm:$0xc] }
 0x4f2   : > { %v5046_v54 = vrot.slane %v5044_v41, 1  ;;  %v5049_v17 = vrot.slane %v5047_v46, 2  ;;  %v5778_v41 = vld [vmem:[%s22866_s9 + $0x38] sm:$0xff] }
 0x4f3   : > { %5818 = vperm.xlu1 %19154, %v5778_v41  }
 0x4f4   : > { %v5050_v25 = vor.u32 %v5049_v17, %v5046_v54  ;;  %v5780_v54 = vld [vmem:[%s22866_s9 + $0x48] sm:$0x3f]  ;;  %v5363_v17 = vrot.slane %v20890_v51, 2 }
 0x4f5   : > { %17084 = vmatmul.mubr.msk.bf16.gmra.mrb[72].mxu1 %vm4548_vm12, %v15127_v20  ;;  %v5084_v20 = vrot.slane %v5082_v18, 2  ;;  %v5493_v18 = vrot.slane %v5491_v60, 2 }
 0x4f6   : > { %17089 = vmatprep.mubr.msk.bf16.mxu1 %vm19624_vm8, %v19623_v34  ;;  %v5059_v26 = vsel %vm2063_vm4, %v5050_v25, %v5058_v22  ;;  %v5364_v22 = vsel %vm2506_vm5, %v5361_v5, %v5363_v17  ;;  %v5366_v25 = vsel %vm2506_vm5, %v5363_v17, %v5365_v1 }
 0x4f7   : > { %v5085_v13 = vor.u32 %v5084_v20, %v5081_v56  ;;  %5828 = vperm.xlu1 %19154, %v5780_v54   ;;  %v13015_v56 = vld [vmem:[%s22867_s10 + $0x10] sm:$0x3f]  ;;  %v5647_v54 = vrot.slane %v20870_v37, 3 }
 0x4f8   : > { %v12134_v20 = vld [vmem:[%s22867_s10 + $0x10] sm:$0x3f] }
 0x4f9   : > { %v5086_v32 = vsel %vm2063_vm4, %v5076_v12, %v5085_v13 }
 0x4fd   : > { %17090 = vmatmul.mubr.msk.bf16.vlgmr.msra.gmra.mrb[56].mxu1 %vm4548_vm12, %v4739_v31 }
 0x4fe   : > { %17110 = vmatpush3.bf16.msra.mxu1 %v19270_v19  ;;  %17093 = vmatprep.mubr.msk.bf16.mxu1 %vm19624_vm8, %v19623_v34  ;;  %v5090_v19 = vrot.slane %v5088_v11, 2  ;;  %v5500_v11 = vshrl.u32 %v20890_v51, 16 }
 0x4ff   : > { %17131 = vmatprep.subr.bf16.mxu1 %v19623_v34 }
 0x500   : > { %v5091_v31 = vsel %vm2063_vm4, %v5085_v13, %v5090_v19  ;;  %v5503_v19 = vshll.u32 %v20890_v51, 16 }
 0x505   : > { %17094 = vmatmul.mubr.msk.bf16.gmra.mrb[60].mxu1 %vm4548_vm12, %v4741_v42  ;;  %v15172_v42 = vcombine.low %v5196_v40, %v5002_v0  ;;  %v5779_v0 = vld [vmem:[%s22866_s9 + $0x40] sm:$0xff] }
 0x506   : > { %17097 = vmatprep.mubr.msk.bf16.mxu1 %vm19624_vm8, %v19623_v34 }
 0x50d   : > { %17098 = vmatmul.mubr.msk.bf16.gmra.mrb[64].mxu1 %vm4548_vm12, %v4743_v43  ;;  %v5203_v43 = vrot.slane %v15172_v42, 2  ;;  %v19293_v42 = vld [vmem:[%s22880_s2 + $0x40] sm:$0xff]  }
 0x50e   : > { %17101 = vmatprep.mubr.msk.bf16.mxu1 %vm19624_vm8, %v19623_v34 }
 0x515   : > { %17102 = vmatmul.mubr.msk.bf16.gmra.mrb[68].mxu1 %vm4548_vm12, %v4745_v38  ;;  %v5205_v38 = vsel %vm2506_vm5, %v5203_v43, %v5204_v10  ;;  %v5502_v43 = vrot.slane %v5500_v11, 2 }
 0x516   : > { %17105 = vmatprep.mubr.msk.bf16.mxu1 %vm19624_vm8, %v19623_v34 }
 0x51d   : > { %17106 = vmatmul.mubr.msk.bf16.gmra.mrb[72].mxu1 %vm4548_vm12, %v4744_v48  ;;  %v19285_v48 = vld [vmem:[%s22880_s2 + $0x30] sm:$0xff]  }
 0x51e   : > { %17111 = vmatprep.mubr.msk.bf16.mxu1 %vm19624_vm8, %v19623_v34 }
 0x525   : > { %17112 = vmatmul.mubr.msk.bf16.vlgmr.msra.gmra.mrb[56].mxu1 %vm4548_vm12, %v4890_v59  ;;  %v5772_v59 = vld [vmem:[%s22866_s9 + $0x8] sm:$0xff] }
 0x526   : > { %17132 = vmatpush3.bf16.msra.mxu1 %v19273_v63  ;;  %17115 = vmatprep.mubr.msk.bf16.mxu1 %vm19624_vm8, %v19623_v34  ;;  %v5771_v63 = vld [vmem:[%s22866_s9] sm:$0xff] }
 0x527   : > { %17153 = vmatprep.subr.bf16.mxu1 %v19623_v34  ;;  %5783 = vperm.xlu0 %19153, %v5771_v63  }
 0x528   : > { %7406 = vperm.xlu1 %19154, %v5772_v59  }
 0x52b   : > { %5788 = vperm.xlu0 %19153, %v5772_v59   ;;  %v5514_v59 = vrot.slane %v5512_v62, 3 }
 0x52c   : > { %7416 = vperm.xlu1 %19154, %v5774_v55   ;;  %v19294_v55 = vld [vmem:[#allocation2 + $0x30] ss:$0 sps:$4 sm:$0x33]  }
 0x52d   : > { %17116 = vmatmul.mubr.msk.bf16.gmra.mrb[60].mxu1 %vm4548_vm12, %v4892_v4  ;;  %v5775_v4 = vld [vmem:[%s22866_s9 + $0x20] sm:$0xff] }
 0x52e   : > { %17119 = vmatprep.mubr.msk.bf16.mxu1 %vm19624_vm8, %v19623_v34 }
 0x52f   : > { %5803 = vperm.xlu0 %19153, %v5775_v4  }
 0x530   : > { %7426 = vperm.xlu1 %19154, %v5776_v14   ;;  %v5530_v14 = vshll.u32 %v19294_v55, 16 }
 0x533   : > { %5813 = vperm.xlu0 %19153, %v5777_v47  }
 0x534   : > { %7436 = vperm.xlu1 %19154, %v5778_v41  }
 0x535   : > { %17120 = vmatmul.mubr.msk.bf16.gmra.mrb[64].mxu1 %vm4548_vm12, %v4894_v36  ;;  %v5212_v36 = vrot.slane %v19283_v29, 2 }
 0x536   : > { %17123 = vmatprep.mubr.msk.bf16.mxu1 %vm19624_vm8, %v19623_v34 }
 0x537   : > { %5823 = vperm.xlu0 %19153, %v5779_v0  }
 0x538   : > { %7446 = vperm.xlu1 %19154, %v7398_v52  }
 0x53b   : > { %7401 = vperm.xlu0 %19153, %v5771_v63  }
 0x53c   : > { %11277 = vperm.xlu1 %19154, %v12133_v27  }
 0x53d   : > { %17124 = vmatmul.mubr.msk.bf16.gmra.mrb[68].mxu1 %vm4548_vm12, %v4896_v7  ;;  %v5213_v7 = vsel %vm2506_vm5, %v5210_v44, %v5212_v36 }
 0x53e   : > { %17127 = vmatprep.mubr.msk.bf16.mxu1 %vm19624_vm8, %v19623_v34 }
 0x53f   : > { %7411 = vperm.xlu0 %19153, %v5773_v35  }
 0x543   : > { %7421 = vperm.xlu0 %19153, %v5775_v4  }
 0x545   : > { %17128 = vmatmul.mubr.msk.bf16.gmra.mrb[72].mxu1 %vm4548_vm12, %v4895_v2  ;;  %v20864_v2 = vld [vmem:[#allocation2 + $0xc] sm:$0xf] }
 0x546   : > { %17133 = vmatprep.mubr.msk.bf16.mxu1 %vm19624_vm8, %v19623_v34  ;;  %v20879_v15 = vcombine.low %v5318_v3, %v20864_v2 }
 0x547   : > { %7431 = vperm.xlu0 %19153, %v5777_v47  }
 0x548   : > { %v5360_v46 = vrot.slane %v20879_v15, 2  ;;  %v5483_v30 = vshrl.u32 %v20879_v15, 16  ;;  %v5486_v12 = vshll.u32 %v20879_v15, 16 }
 0x54a   : > { %v5362_v21 = vsel %vm2506_vm5, %v5360_v46, %v5361_v5  ;;  %v5485_v13 = vrot.slane %v5483_v30, 2  ;;  %v5488_v29 = vrot.slane %v5486_v12, 3  ;;  %v5532_v5 = vrot.slane %v5530_v14, 3 }
 0x54b   : > { %7441 = vperm.xlu0 %19153, %v5779_v0  }
 0x54c   : > { %v5489_v40 = vor.u32 %v5488_v29, %v5485_v13 }
 0x54d   : > { %17134 = vmatmul.mubr.msk.bf16.vlgmr.msra.gmra.mrb[56].mxu1 %vm4548_vm12, %v5059_v26  ;;  %v11267_v26 = vld [vmem:[%s22867_s10] sm:$0xff] }
 0x54e   : > { %17154 = vmatpush3.bf16.msra.mxu1 %v19279_v50  ;;  %17137 = vmatprep.mubr.msk.bf16.mxu1 %vm19624_vm8, %v19623_v34  ;;  %v20908_v50 = vld [vmem:[#allocation2 + $0x28] sm:$0xff]  }
 0x54f   : > { %17175 = vmatprep.subr.bf16.mxu1 %v19623_v34  ;;  %11272 = vperm.xlu0 %19153, %v11267_v26   ;;  %v5367_v9 = vrot.slane %v20908_v50, 2  ;;  %v5521_v4 = vshll.u32 %v20908_v50, 16 }
 0x550   : > { %12137 = vperm.xlu1 %19154, %v11267_v26  }
 0x551   : > { %v5368_v49 = vsel %vm2506_vm5, %v5365_v1, %v5367_v9  ;;  %v5523_v36 = vrot.slane %v5521_v4, 3  ;;  %v5649_v1 = vrot.slane %v20890_v51, 3 }
 0x553   : > { %11282 = vperm.xlu0 %19153, %v11269_v33  }
 0x554   : > { %12147 = vperm.xlu1 %19154, %v12134_v20  }
 0x555   : > { %17138 = vmatmul.mubr.msk.bf16.gmra.mrb[60].mxu1 %vm4548_vm12, %v5068_v45  ;;  %v5369_v45 = vrot.slane %v19292_v6, 2 }
 0x556   : > { %17141 = vmatprep.mubr.msk.bf16.mxu1 %vm19624_vm8, %v19623_v34 }
 0x557   : > { %12142 = vperm.xlu0 %19153, %v12133_v27   ;;  %v5370_v16 = vsel %vm2506_vm5, %v5367_v9, %v5369_v45  ;;  %v5655_v9 = vrot.slane %v19294_v55, 3 }
 0x558   : > { %13023 = vperm.xlu1 %19154, %v12133_v27  }
 0x55b   : > { %13018 = vperm.xlu0 %19153, %v11267_v26   ;;  %v5653_v26 = vrot.slane %v20908_v50, 3 }
 0x55d   : > { %17142 = vmatmul.mubr.msk.bf16.gmra.mrb[64].mxu1 %vm4548_vm12, %v5077_v39  ;;  %v5496_v39 = vrot.slane %v5494_v28, 3  ;;  %v5656_v33 = vsel %vm3706_vm7, %v5653_v26, %v5655_v9 }
 0x55e   : > { %17145 = vmatprep.mubr.msk.bf16.mxu1 %vm19624_vm8, %v19623_v34 }
 0x55f   : > { %13028 = vperm.xlu0 %19153, %v13015_v56  }
 0x565   : > { %17146 = vmatmul.mubr.msk.bf16.gmra.mrb[68].mxu1 %vm4548_vm12, %v5086_v32  ;;  %v5497_v32 = vor.u32 %v5496_v39, %v5493_v18  ;;  %v5794_v39 = vpop.permute.xlu1 %5793 }
 0x566   : > { %17149 = vmatprep.mubr.msk.bf16.mxu1 %vm19624_vm8, %v19623_v34 }
 0x567   : > { %v5498_v10 = vsel %vm3259_vm6, %v5489_v40, %v5497_v32 }
 0x56d   : > { %17150 = vmatmul.mubr.msk.bf16.gmra.mrb[72].mxu1 %vm4548_vm12, %v5091_v31  ;;  %v14489_v31 = vld [vmem:[%s22868_s11] sm:$0x3f] }
 0x56e   : > { %17155 = vmatprep.mubr.msk.bf16.mxu1 %vm19624_vm8, %v19623_v34  ;;  %14492 = vperm.xlu0 %19153, %v14489_v31  }
 0x575   : > { %17156 = vmatmul.mubr.msk.bf16.vlgmr.msra.gmra.mrb[56].mxu1 %vm4548_vm12, %v5205_v38  ;;  %v13866_v38 = vld [vmem:[%s22868_s11] sm:$0x3f] }
 0x576   : > { %17176 = vmatpush3.bf16.msra.mxu1 %v19285_v48  ;;  %17159 = vmatprep.mubr.msk.bf16.mxu1 %vm19624_vm8, %v19623_v34  ;;  %v5505_v48 = vrot.slane %v5503_v19, 3 }
 0x577   : > { %17197 = vmatprep.subr.bf16.mxu1 %v19623_v34  ;;  %13869 = vperm.xlu1 %19154, %v13866_v38  }
 0x578   : > { %v5506_v53 = vor.u32 %v5505_v48, %v5502_v43 }
 0x57d   : > { %17160 = vmatmul.mubr.msk.bf16.gmra.mrb[60].mxu1 %vm4548_vm12, %v5207_v58  ;;  %v5509_v58 = vshrl.u32 %v20901_v24, 16 }
 0x57e   : > { %17163 = vmatprep.mubr.msk.bf16.mxu1 %vm19624_vm8, %v19623_v34 }
 0x57f   : > { %v5511_v63 = vrot.slane %v5509_v58, 2 }
 0x581   : > { %v5515_v44 = vor.u32 %v5514_v59, %v5511_v63  ;;  %v5799_v63 = vpop.permute.xlu1 %5798 }
 0x583   : > { %v5516_v35 = vsel %vm3259_vm6, %v5506_v53, %v5515_v44 }
 0x585   : > { %17164 = vmatmul.mubr.msk.bf16.gmra.mrb[64].mxu1 %vm4548_vm12, %v5209_v57  ;;  %v5507_v57 = vsel %vm3259_vm6, %v5497_v32, %v5506_v53 }
 0x586   : > { %17167 = vmatprep.mubr.msk.bf16.mxu1 %vm19624_vm8, %v19623_v34 }
 0x58d   : > { %17168 = vmatmul.mubr.msk.bf16.gmra.mrb[68].mxu1 %vm4548_vm12, %v5211_v8  ;;  %v5518_v8 = vshrl.u32 %v20908_v50, 16  ;;  %v19299_v50 = vld [vmem:[%s22880_s2 + $0x68] sm:$0xff]  }
 0x58e   : > { %17171 = vmatprep.mubr.msk.bf16.mxu1 %vm19624_vm8, %v19623_v34  ;;  %17330 = vmatpush3.bf16.msra.mxu0 %v19299_v50 }
 0x58f   : > { %v5520_v47 = vrot.slane %v5518_v8, 2  ;;  %17373 = vmatprep.subr.bf16.mxu0 %v19623_v34 }
 0x591   : > { %v5524_v0 = vor.u32 %v5523_v36, %v5520_v47 }
 0x593   : > { %v5525_v3 = vsel %vm3259_vm6, %v5515_v44, %v5524_v0 }
 0x595   : > { %17172 = vmatmul.mubr.msk.bf16.gmra.mrb[72].mxu1 %vm4548_vm12, %v5213_v7  ;;  %v5527_v7 = vshrl.u32 %v19294_v55, 16 }
 0x596   : > { %17177 = vmatprep.mubr.msk.bf16.mxu1 %vm19624_vm8, %v19623_v34 }
 0x597   : > { %v5529_v15 = vrot.slane %v5527_v7, 2 }
 0x599   : > { %v5533_v41 = vor.u32 %v5532_v5, %v5529_v15 }
 0x59b   : > { %v5534_v46 = vsel %vm3259_vm6, %v5524_v0, %v5533_v41 }
 0x59d   : > { %17178 = vmatmul.mubr.msk.bf16.vlgmr.msra.gmra.mrb[56].mxu1 %vm4548_vm12, %v5362_v21 }
 0x59e   : > { %17198 = vmatpush3.bf16.msra.mxu1 %v19288_v23  ;;  %17181 = vmatprep.mubr.msk.bf16.mxu1 %vm19624_vm8, %v19623_v34  ;;  %v5639_v23 = vld [vmem:[#allocation2 + $0x8] sm:$0x8] }
 0x59f   : > { %17219 = vmatprep.subr.bf16.mxu1 %v19623_v34  ;;  %v15204_v21 = vcombine.low %v5639_v23, %v20864_v2  ;;  %v5651_v2 = vrot.slane %v20901_v24, 3  ;;  %v19296_v24 = vld [vmem:[%s22880_s2 + $0x50] sm:$0xff]  }
 0x5a1   : > { %v5646_v17 = vrot.slane %v15204_v21, 3  ;;  %v5652_v37 = vsel %vm3706_vm7, %v5649_v1, %v5651_v2  ;;  %v5654_v51 = vsel %vm3706_vm7, %v5651_v2, %v5653_v26  ;;  %v6005_v26 = vld [vmem:[#allocation3] sm:$0xf] }
 0x5a5   : > { %17182 = vmatmul.mubr.msk.bf16.gmra.mrb[60].mxu1 %vm4548_vm12, %v5364_v22  ;;  %v5648_v22 = vsel %vm3706_vm7, %v5646_v17, %v5647_v54 }
 0x5a6   : > { %17185 = vmatprep.mubr.msk.bf16.mxu1 %vm19624_vm8, %v19623_v34  ;;  %v5784_v52 = vpop.permute.xlu0 %5783 }
 0x5aa   : > { %v5789_v12 = vpop.permute.xlu0 %5788 }
 0x5ad   : > { %17186 = vmatmul.mubr.msk.bf16.gmra.mrb[64].mxu1 %vm4548_vm12, %v5366_v25  ;;  %v5650_v25 = vsel %vm3706_vm7, %v5647_v54, %v5649_v1 }
 0x5ae   : > { %17189 = vmatprep.mubr.msk.bf16.mxu1 %vm19624_vm8, %v19623_v34  ;;  %v5804_v23 = vpop.permute.xlu0 %5803 }
 0x5b5   : > { %17190 = vmatmul.mubr.msk.bf16.gmra.mrb[68].mxu1 %vm4548_vm12, %v5368_v49 }
 0x5b6   : > { %17193 = vmatprep.mubr.msk.bf16.mxu1 %vm19624_vm8, %v19623_v34 }
 0x5bd   : > { %17194 = vmatmul.mubr.msk.bf16.gmra.mrb[72].mxu1 %vm4548_vm12, %v5370_v16 }
 0x5be   : > { %17199 = vmatprep.mubr.msk.bf16.mxu1 %vm19624_vm8, %v19623_v34 }
 0x5c5   : > { %17200 = vmatmul.mubr.msk.bf16.vlgmr.msra.gmra.mrb[56].mxu1 %vm4548_vm12, %v5498_v10  ;;  %v5987_v10 = vld [vmem:[#allocation3 + $0x4] sm:$0xe] }
 0x5c6   : > { %17220 = vmatpush3.bf16.msra.mxu1 %v19293_v42  ;;  %17203 = vmatprep.mubr.msk.bf16.mxu1 %vm19624_vm8, %v19623_v34 }
 0x5c7   : > { %17241 = vmatprep.subr.bf16.mxu1 %v19623_v34 }
 0x5cd   : > { %17204 = vmatmul.mubr.msk.bf16.gmra.mrb[60].mxu1 %vm4548_vm12, %v5507_v57 }
 0x5ce   : > { %17207 = vmatprep.mubr.msk.bf16.mxu1 %vm19624_vm8, %v19623_v34 }
 0x5d5   : > { %17208 = vmatmul.mubr.msk.bf16.gmra.mrb[64].mxu1 %vm4548_vm12, %v5516_v35 }
 0x5d6   : > { %17211 = vmatprep.mubr.msk.bf16.mxu1 %vm19624_vm8, %v19623_v34 }
 0x5dd   : > { %17212 = vmatmul.mubr.msk.bf16.gmra.mrb[68].mxu1 %vm4548_vm12, %v5525_v3 }
 0x5de   : > { %17215 = vmatprep.mubr.msk.bf16.mxu1 %vm19624_vm8, %v19623_v34 }
 0x5e5   : > { %17216 = vmatmul.mubr.msk.bf16.gmra.mrb[72].mxu1 %vm4548_vm12, %v5534_v46 }
 0x5e6   : > { %17221 = vmatprep.mubr.msk.bf16.mxu1 %vm19624_vm8, %v19623_v34 }
 0x5ed   : > { %17222 = vmatmul.mubr.msk.bf16.vlgmr.msra.gmra.mrb[56].mxu1 %vm4548_vm12, %v5648_v22 }
 0x5ee   : > { %17225 = vmatprep.mubr.msk.bf16.mxu1 %vm19624_vm8, %v19623_v34  ;;  %17242 = vmatpush3.bf16.msra.mxu1 %v19296_v24 }
 0x5ef   : > { %17263 = vmatprep.subr.bf16.mxu1 %v19623_v34 }
 0x5f5   : > { %17226 = vmatmul.mubr.msk.bf16.gmra.mrb[60].mxu1 %vm4548_vm12, %v5650_v25 }
 0x5f6   : > { %17229 = vmatprep.mubr.msk.bf16.mxu1 %vm19624_vm8, %v19623_v34 }
 0x5fd   : > { %17230 = vmatmul.mubr.msk.bf16.gmra.mrb[64].mxu1 %vm4548_vm12, %v5652_v37 }
 0x5fe   : > { %17233 = vmatprep.mubr.msk.bf16.mxu1 %vm19624_vm8, %v19623_v34 }
 0x605   : > { %17234 = vmatmul.mubr.msk.bf16.gmra.mrb[68].mxu1 %vm4548_vm12, %v5654_v51  ;;  %v5809_v51 = vpop.permute.xlu1 %5808 }
 0x606   : > { %17237 = vmatprep.mubr.msk.bf16.mxu1 %vm19624_vm8, %v19623_v34 }
 0x60d   : > { %17238 = vmatmul.mubr.msk.bf16.gmra.mrb[72].mxu1 %vm4548_vm12, %v5656_v33 }
 0x60e   : > { %17243 = vmatprep.mubr.msk.bf16.mxu1 %vm19624_vm8, %v19623_v34 }
 0x6c0   : > { %v5712_v49 = vpop.f32.mrb[56].mxu1 }
 0x6c1   : > { %v5761_v6 = vmax.f32 %v5712_v49, 0.0  ;;  %v17223_v27 = vpop.f32.mrb[57].mxu1 }
 0x6c2   : > { %v5715_v45 = vpop.f32.mrb[58].mxu1 }
 0x6c3   : > { %v5831_v60 = vmul.f32 %v5784_v52, %v5761_v6  ;;  %v5762_v28 = vmax.f32 %v5715_v45, 0.0  ;;  %v17224_v30 = vpop.f32.mrb[59].mxu1 }
 0x6c5   : > { %v15963_v16 = vpack.c.bf16 %v5831_v60, %v5831_v60  ;;  %v5832_v18 = vmul.f32 %v5789_v12, %v5762_v28 }
 0x6c7   : > { %v5875_v56 = vshrl.u32 %v15963_v16, 16  ;;  %v5878_v20 = vshll.u32 %v15963_v16, 16  ;;  %v15964_v13 = vpack.c.bf16 %v5832_v18, %v5832_v18 }
 0x6c8   : > { %v5720_v29 = vpop.f32.mrb[60].mxu1 }
 0x6c9   : > { %v5877_v32 = vrot.slane %v5875_v56, 6  ;;  %v5880_v11 = vrot.slane %v5878_v20, 7  ;;  %v5884_v19 = vshrl.u32 %v15964_v13, 16  ;;  %v5887_v31 = vshll.u32 %v15964_v13, 16  ;;  %v17227_v40 = vpop.f32.mrb[61].mxu1 }
 0x6ca   : > { %v5763_v43 = vmax.f32 %v5720_v29, 0.0  ;;  %v5723_v48 = vpop.f32.mrb[62].mxu1 }
 0x6cb   : > { %v5881_v38 = vor.u32 %v5880_v11, %v5877_v32  ;;  %v5886_v53 = vrot.slane %v5884_v19, 6  ;;  %v5889_v58 = vrot.slane %v5887_v31, 7  ;;  %v5764_v62 = vmax.f32 %v5723_v48, 0.0  ;;  %v17228_v57 = vpop.f32.mrb[63].mxu1 }
 0x6cc   : > { %v5833_v44 = vmul.f32 %v5794_v39, %v5763_v43  ;;  %v5814_v43 = vpop.permute.xlu0 %5813  ;;  %v5819_v57 = vpop.permute.xlu1 %5818 }
 0x6cd   : > { %v5882_v8 = vrot.slane %v5881_v38, 4  ;;  %v5988_v4 = vsel %vm21013_vm9, %v5881_v38, %v5987_v10  ;;  %v5890_v35 = vor.u32 %v5889_v58, %v5886_v53  ;;  %v5834_v47 = vmul.f32 %v5799_v63, %v5764_v62 }
 0x6ce   : > { %5989 = vst [vmem:[#allocation3 + $0x4] sm:$0xe] %v5988_v4  ;;  %v15965_v36 = vpack.c.bf16 %v5833_v44, %v5833_v44 }
 0x6cf   : > { %v5891_v55 = vsel %vm21019_vm11, %v5882_v8, %v5890_v35  ;;  %v15966_v0 = vpack.c.bf16 %v5834_v47, %v5834_v47  ;;  %v5892_v9 = vrot.slane %v5890_v35, 4 }
 0x6d0   : > { %5990 = vst.msk [vmem:[#allocation3 + $0x8] sm:$0xf] %vm439_vm10, %v5891_v55  ;;  %v5894_v7 = vshrl.u32 %v15965_v36, 16  ;;  %v5897_v14 = vshll.u32 %v15965_v36, 16  ;;  %v5728_v3 = vpop.f32.mrb[64].mxu1 }
 0x6d1   : > { %v5904_v15 = vshrl.u32 %v15966_v0, 16  ;;  %v5907_v5 = vshll.u32 %v15966_v0, 16  ;;  %v5765_v41 = vmax.f32 %v5728_v3, 0.0  ;;  %v17231_v46 = vpop.f32.mrb[65].mxu1  ;;  %v21046_v0 = vld [vmem:[#allocation3] sm:$0xe] }
 0x6d2   : > { %v5896_v21 = vrot.slane %v5894_v7, 6  ;;  %v5899_v54 = vrot.slane %v5897_v14, 7  ;;  %v5731_v17 = vpop.f32.mrb[66].mxu1 }
 0x6d3   : > { %v5906_v22 = vrot.slane %v5904_v15, 6  ;;  %v5909_v1 = vrot.slane %v5907_v5, 7  ;;  %v5835_v25 = vmul.f32 %v5804_v23, %v5765_v41  ;;  %v5766_v2 = vmax.f32 %v5731_v17, 0.0  ;;  %v17232_v37 = vpop.f32.mrb[67].mxu1 }
 0x6d4   : > { %v5900_v33 = vor.u32 %v5899_v54, %v5896_v21 }
 0x6d5   : > { %v5910_v24 = vor.u32 %v5909_v1, %v5906_v22  ;;  %v15967_v50 = vpack.c.bf16 %v5835_v25, %v5835_v25  ;;  %v5836_v52 = vmul.f32 %v5809_v51, %v5766_v2  ;;  %v21028_v49 = vld [vmem:[#allocation3 + $0x4] sm:$0xf]  ;;  %v19302_v22 = vld [vmem:[%s22880_s2 + $0x48] sm:$0xff]  }
 0x6d6   : > { %v5901_v6 = vsel %vm21019_vm11, %v5892_v9, %v5900_v33  ;;  %v5902_v27 = vrot.slane %v5900_v33, 4  ;;  %v21033_v45 = vcombine.low %v6005_v26, %v21028_v49  ;;  %v6544_v18 = vld [vmem:[#allocation3 + $0x4] sm:$0xe]  ;;  %v15245_v1 = vcombine.low %v21046_v0, %v21028_v49  ;;  %v5824_v33 = vpop.permute.xlu0 %5823 }
 0x6d7   : > { %5991 = vst.msk [vmem:[#allocation3 + $0xc] sm:$0xf] %vm439_vm10, %v5901_v6  ;;  %v5914_v60 = vshrl.u32 %v15967_v50, 16  ;;  %v5917_v28 = vshll.u32 %v15967_v50, 16  ;;  %v15968_v30 = vpack.c.bf16 %v5836_v52, %v5836_v52  ;;  %v21038_v39 = vld [vmem:[#allocation3 + $0x8] sm:$0xf] }
 0x6d8   : > { %v5911_v12 = vsel %vm21019_vm11, %v5902_v27, %v5910_v24  ;;  %v5736_v16 = vpop.f32.mrb[68].mxu1  ;;  %v5912_v11 = vrot.slane %v5910_v24, 4  ;;  %v6050_v40 = vshll.u32 %v21033_v45, 16  ;;  %v15267_v10 = vcombine.low %v6544_v18, %v21038_v39  ;;  %v5829_v18 = vpop.permute.xlu1 %5828 }
 0x6d9   : > { %5992 = vst.msk [vmem:[#allocation3 + $0x10] sm:$0xf] %vm439_vm10, %v5911_v12  ;;  %v5916_v56 = vrot.slane %v5914_v60, 6  ;;  %v5919_v20 = vrot.slane %v5917_v28, 7  ;;  %v5924_v13 = vshrl.u32 %v15968_v30, 16  ;;  %v5927_v29 = vshll.u32 %v15968_v30, 16 }
 0x6da   : > { %v17235_v32 = vpop.f32.mrb[69].mxu1  ;;  %v5767_v19 = vmax.f32 %v5736_v16, 0.0  ;;  %v6048_v44 = vshrl.u32 %v21033_v45, 16  ;;  %v6587_v8 = vshrl.u32 %v15267_v10, 16  ;;  %v6590_v4 = vshll.u32 %v15267_v10, 16 }
 0x6db   : > { %v5739_v31 = vpop.f32.mrb[70].mxu1  ;;  %v5920_v48 = vor.u32 %v5919_v20, %v5916_v56  ;;  %v5926_v38 = vrot.slane %v5924_v13, 6  ;;  %v5929_v53 = vrot.slane %v5927_v29, 7  ;;  %v6052_v3 = vrot.slane %v6050_v40, 1 }
 0x6dc   : > { %v5768_v58 = vmax.f32 %v5739_v31, 0.0  ;;  %v17236_v62 = vpop.f32.mrb[71].mxu1  ;;  %v5837_v63 = vmul.f32 %v5814_v43, %v5767_v19  ;;  %v21053_v46 = vrot.slane %v6587_v8, 1  ;;  %v6592_v9 = vrot.slane %v6590_v4, 2 }
 0x6dd   : > { %v5921_v35 = vsel %vm21019_vm11, %v5912_v11, %v5920_v48  ;;  %v5922_v47 = vrot.slane %v5920_v48, 4  ;;  %v5930_v36 = vor.u32 %v5929_v53, %v5926_v38  ;;  %v6053_v6 = vor.u32 %v6052_v3, %v6048_v44 }
 0x6de   : > { %v5838_v55 = vmul.f32 %v5819_v57, %v5768_v58  ;;  %5993 = vst.msk [vmem:[#allocation3 + $0x14] sm:$0xf] %vm439_vm10, %v5921_v35  ;;  %v15969_v7 = vpack.c.bf16 %v5837_v63, %v5837_v63  ;;  %v21049_v14 = vld [vmem:[#allocation3 + $0x8] sm:$0xff]   ;;  %v6593_v57 = vor.u32 %v6592_v9, %v21053_v46 }
 0x6df   : > { %v5931_v15 = vsel %vm21019_vm11, %v5922_v47, %v5930_v36  ;;  %v5932_v5 = vrot.slane %v5930_v36, 4  ;;  %v6055_v17 = vshll.u32 %v21049_v14, 16  ;;  %v6059_v40 = vshrl.u32 %v21049_v14, 16  ;;  %v19310_v47 = vld [vmem:[%s22880_s2 + $0x78] sm:$0xff]  }
 0x6e0   : > { %v15970_v41 = vpack.c.bf16 %v5838_v55, %v5838_v55  ;;  %5994 = vst.msk [vmem:[#allocation3 + $0x18] sm:$0xf] %vm439_vm10, %v5931_v15  ;;  %v5934_v23 = vshrl.u32 %v15969_v7, 16  ;;  %v5937_v21 = vshll.u32 %v15969_v7, 16  ;;  %v5744_v54 = vpop.f32.mrb[72].mxu1  ;;  %v21062_v51 = vld [vmem:[#allocation3 + $0xc] sm:$0xff]  }
 0x6e1   : > { %v5769_v37 = vmax.f32 %v5744_v54, 0.0  ;;  %v17239_v26 = vpop.f32.mrb[73].mxu1  ;;  %v6057_v27 = vrot.slane %v6055_v17, 1  ;;  %v6595_v13 = vshrl.u32 %v21062_v51, 16  ;;  %v6598_v29 = vshll.u32 %v21062_v51, 16 }
 0x6e2   : > { %v5944_v25 = vshrl.u32 %v15970_v41, 16  ;;  %v5947_v2 = vshll.u32 %v15970_v41, 16  ;;  %v5936_v24 = vrot.slane %v5934_v23, 6  ;;  %v5939_v50 = vrot.slane %v5937_v21, 7  ;;  %v5747_v52 = vpop.f32.mrb[74].mxu1 }
 0x6e3   : > { %v5839_v30 = vmul.f32 %v5824_v33, %v5769_v37  ;;  %v5770_v12 = vmax.f32 %v5747_v52, 0.0  ;;  %v17240_v16 = vpop.f32.mrb[75].mxu1  ;;  %v6058_v20 = vsel %vm586_vm1, %v6053_v6, %v6057_v27  ;;  %v6597_v48 = vrot.slane %v6595_v13, 1 }
 0x6e4   : > { %v5946_v60 = vrot.slane %v5944_v25, 6  ;;  %v5949_v28 = vrot.slane %v5947_v2, 7  ;;  %v5940_v56 = vor.u32 %v5939_v50, %v5936_v24  ;;  %17244 = vmatmul.mubr.msk.bf16.vlgmr.msra.gmra.mrb[76].mxu1 %vm4548_vm12, %v6058_v20  ;;  %v6600_v38 = vrot.slane %v6598_v29, 2  ;;  %v6002_v25 = vld [vmem:[#allocation3 + $0x2c] sm:$0x1] }
 0x6e5   : > { %v15971_v11 = vpack.c.bf16 %v5839_v30, %v5839_v30  ;;  %v5840_v19 = vmul.f32 %v5829_v18, %v5770_v12  ;;  %v21068_v31 = vld [vmem:[#allocation3 + $0x10] sm:$0xff]   ;;  %17264 = vmatpush3.bf16.msra.mxu1 %v19302_v22  ;;  %17247 = vmatprep.mubr.msk.bf16.mxu1 %vm19624_vm8, %v19623_v34  ;;  %v6061_v4 = vor.u32 %v6059_v40, %v6057_v27  ;;  %v6280_v27 = vrot.slane %v15245_v1, 1 }
 0x6e6   : > { %v5950_v32 = vor.u32 %v5949_v28, %v5946_v60  ;;  %v5941_v10 = vsel %vm21019_vm11, %v5932_v5, %v5940_v56  ;;  %v5942_v43 = vrot.slane %v5940_v56, 4  ;;  %17285 = vmatprep.subr.bf16.mxu1 %v19623_v34  ;;  %v6601_v8 = vor.u32 %v6600_v38, %v6597_v48 }
 0x6e7   : > { %5995 = vst.msk [vmem:[#allocation3 + $0x1c] sm:$0xf] %vm439_vm10, %v5941_v10  ;;  %v5954_v53 = vshrl.u32 %v15971_v11, 16  ;;  %v5957_v58 = vshll.u32 %v15971_v11, 16  ;;  %v15972_v62 = vpack.c.bf16 %v5840_v19, %v5840_v19  ;;  %v21077_v63 = vld [vmem:[#allocation3 + $0x14] sm:$0xff]   ;;  %v6063_v35 = vshll.u32 %v21068_v31, 16 }
 0x6e8   : > { %v5951_v44 = vsel %vm21019_vm11, %v5942_v43, %v5950_v32  ;;  %v6602_v15 = vsel %vm2063_vm4, %v6593_v57, %v6601_v8  ;;  %v6604_v41 = vshrl.u32 %v21077_v63, 16  ;;  %v6607_v46 = vshll.u32 %v21077_v63, 16  ;;  %v21131_v11 = vld [vmem:[#allocation3 + $0x30] ss:$0 sps:$4 sm:$0x33]  }
 0x6e9   : > { %5996 = vst.msk [vmem:[#allocation3 + $0x20] sm:$0xf] %vm439_vm10, %v5951_v44  ;;  %v5956_v36 = vrot.slane %v5954_v53, 6  ;;  %v5959_v55 = vrot.slane %v5957_v58, 7  ;;  %v5964_v7 = vshrl.u32 %v15972_v62, 16  ;;  %v5967_v3 = vshll.u32 %v15972_v62, 16  ;;  %17332 = vmatmul.mubr.msk.bf16.vlgmr.msra.gmra.mrb[36].mxu0 %vm4548_vm12, %v6602_v15 }
 0x6ea   : > { %v6065_v5 = vrot.slane %v6063_v35, 1  ;;  %v5952_v23 = vrot.slane %v5950_v32, 4  ;;  %17335 = vmatprep.mubr.msk.bf16.mxu0 %vm19624_vm8, %v19623_v34  ;;  %v6606_v37 = vrot.slane %v6604_v41, 1  ;;  %v6609_v26 = vrot.slane %v6607_v46, 2  ;;  %17374 = vmatpush3.bf16.msra.mxu0 %v19310_v47  ;;  %v21153_v35 = vld [vmem:[#allocation3 + $0xc] sm:$0xf] }
 0x6eb   : > { %v5960_v21 = vor.u32 %v5959_v55, %v5956_v36  ;;  %v5966_v54 = vrot.slane %v5964_v7, 6  ;;  %v5969_v17 = vrot.slane %v5967_v3, 7  ;;  %17417 = vmatprep.subr.bf16.mxu0 %v19623_v34  ;;  %v6067_v30 = vshrl.u32 %v21068_v31, 16  ;;  %v6739_v7 = vld [vmem:[#allocation3 + $0x4] sm:$0xc] }
 0x6ec   : > { %v6066_v2 = vsel %vm586_vm1, %v6061_v4, %v6065_v5  ;;  %v6610_v52 = vor.u32 %v6609_v26, %v6606_v37  ;;  %v6281_v12 = vrot.slane %v21049_v14, 1  ;;  %v6283_v29 = vrot.slane %v21068_v31, 1 }
 0x6ed   : > { %v5961_v9 = vsel %vm21019_vm11, %v5952_v23, %v5960_v21  ;;  %v5962_v33 = vrot.slane %v5960_v21, 4  ;;  %v5970_v24 = vor.u32 %v5969_v17, %v5966_v54  ;;  %v5972_v50 = vrot.slane %v5966_v54, 4  ;;  %17248 = vmatmul.mubr.msk.bf16.gmra.mrb[80].mxu1 %vm4548_vm12, %v6066_v2  ;;  %v6861_v17 = vld [vmem:[#allocation3 + $0x8] sm:$0xc] }
 0x6ee   : > { %5997 = vst.msk [vmem:[#allocation3 + $0x24] sm:$0xf] %vm439_vm10, %v5961_v9  ;;  %17251 = vmatprep.mubr.msk.bf16.mxu1 %vm19624_vm8, %v19623_v34  ;;  %v21107_v6 = vld [vmem:[#allocation3 + $0x18] sm:$0xff]   ;;  %v6611_v16 = vsel %vm2063_vm4, %v6601_v8, %v6610_v52  ;;  %v6069_v49 = vor.u32 %v6067_v30, %v6065_v5  ;;  %v21124_v0 = vsel %vm1192_vm3, %v6280_v27, %v6281_v12  ;;  %v7070_v47 = vshrl.u32 %v21131_v11, 16 }
 0x6ef   : > { %v5971_v60 = vsel %vm21019_vm11, %v5962_v33, %v5970_v24  ;;  %v6003_v28 = vsel %vm21093_vm15, %v5972_v50, %v6002_v25  ;;  %v6071_v18 = vshll.u32 %v21107_v6, 16  ;;  %v6285_v32 = vrot.slane %v21107_v6, 1  ;;  %v21175_v33 = vld [vmem:[#allocation3 + $0x10] sm:$0xff]  }
 0x6f0   : > { %5998 = vst.msk [vmem:[#allocation3 + $0x28] sm:$0xf] %vm439_vm10, %v5971_v60  ;;  %6004 = vst [vmem:[#allocation3 + $0x2c] sm:$0x1] %v6003_v28  ;;  %v21121_v56 = vld [vmem:[#allocation3 + $0x1c] sm:$0xff]   ;;  %v21140_v38 = vsel %vm1192_vm3, %v6281_v12, %v6283_v29  ;;  %v6075_v8 = vshrl.u32 %v21107_v6, 16  ;;  %v15281_v25 = vcombine.low %v6739_v7, %v21038_v39  ;;  %v21166_v26 = vcombine.low %v6861_v17, %v21153_v35 }
 0x6f1   : > { %v6073_v1 = vrot.slane %v6071_v18, 1  ;;  %v6613_v20 = vshrl.u32 %v21121_v56, 16  ;;  %v6616_v13 = vshll.u32 %v21121_v56, 16  ;;  %17336 = vmatmul.mubr.msk.bf16.gmra.mrb[40].mxu0 %vm4548_vm12, %v6611_v16  ;;  %v21136_v43 = vld [vmem:[#allocation3 + $0x20] sm:$0xf]  ;;  %v21143_v53 = vsel %vm1192_vm3, %v6283_v29, %v6285_v32  ;;  %v21178_v60 = vld [vmem:[#allocation3 + $0x18] sm:$0xff]  }
 0x6f2   : > { %17339 = vmatprep.mubr.msk.bf16.mxu0 %vm19624_vm8, %v19623_v34  ;;  %v7073_v21 = vshll.u32 %v21131_v11, 16  ;;  %v7072_v50 = vrot.slane %v7070_v47, 2  ;;  %v6746_v28 = vrot.slane %v15281_v25, 2  ;;  %v6747_v30 = vrot.slane %v21062_v51, 2 }
 0x6f3   : > { %v6074_v19 = vsel %vm586_vm1, %v6069_v49, %v6073_v1  ;;  %v6615_v40 = vrot.slane %v6613_v20, 1  ;;  %v6618_v10 = vrot.slane %v6616_v13, 2  ;;  %v6077_v3 = vor.u32 %v6075_v8, %v6073_v1 }
 0x6f4   : > { %v6749_v12 = vrot.slane %v21077_v63, 2  ;;  %v6751_v49 = vrot.slane %v21121_v56, 2  ;;  %v7026_v13 = vshrl.u32 %v21166_v26, 16  ;;  %v21189_v29 = vsel %vm2506_vm5, %v6746_v28, %v6747_v30 }
 0x6f5   : > { %17252 = vmatmul.mubr.msk.bf16.gmra.mrb[84].mxu1 %vm4548_vm12, %v6074_v19  ;;  %v6018_v48 = vld [vmem:[#allocation3 + $0x24] sm:$0xf]  ;;  %v6619_v58 = vor.u32 %v6618_v10, %v6615_v40  ;;  %v7029_v51 = vshll.u32 %v21166_v26, 16  ;;  %v7034_v63 = vshrl.u32 %v21175_v33, 16  ;;  %v7046_v8 = vshll.u32 %v21178_v60, 16 }
 0x6f6   : > { %17255 = vmatprep.mubr.msk.bf16.mxu1 %vm19624_vm8, %v19623_v34  ;;  %v21148_v62 = vcombine.low %v21136_v43, %v6018_v48  ;;  %v21182_v16 = vld [vmem:[#allocation3 + $0x20] sm:$0xff]   ;;  %v21198_v19 = vsel %vm2506_vm5, %v6749_v12, %v6751_v49  ;;  %v7028_v10 = vrot.slane %v7026_v13, 2  ;;  %v19320_v13 = vld [vmem:[%s22880_s2 + $0x88] sm:$0xff]  }
 0x6f7   : > { %v19308_v57 = vld [vmem:[#allocation3 + $0x24] sm:$0xff]   ;;  %v6620_v44 = vsel %vm2063_vm4, %v6610_v52, %v6619_v58  ;;  %v19309_v5 = vld [vmem:[#allocation3 + $0x2c] ss:$0 sps:$4 sm:$0x11]   ;;  %v7075_v52 = vrot.slane %v7073_v21, 3  ;;  %v7031_v48 = vrot.slane %v7029_v51, 3 }
 0x6f8   : > { %v6079_v4 = vshll.u32 %v21148_v62, 16  ;;  %v6622_v36 = vshrl.u32 %v19308_v57, 16  ;;  %v6625_v55 = vshll.u32 %v19308_v57, 16  ;;  %v6287_v23 = vrot.slane %v21148_v62, 1  ;;  %v21184_v18 = vld [vmem:[#allocation3 + $0x28] sm:$0xff]  }
 0x6f9   : > { %17340 = vmatmul.mubr.msk.bf16.gmra.mrb[44].mxu0 %vm4548_vm12, %v6620_v44  ;;  %v6083_v37 = vshrl.u32 %v21148_v62, 16  ;;  %v6631_v39 = vshll.u32 %v19309_v5, 16  ;;  %v6753_v1 = vrot.slane %v19308_v57, 2  ;;  %v6755_v20 = vrot.slane %v19309_v5, 2 }
 0x6fa   : > { %v6081_v15 = vrot.slane %v6079_v4, 1  ;;  %v6624_v41 = vrot.slane %v6622_v36, 1  ;;  %v6627_v46 = vrot.slane %v6625_v55, 2  ;;  %17343 = vmatprep.mubr.msk.bf16.mxu0 %vm19624_vm8, %v19623_v34  ;;  %v21171_v9 = vsel %vm1192_vm3, %v6285_v32, %v6287_v23 }
 0x6fb   : > { %v21192_v32 = vsel %vm2506_vm5, %v6747_v30, %v6749_v12  ;;  %v21201_v56 = vsel %vm2506_vm5, %v6751_v49, %v6753_v1  ;;  %v21204_v40 = vsel %vm2506_vm5, %v6753_v1, %v6755_v20  ;;  %v7037_v57 = vshll.u32 %v21175_v33, 16  ;;  %v19313_v30 = vld [vmem:[%s22880_s2 + $0x58] sm:$0xff]  }
 0x6fc   : > { %v6082_v54 = vsel %vm586_vm1, %v6077_v3, %v6081_v15  ;;  %v6628_v2 = vor.u32 %v6627_v46, %v6624_v41  ;;  %v6085_v24 = vor.u32 %v6083_v37, %v6081_v15  ;;  %v7043_v44 = vshrl.u32 %v21178_v60, 16 }
 0x6fd   : > { %17256 = vmatmul.mubr.msk.bf16.gmra.mrb[88].mxu1 %vm4548_vm12, %v6082_v54  ;;  %v7052_v4 = vshrl.u32 %v21182_v16, 16  ;;  %v7055_v47 = vshll.u32 %v21182_v16, 16  ;;  %v7061_v36 = vshrl.u32 %v21184_v18, 16  ;;  %v7039_v55 = vrot.slane %v7037_v57, 3 }
 0x6fe   : > { %17259 = vmatprep.mubr.msk.bf16.mxu1 %vm19624_vm8, %v19623_v34  ;;  %v6629_v27 = vsel %vm2063_vm4, %v6619_v58, %v6628_v2  ;;  %v7036_v58 = vrot.slane %v7034_v63, 2  ;;  %v7045_v7 = vrot.slane %v7043_v44, 2  ;;  %v7064_v3 = vshll.u32 %v21184_v18, 16 }
 0x6ff   : > { %v7076_v15 = vor.u32 %v7075_v52, %v7072_v50  ;;  %v7048_v5 = vrot.slane %v7046_v8, 3  ;;  %v7054_v41 = vrot.slane %v7052_v4, 2  ;;  %v7057_v46 = vrot.slane %v7055_v47, 3  ;;  %v19322_v8 = vld [vmem:[%s22880_s2 + $0x60] sm:$0xff]   ;;  %v7182_v4 = vld [vmem:[#allocation3 + $0x8] sm:$0x8] }
 0x700   : > { %v7063_v21 = vrot.slane %v7061_v36, 2  ;;  %v6633_v54 = vrot.slane %v6631_v39, 2  ;;  %v7032_v17 = vor.u32 %v7031_v48, %v7028_v10  ;;  %v7040_v25 = vor.u32 %v7039_v55, %v7036_v58  ;;  %v19318_v58 = vld [vmem:[#allocation3 + $0x30] ss:$0 sps:$4 sm:$0x11]  }
 0x701   : > { %17344 = vmatmul.mubr.msk.bf16.gmra.mrb[48].mxu0 %vm4548_vm12, %v6629_v27  ;;  %v7066_v37 = vrot.slane %v7064_v3, 3  ;;  %v7058_v27 = vor.u32 %v7057_v46, %v7054_v41  ;;  %v6904_v1 = vrot.slane %v21175_v33, 2  ;;  %v6903_v20 = vrot.slane %v21166_v26, 2  ;;  %v19327_v41 = vld [vmem:[#allocation3 + $0x14] sm:$0xff]   ;;  %v19328_v46 = vld [vmem:[#allocation3 + $0x1c] sm:$0xff]  }
 0x702   : > { %17347 = vmatprep.mubr.msk.bf16.mxu0 %vm19624_vm8, %v19623_v34  ;;  %v6634_v28 = vsel %vm2063_vm4, %v6628_v2, %v6633_v54  ;;  %v21223_v12 = vsel %vm3259_vm6, %v7032_v17, %v7040_v25  ;;  %v6908_v63 = vrot.slane %v21182_v16, 2  ;;  %v6910_v10 = vrot.slane %v21184_v18, 2  ;;  %v19329_v17 = vld [vmem:[#allocation3 + $0x24] sm:$0xff]  }
 0x703   : > { %v7067_v50 = vor.u32 %v7066_v37, %v7063_v21  ;;  %v6905_v51 = vsel %vm2506_vm5, %v6903_v20, %v6904_v1  ;;  %v6912_v44 = vrot.slane %v19318_v58, 2  ;;  %v7190_v47 = vrot.slane %v21175_v33, 3 }
 0x704   : > { %v6911_v48 = vsel %vm2506_vm5, %v6908_v63, %v6910_v10  ;;  %v7194_v33 = vrot.slane %v21182_v16, 3  ;;  %v19325_v16 = vld [vmem:[#allocation3 + $0xc] sm:$0xff]   ;;  %v6436_v21 = vrot.slane %v19328_v46, 1 }
 0x705   : > { %17260 = vmatmul.mubr.msk.bf16.gmra.mrb[92].mxu1 %vm4548_vm12, %v6085_v24  ;;  %v7049_v24 = vor.u32 %v7048_v5, %v7045_v7  ;;  %v21235_v2 = vsel %vm3259_vm6, %v7058_v27, %v7067_v50  ;;  %v21238_v49 = vsel %vm3259_vm6, %v7067_v50, %v7076_v15  ;;  %v7198_v7 = vrot.slane %v21131_v11, 3  ;;  %v19326_v5 = vld [vmem:[%s22880_s2 + $0x70] sm:$0xff]  }
 0x706   : > { %17265 = vmatprep.mubr.msk.bf16.mxu1 %vm19624_vm8, %v19623_v34  ;;  %v6434_v11 = vrot.slane %v19327_v41, 1 }
 0x707   : > { %v21227_v52 = vsel %vm3259_vm6, %v7040_v25, %v7049_v24  ;;  %v21230_v39 = vsel %vm3259_vm6, %v7049_v24, %v7058_v27  ;;  %v6438_v25 = vrot.slane %v19329_v17, 1  ;;  %v19331_v24 = vld [vmem:[%s22880_s2 + $0x80] sm:$0xff]   ;;  %s19565_s2 = scalar_lea.vmem %s19564_s23, 32 }
 0x708   : > { %v6437_v54 = vsel %vm1192_vm3, %v6434_v11, %v6436_v21  ;;  %p19567_p1 = scmp.lt.s32.totalorder %s19565_s2, %s19559_s21 }
 0x709   : > { %17348 = vmatmul.mubr.msk.bf16.gmra.mrb[52].mxu0 %vm4548_vm12, %v6634_v28  ;;  %v6439_v37 = vsel %vm1192_vm3, %v6436_v21, %v6438_v25 }
 0x70a   : > { %17375 = vmatprep.mubr.msk.bf16.mxu0 %vm19624_vm8, %v19623_v34  ;;  %p19568_p2 = por %p19567_p1, %p19566_p0 }
 0x70c   : > { %p19569_p3 = pnand %p19568_p2, %p19562_p13 }
 0x70d   : > { %17266 = vmatmul.mubr.msk.bf16.vlgmr.msra.gmra.mrb[96].mxu1 %vm4548_vm12, %v21033_v45  ;;  %v6906_v45 = vrot.slane %v21178_v60, 2 }
 0x70e   : > { %17286 = vmatpush3.bf16.msra.mxu1 %v19313_v30  ;;  %17269 = vmatprep.mubr.msk.bf16.mxu1 %vm19624_vm8, %v19623_v34 }
 0x70f   : > { %17307 = vmatprep.subr.bf16.mxu1 %v19623_v34  ;;  %v6907_v26 = vsel %vm2506_vm5, %v6904_v1, %v6906_v45 }
 0x711   : > { %17376 = vmatmul.mubr.msk.bf16.vlgmr.msra.gmra.mrb[56].mxu0 %vm4548_vm12, %v6905_v51 }
 0x712   : > { %17379 = vmatprep.mubr.msk.bf16.mxu0 %vm19624_vm8, %v19623_v34  ;;  %17418 = vmatpush3.bf16.msra.mxu0 %v19320_v13 }
 0x713   : > { %17637 = vmatprep.subr.bf16.mxu0 %v19623_v34 }
 0x715   : > { %17270 = vmatmul.mubr.msk.bf16.gmra.mrb[100].mxu1 %vm4548_vm12, %v21049_v14  ;;  %v6909_v14 = vsel %vm2506_vm5, %v6906_v45, %v6908_v63 }
 0x716   : > { %17273 = vmatprep.mubr.msk.bf16.mxu1 %vm19624_vm8, %v19623_v34 }
 0x719   : > { %17380 = vmatmul.mubr.msk.bf16.gmra.mrb[60].mxu0 %vm4548_vm12, %v6907_v26 }
 0x71a   : > { %17383 = vmatprep.mubr.msk.bf16.mxu0 %vm19624_vm8, %v19623_v34 }
 0x71d   : > { %17274 = vmatmul.mubr.msk.bf16.gmra.mrb[104].mxu1 %vm4548_vm12, %v21068_v31  ;;  %v6014_v31 = vld [vmem:[#allocation3 + $0x24] sm:$0x7] }
 0x71e   : > { %17277 = vmatprep.mubr.msk.bf16.mxu1 %vm19624_vm8, %v19623_v34  ;;  %v15236_v57 = vcombine.low %v21136_v43, %v6014_v31  ;;  %v15313_v43 = vcombine.low %v7182_v4, %v21153_v35 }
 0x720   : > { %v7189_v36 = vrot.slane %v15313_v43, 3 }
 0x721   : > { %17384 = vmatmul.mubr.msk.bf16.gmra.mrb[64].mxu0 %vm4548_vm12, %v6909_v14 }
 0x722   : > { %17387 = vmatprep.mubr.msk.bf16.mxu0 %vm19624_vm8, %v19623_v34  ;;  %v7191_v55 = vsel %vm3706_vm7, %v7189_v36, %v7190_v47 }
 0x725   : > { %17278 = vmatmul.mubr.msk.bf16.gmra.mrb[108].mxu1 %vm4548_vm12, %v21107_v6  ;;  %v6913_v6 = vsel %vm2506_vm5, %v6910_v10, %v6912_v44 }
 0x726   : > { %17281 = vmatprep.mubr.msk.bf16.mxu1 %vm19624_vm8, %v19623_v34 }
 0x729   : > { %17388 = vmatmul.mubr.msk.bf16.gmra.mrb[68].mxu0 %vm4548_vm12, %v6911_v48 }
 0x72a   : > { %17391 = vmatprep.mubr.msk.bf16.mxu0 %vm19624_vm8, %v19623_v34 }
 0x72d   : > { %17282 = vmatmul.mubr.msk.bf16.gmra.mrb[112].mxu1 %vm4548_vm12, %v15236_v57 }
 0x72e   : > { %17287 = vmatprep.mubr.msk.bf16.mxu1 %vm19624_vm8, %v19623_v34 }
 0x731   : > { %17392 = vmatmul.mubr.msk.bf16.gmra.mrb[72].mxu0 %vm4548_vm12, %v6913_v6 }
 0x732   : > { %17419 = vmatprep.mubr.msk.bf16.mxu0 %vm19624_vm8, %v19623_v34 }
 0x735   : > { %17288 = vmatmul.mubr.msk.bf16.vlgmr.msra.gmra.mrb[116].mxu1 %vm4548_vm12, %v21124_v0  ;;  %v7192_v0 = vrot.slane %v21178_v60, 3  ;;  %v7196_v60 = vrot.slane %v21184_v18, 3  ;;  %v6432_v18 = vrot.slane %v19325_v16, 1 }
 0x736   : > { %17308 = vmatpush3.bf16.msra.mxu1 %v19322_v8  ;;  %17291 = vmatprep.mubr.msk.bf16.mxu1 %vm19624_vm8, %v19623_v34 }
 0x737   : > { %17351 = vmatprep.subr.bf16.mxu1 %v19623_v34  ;;  %v7193_v35 = vsel %vm3706_vm7, %v7190_v47, %v7192_v0  ;;  %v7199_v3 = vsel %vm3706_vm7, %v7196_v60, %v7198_v7 }
 0x739   : > { %17420 = vmatmul.mubr.msk.bf16.vlgmr.msra.gmra.mrb[76].mxu0 %vm4548_vm12, %v7191_v55 }
 0x73a   : > { %17423 = vmatprep.mubr.msk.bf16.mxu0 %vm19624_vm8, %v19623_v34 }
 0x73d   : > { %17292 = vmatmul.mubr.msk.bf16.gmra.mrb[120].mxu1 %vm4548_vm12, %v21140_v38  ;;  %v7195_v38 = vsel %vm3706_vm7, %v7192_v0, %v7194_v33 }
 0x73e   : > { %17295 = vmatprep.mubr.msk.bf16.mxu1 %vm19624_vm8, %v19623_v34 }
 0x741   : > { %17424 = vmatmul.mubr.msk.bf16.gmra.mrb[80].mxu0 %vm4548_vm12, %v7193_v35 }
 0x742   : > { %17427 = vmatprep.mubr.msk.bf16.mxu0 %vm19624_vm8, %v19623_v34 }
 0x745   : > { %17296 = vmatmul.mubr.msk.bf16.gmra.mrb[124].mxu1 %vm4548_vm12, %v21143_v53  ;;  %v7197_v53 = vsel %vm3706_vm7, %v7194_v33, %v7196_v60 }
 0x746   : > { %17299 = vmatprep.mubr.msk.bf16.mxu1 %vm19624_vm8, %v19623_v34 }
 0x749   : > { %17428 = vmatmul.mubr.msk.bf16.gmra.mrb[84].mxu0 %vm4548_vm12, %v7195_v38 }
 0x74a   : > { %17431 = vmatprep.mubr.msk.bf16.mxu0 %vm19624_vm8, %v19623_v34 }
 0x74d   : > { %17300 = vmatmul.mubr.msk.bf16.gmra.mrb[128].mxu1 %vm4548_vm12, %v21171_v9  ;;  %v19324_v9 = vld [vmem:[#allocation3 + $0x4] sm:$0xfe]  }
 0x74e   : > { %17303 = vmatprep.mubr.msk.bf16.mxu1 %vm19624_vm8, %v19623_v34  ;;  %v6431_v15 = vrot.slane %v19324_v9, 1 }
 0x750   : > { %v6433_v62 = vsel %vm1192_vm3, %v6431_v15, %v6432_v18 }
 0x751   : > { %17432 = vmatmul.mubr.msk.bf16.gmra.mrb[88].mxu0 %vm4548_vm12, %v7197_v53 }
 0x752   : > { %17435 = vmatprep.mubr.msk.bf16.mxu0 %vm19624_vm8, %v19623_v34 }
 0x755   : > { %17304 = vmatmul.mubr.msk.bf16.gmra.mrb[132].mxu1 %vm4548_vm12, %v6287_v23  ;;  %v6435_v23 = vsel %vm1192_vm3, %v6432_v18, %v6434_v11 }
 0x756   : > { %17309 = vmatprep.mubr.msk.bf16.mxu1 %vm19624_vm8, %v19623_v34 }
 0x759   : > { %17436 = vmatmul.mubr.msk.bf16.gmra.mrb[92].mxu0 %vm4548_vm12, %v7199_v3 }
 0x75a   : > { %17647 = vmatprep.mubr.msk.bf16.mxu0 %vm19624_vm8, %v19623_v34 }
 0x75d   : > { %17310 = vmatmul.mubr.msk.bf16.vlgmr.msra.gmra.mrb[136].mxu1 %vm4548_vm12, %v6433_v62 }
 0x75e   : > { %17352 = vmatpush3.bf16.msra.mxu1 %v19326_v5  ;;  %17313 = vmatprep.mubr.msk.bf16.mxu1 %vm19624_vm8, %v19623_v34 }
 0x75f   : > { %17395 = vmatprep.subr.bf16.mxu1 %v19623_v34 }
 0x765   : > { %17314 = vmatmul.mubr.msk.bf16.gmra.mrb[140].mxu1 %vm4548_vm12, %v6435_v23 }
 0x766   : > { %17317 = vmatprep.mubr.msk.bf16.mxu1 %vm19624_vm8, %v19623_v34 }
 0x76d   : > { %17318 = vmatmul.mubr.msk.bf16.gmra.mrb[144].mxu1 %vm4548_vm12, %v6437_v54 }
 0x76e   : > { %17321 = vmatprep.mubr.msk.bf16.mxu1 %vm19624_vm8, %v19623_v34 }
 0x775   : > { %17322 = vmatmul.mubr.msk.bf16.gmra.mrb[148].mxu1 %vm4548_vm12, %v6439_v37 }
 0x776   : > { %17325 = vmatprep.mubr.msk.bf16.mxu1 %vm19624_vm8, %v19623_v34 }
 0x77d   : > { %17326 = vmatmul.mubr.msk.bf16.gmra.mrb[152].mxu1 %vm4548_vm12, %v6438_v25 }
 0x77e   : > { %17353 = vmatprep.mubr.msk.bf16.mxu1 %vm19624_vm8, %v19623_v34 }
 0x785   : > { %17354 = vmatmul.mubr.msk.bf16.vlgmr.msra.gmra.mrb[156].mxu1 %vm4548_vm12, %v21189_v29 }
 0x786   : > { %17396 = vmatpush3.bf16.msra.mxu1 %v19331_v24  ;;  %17357 = vmatprep.mubr.msk.bf16.mxu1 %vm19624_vm8, %v19623_v34 }
 0x787   : > { %17439 = vmatprep.subr.bf16.mxu1 %v19623_v34 }
 0x78d   : > { %17358 = vmatmul.mubr.msk.bf16.gmra.mrb[160].mxu1 %vm4548_vm12, %v21192_v32 }
 0x78e   : > { %17361 = vmatprep.mubr.msk.bf16.mxu1 %vm19624_vm8, %v19623_v34 }
 0x795   : > { %17362 = vmatmul.mubr.msk.bf16.gmra.mrb[164].mxu1 %vm4548_vm12, %v21198_v19 }
 0x796   : > { %17365 = vmatprep.mubr.msk.bf16.mxu1 %vm19624_vm8, %v19623_v34 }
 0x79d   : > { %17366 = vmatmul.mubr.msk.bf16.gmra.mrb[168].mxu1 %vm4548_vm12, %v21201_v56 }
 0x79e   : > { %17369 = vmatprep.mubr.msk.bf16.mxu1 %vm19624_vm8, %v19623_v34 }
 0x7a5   : > { %17370 = vmatmul.mubr.msk.bf16.gmra.mrb[172].mxu1 %vm4548_vm12, %v21204_v40 }
 0x7a6   : > { %17397 = vmatprep.mubr.msk.bf16.mxu1 %vm19624_vm8, %v19623_v34 }
 0x7ad   : > { %17398 = vmatmul.mubr.msk.bf16.vlgmr.msra.gmra.mrb[176].mxu1 %vm4548_vm12, %v21223_v12 }
 0x7ae   : > { %17401 = vmatprep.mubr.msk.bf16.mxu1 %vm19624_vm8, %v19623_v34 }
 0x7b5   : > { %17402 = vmatmul.mubr.msk.bf16.gmra.mrb[180].mxu1 %vm4548_vm12, %v21227_v52 }
 0x7b6   : > { %17405 = vmatprep.mubr.msk.bf16.mxu1 %vm19624_vm8, %v19623_v34 }
 0x7b7   : > { %v6141_v29 = vpop.f32.mrb[76].mxu1 }
 0x7b8   : > { %v17245_v32 = vpop.f32.mrb[77].mxu1 }
 0x7b9   : > { %v6144_v19 = vpop.f32.mrb[78].mxu1 }
 0x7ba   : > { %v17246_v56 = vpop.f32.mrb[79].mxu1 }
 0x7bc   : > { %v21398_v40 = vpop.f32.mrb[36].mxu0 }
 0x7bd   : > { %17406 = vmatmul.mubr.msk.bf16.gmra.mrb[184].mxu1 %vm4548_vm12, %v21230_v39  ;;  %v17333_v27 = vpop.f32.mrb[37].mxu0 }
 0x7be   : > { %17409 = vmatprep.mubr.msk.bf16.mxu1 %vm19624_vm8, %v19623_v34  ;;  %v21402_v28 = vpop.f32.mrb[38].mxu0 }
 0x7bf   : > { %v17334_v12 = vpop.f32.mrb[39].mxu0 }
 0x7c0   : > { %v6149_v30 = vpop.f32.mrb[80].mxu1 }
 0x7c1   : > { %v17249_v50 = vpop.f32.mrb[81].mxu1 }
 0x7c2   : > { %v6152_v52 = vpop.f32.mrb[82].mxu1 }
 0x7c3   : > { %v17250_v1 = vpop.f32.mrb[83].mxu1 }
 0x7c4   : > { %v21406_v20 = vpop.f32.mrb[40].mxu0 }
 0x7c5   : > { %17410 = vmatmul.mubr.msk.bf16.gmra.mrb[188].mxu1 %vm4548_vm12, %v21235_v2  ;;  %v17337_v39 = vpop.f32.mrb[41].mxu0 }
 0x7c6   : > { %17413 = vmatprep.mubr.msk.bf16.mxu1 %vm19624_vm8, %v19623_v34  ;;  %v21410_v13 = vpop.f32.mrb[42].mxu0 }
 0x7c7   : > { %v17338_v45 = vpop.f32.mrb[43].mxu0 }
 0x7c8   : > { %v6157_v51 = vpop.f32.mrb[84].mxu1 }
 0x7c9   : > { %v17253_v26 = vpop.f32.mrb[85].mxu1 }
 0x7ca   : > { %v6160_v63 = vpop.f32.mrb[86].mxu1 }
 0x7cb   : > { %v17254_v14 = vpop.f32.mrb[87].mxu1 }
 0x7cc   : > { %v21414_v10 = vpop.f32.mrb[44].mxu0 }
 0x7cd   : > { %17414 = vmatmul.mubr.msk.bf16.gmra.mrb[192].mxu1 %vm4548_vm12, %v21238_v49  ;;  %v17341_v2 = vpop.f32.mrb[45].mxu0 }
 0x7ce   : > { %17441 = vmatprep.mubr.msk.bf16.mxu1 %vm19624_vm8, %v19623_v34  ;;  %v21418_v31 = vpop.f32.mrb[46].mxu0 }
 0x7cf   : > { %v17342_v58 = vpop.f32.mrb[47].mxu0 }
 0x7d0   : > { %v6165_v48 = vpop.f32.mrb[88].mxu1 }
 0x7d1   : > { %v17257_v57 = vpop.f32.mrb[89].mxu1 }
 0x7d2   : > { %v6168_v44 = vpop.f32.mrb[90].mxu1 }
 0x7d3   : > { %v17258_v6 = vpop.f32.mrb[91].mxu1 }
 0x7d4   : > { %v21420_v8 = vpop.f32.mrb[48].mxu0 }
 0x7d5   : > { %v17345_v4 = vpop.f32.mrb[49].mxu0 }
 0x7d6   : > { %v21422_v43 = vpop.f32.mrb[50].mxu0 }
 0x7d7   : > { %v17346_v49 = vpop.f32.mrb[51].mxu0 }
 0x7d8   : > { %v6173_v47 = vpop.f32.mrb[92].mxu1 }
 0x7d9   : > { %v17261_v36 = vpop.f32.mrb[93].mxu1 }
 0x7da   : > { %v6176_v55 = vpop.f32.mrb[94].mxu1 }
 0x7db   : > { %v17262_v0 = vpop.f32.mrb[95].mxu1 }
 0x7dc   : > { %v21424_v35 = vpop.f32.mrb[52].mxu0 }
 0x7dd   : > { %v17349_v33 = vpop.f32.mrb[53].mxu0 }
 0x7de   : > { %v21426_v38 = vpop.f32.mrb[54].mxu0 }
 0x7df   : > { %v17350_v53 = vpop.f32.mrb[55].mxu0 }
 0x7e0   : > { %v6234_v60 = vpop.f32.mrb[96].mxu1 }
 0x7e1   : > { %v6235_v16 = vadd.f32 %v6234_v60, %v6141_v29  ;;  %v17267_v7 = vpop.f32.mrb[97].mxu1 }
 0x7e2   : > { %v6237_v9 = vpop.f32.mrb[98].mxu1 }
 0x7e3   : > { %v6238_v18 = vadd.f32 %v6237_v9, %v6144_v19  ;;  %v17268_v3 = vpop.f32.mrb[99].mxu1 }
 0x7e4   : > { %v21428_v15 = vpop.f32.mrb[56].mxu0 }
 0x7e5   : > { %v17377_v5 = vpop.f32.mrb[57].mxu0 }
 0x7e6   : > { %v21430_v62 = vpop.f32.mrb[58].mxu0 }
 0x7e7   : > { %v17378_v11 = vpop.f32.mrb[59].mxu0 }
 0x7e8   : > { %v6242_v41 = vpop.f32.mrb[100].mxu1 }
 0x7e9   : > { %v6243_v23 = vadd.f32 %v6242_v41, %v6149_v30  ;;  %v17271_v46 = vpop.f32.mrb[101].mxu1 }
 0x7ea   : > { %v6245_v21 = vpop.f32.mrb[102].mxu1 }
 0x7eb   : > { %v6246_v54 = vadd.f32 %v6245_v21, %v6152_v52  ;;  %v17272_v17 = vpop.f32.mrb[103].mxu1 }
 0x7ec   : > { %v21432_v25 = vpop.f32.mrb[60].mxu0 }
 0x7ed   : > { %v17381_v37 = vpop.f32.mrb[61].mxu0 }
 0x7ee   : > { %v21434_v24 = vpop.f32.mrb[62].mxu0 }
 0x7ef   : > { %v17382_v32 = vpop.f32.mrb[63].mxu0 }
 0x7f0   : > { %v6250_v29 = vpop.f32.mrb[104].mxu1 }
 0x7f1   : > { %v6251_v19 = vadd.f32 %v6250_v29, %v6157_v51  ;;  %v17275_v56 = vpop.f32.mrb[105].mxu1 }
 0x7f2   : > { %v6253_v27 = vpop.f32.mrb[106].mxu1 }
 0x7f3   : > { %v6254_v12 = vadd.f32 %v6253_v27, %v6160_v63  ;;  %v17276_v50 = vpop.f32.mrb[107].mxu1 }
 0x7f4   : > { %v21436_v1 = vpop.f32.mrb[64].mxu0 }
 0x7f5   : > { %v17385_v39 = vpop.f32.mrb[65].mxu0 }
 0x7f6   : > { %v21438_v30 = vpop.f32.mrb[66].mxu0 }
 0x7f7   : > { %v17386_v52 = vpop.f32.mrb[67].mxu0 }
 0x7f8   : > { %v6258_v45 = vpop.f32.mrb[108].mxu1 }
 0x7f9   : > { %v6259_v26 = vadd.f32 %v6258_v45, %v6165_v48  ;;  %v17279_v14 = vpop.f32.mrb[109].mxu1 }
 0x7fa   : > { %v6261_v2 = vpop.f32.mrb[110].mxu1 }
 0x7fb   : > { %v6262_v58 = vadd.f32 %v6261_v2, %v6168_v44  ;;  %v17280_v57 = vpop.f32.mrb[111].mxu1 }
 0x7fc   : > { %v21440_v6 = vpop.f32.mrb[68].mxu0 }
 0x7fd   : > { %v17389_v4 = vpop.f32.mrb[69].mxu0 }
 0x7fe   : > { %v21442_v51 = vpop.f32.mrb[70].mxu0 }
 0x7ff   : > { %v17390_v63 = vpop.f32.mrb[71].mxu0 }
 0x800   : > { %v6266_v49 = vpop.f32.mrb[112].mxu1 }
 0x801   : > { %v6267_v36 = vadd.f32 %v6266_v49, %v6173_v47  ;;  %v17283_v0 = vpop.f32.mrb[113].mxu1 }
 0x802   : > { %v6269_v33 = vpop.f32.mrb[114].mxu1 }
 0x803   : > { %v6270_v60 = vadd.f32 %v6269_v33, %v6176_v55  ;;  %v17284_v53 = vpop.f32.mrb[115].mxu1 }
 0x804   : > { %v21444_v7 = vpop.f32.mrb[72].mxu0 }
 0x805   : > { %v17393_v9 = vpop.f32.mrb[73].mxu0 }
 0x806   : > { %v21446_v48 = vpop.f32.mrb[74].mxu0 }
 0x807   : > { %v17394_v44 = vpop.f32.mrb[75].mxu0 }
 0x808   : > { %v6344_v3 = vpop.f32.mrb[116].mxu1 }
 0x809   : > { %v6383_v5 = vadd.f32 %v6344_v3, %v6235_v16  ;;  %v17289_v41 = vpop.f32.mrb[117].mxu1 }
 0x80a   : > { %v6347_v11 = vpop.f32.mrb[118].mxu1 }
 0x80b   : > { %v6384_v46 = vadd.f32 %v6347_v11, %v6238_v18  ;;  %v17290_v21 = vpop.f32.mrb[119].mxu1 }
 0x80c   : > { %v21448_v17 = vpop.f32.mrb[76].mxu0 }
 0x80d   : > { %v17421_v37 = vpop.f32.mrb[77].mxu0 }
 0x80e   : > { %v21450_v47 = vpop.f32.mrb[78].mxu0 }
 0x80f   : > { %v17422_v55 = vpop.f32.mrb[79].mxu0 }
 0x810   : > { %v6352_v29 = vpop.f32.mrb[120].mxu1 }
 0x811   : > { %v6385_v32 = vadd.f32 %v6352_v29, %v6243_v23  ;;  %v17293_v56 = vpop.f32.mrb[121].mxu1  ;;  %v19332_v23 = vld [vmem:[%s22860_s3 + $0x8] sm:$0xff]  }
 0x812   : > { %v6355_v27 = vpop.f32.mrb[122].mxu1  ;;  %17440 = vmatpush3.bf16.msra.mxu1 %v19332_v23 }
 0x813   : > { %v6386_v50 = vadd.f32 %v6355_v27, %v6246_v54  ;;  %v17294_v39 = vpop.f32.mrb[123].mxu1  ;;  %17461 = vmatprep.subr.bf16.mxu1 %v19623_v34 }
 0x814   : > { %v21452_v45 = vpop.f32.mrb[80].mxu0 }
 0x815   : > { %v17425_v52 = vpop.f32.mrb[81].mxu0 }
 0x816   : > { %v21454_v16 = vpop.f32.mrb[82].mxu0 }
 0x817   : > { %v17426_v18 = vpop.f32.mrb[83].mxu0 }
 0x818   : > { %v6360_v14 = vpop.f32.mrb[124].mxu1 }
 0x819   : > { %v6387_v2 = vadd.f32 %v6360_v14, %v6251_v19  ;;  %v17297_v57 = vpop.f32.mrb[125].mxu1 }
 0x81a   : > { %v6363_v4 = vpop.f32.mrb[126].mxu1 }
 0x81b   : > { %v6388_v49 = vadd.f32 %v6363_v4, %v6254_v12  ;;  %v17298_v63 = vpop.f32.mrb[127].mxu1 }
 0x81c   : > { %v21459_v0 = vpop.f32.mrb[84].mxu0 }
 0x81d   : > { %v17429_v54 = vpop.f32.mrb[85].mxu0 }
 0x81e   : > { %v21461_v33 = vpop.f32.mrb[86].mxu0 }
 0x81f   : > { %v17430_v9 = vpop.f32.mrb[87].mxu0 }
 0x820   : > { %v6368_v53 = vpop.f32.mrb[128].mxu1 }
 0x821   : > { %v6389_v3 = vadd.f32 %v6368_v53, %v6259_v26  ;;  %v17301_v19 = vpop.f32.mrb[129].mxu1 }
 0x822   : > { %v6371_v44 = vpop.f32.mrb[130].mxu1 }
 0x823   : > { %v6390_v41 = vadd.f32 %v6371_v44, %v6262_v58  ;;  %v17302_v12 = vpop.f32.mrb[131].mxu1 }
 0x824   : > { %v21464_v11 = vpop.f32.mrb[88].mxu0 }
 0x825   : > { %v17433_v21 = vpop.f32.mrb[89].mxu0 }
 0x826   : > { %v21466_v37 = vpop.f32.mrb[90].mxu0 }
 0x827   : > { %v17434_v55 = vpop.f32.mrb[91].mxu0 }
 0x828   : > { %v6376_v29 = vpop.f32.mrb[132].mxu1 }
 0x829   : > { %v6391_v56 = vadd.f32 %v6376_v29, %v6267_v36  ;;  %v17305_v27 = vpop.f32.mrb[133].mxu1 }
 0x82a   : > { %v6379_v39 = vpop.f32.mrb[134].mxu1 }
 0x82b   : > { %v6392_v52 = vadd.f32 %v6379_v39, %v6270_v60  ;;  %v17306_v14 = vpop.f32.mrb[135].mxu1 }
 0x82c   : > { %v21468_v18 = vpop.f32.mrb[92].mxu0 }
 0x82d   : > { %v17437_v57 = vpop.f32.mrb[93].mxu0 }
 0x82e   : > { %v21470_v26 = vpop.f32.mrb[94].mxu0 }
 0x82f   : > { %v17438_v58 = vpop.f32.mrb[95].mxu0 }
 0x830   : > { %v6495_v4 = vpop.f32.mrb[136].mxu1 }
 0x831   : > { %v6534_v63 = vadd.f32 %v6495_v4, %v6383_v5  ;;  %v17311_v23 = vpop.f32.mrb[137].mxu1 }
 0x832   : > { %v6498_v54 = vpop.f32.mrb[138].mxu1 }
 0x833   : > { %v6535_v53 = vadd.f32 %v6498_v54, %v6384_v46  ;;  %v17312_v9 = vpop.f32.mrb[139].mxu1  ;;  %v6729_v19 = vadd.f32 %v21398_v40, %v6534_v63 }
 0x835   : > { %v6730_v36 = vadd.f32 %v21402_v28, %v6535_v53 }
 0x838   : > { %v6503_v44 = vpop.f32.mrb[140].mxu1 }
 0x839   : > { %v6536_v12 = vadd.f32 %v6503_v44, %v6385_v32  ;;  %v17315_v60 = vpop.f32.mrb[141].mxu1 }
 0x83a   : > { %v6506_v21 = vpop.f32.mrb[142].mxu1 }
 0x83b   : > { %v6537_v29 = vadd.f32 %v6506_v21, %v6386_v50  ;;  %v17316_v55 = vpop.f32.mrb[143].mxu1  ;;  %v6731_v27 = vadd.f32 %v21406_v20, %v6536_v12 }
 0x83d   : > { %v6732_v39 = vadd.f32 %v21410_v13, %v6537_v29 }
 0x840   : > { %v6511_v14 = vpop.f32.mrb[144].mxu1 }
 0x841   : > { %v6538_v5 = vadd.f32 %v6511_v14, %v6387_v2  ;;  %v17319_v57 = vpop.f32.mrb[145].mxu1 }
 0x842   : > { %v6514_v4 = vpop.f32.mrb[146].mxu1 }
 0x843   : > { %v6539_v46 = vadd.f32 %v6514_v4, %v6388_v49  ;;  %v17320_v58 = vpop.f32.mrb[147].mxu1  ;;  %v6733_v40 = vadd.f32 %v21414_v10, %v6538_v5 }
 0x845   : > { %v6734_v28 = vadd.f32 %v21418_v31, %v6539_v46 }
 0x848   : > { %v6519_v63 = vpop.f32.mrb[148].mxu1 }
 0x849   : > { %v6540_v32 = vadd.f32 %v6519_v63, %v6389_v3  ;;  %v17323_v23 = vpop.f32.mrb[149].mxu1 }
 0x84a   : > { %v6522_v54 = vpop.f32.mrb[150].mxu1 }
 0x84b   : > { %v6541_v50 = vadd.f32 %v6522_v54, %v6390_v41  ;;  %v17324_v53 = vpop.f32.mrb[151].mxu1  ;;  %v6735_v20 = vadd.f32 %v21420_v8, %v6540_v32 }
 0x84d   : > { %v6736_v13 = vadd.f32 %v21422_v43, %v6541_v50 }
 0x850   : > { %v6527_v9 = vpop.f32.mrb[152].mxu1 }
 0x851   : > { %v6542_v2 = vadd.f32 %v6527_v9, %v6391_v56  ;;  %v17327_v44 = vpop.f32.mrb[153].mxu1 }
 0x852   : > { %v6530_v12 = vpop.f32.mrb[154].mxu1 }
 0x853   : > { %v6543_v49 = vadd.f32 %v6530_v12, %v6392_v52  ;;  %v17328_v60 = vpop.f32.mrb[155].mxu1  ;;  %v6737_v10 = vadd.f32 %v21424_v35, %v6542_v2 }
 0x855   : > { %v6738_v31 = vadd.f32 %v21426_v38, %v6543_v49  ;;  %v21500_v49 = vld [vmem:[#allocation2 + $0x4] sm:$0xe] }
 0x858   : > { %v6812_v21 = vpop.f32.mrb[156].mxu1 }
 0x859   : > { %v6851_v3 = vadd.f32 %v6812_v21, %v6729_v19  ;;  %v17355_v29 = vpop.f32.mrb[157].mxu1 }
 0x85a   : > { %v6815_v55 = vpop.f32.mrb[158].mxu1 }
 0x85b   : > { %v6852_v41 = vadd.f32 %v6815_v55, %v6730_v36  ;;  %v17356_v14 = vpop.f32.mrb[159].mxu1  ;;  %v7008_v8 = vadd.f32 %v21428_v15, %v6851_v3  ;;  %v16023_v55 = vld [vmem:[#allocation2 + $0x10] sm:$0xff]  }
 0x85d   : > { %v7009_v43 = vadd.f32 %v21430_v62, %v6852_v41 }
 0x860   : > { %v6820_v5 = vpop.f32.mrb[160].mxu1 }
 0x861   : > { %v6853_v56 = vadd.f32 %v6820_v5, %v6731_v27  ;;  %v17359_v57 = vpop.f32.mrb[161].mxu1 }
 0x862   : > { %v6823_v4 = vpop.f32.mrb[162].mxu1 }
 0x863   : > { %v6854_v52 = vadd.f32 %v6823_v4, %v6732_v39  ;;  %v17360_v46 = vpop.f32.mrb[163].mxu1  ;;  %v7010_v35 = vadd.f32 %v21432_v25, %v6853_v56  ;;  %v16008_v4 = vunpack.c.l.bf16 %v16023_v55 }
 0x865   : > { %v21486_v38 = vadd.f32 %v21434_v24, %v6854_v52 }
 0x868   : > { %v6828_v19 = vpop.f32.mrb[164].mxu1 }
 0x869   : > { %v6855_v58 = vadd.f32 %v6828_v19, %v6733_v40  ;;  %v17363_v63 = vpop.f32.mrb[165].mxu1  ;;  %v16009_v19 = vunpack.c.h.bf16 %v16023_v55 }
 0x86a   : > { %v6831_v36 = vpop.f32.mrb[166].mxu1  ;;  %v7402_v63 = vpop.permute.xlu0 %7401 }
 0x86b   : > { %v6856_v32 = vadd.f32 %v6831_v36, %v6734_v28  ;;  %v17364_v23 = vpop.f32.mrb[167].mxu1  ;;  %v21489_v15 = vadd.f32 %v21436_v1, %v6855_v58  ;;  %v16022_v1 = vld [vmem:[#allocation2 + $0x8] sm:$0xff]  }
 0x86d   : > { %v21492_v62 = vadd.f32 %v21438_v30, %v6856_v32  ;;  %v7343_v32 = vrot.slane %v16008_v4, 3 }
 0x870   : > { %v6836_v27 = vpop.f32.mrb[168].mxu1 }
 0x871   : > { %v6857_v39 = vadd.f32 %v6836_v27, %v6735_v20  ;;  %v17367_v54 = vpop.f32.mrb[169].mxu1 }
 0x872   : > { %v6839_v50 = vpop.f32.mrb[170].mxu1  ;;  %v7407_v54 = vpop.permute.xlu1 %7406 }
 0x873   : > { %v6858_v25 = vadd.f32 %v6839_v50, %v6736_v13  ;;  %v17368_v53 = vpop.f32.mrb[171].mxu1  ;;  %v21495_v24 = vadd.f32 %v21440_v6, %v6857_v39  ;;  %v16004_v13 = vunpack.c.l.bf16 %v16022_v1  ;;  %v7315_v6 = vunpack.c.l.bf16 %v21500_v49 }
 0x875   : > { %v21498_v40 = vadd.f32 %v21442_v51, %v6858_v25  ;;  %v16005_v51 = vunpack.c.h.bf16 %v16022_v1  ;;  %v7339_v3 = vrot.slane %v16004_v13, 3  ;;  %v7338_v41 = vrot.slane %v7315_v6, 3  ;;  %v16025_v1 = vld [vmem:[#allocation2 + $0x20] sm:$0xff]  }
 0x876   : > { %v7345_v25 = vrot.slane %v16009_v19, 3 }
 0x877   : > { %v7341_v14 = vrot.slane %v16005_v51, 3  ;;  %v7340_v57 = vsel %vm3706_vm7, %v7338_v41, %v7339_v3 }
 0x878   : > { %v6844_v28 = vpop.f32.mrb[172].mxu1 }
 0x879   : > { %v6859_v9 = vadd.f32 %v6844_v28, %v6737_v10  ;;  %v17371_v2 = vpop.f32.mrb[173].mxu1  ;;  %v7342_v46 = vsel %vm3706_vm7, %v7339_v3, %v7341_v14 }
 0x87a   : > { %v6847_v44 = vpop.f32.mrb[174].mxu1 }
 0x87b   : > { %v6860_v12 = vadd.f32 %v6847_v44, %v6738_v31  ;;  %v17372_v30 = vpop.f32.mrb[175].mxu1  ;;  %v21503_v20 = vadd.f32 %v21444_v7, %v6859_v9  ;;  %v7344_v44 = vsel %vm3706_vm7, %v7341_v14, %v7343_v32 }
 0x87d   : > { %v21506_v60 = vadd.f32 %v21446_v48, %v6860_v12 }
 0x880   : > { %v7133_v21 = vpop.f32.mrb[176].mxu1 }
 0x881   : > { %v7172_v10 = vadd.f32 %v7133_v21, %v7008_v8  ;;  %v17399_v29 = vpop.f32.mrb[177].mxu1  ;;  %v7346_v21 = vsel %vm3706_vm7, %v7343_v32, %v7345_v25  ;;  %v7314_v32 = vld [vmem:[#allocation2 + $0x2c] sm:$0x1] }
 0x882   : > { %v7136_v31 = vpop.f32.mrb[178].mxu1 }
 0x883   : > { %v7294_v5 = vadd.f32 %v21448_v17, %v7172_v10  ;;  %v7173_v56 = vadd.f32 %v7136_v31, %v7009_v43  ;;  %v17400_v7 = vpop.f32.mrb[179].mxu1  ;;  %v16024_v43 = vld [vmem:[#allocation2 + $0x18] sm:$0xff]   ;;  %v16016_v10 = vunpack.c.l.bf16 %v16025_v1 }
 0x884   : > { %v16012_v12 = vunpack.c.l.bf16 %v16024_v43  ;;  %v16013_v3 = vunpack.c.h.bf16 %v16024_v43  ;;  %v16017_v7 = vunpack.c.h.bf16 %v16025_v1  ;;  %v7325_v1 = vunpack.c.l.bf16 %v7314_v32 }
 0x885   : > { %v7369_v48 = vadd.f32 %v7340_v57, %v7294_v5  ;;  %v7295_v52 = vadd.f32 %v21450_v47, %v7173_v56  ;;  %v7412_v57 = vpop.permute.xlu0 %7411 }
 0x886   : > { %v7347_v14 = vrot.slane %v16012_v12, 3 }
 0x887   : > { %v7379_v58 = vmax.f32 %v7369_v48, 0.0  ;;  %v7370_v8 = vadd.f32 %v7342_v46, %v7295_v52 }
 0x888   : > { %v7141_v36 = vpop.f32.mrb[180].mxu1 }
 0x889   : > { %v7449_v23 = vmul.f32 %v7402_v63, %v7379_v58  ;;  %v7380_v27 = vmax.f32 %v7370_v8, 0.0  ;;  %v7174_v39 = vadd.f32 %v7141_v36, %v7010_v35  ;;  %v17403_v17 = vpop.f32.mrb[181].mxu1  ;;  %v7349_v63 = vrot.slane %v16013_v3, 3 }
 0x88a   : > { %v7144_v50 = vpop.f32.mrb[182].mxu1 }
 0x88b   : > { %v15973_v53 = vpack.c.bf16 %v7449_v23, %v7449_v23  ;;  %v7450_v28 = vmul.f32 %v7407_v54, %v7380_v27  ;;  %v7296_v47 = vadd.f32 %v21452_v45, %v7174_v39  ;;  %v7175_v9 = vadd.f32 %v7144_v50, %v21486_v38  ;;  %v17404_v2 = vpop.f32.mrb[183].mxu1  ;;  %v7313_v38 = vld [vmem:[#allocation2 + $0x28] sm:$0xf]  ;;  %v7417_v23 = vpop.permute.xlu1 %7416 }
 0x88c   : > { %v7324_v36 = vunpack.c.l.bf16 %v7313_v38  ;;  %v7351_v2 = vrot.slane %v16016_v10, 3 }
 0x88d   : > { %v7490_v30 = vshrl.u32 %v15973_v53, 16  ;;  %v7493_v13 = vshll.u32 %v15973_v53, 16  ;;  %v15974_v6 = vpack.c.bf16 %v7450_v28, %v7450_v28  ;;  %v7371_v35 = vadd.f32 %v7344_v44, %v7296_v47 }
 0x88e   : > { %v7297_v51 = vadd.f32 %v21454_v16, %v7175_v9  ;;  %v7348_v53 = vsel %vm3706_vm7, %v7345_v25, %v7347_v14  ;;  %v21530_v25 = vrot.slane %v7324_v36, 3 }
 0x88f   : > { %v7492_v29 = vrot.slane %v7490_v30, 6  ;;  %v7495_v55 = vrot.slane %v7493_v13, 7  ;;  %v7499_v45 = vshrl.u32 %v15974_v6, 16  ;;  %v7502_v41 = vshll.u32 %v15974_v6, 16 }
 0x890   : > { %v7381_v31 = vmax.f32 %v7371_v35, 0.0  ;;  %v7372_v5 = vadd.f32 %v7346_v21, %v7297_v51  ;;  %v7149_v56 = vpop.f32.mrb[184].mxu1  ;;  %v7350_v30 = vsel %vm3706_vm7, %v7347_v14, %v7349_v63  ;;  %v7353_v13 = vrot.slane %v16017_v7, 3  ;;  %v7613_v14 = vld [vmem:[#allocation2] sm:$0xf] }
 0x891   : > { %v7496_v4 = vor.u32 %v7495_v55, %v7492_v29  ;;  %v7501_v48 = vrot.slane %v7499_v45, 6  ;;  %v7504_v52 = vrot.slane %v7502_v41, 7  ;;  %v7176_v16 = vadd.f32 %v7149_v56, %v21489_v15  ;;  %v17407_v46 = vpop.f32.mrb[185].mxu1 }
 0x892   : > { %v7451_v19 = vmul.f32 %v7412_v57, %v7381_v31  ;;  %v7382_v58 = vmax.f32 %v7372_v5, 0.0  ;;  %v7152_v8 = vpop.f32.mrb[186].mxu1  ;;  %v7352_v45 = vsel %vm3706_vm7, %v7349_v63, %v7351_v2  ;;  %v7427_v46 = vpop.permute.xlu1 %7426 }
 0x893   : > { %v7497_v27 = vrot.slane %v7496_v4, 4  ;;  %v7599_v39 = vsel %vm21013_vm9, %v7496_v4, %v21500_v49  ;;  %v7505_v17 = vor.u32 %v7504_v52, %v7501_v48  ;;  %v7298_v43 = vadd.f32 %v21459_v0, %v7176_v16  ;;  %v17408_v54 = vpop.f32.mrb[187].mxu1 }
 0x894   : > { %7600 = vst [vmem:[#allocation2 + $0x4] sm:$0xe] %v7599_v39  ;;  %v15975_v50 = vpack.c.bf16 %v7451_v19, %v7451_v19  ;;  %v7452_v15 = vmul.f32 %v7417_v23, %v7382_v58  ;;  %v7177_v28 = vadd.f32 %v7152_v8, %v21492_v62  ;;  %v7422_v62 = vpop.permute.xlu0 %7421  ;;  %v7357_v39 = vrot.slane %v7325_v1, 3 }
 0x895   : > { %v7506_v47 = vsel %vm21019_vm11, %v7497_v27, %v7505_v17  ;;  %v7373_v9 = vadd.f32 %v7348_v53, %v7298_v43  ;;  %v7354_v27 = vsel %vm3706_vm7, %v7351_v2, %v7353_v13  ;;  %vm9034_vm9 = vcmask 257024  }
 0x896   : > { %7601 = vst.msk [vmem:[#allocation2 + $0x8] sm:$0xf] %vm439_vm10, %v7506_v47  ;;  %v7509_v42 = vshrl.u32 %v15975_v50, 16  ;;  %v7512_v49 = vshll.u32 %v15975_v50, 16  ;;  %v15976_v44 = vpack.c.bf16 %v7452_v15, %v7452_v15  ;;  %v7299_v0 = vadd.f32 %v21461_v33, %v7177_v28  ;;  %v7880_v15 = vld [vmem:[#allocation2] sm:$0xe] }
 0x897   : > { %v7383_v12 = vmax.f32 %v7373_v9, 0.0  ;;  %v7507_v33 = vrot.slane %v7505_v17, 4 }
 0x898   : > { %v7511_v6 = vrot.slane %v7509_v42, 6  ;;  %v7514_v35 = vrot.slane %v7512_v49, 7  ;;  %v7519_v51 = vshrl.u32 %v15976_v44, 16  ;;  %v7522_v21 = vshll.u32 %v15976_v44, 16  ;;  %v7157_v3 = vpop.f32.mrb[188].mxu1  ;;  %v7432_v53 = vpop.permute.xlu0 %7431 }
 0x899   : > { %v7453_v10 = vmul.f32 %v7422_v62, %v7383_v12  ;;  %v7374_v29 = vadd.f32 %v7350_v30, %v7299_v0  ;;  %v7178_v55 = vadd.f32 %v7157_v3, %v21495_v24  ;;  %v17411_v41 = vpop.f32.mrb[189].mxu1  ;;  %v7356_v62 = vsel %vm3706_vm7, %v7353_v13, %v21530_v25 }
 0x89a   : > { %v7515_v38 = vor.u32 %v7514_v35, %v7511_v6  ;;  %v7521_v31 = vrot.slane %v7519_v51, 6  ;;  %v7524_v5 = vrot.slane %v7522_v21, 7  ;;  %v7160_v56 = vpop.f32.mrb[190].mxu1  ;;  %v7437_v51 = vpop.permute.xlu1 %7436 }
 0x89b   : > { %v15977_v7 = vpack.c.bf16 %v7453_v10, %v7453_v10  ;;  %v7384_v57 = vmax.f32 %v7374_v29, 0.0  ;;  %v7300_v4 = vadd.f32 %v21464_v11, %v7178_v55  ;;  %v7179_v48 = vadd.f32 %v7160_v56, %v21498_v40  ;;  %v17412_v52 = vpop.f32.mrb[191].mxu1  ;;  %v7614_v16 = vld [vmem:[#allocation2 + $0x4] sm:$0xf] }
 0x89c   : > { %v7516_v24 = vsel %vm21019_vm11, %v7507_v33, %v7515_v38  ;;  %v7517_v19 = vrot.slane %v7515_v38, 4  ;;  %v7525_v58 = vor.u32 %v7524_v5, %v7521_v31  ;;  %v21538_v8 = vcombine.low %v7613_v14, %v7614_v16 }
 0x89d   : > { %7602 = vst.msk [vmem:[#allocation2 + $0xc] sm:$0xf] %vm439_vm10, %v7516_v24  ;;  %v7529_v63 = vshrl.u32 %v15977_v7, 16  ;;  %v7532_v36 = vshll.u32 %v15977_v7, 16  ;;  %v7454_v32 = vmul.f32 %v7427_v46, %v7384_v57  ;;  %v7375_v23 = vadd.f32 %v7352_v45, %v7300_v4 }
 0x89e   : > { %v7526_v11 = vsel %vm21019_vm11, %v7517_v19, %v7525_v58  ;;  %v7301_v40 = vadd.f32 %v21466_v37, %v7179_v48  ;;  %v7527_v28 = vrot.slane %v7525_v58, 4  ;;  %v7657_v42 = vshll.u32 %v21538_v8, 16 }
 0x89f   : > { %7603 = vst.msk [vmem:[#allocation2 + $0x10] sm:$0xf] %vm439_vm10, %v7526_v11  ;;  %v7531_v17 = vrot.slane %v7529_v63, 6  ;;  %v7534_v43 = vrot.slane %v7532_v36, 7  ;;  %v15978_v54 = vpack.c.bf16 %v7454_v32, %v7454_v32  ;;  %v7385_v50 = vmax.f32 %v7375_v23, 0.0  ;;  %v19335_v32 = vld [vmem:[%s22860_s3] sm:$0xff]   ;;  %v7442_v23 = vpop.permute.xlu0 %7441 }
 0x8a0   : > { %v7376_v47 = vadd.f32 %v7354_v27, %v7301_v40  ;;  %v7165_v9 = vpop.f32.mrb[192].mxu1  ;;  %v15352_v49 = vcombine.low %v7880_v15, %v7614_v16  ;;  %v7659_v35 = vrot.slane %v7657_v42, 1  ;;  %v7358_v31 = vsel %vm3706_vm7, %v21530_v25, %v7357_v39 }
 0x8a1   : > { %v7535_v44 = vor.u32 %v7534_v43, %v7531_v17  ;;  %v7539_v0 = vshrl.u32 %v15978_v54, 16  ;;  %v7542_v37 = vshll.u32 %v15978_v54, 16  ;;  %v7455_v12 = vmul.f32 %v7432_v53, %v7385_v50  ;;  %v17415_v2 = vpop.f32.mrb[193].mxu1  ;;  %v7447_v50 = vpop.permute.xlu1 %7446 }
 0x8a2   : > { %v7386_v1 = vmax.f32 %v7376_v47, 0.0  ;;  %v7180_v30 = vadd.f32 %v7165_v9, %v21503_v20  ;;  %v7168_v6 = vpop.f32.mrb[194].mxu1  ;;  %v7655_v5 = vshrl.u32 %v21538_v8, 16  ;;  %v7887_v56 = vrot.slane %v15352_v49, 1 }
 0x8a3   : > { %v7536_v21 = vsel %vm21019_vm11, %v7527_v28, %v7535_v44  ;;  %v7537_v3 = vrot.slane %v7535_v44, 4  ;;  %v7541_v10 = vrot.slane %v7539_v0, 6  ;;  %v7544_v29 = vrot.slane %v7542_v37, 7  ;;  %v17416_v55 = vpop.f32.mrb[195].mxu1 }
 0x8a4   : > { %7604 = vst.msk [vmem:[#allocation2 + $0x14] sm:$0xf] %vm439_vm10, %v7536_v21  ;;  %v15979_v45 = vpack.c.bf16 %v7455_v12, %v7455_v12  ;;  %v7456_v41 = vmul.f32 %v7437_v51, %v7386_v1  ;;  %v7302_v33 = vadd.f32 %v21468_v18, %v7180_v30  ;;  %v7181_v20 = vadd.f32 %v7168_v6, %v21506_v60  ;;  %v21555_v38 = vld [vmem:[#allocation2 + $0x8] sm:$0xff]  }
 0x8a5   : > { %v7545_v13 = vor.u32 %v7544_v29, %v7541_v10  ;;  %v7660_v52 = vor.u32 %v7659_v35, %v7655_v5  ;;  %v7662_v60 = vshll.u32 %v21555_v38, 16  ;;  %v7888_v27 = vrot.slane %v21555_v38, 1 }
 0x8a6   : > { %v7549_v14 = vshrl.u32 %v15979_v45, 16  ;;  %v7552_v7 = vshll.u32 %v15979_v45, 16  ;;  %v15980_v57 = vpack.c.bf16 %v7456_v41, %v7456_v41  ;;  %v7377_v4 = vadd.f32 %v7356_v62, %v7302_v33 }
 0x8a7   : > { %v7546_v48 = vsel %vm21019_vm11, %v7537_v3, %v7545_v13  ;;  %v7303_v18 = vadd.f32 %v21470_v26, %v7181_v20  ;;  %v7547_v19 = vrot.slane %v7545_v13, 4  ;;  %v7664_v36 = vrot.slane %v7662_v60, 1 }
 0x8a8   : > { %7605 = vst.msk [vmem:[#allocation2 + $0x18] sm:$0xf] %vm439_vm10, %v7546_v48  ;;  %v7551_v16 = vrot.slane %v7549_v14, 6  ;;  %v7554_v46 = vrot.slane %v7552_v7, 7  ;;  %v7559_v25 = vshrl.u32 %v15980_v57, 16  ;;  %v7562_v24 = vshll.u32 %v15980_v57, 16 }
 0x8a9   : > { %v7387_v58 = vmax.f32 %v7377_v4, 0.0  ;;  %v7378_v63 = vadd.f32 %v7358_v31, %v7303_v18  ;;  %v7665_v43 = vsel %vm586_vm1, %v7660_v52, %v7664_v36  ;;  %v21576_v47 = vsel %vm1192_vm3, %v7887_v56, %v7888_v27  ;;  %v7610_v56 = vld [vmem:[#allocation2 + $0x2c] sm:$0x1] }
 0x8aa   : > { %v7555_v11 = vor.u32 %v7554_v46, %v7551_v16  ;;  %v7561_v26 = vrot.slane %v7559_v25, 6  ;;  %v7564_v40 = vrot.slane %v7562_v24, 7  ;;  %17442 = vmatmul.mubr.msk.bf16.vlgmr.msra.gmra.mrb[196].mxu1 %vm4548_vm12, %v7665_v43  ;;  %v7666_v0 = vshrl.u32 %v21555_v38, 16 }
 0x8ab   : > { %v7457_v39 = vmul.f32 %v7442_v23, %v7387_v58  ;;  %v7388_v17 = vmax.f32 %v7378_v63, 0.0  ;;  %v21570_v54 = vld [vmem:[#allocation2 + $0x10] sm:$0xff]   ;;  %17462 = vmatpush3.bf16.msra.mxu1 %v19335_v32  ;;  %17445 = vmatprep.mubr.msk.bf16.mxu1 %vm19624_vm8, %v19623_v34  ;;  %v21624_v23 = vld [vmem:[#allocation2 + $0xc] sm:$0xf] }
 0x8ac   : > { %v7556_v15 = vsel %vm21019_vm11, %v7547_v19, %v7555_v11  ;;  %v7557_v53 = vrot.slane %v7555_v11, 4  ;;  %v7565_v28 = vor.u32 %v7564_v40, %v7561_v26  ;;  %v7670_v49 = vshll.u32 %v21570_v54, 16  ;;  %17483 = vmatprep.subr.bf16.mxu1 %v19623_v34  ;;  %v8789_v11 = vld [vmem:[#allocation2 + $0x8] sm:$0x8] }
 0x8ad   : > { %7606 = vst.msk [vmem:[#allocation2 + $0x1c] sm:$0xf] %vm439_vm10, %v7556_v15  ;;  %v15981_v9 = vpack.c.bf16 %v7457_v39, %v7457_v39  ;;  %v7458_v42 = vmul.f32 %v7447_v50, %v7388_v17  ;;  %v7890_v37 = vrot.slane %v21570_v54, 1  ;;  %v7668_v62 = vor.u32 %v7666_v0, %v7664_v36 }
 0x8ae   : > { %v7566_v44 = vsel %vm21019_vm11, %v7557_v53, %v7565_v28  ;;  %v7672_v30 = vrot.slane %v7670_v49, 1  ;;  %v7567_v29 = vrot.slane %v7565_v28, 4  ;;  %v7674_v14 = vshrl.u32 %v21570_v54, 16 }
 0x8af   : > { %7607 = vst.msk [vmem:[#allocation2 + $0x20] sm:$0xf] %vm439_vm10, %v7566_v44  ;;  %v7569_v12 = vshrl.u32 %v15981_v9, 16  ;;  %v7572_v2 = vshll.u32 %v15981_v9, 16  ;;  %v15982_v1 = vpack.c.bf16 %v7458_v42, %v7458_v42  ;;  %v21589_v6 = vsel %vm1192_vm3, %v7888_v27, %v7890_v37  ;;  %v21628_v27 = vld [vmem:[#allocation2 + $0x10] sm:$0xff]  }
 0x8b0   : > { %v7673_v10 = vsel %vm586_vm1, %v7668_v62, %v7672_v30  ;;  %v7676_v18 = vor.u32 %v7674_v14, %v7672_v30  ;;  %v15420_v40 = vcombine.low %v8789_v11, %v21624_v23  ;;  %v8797_v53 = vrot.slane %v21628_v27, 3 }
 0x8b1   : > { %v7571_v35 = vrot.slane %v7569_v12, 6  ;;  %v7574_v51 = vrot.slane %v7572_v2, 7  ;;  %v7579_v21 = vshrl.u32 %v15982_v1, 16  ;;  %v7582_v3 = vshll.u32 %v15982_v1, 16  ;;  %v19428_v2 = vld [vmem:[#allocation2 + $0x10] sm:$0xff]  }
 0x8b2   : > { %17446 = vmatmul.mubr.msk.bf16.gmra.mrb[200].mxu1 %vm4548_vm12, %v7673_v10  ;;  %v8796_v15 = vrot.slane %v15420_v40, 3 }
 0x8b3   : > { %v7575_v55 = vor.u32 %v7574_v51, %v7571_v35  ;;  %v7581_v45 = vrot.slane %v7579_v21, 6  ;;  %v7584_v41 = vrot.slane %v7582_v3, 7  ;;  %17449 = vmatprep.mubr.msk.bf16.mxu1 %vm19624_vm8, %v19623_v34  ;;  %v11007_v21 = vrot.slane %v19428_v2, 3 }
 0x8b4   : > { %v19337_v33 = vld [vmem:[#allocation2 + $0x18] sm:$0xff]   ;;  %v21644_v49 = vsel %vm3706_vm7, %v8796_v15, %v8797_v53 }
 0x8b5   : > { %v7576_v20 = vsel %vm21019_vm11, %v7567_v29, %v7575_v55  ;;  %v7577_v13 = vrot.slane %v7575_v55, 4  ;;  %v7585_v31 = vor.u32 %v7584_v41, %v7581_v45  ;;  %v7587_v5 = vrot.slane %v7581_v45, 4  ;;  %v21630_v39 = vld [vmem:[#allocation2 + $0x18] sm:$0xff]  }
 0x8b6   : > { %7608 = vst.msk [vmem:[#allocation2 + $0x24] sm:$0xf] %vm439_vm10, %v7576_v20  ;;  %v7678_v7 = vshll.u32 %v19337_v33, 16  ;;  %v7892_v57 = vrot.slane %v19337_v33, 1  ;;  %v7621_v59 = vld [vmem:[#allocation2 + $0x20] sm:$0xf] }
 0x8b7   : > { %v7586_v4 = vsel %vm21019_vm11, %v7577_v13, %v7585_v31  ;;  %v7611_v48 = vsel %vm21093_vm15, %v7587_v5, %v7610_v56  ;;  %v7682_v22 = vshrl.u32 %v19337_v33, 16  ;;  %v8799_v28 = vrot.slane %v21630_v39, 3  ;;  %v19430_v1 = vld [vmem:[#allocation2 + $0x18] sm:$0xff]   ;;  %v19345_v56 = vld [vmem:[%s22860_s3 + $0x20] sm:$0xff]  }
 0x8b8   : > { %7609 = vst.msk [vmem:[#allocation2 + $0x28] sm:$0xf] %vm439_vm10, %v7586_v4  ;;  %7612 = vst [vmem:[#allocation2 + $0x2c] sm:$0x1] %v7611_v48  ;;  %v7680_v52 = vrot.slane %v7678_v7, 1  ;;  %v21605_v60 = vsel %vm1192_vm3, %v7890_v37, %v7892_v57  ;;  %v19339_v37 = vld [vmem:[%s22860_s3 + $0x10] sm:$0xff]  }
 0x8b9   : > { %v21647_v44 = vsel %vm3706_vm7, %v8797_v53, %v8799_v28  ;;  %v11009_v3 = vrot.slane %v19430_v1, 3  ;;  %v19342_v13 = vld [vmem:[%s22860_s3 + $0x18] sm:$0xff]   ;;  %vm8944_vm10 = vcmask 637952   ;;  %vm9039_vm11 = vcmask 254976  }
 0x8ba   : > { %v7681_v16 = vsel %vm586_vm1, %v7676_v18, %v7680_v52  ;;  %v7684_v58 = vor.u32 %v7682_v22, %v7680_v52  ;;  %v19346_v7 = vld [vmem:[#allocation2 + $0x14] sm:$0xff]   ;;  %v19347_v48 = vld [vmem:[#allocation2 + $0x1c] sm:$0xff]   ;;  %v8151_v22 = vld [vmem:[#allocation2 + $0x4] sm:$0xe] }
 0x8bb   : > { %17450 = vmatmul.mubr.msk.bf16.gmra.mrb[204].mxu1 %vm4548_vm12, %v7681_v16  ;;  %v21679_v55 = vsel %vm3706_vm7, %v11007_v21, %v11009_v3  ;;  %v8043_v18 = vrot.slane %v19347_v48, 1 }
 0x8bc   : > { %17453 = vmatprep.mubr.msk.bf16.mxu1 %vm19624_vm8, %v19623_v34 }
 0x8bd   : > { %v7625_v46 = vld [vmem:[#allocation2 + $0x24] sm:$0xf] }
 0x8be   : > { %v21611_v25 = vcombine.low %v7621_v59, %v7625_v46  ;;  %v21632_v43 = vld [vmem:[#allocation2 + $0x20] sm:$0xff]  }
 0x8bf   : > { %v21634_v50 = vld [vmem:[#allocation2 + $0x28] sm:$0xff]   ;;  %v8801_v9 = vrot.slane %v21632_v43, 3  ;;  %v19431_v30 = vld [vmem:[#allocation2 + $0x20] sm:$0xff]  }
 0x8c0   : > { %v7686_v24 = vshll.u32 %v21611_v25, 16  ;;  %v7894_v19 = vrot.slane %v21611_v25, 1  ;;  %v7690_v26 = vshrl.u32 %v21611_v25, 16  ;;  %v8803_v42 = vrot.slane %v21634_v50, 3  ;;  %v21676_v62 = vld [vmem:[#allocation2 + $0x28] sm:$0xff]  }
 0x8c1   : > { %v21650_v0 = vsel %vm3706_vm7, %v8799_v28, %v8801_v9  ;;  %v7622_v35 = vld [vmem:[#allocation2 + $0x24] sm:$0x7]  ;;  %v11011_v10 = vrot.slane %v19431_v30, 3  ;;  %v11013_v45 = vrot.slane %v21676_v62, 3  ;;  %v21738_v25 = vld [vmem:[#allocation2 + $0xc] sm:$0xff]   ;;  %v19353_v30 = vld [vmem:[#allocation2 + $0x1c] sm:$0xff]  }
 0x8c2   : > { %v7688_v63 = vrot.slane %v7686_v24, 1  ;;  %v21618_v36 = vsel %vm1192_vm3, %v7892_v57, %v7894_v19  ;;  %v21658_v12 = vsel %vm3706_vm7, %v8801_v9, %v8803_v42  ;;  %v15343_v29 = vcombine.low %v7621_v59, %v7622_v35  ;;  %v8152_v59 = vld [vmem:[#allocation2 + $0x8] sm:$0xf] }
 0x8c3   : > { %v21692_v20 = vsel %vm3706_vm7, %v11011_v10, %v11013_v45  ;;  %v8041_v57 = vrot.slane %v19346_v7, 1  ;;  %v15374_v24 = vcombine.low %v8151_v22, %v8152_v59  ;;  %v8220_v35 = vshrl.u32 %v19353_v30, 16 }
 0x8c4   : > { %v7689_v32 = vsel %vm586_vm1, %v7684_v58, %v7688_v63  ;;  %v7692_v17 = vor.u32 %v7690_v26, %v7688_v63  ;;  %v8205_v58 = vshll.u32 %v21738_v25, 16  ;;  %v19352_v26 = vld [vmem:[#allocation2 + $0x14] sm:$0xff]  }
 0x8c5   : > { %17454 = vmatmul.mubr.msk.bf16.gmra.mrb[208].mxu1 %vm4548_vm12, %v7689_v32  ;;  %v8044_v52 = vsel %vm1192_vm3, %v8041_v57, %v8043_v18  ;;  %v8194_v63 = vshrl.u32 %v15374_v24, 16  ;;  %v8211_v53 = vshrl.u32 %v19352_v26, 16  ;;  %v8214_v28 = vshll.u32 %v19352_v26, 16 }
 0x8c6   : > { %17457 = vmatprep.mubr.msk.bf16.mxu1 %vm19624_vm8, %v19623_v34  ;;  %v8207_v11 = vrot.slane %v8205_v58, 2 }
 0x8c7   : > { %v8196_v40 = vrot.slane %v8194_v63, 1  ;;  %v8213_v2 = vrot.slane %v8211_v53, 1  ;;  %v8216_v1 = vrot.slane %v8214_v28, 2  ;;  %v8513_v28 = vrot.slane %v21630_v39, 2 }
 0x8cd   : > { %17458 = vmatmul.mubr.msk.bf16.gmra.mrb[212].mxu1 %vm4548_vm12, %v7692_v17 }
 0x8ce   : > { %17463 = vmatprep.mubr.msk.bf16.mxu1 %vm19624_vm8, %v19623_v34 }
 0x8d5   : > { %17464 = vmatmul.mubr.msk.bf16.vlgmr.msra.gmra.mrb[196].mxu1 %vm4548_vm12, %v21538_v8  ;;  %v10679_v8 = vld [vmem:[#allocation2 + $0xc] sm:$0xf] }
 0x8d6   : > { %17484 = vmatpush3.bf16.msra.mxu1 %v19339_v37  ;;  %17467 = vmatprep.mubr.msk.bf16.mxu1 %vm19624_vm8, %v19623_v34  ;;  %v19351_v37 = vld [vmem:[%s22860_s3 + $0x28] sm:$0xff]  }
 0x8d7   : > { %17505 = vmatprep.subr.bf16.mxu1 %v19623_v34 }
 0x8dd   : > { %17468 = vmatmul.mubr.msk.bf16.gmra.mrb[200].mxu1 %vm4548_vm12, %v21555_v38  ;;  %v10999_v38 = vld [vmem:[#allocation2 + $0x8] sm:$0x8] }
 0x8de   : > { %17471 = vmatprep.mubr.msk.bf16.mxu1 %vm19624_vm8, %v19623_v34  ;;  %v15611_v51 = vcombine.low %v10999_v38, %v10679_v8  ;;  %v8217_v38 = vor.u32 %v8216_v1, %v8213_v2  ;;  %v19364_v1 = vld [vmem:[#allocation2 + $0x30] ss:$0 sps:$4 sm:$0x11]  }
 0x8e5   : > { %17472 = vmatmul.mubr.msk.bf16.gmra.mrb[204].mxu1 %vm4548_vm12, %v21570_v54  ;;  %v11006_v54 = vrot.slane %v15611_v51, 3  ;;  %v8223_v51 = vshll.u32 %v19353_v30, 16 }
 0x8e6   : > { %17475 = vmatprep.mubr.msk.bf16.mxu1 %vm19624_vm8, %v19623_v34 }
 0x8e7   : > { %v21683_v41 = vsel %vm3706_vm7, %v11006_v54, %v11007_v21  ;;  %v8225_v54 = vrot.slane %v8223_v51, 2 }
 0x8ed   : > { %17476 = vmatmul.mubr.msk.bf16.gmra.mrb[208].mxu1 %vm4548_vm12, %v19337_v33  ;;  %v21687_v33 = vsel %vm3706_vm7, %v11009_v3, %v11011_v10  ;;  %v8222_v3 = vrot.slane %v8220_v35, 1  ;;  %v19354_v10 = vld [vmem:[#allocation2 + $0x24] sm:$0xff]   ;;  %v8519_v35 = vrot.slane %v19364_v1, 2 }
 0x8ee   : > { %17479 = vmatprep.mubr.msk.bf16.mxu1 %vm19624_vm8, %v19623_v34  ;;  %v8360_v58 = vrot.slane %v19354_v10, 2 }
 0x8f5   : > { %17480 = vmatmul.mubr.msk.bf16.gmra.mrb[212].mxu1 %vm4548_vm12, %v15343_v29  ;;  %v8226_v29 = vor.u32 %v8225_v54, %v8222_v3 }
 0x8f6   : > { %17485 = vmatprep.mubr.msk.bf16.mxu1 %vm19624_vm8, %v19623_v34 }
 0x8fd   : > { %17486 = vmatmul.mubr.msk.bf16.vlgmr.msra.gmra.mrb[196].mxu1 %vm4548_vm12, %v21576_v47  ;;  %v19344_v47 = vld [vmem:[#allocation2 + $0xc] sm:$0xff]  }
 0x8fe   : > { %17506 = vmatpush3.bf16.msra.mxu1 %v19342_v13  ;;  %17489 = vmatprep.mubr.msk.bf16.mxu1 %vm19624_vm8, %v19623_v34  ;;  %v8039_v31 = vrot.slane %v19344_v47, 1  ;;  %v8229_v13 = vshrl.u32 %v19354_v10, 16  ;;  %v8232_v47 = vshll.u32 %v19354_v10, 16 }
 0x8ff   : > { %17527 = vmatprep.subr.bf16.mxu1 %v19623_v34 }
 0x900   : > { %v8042_v4 = vsel %vm1192_vm3, %v8039_v31, %v8041_v57 }
 0x905   : > { %17490 = vmatmul.mubr.msk.bf16.gmra.mrb[200].mxu1 %vm4548_vm12, %v21589_v6  ;;  %v19343_v6 = vld [vmem:[#allocation2 + $0x4] sm:$0xfe]  }
 0x906   : > { %17493 = vmatprep.mubr.msk.bf16.mxu1 %vm19624_vm8, %v19623_v34  ;;  %v8038_v5 = vrot.slane %v19343_v6, 1  ;;  %v8227_v6 = vsel %vm2063_vm4, %v8217_v38, %v8226_v29 }
 0x908   : > { %v8040_v14 = vsel %vm1192_vm3, %v8038_v5, %v8039_v31  ;;  %v8231_v31 = vrot.slane %v8229_v13, 1  ;;  %v8234_v5 = vrot.slane %v8232_v47, 2 }
 0x90d   : > { %17494 = vmatmul.mubr.msk.bf16.gmra.mrb[204].mxu1 %vm4548_vm12, %v21605_v60  ;;  %v19348_v60 = vld [vmem:[#allocation2 + $0x24] sm:$0xff]  }
 0x90e   : > { %17497 = vmatprep.mubr.msk.bf16.mxu1 %vm19624_vm8, %v19623_v34  ;;  %v8045_v16 = vrot.slane %v19348_v60, 1  ;;  %v8354_v60 = vrot.slane %v21738_v25, 2 }
 0x910   : > { %v8046_v46 = vsel %vm1192_vm3, %v8043_v18, %v8045_v16  ;;  %v8346_v18 = vld [vmem:[#allocation2 + $0x4] sm:$0xc] }
 0x915   : > { %17498 = vmatmul.mubr.msk.bf16.gmra.mrb[208].mxu1 %vm4548_vm12, %v21618_v36  ;;  %v8197_v36 = vshll.u32 %v15374_v24, 16  ;;  %v8356_v24 = vrot.slane %v19352_v26, 2 }
 0x916   : > { %17501 = vmatprep.mubr.msk.bf16.mxu1 %vm19624_vm8, %v19623_v34 }
 0x917   : > { %v8199_v17 = vrot.slane %v8197_v36, 2 }
 0x919   : > { %v8200_v9 = vor.u32 %v8199_v17, %v8196_v40  ;;  %v8511_v40 = vrot.slane %v21628_v27, 2 }
 0x91d   : > { %17502 = vmatmul.mubr.msk.bf16.gmra.mrb[212].mxu1 %vm4548_vm12, %v7894_v19  ;;  %v8202_v19 = vshrl.u32 %v21738_v25, 16  ;;  %v8358_v25 = vrot.slane %v19353_v30, 2  ;;  %v8641_v30 = vshrl.u32 %v21628_v27, 16 }
 0x91e   : > { %17507 = vmatprep.mubr.msk.bf16.mxu1 %vm19624_vm8, %v19623_v34 }
 0x91f   : > { %v8204_v32 = vrot.slane %v8202_v19, 1  ;;  %v8359_v19 = vsel %vm2506_vm5, %v8356_v24, %v8358_v25  ;;  %v8361_v63 = vsel %vm2506_vm5, %v8358_v25, %v8360_v58  ;;  %v8643_v54 = vrot.slane %v8641_v30, 2 }
 0x921   : > { %v8208_v15 = vor.u32 %v8207_v11, %v8204_v32  ;;  %v8468_v11 = vld [vmem:[#allocation2 + $0x8] sm:$0xc] }
 0x922   : > { %v15397_v26 = vcombine.low %v8468_v11, %v21624_v23  ;;  %v8514_v23 = vsel %vm2506_vm5, %v8511_v40, %v8513_v28 }
 0x923   : > { %v8209_v8 = vsel %vm2063_vm4, %v8200_v9, %v8208_v15  ;;  %v8218_v21 = vsel %vm2063_vm4, %v8208_v15, %v8217_v38  ;;  %v19360_v15 = vld [vmem:[%s22860_s3 + $0x38] sm:$0xff]   ;;  %v8515_v9 = vrot.slane %v21632_v43, 2  ;;  %v8644_v38 = vshll.u32 %v21628_v27, 16 }
 0x924   : > { %v8510_v17 = vrot.slane %v15397_v26, 2  ;;  %v8633_v51 = vshrl.u32 %v15397_v26, 16 }
 0x925   : > { %17508 = vmatmul.mubr.msk.bf16.vlgmr.msra.gmra.mrb[196].mxu1 %vm4548_vm12, %v8040_v14  ;;  %v19355_v14 = vld [vmem:[#allocation2 + $0x2c] ss:$0 sps:$4 sm:$0x11]   ;;  %v8646_v10 = vrot.slane %v8644_v38, 3 }
 0x926   : > { %17528 = vmatpush3.bf16.msra.mxu1 %v19345_v56  ;;  %17511 = vmatprep.mubr.msk.bf16.mxu1 %vm19624_vm8, %v19623_v34  ;;  %v8235_v56 = vor.u32 %v8234_v5, %v8231_v31  ;;  %v8238_v57 = vshll.u32 %v19355_v14, 16  ;;  %v8362_v36 = vrot.slane %v19355_v14, 2  ;;  %v8512_v53 = vsel %vm2506_vm5, %v8510_v17, %v8511_v40  ;;  %v19365_v5 = vld [vmem:[%s22860_s3 + $0x40] sm:$0xff]  }
 0x927   : > { %17549 = vmatprep.subr.bf16.mxu1 %v19623_v34  ;;  %v8647_v47 = vor.u32 %v8646_v10, %v8643_v54  ;;  %v8653_v31 = vshll.u32 %v21630_v39, 16 }
 0x928   : > { %v8236_v7 = vsel %vm2063_vm4, %v8226_v29, %v8235_v56  ;;  %v8363_v32 = vsel %vm2506_vm5, %v8360_v58, %v8362_v36  ;;  %v8635_v29 = vrot.slane %v8633_v51, 2 }
 0x92d   : > { %17512 = vmatmul.mubr.msk.bf16.gmra.mrb[200].mxu1 %vm4548_vm12, %v8042_v4  ;;  %v8240_v4 = vrot.slane %v8238_v57, 2 }
 0x92e   : > { %17515 = vmatprep.mubr.msk.bf16.mxu1 %vm19624_vm8, %v19623_v34 }
 0x92f   : > { %v8241_v48 = vsel %vm2063_vm4, %v8235_v56, %v8240_v4  ;;  %v8662_v4 = vshll.u32 %v21632_v43, 16 }
 0x935   : > { %17516 = vmatmul.mubr.msk.bf16.gmra.mrb[204].mxu1 %vm4548_vm12, %v8044_v52  ;;  %v15388_v52 = vcombine.low %v8346_v18, %v8152_v59  ;;  %v8357_v59 = vsel %vm2506_vm5, %v8354_v60, %v8356_v24 }
 0x936   : > { %17519 = vmatprep.mubr.msk.bf16.mxu1 %vm19624_vm8, %v19623_v34 }
 0x93d   : > { %17520 = vmatmul.mubr.msk.bf16.gmra.mrb[208].mxu1 %vm4548_vm12, %v8046_v46  ;;  %v19357_v46 = vld [vmem:[%s22860_s3 + $0x30] sm:$0xff]  }
 0x93e   : > { %17523 = vmatprep.mubr.msk.bf16.mxu1 %vm19624_vm8, %v19623_v34 }
 0x945   : > { %17524 = vmatmul.mubr.msk.bf16.gmra.mrb[212].mxu1 %vm4548_vm12, %v8045_v16  ;;  %v8353_v16 = vrot.slane %v15388_v52, 2  ;;  %v8664_v52 = vrot.slane %v8662_v4, 3 }
 0x946   : > { %17529 = vmatprep.mubr.msk.bf16.mxu1 %vm19624_vm8, %v19623_v34 }
 0x947   : > { %v8355_v22 = vsel %vm2506_vm5, %v8353_v16, %v8354_v60  ;;  %v8668_v16 = vshrl.u32 %v21634_v50, 16 }
 0x949   : > { %v8670_v24 = vrot.slane %v8668_v16, 2  ;;  %v19372_v16 = vld [vmem:[%s22861_s4 + $0x18] sm:$0xff]  }
 0x94d   : > { %17530 = vmatmul.mubr.msk.bf16.vlgmr.msra.gmra.mrb[196].mxu1 %vm4548_vm12, %v8209_v8  ;;  %v8517_v8 = vrot.slane %v21634_v50, 2 }
 0x94e   : > { %17550 = vmatpush3.bf16.msra.mxu1 %v19351_v37  ;;  %17533 = vmatprep.mubr.msk.bf16.mxu1 %vm19624_vm8, %v19623_v34  ;;  %v8516_v37 = vsel %vm2506_vm5, %v8513_v28, %v8515_v9 }
 0x94f   : > { %17571 = vmatprep.subr.bf16.mxu1 %v19623_v34  ;;  %v8518_v2 = vsel %vm2506_vm5, %v8515_v9, %v8517_v8  ;;  %v8520_v3 = vsel %vm2506_vm5, %v8517_v8, %v8519_v35 }
 0x955   : > { %17534 = vmatmul.mubr.msk.bf16.gmra.mrb[200].mxu1 %vm4548_vm12, %v8218_v21  ;;  %v8636_v21 = vshll.u32 %v15397_v26, 16 }
 0x956   : > { %17537 = vmatprep.mubr.msk.bf16.mxu1 %vm19624_vm8, %v19623_v34 }
 0x957   : > { %v8638_v13 = vrot.slane %v8636_v21, 3 }
 0x959   : > { %v8639_v27 = vor.u32 %v8638_v13, %v8635_v29 }
 0x95b   : > { %v8648_v56 = vsel %vm3259_vm6, %v8639_v27, %v8647_v47 }
 0x95d   : > { %17538 = vmatmul.mubr.msk.bf16.gmra.mrb[204].mxu1 %vm4548_vm12, %v8227_v6  ;;  %v8650_v6 = vshrl.u32 %v21630_v39, 16  ;;  %v8659_v39 = vshrl.u32 %v21632_v43, 16  ;;  %v19366_v43 = vld [vmem:[#allocation2 + $0x30] ss:$0 sps:$4 sm:$0x33]  }
 0x95e   : > { %17541 = vmatprep.mubr.msk.bf16.mxu1 %vm19624_vm8, %v19623_v34  ;;  %v8680_v58 = vshll.u32 %v19366_v43, 16 }
 0x95f   : > { %v8652_v14 = vrot.slane %v8650_v6, 2  ;;  %v8661_v18 = vrot.slane %v8659_v39, 2 }
 0x961   : > { %v8665_v60 = vor.u32 %v8664_v52, %v8661_v18  ;;  %v19369_v18 = vld [vmem:[%s22864_s7 + $0x8] sm:$0xff]   ;;  %v19370_v52 = vld [vmem:[%s22864_s7 + $0x10] ss:$0 sps:$4 sm:$0x33]  }
 0x965   : > { %17542 = vmatmul.mubr.msk.bf16.gmra.mrb[208].mxu1 %vm4548_vm12, %v8236_v7  ;;  %v8655_v7 = vrot.slane %v8653_v31, 3 }
 0x966   : > { %17545 = vmatprep.mubr.msk.bf16.mxu1 %vm19624_vm8, %v19623_v34 }
 0x967   : > { %v8656_v57 = vor.u32 %v8655_v7, %v8652_v14 }
 0x96d   : > { %17546 = vmatmul.mubr.msk.bf16.gmra.mrb[212].mxu1 %vm4548_vm12, %v8241_v48  ;;  %v8657_v48 = vsel %vm3259_vm6, %v8647_v47, %v8656_v57 }
 0x96e   : > { %17551 = vmatprep.mubr.msk.bf16.mxu1 %vm19624_vm8, %v19623_v34 }
 0x975   : > { %17552 = vmatmul.mubr.msk.bf16.vlgmr.msra.gmra.mrb[196].mxu1 %vm4548_vm12, %v8355_v22  ;;  %v8666_v22 = vsel %vm3259_vm6, %v8656_v57, %v8665_v60 }
 0x976   : > { %17572 = vmatpush3.bf16.msra.mxu1 %v19357_v46  ;;  %17555 = vmatprep.mubr.msk.bf16.mxu1 %vm19624_vm8, %v19623_v34  ;;  %v8671_v46 = vshll.u32 %v21634_v50, 16 }
 0x977   : > { %17593 = vmatprep.subr.bf16.mxu1 %v19623_v34 }
 0x97d   : > { %17556 = vmatmul.mubr.msk.bf16.gmra.mrb[200].mxu1 %vm4548_vm12, %v8357_v59  ;;  %v8673_v59 = vrot.slane %v8671_v46, 3  ;;  %v19375_v46 = vld [vmem:[%s22861_s4] sm:$0xff]  }
 0x97e   : > { %17559 = vmatprep.mubr.msk.bf16.mxu1 %vm19624_vm8, %v19623_v34 }
 0x97f   : > { %v8674_v25 = vor.u32 %v8673_v59, %v8670_v24 }
 0x985   : > { %17560 = vmatmul.mubr.msk.bf16.gmra.mrb[204].mxu1 %vm4548_vm12, %v8359_v19  ;;  %v8677_v19 = vshrl.u32 %v19366_v43, 16 }
 0x986   : > { %17563 = vmatprep.mubr.msk.bf16.mxu1 %vm19624_vm8, %v19623_v34 }
 0x987   : > { %v8679_v36 = vrot.slane %v8677_v19, 2 }
 0x98d   : > { %17564 = vmatmul.mubr.msk.bf16.gmra.mrb[208].mxu1 %vm4548_vm12, %v8361_v63  ;;  %v8675_v63 = vsel %vm3259_vm6, %v8665_v60, %v8674_v25  ;;  %v19371_v60 = vld [vmem:[%s22861_s4 + $0x10] sm:$0xff]  }
 0x98e   : > { %17567 = vmatprep.mubr.msk.bf16.mxu1 %vm19624_vm8, %v19623_v34 }
 0x995   : > { %17568 = vmatmul.mubr.msk.bf16.gmra.mrb[212].mxu1 %vm4548_vm12, %v8363_v32  ;;  %v8682_v32 = vrot.slane %v8680_v58, 3 }
 0x996   : > { %17573 = vmatprep.mubr.msk.bf16.mxu1 %vm19624_vm8, %v19623_v34 }
 0x997   : > { %v8683_v11 = vor.u32 %v8682_v32, %v8679_v36 }
 0x999   : > { %v8684_v26 = vsel %vm3259_vm6, %v8674_v25, %v8683_v11 }
 0x99d   : > { %17574 = vmatmul.mubr.msk.bf16.vlgmr.msra.gmra.mrb[196].mxu1 %vm4548_vm12, %v8512_v53 }
 0x99e   : > { %17594 = vmatpush3.bf16.msra.mxu1 %v19360_v15  ;;  %17577 = vmatprep.mubr.msk.bf16.mxu1 %vm19624_vm8, %v19623_v34 }
 0x99f   : > { %17615 = vmatprep.subr.bf16.mxu1 %v19623_v34 }
 0x9a5   : > { %17578 = vmatmul.mubr.msk.bf16.gmra.mrb[200].mxu1 %vm4548_vm12, %v8514_v23 }
 0x9a6   : > { %17581 = vmatprep.mubr.msk.bf16.mxu1 %vm19624_vm8, %v19623_v34 }
 0x9ad   : > { %17582 = vmatmul.mubr.msk.bf16.gmra.mrb[204].mxu1 %vm4548_vm12, %v8516_v37 }
 0x9ae   : > { %17585 = vmatprep.mubr.msk.bf16.mxu1 %vm19624_vm8, %v19623_v34 }
 0x9b5   : > { %17586 = vmatmul.mubr.msk.bf16.gmra.mrb[208].mxu1 %vm4548_vm12, %v8518_v2 }
 0x9b6   : > { %17589 = vmatprep.mubr.msk.bf16.mxu1 %vm19624_vm8, %v19623_v34 }
 0x9bd   : > { %17590 = vmatmul.mubr.msk.bf16.gmra.mrb[212].mxu1 %vm4548_vm12, %v8520_v3 }
 0x9be   : > { %17595 = vmatprep.mubr.msk.bf16.mxu1 %vm19624_vm8, %v19623_v34 }
 0x9c5   : > { %17596 = vmatmul.mubr.msk.bf16.vlgmr.msra.gmra.mrb[196].mxu1 %vm4548_vm12, %v8648_v56 }
 0x9c6   : > { %17616 = vmatpush3.bf16.msra.mxu1 %v19365_v5  ;;  %17599 = vmatprep.mubr.msk.bf16.mxu1 %vm19624_vm8, %v19623_v34 }
 0x9c7   : > { %17929 = vmatprep.subr.bf16.mxu1 %v19623_v34 }
 0x9cd   : > { %17600 = vmatmul.mubr.msk.bf16.gmra.mrb[200].mxu1 %vm4548_vm12, %v8657_v48  ;;  %v19368_v48 = vld [vmem:[%s22864_s7] sm:$0xff]  }
 0x9ce   : > { %17603 = vmatprep.mubr.msk.bf16.mxu1 %vm19624_vm8, %v19623_v34 }
 0x9d5   : > { %17604 = vmatmul.mubr.msk.bf16.gmra.mrb[204].mxu1 %vm4548_vm12, %v8666_v22 }
 0x9d6   : > { %17607 = vmatprep.mubr.msk.bf16.mxu1 %vm19624_vm8, %v19623_v34 }
 0x9dd   : > { %17608 = vmatmul.mubr.msk.bf16.gmra.mrb[208].mxu1 %vm4548_vm12, %v8675_v63 }
 0x9de   : > { %17611 = vmatprep.mubr.msk.bf16.mxu1 %vm19624_vm8, %v19623_v34 }
 0x9e5   : > { %17612 = vmatmul.mubr.msk.bf16.gmra.mrb[212].mxu1 %vm4548_vm12, %v8684_v26 }
 0x9e6   : > { %17617 = vmatprep.mubr.msk.bf16.mxu1 %vm19624_vm8, %v19623_v34 }
 0x9ed   : > { %17618 = vmatmul.mubr.msk.bf16.vlgmr.msra.gmra.mrb[196].mxu1 %vm4548_vm12, %v21644_v49  ;;  %v8805_v49 = vrot.slane %v19366_v43, 3 }
 0x9ee   : > { %17621 = vmatprep.mubr.msk.bf16.mxu1 %vm19624_vm8, %v19623_v34 }
 0x9f5   : > { %17622 = vmatmul.mubr.msk.bf16.gmra.mrb[200].mxu1 %vm4548_vm12, %v21647_v44  ;;  %v8806_v44 = vsel %vm3706_vm7, %v8803_v42, %v8805_v49 }
 0x9f6   : > { %17625 = vmatprep.mubr.msk.bf16.mxu1 %vm19624_vm8, %v19623_v34 }
 0x9fd   : > { %17626 = vmatmul.mubr.msk.bf16.gmra.mrb[204].mxu1 %vm4548_vm12, %v21650_v0 }
 0x9fe   : > { %17629 = vmatprep.mubr.msk.bf16.mxu1 %vm19624_vm8, %v19623_v34 }
 0xa05   : > { %17630 = vmatmul.mubr.msk.bf16.gmra.mrb[208].mxu1 %vm4548_vm12, %v21658_v12 }
 0xa06   : > { %17633 = vmatprep.mubr.msk.bf16.mxu1 %vm19624_vm8, %v19623_v34 }
 0xa0d   : > { %17634 = vmatmul.mubr.msk.bf16.gmra.mrb[212].mxu1 %vm4548_vm12, %v8806_v44 }
 0xa0e   : > { %17939 = vmatprep.mubr.msk.bf16.mxu1 %vm19624_vm8, %v19623_v34 }
 0xac0   : > { %v8862_v0 = vpop.f32.mrb[196].mxu1 }
 0xac1   : > { %v17619_v40 = vpop.f32.mrb[197].mxu1  ;;  %v8911_v15 = vmax.f32 %v8862_v0, 0.0 }
 0xac2   : > { %v8865_v17 = vpop.f32.mrb[198].mxu1 }
 0xac3   : > { %v8912_v53 = vmax.f32 %v8865_v17, 0.0  ;;  %v17620_v28 = vpop.f32.mrb[199].mxu1 }
 0xac5   : > { %v8926_v12 = vpack.c.bf16 %v8912_v53, %v8911_v15 }
 0xac7   : > { %17638 = vmatpush3.bf16.msra.mxu0 %v8926_v12 }
 0xac8   : > { %v8870_v23 = vpop.f32.mrb[200].mxu1  ;;  %17639 = vmatprep.subr.bf16.mxu0 %v19623_v34 }
 0xac9   : > { %v17623_v9 = vpop.f32.mrb[201].mxu1  ;;  %v8913_v37 = vmax.f32 %v8870_v23, 0.0 }
 0xaca   : > { %v8873_v50 = vpop.f32.mrb[202].mxu1 }
 0xacb   : > { %v8914_v42 = vmax.f32 %v8873_v50, 0.0  ;;  %v17624_v8 = vpop.f32.mrb[203].mxu1 }
 0xacd   : > { %v8927_v2 = vpack.c.bf16 %v8914_v42, %v8913_v37 }
 0xacf   : > { %17640 = vmatpush3.bf16.msra.mxu0 %v8927_v2 }
 0xad0   : > { %v8878_v1 = vpop.f32.mrb[204].mxu1  ;;  %17641 = vmatprep.subr.bf16.mxu0 %v19623_v34 }
 0xad1   : > { %v17627_v30 = vpop.f32.mrb[205].mxu1  ;;  %v8915_v35 = vmax.f32 %v8878_v1, 0.0 }
 0xad2   : > { %v8881_v38 = vpop.f32.mrb[206].mxu1  ;;  %v19376_v30 = vld [vmem:[%s22861_s4 + $0x8] sm:$0xff]  }
 0xad3   : > { %v8916_v51 = vmax.f32 %v8881_v38, 0.0  ;;  %v17628_v21 = vpop.f32.mrb[207].mxu1 }
 0xad5   : > { %v8928_v3 = vpack.c.bf16 %v8916_v51, %v8915_v35  ;;  %v19378_v35 = vld [vmem:[%s22861_s4 + $0x20] sm:$0xff]  }
 0xad7   : > { %17642 = vmatpush3.bf16.msra.mxu0 %v8928_v3 }
 0xad8   : > { %v8886_v54 = vpop.f32.mrb[208].mxu1  ;;  %17643 = vmatprep.subr.bf16.mxu0 %v19623_v34 }
 0xad9   : > { %v17631_v10 = vpop.f32.mrb[209].mxu1  ;;  %v8917_v13 = vmax.f32 %v8886_v54, 0.0 }
 0xada   : > { %v8889_v29 = vpop.f32.mrb[210].mxu1 }
 0xadb   : > { %v8918_v47 = vmax.f32 %v8889_v29, 0.0  ;;  %v17632_v6 = vpop.f32.mrb[211].mxu1 }
 0xadd   : > { %v8929_v31 = vpack.c.bf16 %v8918_v47, %v8917_v13  ;;  %v19379_v13 = vld [vmem:[%s22861_s4 + $0x28] sm:$0xff]  }
 0xadf   : > { %17644 = vmatpush3.bf16.msra.mxu0 %v8929_v31 }
 0xae0   : > { %v8894_v27 = vpop.f32.mrb[212].mxu1  ;;  %17645 = vmatprep.subr.bf16.mxu0 %v19623_v34 }
 0xae1   : > { %v17635_v5 = vpop.f32.mrb[213].mxu1  ;;  %v8919_v14 = vmax.f32 %v8894_v27, 0.0 }
 0xae2   : > { %v8897_v56 = vpop.f32.mrb[214].mxu1 }
 0xae3   : > { %v8920_v7 = vmax.f32 %v8897_v56, 0.0  ;;  %v17636_v57 = vpop.f32.mrb[215].mxu1 }
 0xae5   : > { %v8930_v39 = vpack.c.bf16 %v8920_v7, %v8919_v14  ;;  %v19380_v14 = vld [vmem:[%s22861_s4 + $0x30] sm:$0xff]  }
 0xae7   : > { %v8955_v4 = vsel %vm1192_vm3, %v8930_v39, 0 }
 0xae8   : > { %17646 = vmatpush3.bf16.msra.mxu0 %v8955_v4 }
 0xae9   : > { %17659 = vmatprep.subr.bf16.mxu0 %v19371_v60 }
 0xaeb   : > { %17648 = vmatmul.mubr.msk.bf16.vlgmr.msra.gmra.mrb[96].mxu0 %vm8944_vm10, %v19368_v48 }
 0xaec   : > { %17651 = vmatprep.mubr.msk.bf16.mxu0 %vm19624_vm8, %v19623_v34  ;;  %17660 = vmatpush3.bf16.msra.mxu0 %v19371_v60 }
 0xaed   : > { %17661 = vmatprep.subr.bf16.mxu0 %v19372_v16 }
 0xaf0   : > { %17662 = vmatpush3.bf16.msra.mxu0 %v19372_v16 }
 0xaf1   : > { %17667 = vmatprep.subr.bf16.mxu0 %v19375_v46 }
 0xaf3   : > { %17652 = vmatmul.mubr.msk.bf16.gmra.mrb[100].mxu0 %vm8944_vm10, %v19369_v18  ;;  %v19383_v18 = vld [vmem:[%s22861_s4 + $0x38] sm:$0xff]  }
 0xaf4   : > { %17655 = vmatprep.mubr.msk.bf16.mxu0 %vm19624_vm8, %v19623_v34 }
 0xafb   : > { %17656 = vmatmul.mubr.msk.bf16.gmra.mrb[104].mxu0 %vm8944_vm10, %v19370_v52 }
 0xbbe   : > { %v8991_v22 = vpop.f32.mrb[96].mxu0 }
 0xbbf   : > { %v15983_v24 = vpack.c.bf16 %v8991_v22, %v8991_v22  ;;  %v17649_v59 = vpop.f32.mrb[97].mxu0 }
 0xbc0   : > { %v8994_v43 = vpop.f32.mrb[98].mxu0 }
 0xbc1   : > { %9035 = vst.msk [vmem:[#allocation4] sm:$0xf] %vm9034_vm9, %v15983_v24  ;;  %v15984_v25 = vpack.c.bf16 %v8994_v43, %v8994_v43  ;;  %v17650_v19 = vpop.f32.mrb[99].mxu0  ;;  %v19384_v24 = vld [vmem:[%s22861_s4 + $0x40] sm:$0xff]  }
 0xbc3   : > { %9036 = vst.msk [vmem:[#allocation4 + $0x4] sm:$0xf] %vm9034_vm9, %v15984_v25 }
 0xbc6   : > { %v8999_v58 = vpop.f32.mrb[100].mxu0 }
 0xbc7   : > { %v15985_v61 = vpack.c.bf16 %v8999_v58, %v8999_v58  ;;  %v17653_v63 = vpop.f32.mrb[101].mxu0  ;;  %v19386_v58 = vld [vmem:[%s22861_s4 + $0x48] sm:$0xff]  }
 0xbc8   : > { %v9002_v36 = vpop.f32.mrb[102].mxu0  ;;  %v9041_v26 = vld [vmem:[#allocation4] sm:$0xf]  ;;  %v19387_v63 = vld [vmem:[%s22861_s4 + $0x50] sm:$0xff]  }
 0xbc9   : > { %9037 = vst.msk [vmem:[#allocation4 + $0x8] sm:$0xf] %vm9034_vm9, %v15985_v61  ;;  %v15986_v32 = vpack.c.bf16 %v9002_v36, %v9002_v36  ;;  %v17654_v11 = vpop.f32.mrb[103].mxu0  ;;  %v9211_v38 = vld [vmem:[#allocation4] sm:$0xe] }
 0xbca   : > { %v9042_v49 = vld [vmem:[#allocation4 + $0x4] sm:$0xf]  ;;  %v9292_v56 = vld [vmem:[#allocation4] sm:$0x8]  ;;  %v19389_v11 = vld [vmem:[%s22861_s4 + $0x58] sm:$0xff]  }
 0xbcb   : > { %9038 = vst.msk [vmem:[#allocation4 + $0xc] sm:$0xf] %vm9034_vm9, %v15986_v32  ;;  %v15442_v44 = vcombine.low %v9041_v26, %v9042_v49  ;;  %v15457_v51 = vcombine.low %v9211_v38, %v9042_v49  ;;  %v9293_v47 = vld [vmem:[#allocation4 + $0x4] sm:$0xf]  ;;  %v19395_v38 = vld [vmem:[%s22861_s4 + $0x70] sm:$0xff]  }
 0xbcc   : > { %v15466_v7 = vcombine.low %v9292_v56, %v9293_v47 }
 0xbcd   : > { %v9065_v0 = vshll.u32 %v15442_v44, 16  ;;  %v9063_v12 = vshrl.u32 %v15442_v44, 16  ;;  %v9220_v29 = vrot.slane %v15457_v51, 1 }
 0xbce   : > { %v9007_v40 = vpop.f32.mrb[104].mxu0  ;;  %v9311_v48 = vrot.slane %v15466_v7, 3  ;;  %v9394_v52 = vshrl.u32 %v15466_v7, 16  ;;  %v9397_v60 = vshll.u32 %v15466_v7, 16 }
 0xbcf   : > { %v15987_v17 = vpack.c.bf16 %v9007_v40, %v9007_v40  ;;  %v9067_v15 = vrot.slane %v9065_v0, 1  ;;  %v17657_v53 = vpop.f32.mrb[105].mxu0 }
 0xbd0   : > { %v19374_v28 = vld [vmem:[#allocation4 + $0x8] ss:$0 sps:$4 sm:$0xff]   ;;  %v9010_v9 = vpop.f32.mrb[106].mxu0  ;;  %v9396_v59 = vrot.slane %v9394_v52, 3  ;;  %v9399_v43 = vrot.slane %v9397_v60, 4 }
 0xbd1   : > { %9040 = vst.msk [vmem:[#allocation4 + $0x10] sm:$0x3] %vm9039_vm11, %v15987_v17  ;;  %v9070_v23 = vshll.u32 %v19374_v28, 16  ;;  %v9068_v50 = vor.u32 %v9067_v15, %v9063_v12  ;;  %v9074_v42 = vshrl.u32 %v19374_v28, 16  ;;  %v17658_v8 = vpop.f32.mrb[107].mxu0  ;;  %v9221_v21 = vrot.slane %v19374_v28, 1 }
 0xbd2   : > { %v9295_v3 = vld [vmem:[#allocation4 + $0xc] sm:$0x3]  ;;  %v19377_v10 = vld [vmem:[#allocation4 + $0x8] ss:$0 sps:$4 sm:$0x77]   ;;  %v9400_v19 = vor.u32 %v9399_v43, %v9396_v59  ;;  %v19391_v15 = vld [vmem:[%s22861_s4 + $0x60] sm:$0xff]  }
 0xbd3   : > { %v9072_v37 = vrot.slane %v9070_v23, 1  ;;  %v21927_v54 = vld [vmem:[#allocation4 + $0xc] sm:$0x7]  ;;  %v9294_v6 = vld [vmem:[#allocation4 + $0x8] sm:$0xf]  ;;  %v9222_v31 = vsel %vm1192_vm3, %v9220_v29, %v9221_v21 }
 0xbd4   : > { %v15467_v27 = vcombine.low %v9294_v6, %v9295_v3  ;;  %v15476_v5 = vcombine.low %v9294_v6, %v21927_v54  ;;  %v15485_v26 = vcombine.low %v9293_v47, %v9294_v6  ;;  %v9556_v49 = vld [vmem:[#allocation4 + $0x8] sm:$0xf]  ;;  %v9555_v17 = vld [vmem:[#allocation4 + $0x4] sm:$0xc]  ;;  %v15486_v9 = vcombine.low %v21927_v54, %v21927_v54  ;;  %v19397_v54 = vld [vmem:[%s22861_s4 + $0x78] sm:$0xff]  }
 0xbd5   : > { %v9073_v2 = vsel %vm586_vm1, %v9068_v50, %v9072_v37  ;;  %v9076_v1 = vor.u32 %v9074_v42, %v9072_v37  ;;  %v15495_v53 = vcombine.low %v9555_v17, %v9556_v49  ;;  %v19394_v37 = vld [vmem:[%s22861_s4 + $0x68] sm:$0xff]  }
 0xbd6   : > { %17663 = vmatprep.mubr.msk.bf16.mxu0 %vm454_vm2, %v9073_v2  ;;  %v9312_v57 = vrot.slane %v15467_v27, 3  ;;  %v9402_v39 = vshrl.u32 %v15476_v5, 16  ;;  %v9405_v4 = vshll.u32 %v15476_v5, 16  ;;  %v9741_v29 = vld [vmem:[#allocation4 + $0x4] sm:$0x8] }
 0xbd7   : > { %17664 = vmatmul.mubr.msk.bf16.vlgmr.msra.gmra.mrb[108].mxu0 %vm454_vm2, %v9076_v1  ;;  %v9574_v50 = vrot.slane %v15495_v53, 2  ;;  %v9656_v42 = vshrl.u32 %v15495_v53, 16  ;;  %v9659_v8 = vshll.u32 %v15495_v53, 16  ;;  %v15514_v47 = vcombine.low %v9741_v29, %v9556_v49  ;;  %v19400_v27 = vld [vmem:[%s22861_s4 + $0x88] sm:$0xff]   ;;  %v21988_v5 = vld [vmem:[#allocation2 + $0x4] sm:$0xf] }
 0xbd8   : > { %17668 = vmatpush3.bf16.msra.mxu0 %v19375_v46  ;;  %17671 = vmatprep.mubr.msk.bf16.mxu0 %vm454_vm2, %v15442_v44  ;;  %v9313_v16 = vsel %vm3706_vm7, %v9311_v48, %v9312_v57  ;;  %v9404_v46 = vrot.slane %v9402_v39, 3  ;;  %v9407_v22 = vrot.slane %v9405_v4, 4  ;;  %v9558_v36 = vld [vmem:[#allocation4 + $0x10] sm:$0x1]  ;;  %v9557_v44 = vld [vmem:[#allocation4 + $0xc] sm:$0xf] }
 0xbd9   : > { %17669 = vmatprep.subr.bf16.mxu0 %v19376_v30  ;;  %v9646_v32 = vld [vmem:[#allocation4 + $0x10] sm:$0x3]  ;;  %v15496_v0 = vcombine.low %v9557_v44, %v9558_v36  ;;  %v9661_v51 = vrot.slane %v9659_v8, 3  ;;  %v19401_v39 = vld [vmem:[%s22860_s3 + $0x50] sm:$0xff]   ;;  %v9835_v36 = vld [vmem:[#allocation2 + $0x24] sm:$0xf] }
 0xbda   : > { %v9408_v25 = vor.u32 %v9407_v22, %v9404_v46  ;;  %v15505_v40 = vcombine.low %v9557_v44, %v9646_v32  ;;  %v19404_v22 = vld [vmem:[%s22860_s3 + $0x48] sm:$0xff]   ;;  %v9830_v32 = vld [vmem:[#allocation2 + $0x20] sm:$0xf] }
 0xbdb   : > { %v9575_v28 = vrot.slane %v15496_v0, 2  ;;  %v15527_v49 = vcombine.low %v9830_v32, %v9835_v36  ;;  %v19413_v29 = vld [vmem:[#allocation2 + $0xc] sm:$0xff]  }
 0xbdc   : > { %17670 = vmatpush3.bf16.msra.mxu0 %v19376_v30  ;;  %v9409_v61 = vsel %vm9392_vm13, %v9400_v19, %v9408_v25  ;;  %v9664_v12 = vshrl.u32 %v15505_v40, 16  ;;  %v9667_v23 = vshll.u32 %v15505_v40, 16  ;;  %v9751_v6 = vrot.slane %v15505_v40, 3  ;;  %v19406_v19 = vld [vmem:[#allocation2 + $0x18] sm:$0xff]  }
 0xbdd   : > { %17675 = vmatprep.subr.bf16.mxu0 %v19378_v35  ;;  %v9576_v2 = vsel %vm2506_vm5, %v9574_v50, %v9575_v28  ;;  %v9896_v40 = vshll.u32 %v15527_v49, 16  ;;  %v9892_v17 = vshrl.u32 %v19406_v19, 16  ;;  %v9831_v50 = vld [vmem:[#allocation2 + $0x24] sm:$0x7] }
 0xbde   : > { %v9666_v1 = vrot.slane %v9664_v12, 2  ;;  %v9669_v30 = vrot.slane %v9667_v23, 3  ;;  %v9900_v12 = vshrl.u32 %v15527_v49, 16 }
 0xbdf   : > { %17672 = vmatmul.mubr.msk.bf16.vlgmr.msra.gmra.mrb[112].mxu0 %vm454_vm2, %v19377_v10 }
 0xbe0   : > { %17676 = vmatpush3.bf16.msra.mxu0 %v19378_v35  ;;  %17679 = vmatprep.mubr.msk.bf16.mxu0 %vm454_vm2, %v9222_v31  ;;  %v9658_v35 = vrot.slane %v9656_v42, 2  ;;  %v9750_v31 = vrot.slane %v15514_v47, 3  ;;  %v10090_v42 = vld [vmem:[#allocation2] sm:$0xe]  ;;  %v10249_v47 = vrot.slane %v19413_v29, 1 }
 0xbe1   : > { %17677 = vmatprep.subr.bf16.mxu0 %v19379_v13  ;;  %v15543_v8 = vcombine.low %v10090_v42, %v21988_v5 }
 0xbe2   : > { %v9662_v3 = vor.u32 %v9661_v51, %v9658_v35  ;;  %v9752_v56 = vsel %vm3706_vm7, %v9750_v31, %v9751_v6  ;;  %v19414_v31 = vld [vmem:[%s22860_s3 + $0x68] sm:$0xff]  }
 0xbe4   : > { %17678 = vmatpush3.bf16.msra.mxu0 %v19379_v13  ;;  %v19398_v13 = vld [vmem:[%s22861_s4 + $0x80] sm:$0xff]  }
 0xbe5   : > { %17683 = vmatprep.subr.bf16.mxu0 %v19380_v14 }
 0xbe7   : > { %17680 = vmatmul.mubr.msk.bf16.vlgmr.msra.gmra.mrb[116].mxu0 %vm454_vm2, %v9221_v21  ;;  %v9670_v21 = vor.u32 %v9669_v30, %v9666_v1  ;;  %v10097_v1 = vrot.slane %v15543_v8, 1  ;;  %v19411_v30 = vld [vmem:[%s22860_s3 + $0x60] sm:$0xff]  }
 0xbe8   : > { %17684 = vmatpush3.bf16.msra.mxu0 %v19380_v14  ;;  %17687 = vmatprep.mubr.msk.bf16.mxu0 %vm454_vm2, %v9313_v16  ;;  %v9822_v14 = vld [vmem:[#allocation2] sm:$0xf]  ;;  %v22005_v16 = vld [vmem:[#allocation2 + $0x10] sm:$0xff]  }
 0xbe9   : > { %17685 = vmatprep.subr.bf16.mxu0 %v19383_v18  ;;  %v9671_v10 = vsel %vm3259_vm6, %v9662_v3, %v9670_v21  ;;  %v15523_v7 = vcombine.low %v9822_v14, %v21988_v5  ;;  %v9880_v59 = vshll.u32 %v22005_v16, 16  ;;  %v10100_v35 = vrot.slane %v22005_v16, 1  ;;  %v19415_v5 = vld [vmem:[#allocation2 + $0x14] sm:$0xff]  }
 0xbeb   : > { %v9867_v4 = vshll.u32 %v15523_v7, 16  ;;  %v9865_v52 = vshrl.u32 %v15523_v7, 16 }
 0xbec   : > { %17686 = vmatpush3.bf16.msra.mxu0 %v19383_v18 }
 0xbed   : > { %17691 = vmatprep.subr.bf16.mxu0 %v19384_v24  ;;  %v9869_v18 = vrot.slane %v9867_v4, 1  ;;  %v19417_v4 = vld [vmem:[#allocation2 + $0x24] sm:$0xff]  }
 0xbef   : > { %17688 = vmatmul.mubr.msk.bf16.vlgmr.msra.gmra.mrb[120].mxu0 %vm454_vm2, %v9312_v57  ;;  %v21994_v57 = vld [vmem:[#allocation2 + $0x8] sm:$0xff]   ;;  %v9870_v46 = vor.u32 %v9869_v18, %v9865_v52  ;;  %v10255_v18 = vrot.slane %v19417_v4, 1 }
 0xbf0   : > { %17692 = vmatpush3.bf16.msra.mxu0 %v19384_v24  ;;  %17695 = vmatprep.mubr.msk.bf16.mxu0 %vm454_vm2, %v9409_v61  ;;  %v9872_v48 = vshll.u32 %v21994_v57, 16  ;;  %v9876_v43 = vshrl.u32 %v21994_v57, 16 }
 0xbf1   : > { %17693 = vmatprep.subr.bf16.mxu0 %v19386_v58 }
 0xbf2   : > { %v9874_v60 = vrot.slane %v9872_v48, 1 }
 0xbf4   : > { %17694 = vmatpush3.bf16.msra.mxu0 %v19386_v58  ;;  %v9875_v24 = vsel %vm586_vm1, %v9870_v46, %v9874_v60  ;;  %v9878_v58 = vor.u32 %v9876_v43, %v9874_v60  ;;  %v22096_v46 = vld [vmem:[#allocation2 + $0x8] sm:$0xf] }
 0xbf5   : > { %17699 = vmatprep.subr.bf16.mxu0 %v19387_v63 }
 0xbf7   : > { %17696 = vmatmul.mubr.msk.bf16.vlgmr.msra.gmra.mrb[124].mxu0 %vm454_vm2, %v9408_v25  ;;  %v9882_v25 = vrot.slane %v9880_v59, 1  ;;  %v10361_v59 = vld [vmem:[#allocation2 + $0x4] sm:$0xe] }
 0xbf8   : > { %17700 = vmatpush3.bf16.msra.mxu0 %v19387_v63  ;;  %17703 = vmatprep.mubr.msk.bf16.mxu0 %vm454_vm2, %v15485_v26  ;;  %v9888_v63 = vshll.u32 %v19406_v19, 16  ;;  %v15565_v43 = vcombine.low %v10361_v59, %v22096_v46 }
 0xbf9   : > { %17701 = vmatprep.subr.bf16.mxu0 %v19389_v11  ;;  %v9883_v61 = vsel %vm586_vm1, %v9878_v58, %v9882_v25 }
 0xbfa   : > { %v9890_v26 = vrot.slane %v9888_v63, 1 }
 0xbfc   : > { %17702 = vmatpush3.bf16.msra.mxu0 %v19389_v11  ;;  %v9884_v11 = vshrl.u32 %v22005_v16, 16  ;;  %v9894_v53 = vor.u32 %v9892_v17, %v9890_v26  ;;  %v22107_v17 = vld [vmem:[#allocation2 + $0x14] sm:$0xff]  }
 0xbfd   : > { %17707 = vmatprep.subr.bf16.mxu0 %v19391_v15 }
 0xbfe   : > { %v9886_v44 = vor.u32 %v9884_v11, %v9882_v25  ;;  %v10404_v11 = vshrl.u32 %v15565_v43, 16 }
 0xbff   : > { %17704 = vmatmul.mubr.msk.bf16.vlgmr.msra.gmra.mrb[128].mxu0 %vm454_vm2, %v15486_v9  ;;  %v19408_v9 = vld [vmem:[%s22860_s3 + $0x58] sm:$0xff]  }
 0xc00   : > { %17708 = vmatpush3.bf16.msra.mxu0 %v19391_v15  ;;  %17711 = vmatprep.mubr.msk.bf16.mxu0 %vm454_vm2, %v9576_v2  ;;  %v9891_v0 = vsel %vm586_vm1, %v9886_v44, %v9890_v26  ;;  %v9898_v15 = vrot.slane %v9896_v40, 1  ;;  %v10098_v2 = vrot.slane %v21994_v57, 1  ;;  %v10407_v26 = vshll.u32 %v15565_v43, 16 }
 0xc01   : > { %17709 = vmatprep.subr.bf16.mxu0 %v19394_v37 }
 0xc02   : > { %v9902_v23 = vor.u32 %v9900_v12, %v9898_v15  ;;  %v10101_v51 = vsel %vm1192_vm3, %v10098_v2, %v10100_v35 }
 0xc04   : > { %17710 = vmatpush3.bf16.msra.mxu0 %v19394_v37  ;;  %v15534_v37 = vcombine.low %v9830_v32, %v9831_v50 }
 0xc05   : > { %17715 = vmatprep.subr.bf16.mxu0 %v19395_v38 }
 0xc07   : > { %17712 = vmatmul.mubr.msk.bf16.vlgmr.msra.gmra.mrb[132].mxu0 %vm454_vm2, %v9575_v28  ;;  %v9899_v28 = vsel %vm586_vm1, %v9894_v53, %v9898_v15  ;;  %v10406_v15 = vrot.slane %v10404_v11, 1  ;;  %v10409_v53 = vrot.slane %v10407_v26, 2 }
 0xc08   : > { %17716 = vmatpush3.bf16.msra.mxu0 %v19395_v38  ;;  %17719 = vmatprep.mubr.msk.bf16.mxu0 %vm454_vm2, %v9671_v10  ;;  %v10099_v38 = vsel %vm1192_vm3, %v10097_v1, %v10098_v2  ;;  %v19420_v1 = vld [vmem:[%s22860_s3 + $0x70] sm:$0xff]  }
 0xc09   : > { %17717 = vmatprep.subr.bf16.mxu0 %v19397_v54  ;;  %v10410_v2 = vor.u32 %v10409_v53, %v10406_v15 }
 0xc0c   : > { %17718 = vmatpush3.bf16.msra.mxu0 %v19397_v54  ;;  %v10104_v54 = vrot.slane %v15527_v49, 1 }
 0xc0d   : > { %17723 = vmatprep.subr.bf16.mxu0 %v19398_v13 }
 0xc0f   : > { %17720 = vmatmul.mubr.msk.bf16.vlgmr.msra.gmra.mrb[136].mxu0 %vm454_vm2, %v9670_v21  ;;  %v10102_v21 = vrot.slane %v19406_v19, 1 }
 0xc10   : > { %17724 = vmatpush3.bf16.msra.mxu0 %v19398_v13  ;;  %17727 = vmatprep.mubr.msk.bf16.mxu0 %vm454_vm2, %v9752_v56  ;;  %v19412_v13 = vld [vmem:[#allocation2 + $0x4] sm:$0xfe]   ;;  %v10251_v56 = vrot.slane %v19415_v5, 1 }
 0xc11   : > { %17725 = vmatprep.subr.bf16.mxu0 %v19400_v27  ;;  %v10103_v3 = vsel %vm1192_vm3, %v10100_v35, %v10102_v21  ;;  %v10105_v10 = vsel %vm1192_vm3, %v10102_v21, %v10104_v54 }
 0xc12   : > { %v10252_v14 = vsel %vm1192_vm3, %v10249_v47, %v10251_v56 }
 0xc14   : > { %17726 = vmatpush3.bf16.msra.mxu0 %v19400_v27 }
 0xc15   : > { %17731 = vmatprep.subr.bf16.mxu0 %v19623_v34 }
 0xc17   : > { %17728 = vmatmul.mubr.msk.bf16.vlgmr.msra.gmra.mrb[140].mxu0 %vm454_vm2, %v9751_v6  ;;  %v10248_v6 = vrot.slane %v19412_v13, 1 }
 0xc18   : > { %17732 = vmatpush3.bf16.msra.mxu0 %v19401_v39  ;;  %17733 = vmatprep.mubr.msk.bf16.mxu0 %vm19624_vm8, %v19623_v34 }
 0xc19   : > { %17753 = vmatprep.subr.bf16.mxu0 %v19623_v34  ;;  %v10250_v27 = vsel %vm1192_vm3, %v10248_v6, %v10249_v47 }
 0xc1f   : > { %17734 = vmatmul.mubr.msk.bf16.vlgmr.msra.gmra.mrb[144].mxu0 %vm4548_vm12, %v9875_v24  ;;  %v22099_v24 = vld [vmem:[#allocation2 + $0xc] sm:$0xff]  }
 0xc20   : > { %17754 = vmatpush3.bf16.msra.mxu0 %v19404_v22  ;;  %17737 = vmatprep.mubr.msk.bf16.mxu0 %vm19624_vm8, %v19623_v34  ;;  %v10415_v58 = vshll.u32 %v22099_v24, 16 }
 0xc21   : > { %17775 = vmatprep.subr.bf16.mxu0 %v19623_v34 }
 0xc22   : > { %v10417_v40 = vrot.slane %v10415_v58, 2 }
 0xc27   : > { %17738 = vmatmul.mubr.msk.bf16.gmra.mrb[148].mxu0 %vm4548_vm12, %v9883_v61 }
 0xc28   : > { %17741 = vmatprep.mubr.msk.bf16.mxu0 %vm19624_vm8, %v19623_v34 }
 0xc2f   : > { %17742 = vmatmul.mubr.msk.bf16.gmra.mrb[152].mxu0 %vm4548_vm12, %v9891_v0 }
 0xc30   : > { %17745 = vmatprep.mubr.msk.bf16.mxu0 %vm19624_vm8, %v19623_v34 }
 0xc37   : > { %17746 = vmatmul.mubr.msk.bf16.gmra.mrb[156].mxu0 %vm4548_vm12, %v9899_v28 }
 0xc38   : > { %17749 = vmatprep.mubr.msk.bf16.mxu0 %vm19624_vm8, %v19623_v34 }
 0xc3f   : > { %17750 = vmatmul.mubr.msk.bf16.gmra.mrb[160].mxu0 %vm4548_vm12, %v9902_v23  ;;  %v10421_v23 = vshrl.u32 %v22107_v17, 16 }
 0xc40   : > { %17755 = vmatprep.mubr.msk.bf16.mxu0 %vm19624_vm8, %v19623_v34 }
 0xc47   : > { %17756 = vmatmul.mubr.msk.bf16.vlgmr.msra.gmra.mrb[144].mxu0 %vm4548_vm12, %v15523_v7  ;;  %v19416_v7 = vld [vmem:[#allocation2 + $0x1c] sm:$0xff]  }
 0xc48   : > { %17776 = vmatpush3.bf16.msra.mxu0 %v19408_v9  ;;  %17759 = vmatprep.mubr.msk.bf16.mxu0 %vm19624_vm8, %v19623_v34  ;;  %v10424_v9 = vshll.u32 %v22107_v17, 16 }
 0xc49   : > { %17797 = vmatprep.subr.bf16.mxu0 %v19623_v34 }
 0xc4a   : > { %v10426_v21 = vrot.slane %v10424_v9, 2 }
 0xc4f   : > { %17760 = vmatmul.mubr.msk.bf16.gmra.mrb[148].mxu0 %vm4548_vm12, %v21994_v57  ;;  %v10253_v57 = vrot.slane %v19416_v7, 1 }
 0xc50   : > { %17763 = vmatprep.mubr.msk.bf16.mxu0 %vm19624_vm8, %v19623_v34 }
 0xc51   : > { %v10254_v39 = vsel %vm1192_vm3, %v10251_v56, %v10253_v57  ;;  %v10256_v22 = vsel %vm1192_vm3, %v10253_v57, %v10255_v18 }
 0xc57   : > { %17764 = vmatmul.mubr.msk.bf16.gmra.mrb[152].mxu0 %vm4548_vm12, %v22005_v16 }
 0xc58   : > { %17767 = vmatprep.mubr.msk.bf16.mxu0 %vm19624_vm8, %v19623_v34 }
 0xc5f   : > { %17768 = vmatmul.mubr.msk.bf16.gmra.mrb[156].mxu0 %vm4548_vm12, %v19406_v19  ;;  %v10412_v19 = vshrl.u32 %v22099_v24, 16 }
 0xc60   : > { %17771 = vmatprep.mubr.msk.bf16.mxu0 %vm19624_vm8, %v19623_v34 }
 0xc61   : > { %v10414_v0 = vrot.slane %v10412_v19, 1 }
 0xc63   : > { %v10418_v12 = vor.u32 %v10417_v40, %v10414_v0 }
 0xc65   : > { %v10419_v35 = vsel %vm2063_vm4, %v10410_v2, %v10418_v12 }
 0xc67   : > { %17772 = vmatmul.mubr.msk.bf16.gmra.mrb[160].mxu0 %vm4548_vm12, %v15534_v37 }
 0xc68   : > { %17777 = vmatprep.mubr.msk.bf16.mxu0 %vm19624_vm8, %v19623_v34 }
 0xc6f   : > { %17778 = vmatmul.mubr.msk.bf16.vlgmr.msra.gmra.mrb[144].mxu0 %vm4548_vm12, %v10099_v38 }
 0xc70   : > { %17798 = vmatpush3.bf16.msra.mxu0 %v19411_v30  ;;  %17781 = vmatprep.mubr.msk.bf16.mxu0 %vm19624_vm8, %v19623_v34 }
 0xc71   : > { %17819 = vmatprep.subr.bf16.mxu0 %v19623_v34 }
 0xc77   : > { %17782 = vmatmul.mubr.msk.bf16.gmra.mrb[148].mxu0 %vm4548_vm12, %v10101_v51  ;;  %v10423_v51 = vrot.slane %v10421_v23, 1 }
 0xc78   : > { %17785 = vmatprep.mubr.msk.bf16.mxu0 %vm19624_vm8, %v19623_v34 }
 0xc7f   : > { %17786 = vmatmul.mubr.msk.bf16.gmra.mrb[152].mxu0 %vm4548_vm12, %v10103_v3  ;;  %v22118_v3 = vld [vmem:[#allocation2 + $0x1c] sm:$0xff]  }
 0xc80   : > { %17789 = vmatprep.mubr.msk.bf16.mxu0 %vm19624_vm8, %v19623_v34  ;;  %v10430_v29 = vshrl.u32 %v22118_v3, 16  ;;  %v10433_v13 = vshll.u32 %v22118_v3, 16 }
 0xc82   : > { %v10432_v7 = vrot.slane %v10430_v29, 1  ;;  %v10435_v57 = vrot.slane %v10433_v13, 2  ;;  %v19426_v13 = vld [vmem:[%s22860_s3 + $0x78] sm:$0xff]  }
 0xc87   : > { %17790 = vmatmul.mubr.msk.bf16.gmra.mrb[156].mxu0 %vm4548_vm12, %v10105_v10  ;;  %v10427_v10 = vor.u32 %v10426_v21, %v10423_v51 }
 0xc88   : > { %17793 = vmatprep.mubr.msk.bf16.mxu0 %vm19624_vm8, %v19623_v34 }
 0xc8f   : > { %17794 = vmatmul.mubr.msk.bf16.gmra.mrb[160].mxu0 %vm4548_vm12, %v10104_v54 }
 0xc90   : > { %17799 = vmatprep.mubr.msk.bf16.mxu0 %vm19624_vm8, %v19623_v34 }
 0xc97   : > { %17800 = vmatmul.mubr.msk.bf16.vlgmr.msra.gmra.mrb[144].mxu0 %vm4548_vm12, %v10250_v27 }
 0xc98   : > { %17820 = vmatpush3.bf16.msra.mxu0 %v19414_v31  ;;  %17803 = vmatprep.mubr.msk.bf16.mxu0 %vm19624_vm8, %v19623_v34 }
 0xc99   : > { %17841 = vmatprep.subr.bf16.mxu0 %v19623_v34 }
 0xc9f   : > { %17804 = vmatmul.mubr.msk.bf16.gmra.mrb[148].mxu0 %vm4548_vm12, %v10252_v14  ;;  %v10428_v14 = vsel %vm2063_vm4, %v10418_v12, %v10427_v10 }
 0xca0   : > { %17807 = vmatprep.mubr.msk.bf16.mxu0 %vm19624_vm8, %v19623_v34 }
 0xca7   : > { %17808 = vmatmul.mubr.msk.bf16.gmra.mrb[152].mxu0 %vm4548_vm12, %v10254_v39  ;;  %v22127_v39 = vld [vmem:[#allocation2 + $0x24] sm:$0xff]  }
 0xca8   : > { %17811 = vmatprep.mubr.msk.bf16.mxu0 %vm19624_vm8, %v19623_v34 }
 0xcaa   : > { %v17665_v48 = vpop.f32.mrb[108].mxu0 }
 0xcab   : > { %v9129_v52 = vpop.f32.mrb[109].mxu0 }
 0xcac   : > { %v17666_v60 = vpop.f32.mrb[110].mxu0 }
 0xcad   : > { %v9132_v16 = vpop.f32.mrb[111].mxu0 }
 0xcaf   : > { %17812 = vmatmul.mubr.msk.bf16.gmra.mrb[156].mxu0 %vm4548_vm12, %v10256_v22 }
 0xcb0   : > { %17815 = vmatprep.mubr.msk.bf16.mxu0 %vm19624_vm8, %v19623_v34 }
 0xcb2   : > { %v17673_v25 = vpop.f32.mrb[112].mxu0 }
 0xcb3   : > { %v9206_v61 = vadd.f32 %v17673_v25, %v17665_v48  ;;  %v9197_v63 = vpop.f32.mrb[113].mxu0  ;;  %v10436_v48 = vor.u32 %v10435_v57, %v10432_v7 }
 0xcb4   : > { %v9198_v36 = vadd.f32 %v9197_v63, %v9129_v52  ;;  %v17674_v32 = vpop.f32.mrb[114].mxu0  ;;  %v10442_v52 = vshll.u32 %v22127_v39, 16 }
 0xcb5   : > { %v9200_v49 = vpop.f32.mrb[115].mxu0  ;;  %v10437_v19 = vsel %vm2063_vm4, %v10427_v10, %v10436_v48 }
 0xcb6   : > { %v9201_v44 = vadd.f32 %v9200_v49, %v9132_v16 }
 0xcb7   : > { %17816 = vmatmul.mubr.msk.bf16.gmra.mrb[160].mxu0 %vm4548_vm12, %v10255_v18  ;;  %v10439_v18 = vshrl.u32 %v22127_v39, 16 }
 0xcb8   : > { %17821 = vmatprep.mubr.msk.bf16.mxu0 %vm19624_vm8, %v19623_v34 }
 0xcb9   : > { %v10441_v58 = vrot.slane %v10439_v18, 1  ;;  %v10570_v18 = vrot.slane %v22127_v39, 2 }
 0xcba   : > { %v17681_v28 = vpop.f32.mrb[116].mxu0 }
 0xcbb   : > { %v9291_v50 = vadd.f32 %v17681_v28, %v9206_v61  ;;  %v9275_v37 = vpop.f32.mrb[117].mxu0  ;;  %v10444_v61 = vrot.slane %v10442_v52, 2 }
 0xcbc   : > { %v9289_v42 = vadd.f32 %v9275_v37, %v9198_v36  ;;  %v17682_v8 = vpop.f32.mrb[118].mxu0 }
 0xcbd   : > { %v9278_v30 = vpop.f32.mrb[119].mxu0  ;;  %v10445_v36 = vor.u32 %v10444_v61, %v10441_v58  ;;  %v19556_v61 = vld [vmem:[#allocation2 + $0x18] sm:$0xff]  }
 0xcbe   : > { %v9290_v38 = vadd.f32 %v9278_v30, %v9201_v44  ;;  %v19424_v44 = vld [vmem:[#allocation2 + $0x2c] ss:$0 sps:$4 sm:$0x11]  }
 0xcbf   : > { %17822 = vmatmul.mubr.msk.bf16.vlgmr.msra.gmra.mrb[144].mxu0 %vm4548_vm12, %v10419_v35  ;;  %v10446_v15 = vsel %vm2063_vm4, %v10436_v48, %v10445_v36  ;;  %v10448_v53 = vshll.u32 %v19424_v44, 16  ;;  %v10564_v35 = vrot.slane %v22099_v24, 2  ;;  %v10566_v24 = vrot.slane %v22107_v17, 2 }
 0xcc0   : > { %17842 = vmatpush3.bf16.msra.mxu0 %v19420_v1  ;;  %17825 = vmatprep.mubr.msk.bf16.mxu0 %vm19624_vm8, %v19623_v34  ;;  %v10556_v1 = vld [vmem:[#allocation2 + $0x4] sm:$0xc]  ;;  %v10568_v48 = vrot.slane %v22118_v3, 2  ;;  %v10678_v3 = vld [vmem:[#allocation2 + $0x8] sm:$0xc] }
 0xcc1   : > { %17863 = vmatprep.subr.bf16.mxu0 %v19623_v34  ;;  %v10450_v37 = vrot.slane %v10448_v53, 2  ;;  %v15579_v30 = vcombine.low %v10556_v1, %v22096_v46  ;;  %v10860_v1 = vshrl.u32 %v19556_v61, 16 }
 0xcc2   : > { %v17689_v54 = vpop.f32.mrb[120].mxu0  ;;  %v10569_v17 = vsel %vm2506_vm5, %v10566_v24, %v10568_v48  ;;  %v10571_v52 = vsel %vm2506_vm5, %v10568_v48, %v10570_v18  ;;  %v19435_v48 = vld [vmem:[#allocation2 + $0x30] ss:$0 sps:$4 sm:$0x33]  }
 0xcc3   : > { %v9382_v47 = vadd.f32 %v17689_v54, %v9291_v50  ;;  %v9366_v6 = vpop.f32.mrb[121].mxu0  ;;  %v10451_v2 = vsel %vm2063_vm4, %v10445_v36, %v10450_v37  ;;  %v10563_v29 = vrot.slane %v15579_v30, 2  ;;  %v10863_v30 = vshll.u32 %v19556_v61, 16 }
 0xcc4   : > { %v9380_v31 = vadd.f32 %v9366_v6, %v9289_v42  ;;  %v17690_v27 = vpop.f32.mrb[122].mxu0  ;;  %vm22872_vm4 = vcmask 1040384  }
 0xcc5   : > { %v9369_v5 = vpop.f32.mrb[123].mxu0 }
 0xcc6   : > { %v9381_v56 = vadd.f32 %v9369_v5, %v9290_v38 }
 0xcc7   : > { %17826 = vmatmul.mubr.msk.bf16.gmra.mrb[148].mxu0 %vm4548_vm12, %v10428_v14 }
 0xcc8   : > { %17829 = vmatprep.mubr.msk.bf16.mxu0 %vm19624_vm8, %v19623_v34 }
 0xcca   : > { %v17697_v4 = vpop.f32.mrb[124].mxu0 }
 0xccb   : > { %v9478_v60 = vadd.f32 %v17697_v4, %v9382_v47  ;;  %v9462_v16 = vpop.f32.mrb[125].mxu0  ;;  %v10567_v4 = vsel %vm2506_vm5, %v10564_v35, %v10566_v24 }
 0xccc   : > { %v9476_v22 = vadd.f32 %v9462_v16, %v9380_v31  ;;  %v17698_v59 = vpop.f32.mrb[126].mxu0  ;;  %v10565_v31 = vsel %vm2506_vm5, %v10563_v29, %v10564_v35  ;;  %v19434_v35 = vld [vmem:[%s22860_s3 + $0x88] sm:$0xff]  }
 0xccd   : > { %v9465_v43 = vpop.f32.mrb[127].mxu0 }
 0xcce   : > { %v9477_v25 = vadd.f32 %v9465_v43, %v9381_v56  ;;  %v19555_v43 = vld [vmem:[#allocation2 + $0x10] sm:$0xff]  }
 0xccf   : > { %17830 = vmatmul.mubr.msk.bf16.gmra.mrb[152].mxu0 %vm4548_vm12, %v10437_v19  ;;  %v10721_v39 = vrot.slane %v19555_v43, 2  ;;  %v19429_v19 = vld [vmem:[%s22860_s3 + $0x80] sm:$0xff]   ;;  %v10854_v53 = vshll.u32 %v19555_v43, 16 }
 0xcd0   : > { %17833 = vmatprep.mubr.msk.bf16.mxu0 %vm19624_vm8, %v19623_v34 }
 0xcd1   : > { %v10856_v37 = vrot.slane %v10854_v53, 3 }
 0xcd2   : > { %v17705_v63 = vpop.f32.mrb[128].mxu0 }
 0xcd3   : > { %v9554_v32 = vadd.f32 %v17705_v63, %v9478_v60  ;;  %v9538_v11 = vpop.f32.mrb[129].mxu0  ;;  %v10572_v60 = vrot.slane %v19424_v44, 2  ;;  %v10723_v63 = vrot.slane %v19556_v61, 2 }
 0xcd4   : > { %v9552_v26 = vadd.f32 %v9538_v11, %v9476_v22  ;;  %v17706_v49 = vpop.f32.mrb[130].mxu0  ;;  %v19554_v22 = vld [vmem:[#allocation2 + $0xc] sm:$0xf] }
 0xcd5   : > { %v9541_v0 = vpop.f32.mrb[131].mxu0  ;;  %v10573_v16 = vsel %vm2506_vm5, %v10570_v18, %v10572_v60  ;;  %v15588_v59 = vcombine.low %v10678_v3, %v19554_v22  ;;  %v10724_v36 = vsel %vm2506_vm5, %v10721_v39, %v10723_v63  ;;  %v19558_v49 = vld [vmem:[#allocation2 + $0x28] sm:$0xff]   ;;  %v10887_v18 = vshrl.u32 %v19435_v48, 16 }
 0xcd6   : > { %v9553_v40 = vadd.f32 %v9541_v0, %v9477_v25  ;;  %v10727_v44 = vrot.slane %v19558_v49, 2  ;;  %v10878_v24 = vshrl.u32 %v19558_v49, 16 }
 0xcd7   : > { %17834 = vmatmul.mubr.msk.bf16.gmra.mrb[156].mxu0 %vm4548_vm12, %v10446_v15  ;;  %v10720_v25 = vrot.slane %v15588_v59, 2  ;;  %v10851_v15 = vshrl.u32 %v19555_v43, 16 }
 0xcd8   : > { %17837 = vmatprep.mubr.msk.bf16.mxu0 %vm19624_vm8, %v19623_v34 }
 0xcd9   : > { %v10722_v58 = vsel %vm2506_vm5, %v10720_v25, %v10721_v39 }
 0xcda   : > { %v17713_v28 = vpop.f32.mrb[132].mxu0 }
 0xcdb   : > { %v9645_v12 = vadd.f32 %v17713_v28, %v9554_v32  ;;  %v9629_v23 = vpop.f32.mrb[133].mxu0  ;;  %v19557_v32 = vld [vmem:[#allocation2 + $0x20] sm:$0xff]  }
 0xcdc   : > { %v9643_v9 = vadd.f32 %v9629_v23, %v9552_v26  ;;  %v17714_v50 = vpop.f32.mrb[134].mxu0  ;;  %v10725_v11 = vrot.slane %v19557_v32, 2  ;;  %v10846_v23 = vshll.u32 %v15588_v59, 16  ;;  %v10869_v29 = vshrl.u32 %v19557_v32, 16 }
 0xcdd   : > { %v9632_v42 = vpop.f32.mrb[135].mxu0  ;;  %v10853_v50 = vrot.slane %v10851_v15, 2 }
 0xcde   : > { %v9644_v8 = vadd.f32 %v9632_v42, %v9553_v40  ;;  %v10726_v26 = vsel %vm2506_vm5, %v10723_v63, %v10725_v11  ;;  %v10728_v0 = vsel %vm2506_vm5, %v10725_v11, %v10727_v44  ;;  %v19433_v40 = vld [vmem:[#allocation2 + $0x30] ss:$0 sps:$4 sm:$0x11]  }
 0xcdf   : > { %17838 = vmatmul.mubr.msk.bf16.gmra.mrb[160].mxu0 %vm4548_vm12, %v10451_v2  ;;  %v10729_v28 = vrot.slane %v19433_v40, 2  ;;  %v10857_v2 = vor.u32 %v10856_v37, %v10853_v50  ;;  %v19437_v37 = vld [vmem:[%s22864_s7] sm:$0xff]  }
 0xce0   : > { %17843 = vmatprep.mubr.msk.bf16.mxu0 %vm19624_vm8, %v19623_v34 }
 0xce2   : > { %v17721_v38 = vpop.f32.mrb[136].mxu0 }
 0xce3   : > { %v9740_v51 = vadd.f32 %v17721_v38, %v9645_v12  ;;  %v9724_v21 = vpop.f32.mrb[137].mxu0  ;;  %v10843_v12 = vshrl.u32 %v15588_v59, 16 }
 0xce4   : > { %v9738_v54 = vadd.f32 %v9724_v21, %v9643_v9  ;;  %v17722_v10 = vpop.f32.mrb[138].mxu0  ;;  %v10730_v9 = vsel %vm2506_vm5, %v10727_v44, %v10729_v28  ;;  %v10862_v21 = vrot.slane %v10860_v1, 2  ;;  %v19441_v1 = vld [vmem:[%s22861_s4 + $0xa8] sm:$0xff]  }
 0xce5   : > { %v9727_v47 = vpop.f32.mrb[139].mxu0  ;;  %v10845_v42 = vrot.slane %v10843_v12, 2 }
 0xce6   : > { %v9739_v6 = vadd.f32 %v9727_v47, %v9644_v8  ;;  %v10848_v8 = vrot.slane %v10846_v23, 3 }
 0xce7   : > { %17844 = vmatmul.mubr.msk.bf16.vlgmr.msra.gmra.mrb[144].mxu0 %vm4548_vm12, %v10565_v31 }
 0xce8   : > { %17864 = vmatpush3.bf16.msra.mxu0 %v19426_v13  ;;  %17847 = vmatprep.mubr.msk.bf16.mxu0 %vm19624_vm8, %v19623_v34  ;;  %v10849_v38 = vor.u32 %v10848_v8, %v10845_v42  ;;  %v10872_v13 = vshll.u32 %v19557_v32, 16  ;;  %v19438_v42 = vld [vmem:[%s22864_s7 + $0x8] sm:$0xff]   ;;  %v19439_v8 = vld [vmem:[%s22861_s4 + $0xa0] sm:$0xff]  }
 0xce9   : > { %17885 = vmatprep.subr.bf16.mxu0 %v19623_v34 }
 0xcea   : > { %v17729_v46 = vpop.f32.mrb[140].mxu0  ;;  %v10874_v31 = vrot.slane %v10872_v13, 3 }
 0xceb   : > { %v22157_v27 = vadd.f32 %v17729_v46, %v9740_v51  ;;  %v9805_v5 = vpop.f32.mrb[141].mxu0  ;;  %v10858_v51 = vsel %vm3259_vm6, %v10849_v38, %v10857_v2 }
 0xcec   : > { %v22159_v56 = vadd.f32 %v9805_v5, %v9738_v54  ;;  %v17730_v14 = vpop.f32.mrb[142].mxu0  ;;  %v10865_v54 = vrot.slane %v10863_v30, 3  ;;  %v10881_v5 = vshll.u32 %v19558_v49, 16  ;;  %v22278_v30 = vld [vmem:[%s22861_s4 + $0x90] sm:$0xff]  }
 0xced   : > { %v9808_v7 = vpop.f32.mrb[143].mxu0 }
 0xcee   : > { %v22161_v57 = vadd.f32 %v9808_v7, %v9739_v6  ;;  %v10866_v10 = vor.u32 %v10865_v54, %v10862_v21  ;;  %v10871_v6 = vrot.slane %v10869_v29, 2  ;;  %v10880_v7 = vrot.slane %v10878_v24, 2 }
 0xcef   : > { %17848 = vmatmul.mubr.msk.bf16.gmra.mrb[148].mxu0 %vm4548_vm12, %v10567_v4  ;;  %v10883_v4 = vrot.slane %v10881_v5, 3 }
 0xcf0   : > { %17851 = vmatprep.mubr.msk.bf16.mxu0 %vm19624_vm8, %v19623_v34  ;;  %v10867_v47 = vsel %vm3259_vm6, %v10857_v2, %v10866_v10  ;;  %v10875_v46 = vor.u32 %v10874_v31, %v10871_v6  ;;  %v19440_v2 = vld [vmem:[%s22864_s7 + $0x10] ss:$0 sps:$4 sm:$0x33]  }
 0xcf2   : > { %v10876_v14 = vsel %vm3259_vm6, %v10866_v10, %v10875_v46 }
 0xcf7   : > { %17852 = vmatmul.mubr.msk.bf16.gmra.mrb[152].mxu0 %vm4548_vm12, %v10569_v17  ;;  %v10884_v17 = vor.u32 %v10883_v4, %v10880_v7 }
 0xcf8   : > { %17855 = vmatprep.mubr.msk.bf16.mxu0 %vm19624_vm8, %v19623_v34 }
 0xcf9   : > { %v10885_v60 = vsel %vm3259_vm6, %v10875_v46, %v10884_v17 }
 0xcff   : > { %17856 = vmatmul.mubr.msk.bf16.gmra.mrb[156].mxu0 %vm4548_vm12, %v10571_v52  ;;  %v10890_v52 = vshll.u32 %v19435_v48, 16 }
 0xd00   : > { %17859 = vmatprep.mubr.msk.bf16.mxu0 %vm19624_vm8, %v19623_v34 }
 0xd01   : > { %v10892_v3 = vrot.slane %v10890_v52, 3 }
 0xd07   : > { %17860 = vmatmul.mubr.msk.bf16.gmra.mrb[160].mxu0 %vm4548_vm12, %v10573_v16  ;;  %v10889_v16 = vrot.slane %v10887_v18, 2 }
 0xd08   : > { %17865 = vmatprep.mubr.msk.bf16.mxu0 %vm19624_vm8, %v19623_v34 }
 0xd09   : > { %v10893_v22 = vor.u32 %v10892_v3, %v10889_v16 }
 0xd0b   : > { %v10894_v59 = vsel %vm3259_vm6, %v10884_v17, %v10893_v22  ;;  %v11273_v22 = vpop.permute.xlu0 %11272 }
 0xd0f   : > { %17866 = vmatmul.mubr.msk.bf16.vlgmr.msra.gmra.mrb[144].mxu0 %vm4548_vm12, %v10722_v58 }
 0xd10   : > { %17886 = vmatpush3.bf16.msra.mxu0 %v19429_v19  ;;  %17869 = vmatprep.mubr.msk.bf16.mxu0 %vm19624_vm8, %v19623_v34 }
 0xd11   : > { %17907 = vmatprep.subr.bf16.mxu0 %v19623_v34 }
 0xd17   : > { %17870 = vmatmul.mubr.msk.bf16.gmra.mrb[148].mxu0 %vm4548_vm12, %v10724_v36 }
 0xd18   : > { %17873 = vmatprep.mubr.msk.bf16.mxu0 %vm19624_vm8, %v19623_v34 }
 0xd1f   : > { %17874 = vmatmul.mubr.msk.bf16.gmra.mrb[152].mxu0 %vm4548_vm12, %v10726_v26 }
 0xd20   : > { %17877 = vmatprep.mubr.msk.bf16.mxu0 %vm19624_vm8, %v19623_v34 }
 0xd27   : > { %17878 = vmatmul.mubr.msk.bf16.gmra.mrb[156].mxu0 %vm4548_vm12, %v10728_v0 }
 0xd28   : > { %17881 = vmatprep.mubr.msk.bf16.mxu0 %vm19624_vm8, %v19623_v34 }
 0xd2f   : > { %17882 = vmatmul.mubr.msk.bf16.gmra.mrb[160].mxu0 %vm4548_vm12, %v10730_v9 }
 0xd30   : > { %17887 = vmatprep.mubr.msk.bf16.mxu0 %vm19624_vm8, %v19623_v34 }
 0xd37   : > { %17888 = vmatmul.mubr.msk.bf16.vlgmr.msra.gmra.mrb[144].mxu0 %vm4548_vm12, %v10858_v51 }
 0xd38   : > { %17908 = vmatpush3.bf16.msra.mxu0 %v19434_v35  ;;  %17891 = vmatprep.mubr.msk.bf16.mxu0 %vm19624_vm8, %v19623_v34 }
 0xd3f   : > { %17892 = vmatmul.mubr.msk.bf16.gmra.mrb[148].mxu0 %vm4548_vm12, %v10867_v47 }
 0xd40   : > { %17895 = vmatprep.mubr.msk.bf16.mxu0 %vm19624_vm8, %v19623_v34 }
 0xd47   : > { %17896 = vmatmul.mubr.msk.bf16.gmra.mrb[152].mxu0 %vm4548_vm12, %v10876_v14 }
 0xd48   : > { %17899 = vmatprep.mubr.msk.bf16.mxu0 %vm19624_vm8, %v19623_v34 }
 0xd4f   : > { %17900 = vmatmul.mubr.msk.bf16.gmra.mrb[156].mxu0 %vm4548_vm12, %v10885_v60 }
 0xd50   : > { %17903 = vmatprep.mubr.msk.bf16.mxu0 %vm19624_vm8, %v19623_v34 }
 0xd57   : > { %17904 = vmatmul.mubr.msk.bf16.gmra.mrb[160].mxu0 %vm4548_vm12, %v10894_v59 }
 0xd58   : > { %17909 = vmatprep.mubr.msk.bf16.mxu0 %vm19624_vm8, %v19623_v34 }
 0xd5f   : > { %17910 = vmatmul.mubr.msk.bf16.vlgmr.msra.gmra.mrb[144].mxu0 %vm4548_vm12, %v21683_v41  ;;  %v11015_v41 = vrot.slane %v19435_v48, 3 }
 0xd60   : > { %17913 = vmatprep.mubr.msk.bf16.mxu0 %vm19624_vm8, %v19623_v34 }
 0xd67   : > { %17914 = vmatmul.mubr.msk.bf16.gmra.mrb[148].mxu0 %vm4548_vm12, %v21679_v55  ;;  %v11016_v55 = vsel %vm3706_vm7, %v11013_v45, %v11015_v41 }
 0xd68   : > { %17917 = vmatprep.mubr.msk.bf16.mxu0 %vm19624_vm8, %v19623_v34 }
 0xd6f   : > { %17918 = vmatmul.mubr.msk.bf16.gmra.mrb[152].mxu0 %vm4548_vm12, %v21687_v33 }
 0xd70   : > { %17921 = vmatprep.mubr.msk.bf16.mxu0 %vm19624_vm8, %v19623_v34 }
 0xd77   : > { %17922 = vmatmul.mubr.msk.bf16.gmra.mrb[156].mxu0 %vm4548_vm12, %v21692_v20 }
 0xd78   : > { %17925 = vmatprep.mubr.msk.bf16.mxu0 %vm19624_vm8, %v19623_v34 }
 0xd7f   : > { %17926 = vmatmul.mubr.msk.bf16.gmra.mrb[160].mxu0 %vm4548_vm12, %v11016_v55  ;;  %vm11334_vm12 = vcmask 257027  }
 0xd80   : > { %vm22291_vm15 = vmand %vm11334_vm12, %vm11335_vm14  ;;  %vm11342_vm14 = vcmask 256000  }
 0xe32   : > { %v11072_v43 = vpop.f32.mrb[144].mxu0 }
 0xe33   : > { %v17911_v39 = vpop.f32.mrb[145].mxu0 }
 0xe34   : > { %v11075_v25 = vpop.f32.mrb[146].mxu0 }
 0xe35   : > { %v11126_v33 = vpack.c.bf16 %v11075_v25, %v11072_v43  ;;  %v17912_v19 = vpop.f32.mrb[147].mxu0 }
 0xe37   : > { %17930 = vmatpush3.bf16.msra.mxu1 %v11126_v33 }
 0xe38   : > { %17931 = vmatprep.subr.bf16.mxu1 %v19623_v34 }
 0xe3a   : > { %v11080_v58 = vpop.f32.mrb[148].mxu0 }
 0xe3b   : > { %v17915_v20 = vpop.f32.mrb[149].mxu0 }
 0xe3c   : > { %v11083_v61 = vpop.f32.mrb[150].mxu0 }
 0xe3d   : > { %v11127_v63 = vpack.c.bf16 %v11083_v61, %v11080_v58  ;;  %v17916_v36 = vpop.f32.mrb[151].mxu0 }
 0xe3f   : > { %17932 = vmatpush3.bf16.msra.mxu1 %v11127_v63  ;;  %v11278_v63 = vpop.permute.xlu1 %11277 }
 0xe40   : > { %17933 = vmatprep.subr.bf16.mxu1 %v19623_v34 }
 0xe42   : > { %v11088_v62 = vpop.f32.mrb[152].mxu0 }
 0xe43   : > { %v17919_v45 = vpop.f32.mrb[153].mxu0 }
 0xe44   : > { %v11091_v32 = vpop.f32.mrb[154].mxu0 }
 0xe45   : > { %v11128_v11 = vpack.c.bf16 %v11091_v32, %v11088_v62  ;;  %v17920_v26 = vpop.f32.mrb[155].mxu0 }
 0xe46   : > { %v11283_v26 = vpop.permute.xlu0 %11282 }
 0xe47   : > { %17934 = vmatpush3.bf16.msra.mxu1 %v11128_v11 }
 0xe48   : > { %17935 = vmatprep.subr.bf16.mxu1 %v19623_v34 }
 0xe4a   : > { %v11096_v49 = vpop.f32.mrb[156].mxu0 }
 0xe4b   : > { %v17923_v44 = vpop.f32.mrb[157].mxu0 }
 0xe4c   : > { %v11099_v0 = vpop.f32.mrb[158].mxu0 }
 0xe4d   : > { %v11129_v40 = vpack.c.bf16 %v11099_v0, %v11096_v49  ;;  %v17924_v15 = vpop.f32.mrb[159].mxu0  ;;  %v11337_v49 = vld [vmem:[#allocation4] sm:$0x8] }
 0xe4f   : > { %17936 = vmatpush3.bf16.msra.mxu1 %v11129_v40 }
 0xe50   : > { %17937 = vmatprep.subr.bf16.mxu1 %v19623_v34 }
 0xe52   : > { %v11104_v53 = vpop.f32.mrb[160].mxu0 }
 0xe53   : > { %v17927_v28 = vpop.f32.mrb[161].mxu0 }
 0xe54   : > { %v11107_v12 = vpop.f32.mrb[162].mxu0 }
 0xe55   : > { %v11130_v23 = vpack.c.bf16 %v11107_v12, %v11104_v53  ;;  %v17928_v9 = vpop.f32.mrb[163].mxu0 }
 0xe57   : > { %v11154_v50 = vsel %vm1192_vm3, %v11130_v23, 0 }
 0xe58   : > { %17938 = vmatpush3.bf16.msra.mxu1 %v11154_v50 }
 0xe59   : > { %17951 = vmatprep.subr.bf16.mxu1 %v19439_v8 }
 0xe5b   : > { %17940 = vmatmul.mubr.msk.bf16.vlgmr.msra.gmra.mrb[216].mxu1 %vm8944_vm10, %v19437_v37 }
 0xe5c   : > { %17943 = vmatprep.mubr.msk.bf16.mxu1 %vm19624_vm8, %v19623_v34  ;;  %17952 = vmatpush3.bf16.msra.mxu1 %v19439_v8 }
 0xe5d   : > { %17953 = vmatprep.subr.bf16.mxu1 %v19441_v1 }
 0xe60   : > { %17954 = vmatpush3.bf16.msra.mxu1 %v19441_v1 }
 0xe61   : > { %17959 = vmatprep.subr.bf16.mxu1 %v22278_v30 }
 0xe63   : > { %17944 = vmatmul.mubr.msk.bf16.gmra.mrb[220].mxu1 %vm8944_vm10, %v19438_v42 }
 0xe64   : > { %17947 = vmatprep.mubr.msk.bf16.mxu1 %vm19624_vm8, %v19623_v34 }
 0xe6b   : > { %17948 = vmatmul.mubr.msk.bf16.gmra.mrb[224].mxu1 %vm8944_vm10, %v19440_v2  ;;  %vm11298_vm10 = vsmask.f32 3328 }
 0xe6c   : > { %vm22297_vm12 = vmor %vm11298_vm10, %vm11299_vm0 }
 0xf2e   : > { %v11190_v38 = vpop.f32.mrb[216].mxu1 }
 0xf2f   : > { %v15988_v35 = vpack.c.bf16 %v11190_v38, %v11190_v38  ;;  %v17941_v51 = vpop.f32.mrb[217].mxu1 }
 0xf30   : > { %v11193_v21 = vpop.f32.mrb[218].mxu1  ;;  %v22530_v51 = vld [vmem:[#allocation4 + $0x10] sm:$0x1] }
 0xf31   : > { %11233 = vst.msk [vmem:[#allocation5] sm:$0xf] %vm9034_vm9, %v15988_v35  ;;  %v15989_v54 = vpack.c.bf16 %v11193_v21, %v11193_v21  ;;  %v17942_v10 = vpop.f32.mrb[219].mxu1  ;;  %v13164_v12 = vunpack.c.l.bf16 %v22530_v51 }
 0xf32   : > { %v11345_v10 = vld [vmem:[#allocation4 + $0xc] sm:$0x7] }
 0xf33   : > { %11234 = vst.msk [vmem:[#allocation5 + $0x4] sm:$0xf] %vm9034_vm9, %v15989_v54 }
 0xf36   : > { %v11198_v29 = vpop.f32.mrb[220].mxu1 }
 0xf37   : > { %v15990_v13 = vpack.c.bf16 %v11198_v29, %v11198_v29  ;;  %v17945_v47 = vpop.f32.mrb[221].mxu1 }
 0xf38   : > { %v11238_v6 = vld [vmem:[#allocation5] sm:$0x8]  ;;  %v11201_v31 = vpop.f32.mrb[222].mxu1 }
 0xf39   : > { %v11242_v46 = vunpack.c.l.bf16 %v11238_v6  ;;  %11235 = vst.msk [vmem:[#allocation5 + $0x8] sm:$0xf] %vm9034_vm9, %v15990_v13  ;;  %v15991_v24 = vpack.c.bf16 %v11201_v31, %v11201_v31  ;;  %v17946_v5 = vpop.f32.mrb[223].mxu1 }
 0xf3a   : > { %v11239_v14 = vld [vmem:[#allocation5 + $0x4] sm:$0xf] }
 0xf3b   : > { %v11243_v7 = vunpack.c.l.bf16 %v11239_v14  ;;  %11236 = vst.msk [vmem:[#allocation5 + $0xc] sm:$0xf] %vm9034_vm9, %v15991_v24  ;;  %v11251_v4 = vrot.slane %v11242_v46, 7 }
 0xf3d   : > { %v11252_v48 = vrot.slane %v11243_v7, 7 }
 0xf3f   : > { %v11253_v17 = vsel %vm22872_vm4, %v11251_v4, %v11252_v48 }
 0xf40   : > { %v11261_v18 = vadd.f32 %v11253_v17, %v22159_v56  ;;  %v11240_v52 = vld [vmem:[#allocation5 + $0x8] sm:$0xf] }
 0xf41   : > { %v11244_v60 = vunpack.c.l.bf16 %v11240_v52  ;;  %v19445_v52 = vld [vmem:[%s22861_s4 + $0x98] sm:$0xff]  }
 0xf42   : > { %v11264_v16 = vmax.f32 %v11261_v18, 0.0  ;;  %v11241_v3 = vld [vmem:[#allocation5 + $0xc] sm:$0x7] }
 0xf43   : > { %v11254_v59 = vrot.slane %v11244_v60, 7  ;;  %v11245_v41 = vunpack.c.l.bf16 %v11241_v3  ;;  %v19448_v60 = vld [vmem:[%s22861_s4 + $0xb0] sm:$0xff]  }
 0xf44   : > { %v11285_v55 = vmul.f32 %v11273_v22, %v11264_v16 }
 0xf45   : > { %v11255_v43 = vsel %vm22872_vm4, %v11252_v48, %v11254_v59  ;;  %v11256_v39 = vrot.slane %v11245_v41, 7 }
 0xf46   : > { %v15993_v25 = vpack.c.bf16 %v11285_v55, %v11285_v55  ;;  %v11262_v33 = vadd.f32 %v11255_v43, %v22161_v57  ;;  %v19449_v55 = vld [vmem:[%s22861_s4 + $0xb8] sm:$0xff]  }
 0xf47   : > { %v11257_v19 = vsel %vm22872_vm4, %v11254_v59, %v11256_v39  ;;  %vm11343_vm4 = vsmask.f32 2304  ;;  %v19452_v39 = vld [vmem:[%s22861_s4 + $0xc0] sm:$0xff]  }
 0xf48   : > { %v11302_v58 = vshll.u32 %v15993_v25, 16  ;;  %v11305_v56 = vshrl.u32 %v15993_v25, 16  ;;  %v11265_v20 = vmax.f32 %v11262_v33, 0.0  ;;  %v11263_v61 = vadd.f32 %v11257_v19, %v22157_v27  ;;  %vm22304_vm0 = vmand %vm11342_vm14, %vm11343_vm4 }
 0xf4a   : > { %v11304_v62 = vrot.slane %v11302_v58, 5  ;;  %v11307_v45 = vrot.slane %v11305_v56, 4  ;;  %v11286_v32 = vmul.f32 %v11278_v63, %v11265_v20  ;;  %v11266_v11 = vmax.f32 %v11263_v61, 0.0 }
 0xf4c   : > { %v11308_v57 = vor.u32 %v11307_v45, %v11304_v62  ;;  %v11338_v44 = vsel %vm22291_vm15, %v11304_v62, %v11337_v49  ;;  %v15994_v0 = vpack.c.bf16 %v11286_v32, %v11286_v32  ;;  %v11287_v40 = vmul.f32 %v11283_v26, %v11266_v11  ;;  %v19453_v45 = vld [vmem:[%s22861_s4 + $0xc8] sm:$0xff]  }
 0xf4d   : > { %11339 = vst [vmem:[#allocation4] sm:$0x8] %v11338_v44  ;;  %v19455_v44 = vld [vmem:[%s22861_s4 + $0xd0] sm:$0xff]  }
 0xf4e   : > { %v11311_v27 = vshll.u32 %v15994_v0, 16  ;;  %v11315_v15 = vshrl.u32 %v15994_v0, 16  ;;  %v15995_v53 = vpack.c.bf16 %v11287_v40, %v11287_v40  ;;  %v11309_v28 = vrot.slane %v11308_v57, 4 }
 0xf50   : > { %v11313_v23 = vrot.slane %v11311_v27, 5  ;;  %v11317_v9 = vrot.slane %v11315_v15, 4  ;;  %v11321_v50 = vshll.u32 %v15995_v53, 16  ;;  %v11325_v37 = vshrl.u32 %v15995_v53, 16 }
 0xf52   : > { %v11314_v42 = vsel %vm22297_vm12, %v11309_v28, %v11313_v23  ;;  %v11318_v8 = vor.u32 %v11317_v9, %v11313_v23  ;;  %v11323_v2 = vrot.slane %v11321_v50, 5  ;;  %v11327_v1 = vrot.slane %v11325_v37, 4  ;;  %v19456_v23 = vld [vmem:[%s22861_s4 + $0xd8] sm:$0xff]   ;;  %v19458_v50 = vld [vmem:[%s22861_s4 + $0xe0] sm:$0xff]   ;;  %v19459_v37 = vld [vmem:[%s22861_s4 + $0xe8] sm:$0xff]  }
 0xf53   : > { %11340 = vst.msk [vmem:[#allocation4 + $0x4] sm:$0xf] %vm9034_vm9, %v11314_v42 }
 0xf54   : > { %v11319_v38 = vrot.slane %v11318_v8, 4  ;;  %v11328_v35 = vor.u32 %v11327_v1, %v11323_v2  ;;  %v11348_v13 = vld [vmem:[#allocation4] sm:$0xf] }
 0xf55   : > { %v11519_v16 = vld [vmem:[#allocation4] sm:$0xe] }
 0xf56   : > { %v11324_v21 = vsel %vm22297_vm12, %v11319_v38, %v11323_v2  ;;  %v11329_v54 = vrot.slane %v11328_v35, 4  ;;  %v11600_v58 = vld [vmem:[#allocation4] sm:$0x8]  ;;  %v19464_v2 = vld [vmem:[%s22861_s4 + $0xf0] sm:$0xff]   ;;  %v11865_v38 = vld [vmem:[#allocation4 + $0x10] sm:$0x1] }
 0xf57   : > { %11341 = vst.msk [vmem:[#allocation4 + $0x8] sm:$0xf] %vm9034_vm9, %v11324_v21 }
 0xf58   : > { %v11346_v29 = vsel %vm22304_vm0, %v11329_v54, %v11345_v10  ;;  %v11953_v10 = vld [vmem:[#allocation4 + $0x10] sm:$0x3] }
 0xf59   : > { %11347 = vst [vmem:[#allocation4 + $0xc] sm:$0x7] %v11346_v29 }
 0xf5a   : > { %v11349_v47 = vld [vmem:[#allocation4 + $0x4] sm:$0xf] }
 0xf5b   : > { %v15640_v6 = vcombine.low %v11348_v13, %v11349_v47  ;;  %v15655_v3 = vcombine.low %v11519_v16, %v11349_v47  ;;  %v11601_v25 = vld [vmem:[#allocation4 + $0x4] sm:$0xf] }
 0xf5c   : > { %v15664_v20 = vcombine.low %v11600_v58, %v11601_v25  ;;  %v11862_v21 = vld [vmem:[#allocation4 + $0x4] sm:$0xc] }
 0xf5d   : > { %v11373_v31 = vshll.u32 %v15640_v6, 16  ;;  %v11371_v24 = vshrl.u32 %v15640_v6, 16  ;;  %v11528_v41 = vrot.slane %v15655_v3, 1  ;;  %v19467_v3 = vld [vmem:[%s22861_s4 + $0x108] sm:$0xff]  }
 0xf5e   : > { %v19443_v46 = vld [vmem:[#allocation4 + $0x8] ss:$0 sps:$4 sm:$0xff]   ;;  %v11619_v62 = vrot.slane %v15664_v20, 3  ;;  %v11701_v49 = vshrl.u32 %v15664_v20, 16  ;;  %v11704_v57 = vshll.u32 %v15664_v20, 16 }
 0xf5f   : > { %v11375_v5 = vrot.slane %v11373_v31, 1  ;;  %v11378_v14 = vshll.u32 %v19443_v46, 16  ;;  %v11382_v48 = vshrl.u32 %v19443_v46, 16  ;;  %v11529_v22 = vrot.slane %v19443_v46, 1  ;;  %v11602_v33 = vld [vmem:[#allocation4 + $0x8] sm:$0xf] }
 0xf60   : > { %v19446_v59 = vld [vmem:[#allocation4 + $0x8] ss:$0 sps:$4 sm:$0x77]   ;;  %v11603_v43 = vld [vmem:[#allocation4 + $0xc] sm:$0x3]  ;;  %v11703_v27 = vrot.slane %v11701_v49, 3  ;;  %v15683_v42 = vcombine.low %v11601_v25, %v11602_v33 }
 0xf61   : > { %v11376_v7 = vor.u32 %v11375_v5, %v11371_v24  ;;  %v11380_v4 = vrot.slane %v11378_v14, 1  ;;  %v15665_v19 = vcombine.low %v11602_v33, %v11603_v43  ;;  %v11691_v56 = vld [vmem:[#allocation4 + $0xc] sm:$0x7]  ;;  %v11706_v15 = vrot.slane %v11704_v57, 4  ;;  %v11863_v1 = vld [vmem:[#allocation4 + $0x8] sm:$0xf] }
 0xf62   : > { %v15674_v63 = vcombine.low %v11602_v33, %v11691_v56  ;;  %v11864_v8 = vld [vmem:[#allocation4 + $0xc] sm:$0xf]  ;;  %v15693_v54 = vcombine.low %v11862_v21, %v11863_v1  ;;  %v15684_v47 = vcombine.low %v11691_v56, %v11691_v56  ;;  %v19465_v31 = vld [vmem:[%s22861_s4 + $0xf8] sm:$0xff]   ;;  %v12048_v25 = vld [vmem:[#allocation4 + $0x4] sm:$0x8] }
 0xf63   : > { %v11381_v17 = vsel %vm586_vm1, %v11376_v7, %v11380_v4  ;;  %v11384_v18 = vor.u32 %v11382_v48, %v11380_v4  ;;  %v11620_v61 = vrot.slane %v15665_v19, 3  ;;  %v11707_v28 = vor.u32 %v11706_v15, %v11703_v27  ;;  %v19466_v4 = vld [vmem:[%s22861_s4 + $0x100] sm:$0xff]   ;;  %v19470_v56 = vld [vmem:[%s22861_s4 + $0x118] sm:$0xff]  }
 0xf64   : > { %17955 = vmatprep.mubr.msk.bf16.mxu1 %vm454_vm2, %v11381_v17  ;;  %v11709_v11 = vshrl.u32 %v15674_v63, 16  ;;  %v11712_v26 = vshll.u32 %v15674_v63, 16  ;;  %v15694_v35 = vcombine.low %v11864_v8, %v11865_v38  ;;  %v15703_v13 = vcombine.low %v11864_v8, %v11953_v10  ;;  %v19472_v63 = vld [vmem:[%s22861_s4 + $0x130] sm:$0xff]  }
 0xf65   : > { %17956 = vmatmul.mubr.msk.bf16.vlgmr.msra.gmra.mrb[228].mxu1 %vm454_vm2, %v11384_v18  ;;  %v11621_v32 = vsel %vm3706_vm7, %v11619_v62, %v11620_v61  ;;  %v11963_v14 = vshrl.u32 %v15693_v54, 16  ;;  %v11966_v7 = vshll.u32 %v15693_v54, 16  ;;  %v15712_v33 = vcombine.low %v12048_v25, %v11863_v1  ;;  %v19473_v62 = vld [vmem:[%s22861_s4 + $0x138] sm:$0xff]  }
 0xf66   : > { %17963 = vmatprep.mubr.msk.bf16.mxu1 %vm454_vm2, %v15640_v6  ;;  %17960 = vmatpush3.bf16.msra.mxu1 %v22278_v30  ;;  %v11530_v30 = vsel %vm1192_vm3, %v11528_v41, %v11529_v22  ;;  %v11711_v0 = vrot.slane %v11709_v11, 3  ;;  %v11714_v40 = vrot.slane %v11712_v26, 4  ;;  %v11882_v29 = vrot.slane %v15694_v35, 2  ;;  %v22406_v11 = vld [vmem:[%s22861_s4 + $0x180] sm:$0xff]   ;;  %v12138_v26 = vpop.permute.xlu1 %12137 }
 0xf67   : > { %17961 = vmatprep.subr.bf16.mxu1 %v19445_v52  ;;  %v11881_v6 = vrot.slane %v15693_v54, 2  ;;  %v11971_v24 = vshrl.u32 %v15703_v13, 16  ;;  %v11974_v5 = vshll.u32 %v15703_v13, 16  ;;  %v11965_v18 = vrot.slane %v11963_v14, 2 }
 0xf68   : > { %v11715_v53 = vor.u32 %v11714_v40, %v11711_v0  ;;  %v12058_v19 = vrot.slane %v15703_v13, 3  ;;  %v12057_v58 = vrot.slane %v15712_v33, 3 }
 0xf69   : > { %v11883_v46 = vsel %vm2506_vm5, %v11881_v6, %v11882_v29  ;;  %v11973_v48 = vrot.slane %v11971_v24, 2  ;;  %v11976_v17 = vrot.slane %v11974_v5, 3 }
 0xf6a   : > { %17962 = vmatpush3.bf16.msra.mxu1 %v19445_v52  ;;  %v11716_v9 = vsel %vm9392_vm13, %v11707_v28, %v11715_v53  ;;  %v11968_v52 = vrot.slane %v11966_v7, 3  ;;  %v12059_v20 = vsel %vm3706_vm7, %v12057_v58, %v12058_v19  ;;  %v12148_v0 = vpop.permute.xlu1 %12147 }
 0xf6b   : > { %17967 = vmatprep.subr.bf16.mxu1 %v19448_v60 }
 0xf6c   : > { %v11969_v16 = vor.u32 %v11968_v52, %v11965_v18 }
 0xf71   : > { %17964 = vmatmul.mubr.msk.bf16.vlgmr.msra.gmra.mrb[228].mxu1 %vm454_vm2, %v19446_v59 }
 0xf72   : > { %17971 = vmatprep.mubr.msk.bf16.mxu1 %vm454_vm2, %v11530_v30  ;;  %17968 = vmatpush3.bf16.msra.mxu1 %v19448_v60  ;;  %v11977_v60 = vor.u32 %v11976_v17, %v11973_v48 }
 0xf73   : > { %17969 = vmatprep.subr.bf16.mxu1 %v19449_v55 }
 0xf76   : > { %17970 = vmatpush3.bf16.msra.mxu1 %v19449_v55  ;;  %v11978_v55 = vsel %vm3259_vm6, %v11969_v16, %v11977_v60 }
 0xf77   : > { %17975 = vmatprep.subr.bf16.mxu1 %v19452_v39 }
 0xf7d   : > { %17972 = vmatmul.mubr.msk.bf16.vlgmr.msra.gmra.mrb[228].mxu1 %vm454_vm2, %v11529_v22  ;;  %v11206_v22 = vpop.f32.mrb[224].mxu1 }
 0xf7e   : > { %17979 = vmatprep.mubr.msk.bf16.mxu1 %vm454_vm2, %v11621_v32  ;;  %17976 = vmatpush3.bf16.msra.mxu1 %v19452_v39  ;;  %v15992_v59 = vpack.c.bf16 %v11206_v22, %v11206_v22  ;;  %v17949_v41 = vpop.f32.mrb[225].mxu1  ;;  %v19469_v39 = vld [vmem:[%s22861_s4 + $0x110] sm:$0xff]   ;;  %v22400_v32 = vld [vmem:[%s22861_s4 + $0x120] sm:$0xff]  }
 0xf7f   : > { %17977 = vmatprep.subr.bf16.mxu1 %v19453_v45  ;;  %v11209_v30 = vpop.f32.mrb[226].mxu1 }
 0xf80   : > { %11237 = vst.msk [vmem:[#allocation5 + $0x10] sm:$0x3] %vm9039_vm11, %v15992_v59  ;;  %v17950_v43 = vpop.f32.mrb[227].mxu1  ;;  %vm13185_vm11 = vcmask 1042432  }
 0xf82   : > { %17978 = vmatpush3.bf16.msra.mxu1 %v19453_v45  ;;  %v19474_v45 = vld [vmem:[%s22861_s4 + $0x168] sm:$0xff]  }
 0xf83   : > { %17983 = vmatprep.subr.bf16.mxu1 %v19455_v44 }
 0xf89   : > { %17980 = vmatmul.mubr.msk.bf16.vlgmr.msra.gmra.mrb[228].mxu1 %vm454_vm2, %v11620_v61  ;;  %v19471_v61 = vld [vmem:[%s22861_s4 + $0x160] sm:$0xff]  }
 0xf8a   : > { %17987 = vmatprep.mubr.msk.bf16.mxu1 %vm454_vm2, %v11716_v9  ;;  %17984 = vmatpush3.bf16.msra.mxu1 %v19455_v44  ;;  %v12143_v9 = vpop.permute.xlu0 %12142 }
 0xf8b   : > { %17985 = vmatprep.subr.bf16.mxu1 %v19456_v23  ;;  %18055 = vmatprep.subr.bf16.mxu0 %v19471_v61 }
 0xf8c   : > { %18056 = vmatpush3.bf16.msra.mxu0 %v19471_v61 }
 0xf8d   : > { %18057 = vmatprep.subr.bf16.mxu0 %v19474_v45 }
 0xf8e   : > { %17986 = vmatpush3.bf16.msra.mxu1 %v19456_v23 }
 0xf8f   : > { %17991 = vmatprep.subr.bf16.mxu1 %v19458_v50 }
 0xf90   : > { %18058 = vmatpush3.bf16.msra.mxu0 %v19474_v45 }
 0xf91   : > { %18071 = vmatprep.subr.bf16.mxu0 %v22406_v11 }
 0xf95   : > { %17988 = vmatmul.mubr.msk.bf16.vlgmr.msra.gmra.mrb[228].mxu1 %vm454_vm2, %v11715_v53 }
 0xf96   : > { %17995 = vmatprep.mubr.msk.bf16.mxu1 %vm454_vm2, %v15683_v42  ;;  %17992 = vmatpush3.bf16.msra.mxu1 %v19458_v50 }
 0xf97   : > { %17993 = vmatprep.subr.bf16.mxu1 %v19459_v37 }
 0xf9a   : > { %17994 = vmatpush3.bf16.msra.mxu1 %v19459_v37 }
 0xf9b   : > { %17999 = vmatprep.subr.bf16.mxu1 %v19464_v2 }
 0xfa1   : > { %17996 = vmatmul.mubr.msk.bf16.vlgmr.msra.gmra.mrb[228].mxu1 %vm454_vm2, %v15684_v47 }
 0xfa2   : > { %18003 = vmatprep.mubr.msk.bf16.mxu1 %vm454_vm2, %v11883_v46  ;;  %18000 = vmatpush3.bf16.msra.mxu1 %v19464_v2 }
 0xfa3   : > { %18001 = vmatprep.subr.bf16.mxu1 %v19465_v31 }
 0xfa6   : > { %18002 = vmatpush3.bf16.msra.mxu1 %v19465_v31  ;;  %v12196_v31 = vld [vmem:[#allocation5] sm:$0x8] }
 0xfa7   : > { %18007 = vmatprep.subr.bf16.mxu1 %v19466_v4 }
 0xfad   : > { %18004 = vmatmul.mubr.msk.bf16.vlgmr.msra.gmra.mrb[228].mxu1 %vm454_vm2, %v11882_v29 }
 0xfae   : > { %18011 = vmatprep.mubr.msk.bf16.mxu1 %vm454_vm2, %v11978_v55  ;;  %18008 = vmatpush3.bf16.msra.mxu1 %v19466_v4  ;;  %v12201_v4 = vld [vmem:[#allocation5 + $0xc] sm:$0x7] }
 0xfaf   : > { %18009 = vmatprep.subr.bf16.mxu1 %v19467_v3 }
 0xfb2   : > { %18010 = vmatpush3.bf16.msra.mxu1 %v19467_v3 }
 0xfb3   : > { %18015 = vmatprep.subr.bf16.mxu1 %v19469_v39 }
 0xfb9   : > { %18012 = vmatmul.mubr.msk.bf16.vlgmr.msra.gmra.mrb[228].mxu1 %vm454_vm2, %v11977_v60 }
 0xfba   : > { %18019 = vmatprep.mubr.msk.bf16.mxu1 %vm454_vm2, %v12059_v20  ;;  %18016 = vmatpush3.bf16.msra.mxu1 %v19469_v39 }
 0xfbb   : > { %18017 = vmatprep.subr.bf16.mxu1 %v19470_v56 }
 0xfbe   : > { %18018 = vmatpush3.bf16.msra.mxu1 %v19470_v56 }
 0xfbf   : > { %18023 = vmatprep.subr.bf16.mxu1 %v19472_v63 }
 0xfc5   : > { %18020 = vmatmul.mubr.msk.bf16.vlgmr.msra.gmra.mrb[228].mxu1 %vm454_vm2, %v12058_v19 }
 0xfc6   : > { %18024 = vmatpush3.bf16.msra.mxu1 %v19472_v63 }
 0xfc7   : > { %18025 = vmatprep.subr.bf16.mxu1 %v19473_v62 }
 0xfca   : > { %18026 = vmatpush3.bf16.msra.mxu1 %v19473_v62 }
 0xfcb   : > { %18031 = vmatprep.subr.bf16.mxu1 %v22400_v32 }
0x1098   : > { %v18021_v49 = vpop.f32.mrb[228].mxu1 }
0x1099   : > { %v12131_v57 = vmax.f32 %v18021_v49, 0.0  ;;  %v12112_v44 = vpop.f32.mrb[229].mxu1 }
0x109a   : > { %v12129_v40 = vmax.f32 %v12112_v44, 0.0  ;;  %v18022_v27 = vpop.f32.mrb[230].mxu1 }
0x109b   : > { %v12152_v15 = vmul.f32 %v12148_v0, %v12131_v57  ;;  %v12115_v53 = vpop.f32.mrb[231].mxu1 }
0x109c   : > { %v12150_v28 = vmul.f32 %v12138_v26, %v12129_v40  ;;  %v12130_v23 = vmax.f32 %v12115_v53, 0.0 }
0x109d   : > { %v15998_v50 = vpack.c.bf16 %v12152_v15, %v12152_v15 }
0x109e   : > { %v15996_v37 = vpack.c.bf16 %v12150_v28, %v12150_v28  ;;  %v12151_v42 = vmul.f32 %v12143_v9, %v12130_v23  ;;  %v12721_v9 = vld [vmem:[#allocation5 + $0x10] sm:$0x1] }
0x109f   : > { %v12183_v8 = vshll.u32 %v15998_v50, 16  ;;  %v12187_v2 = vshrl.u32 %v15998_v50, 16 }
0x10a0   : > { %v12164_v1 = vshll.u32 %v15996_v37, 16  ;;  %v12167_v38 = vshrl.u32 %v15996_v37, 16  ;;  %v15997_v35 = vpack.c.bf16 %v12151_v42, %v12151_v42 }
0x10a1   : > { %v12185_v21 = vrot.slane %v12183_v8, 5  ;;  %v12189_v54 = vrot.slane %v12187_v2, 4 }
0x10a2   : > { %v12166_v10 = vrot.slane %v12164_v1, 5  ;;  %v12169_v29 = vrot.slane %v12167_v38, 4  ;;  %v12173_v13 = vshll.u32 %v15997_v35, 16  ;;  %v12177_v47 = vshrl.u32 %v15997_v35, 16  ;;  %v19484_v1 = vld [vmem:[%s22861_s4 + $0x128] sm:$0xff]  }
0x10a3   : > { %v12190_v6 = vor.u32 %v12189_v54, %v12185_v21 }
0x10a4   : > { %v12170_v46 = vor.u32 %v12169_v29, %v12166_v10  ;;  %v12197_v24 = vsel %vm22291_vm15, %v12166_v10, %v12196_v31  ;;  %v12175_v5 = vrot.slane %v12173_v13, 5  ;;  %v12179_v14 = vrot.slane %v12177_v47, 4  ;;  %v19485_v29 = vld [vmem:[%s22861_s4 + $0x188] sm:$0xff]   ;;  %v19487_v13 = vld [vmem:[%s22861_s4 + $0x140] sm:$0xff]  }
0x10a5   : > { %v12191_v7 = vrot.slane %v12190_v6, 4  ;;  %12198 = vst [vmem:[#allocation5] sm:$0x8] %v12197_v24  ;;  %v12809_v31 = vld [vmem:[#allocation5 + $0x10] sm:$0x3] }
0x10a6   : > { %v12171_v48 = vrot.slane %v12170_v46, 4  ;;  %v12180_v17 = vor.u32 %v12179_v14, %v12175_v5 }
0x10a7   : > { %v12202_v18 = vsel %vm22304_vm0, %v12191_v7, %v12201_v4  ;;  %v19489_v7 = vld [vmem:[%s22861_s4 + $0x1a0] sm:$0xff]   ;;  %v19491_v4 = vld [vmem:[%s22861_s4 + $0x148] sm:$0xff]  }
0x10a8   : > { %12203 = vst [vmem:[#allocation5 + $0xc] sm:$0x7] %v12202_v18  ;;  %v12176_v52 = vsel %vm22297_vm12, %v12171_v48, %v12175_v5  ;;  %v12181_v60 = vrot.slane %v12180_v17, 4 }
0x10a9   : > { %12199 = vst.msk [vmem:[#allocation5 + $0x4] sm:$0xf] %vm9034_vm9, %v12176_v52 }
0x10aa   : > { %v12186_v16 = vsel %vm22297_vm12, %v12181_v60, %v12185_v21  ;;  %v19492_v60 = vld [vmem:[%s22861_s4 + $0x1a8] sm:$0xff]  }
0x10ab   : > { %12200 = vst.msk [vmem:[#allocation5 + $0x8] sm:$0xf] %vm9034_vm9, %v12186_v16  ;;  %v19493_v16 = vld [vmem:[%s22861_s4 + $0x150] sm:$0xff]  }
0x10ac   : > { %v12204_v3 = vld [vmem:[#allocation5] sm:$0xf] }
0x10ad   : > { %v12456_v59 = vld [vmem:[#allocation5] sm:$0x8] }
0x10ae   : > { %v12375_v35 = vld [vmem:[#allocation5] sm:$0xe] }
0x10af   : > { %v22424_v43 = vld [vmem:[#allocation5 + $0xc] sm:$0x7] }
0x10b0   : > { %v12205_v22 = vld [vmem:[#allocation5 + $0x4] sm:$0xf]  ;;  %v12720_v20 = vld [vmem:[#allocation5 + $0xc] sm:$0xf] }
0x10b1   : > { %v22419_v41 = vld [vmem:[#allocation5 + $0x4] sm:$0xf]  ;;  %v15728_v55 = vcombine.low %v12204_v3, %v12205_v22  ;;  %v15782_v37 = vcombine.low %v12720_v20, %v12721_v9  ;;  %v15743_v54 = vcombine.low %v12375_v35, %v12205_v22  ;;  %v15791_v5 = vcombine.low %v12720_v20, %v12809_v31  ;;  %v12459_v48 = vld [vmem:[#allocation5 + $0xc] sm:$0x3] }
0x10b2   : > { %v22422_v30 = vcombine.low %v12456_v59, %v22419_v41  ;;  %v22426_v39 = vld [vmem:[#allocation5 + $0x8] ss:$0 sps:$4 sm:$0xff]   ;;  %v12718_v44 = vld [vmem:[#allocation5 + $0x4] sm:$0xc] }
0x10b3   : > { %v22428_v25 = vld [vmem:[#allocation5 + $0x8] sm:$0xf]  ;;  %v12229_v33 = vshll.u32 %v15728_v55, 16  ;;  %v12227_v61 = vshrl.u32 %v15728_v55, 16  ;;  %v12234_v63 = vshll.u32 %v22426_v39, 16  ;;  %v12238_v40 = vshrl.u32 %v22426_v39, 16 }
0x10b4   : > { %v15762_v19 = vcombine.low %v22428_v25, %v22424_v43  ;;  %v12557_v58 = vshrl.u32 %v22422_v30, 16  ;;  %v12719_v56 = vld [vmem:[#allocation5 + $0x8] sm:$0xf]  ;;  %v12560_v62 = vshll.u32 %v22422_v30, 16  ;;  %v12738_v10 = vrot.slane %v15782_v37, 2 }
0x10b5   : > { %v12231_v45 = vrot.slane %v12229_v33, 1  ;;  %v12236_v0 = vrot.slane %v12234_v63, 1  ;;  %v22436_v15 = vcombine.low %v12718_v44, %v12719_v56  ;;  %v12904_v47 = vld [vmem:[#allocation5 + $0x4] sm:$0x8]  ;;  %v12384_v46 = vrot.slane %v15743_v54, 1  ;;  %v19496_v33 = vld [vmem:[%s22861_s4 + $0x170] sm:$0xff]  }
0x10b6   : > { %v12559_v26 = vrot.slane %v12557_v58, 3  ;;  %v12565_v49 = vshrl.u32 %v15762_v19, 16  ;;  %v12568_v57 = vshll.u32 %v15762_v19, 16  ;;  %v12562_v27 = vrot.slane %v12560_v62, 4  ;;  %v19498_v58 = vld [vmem:[%s22861_s4 + $0x178] sm:$0xff]  }
0x10b7   : > { %v12232_v53 = vor.u32 %v12231_v45, %v12227_v61  ;;  %v12240_v50 = vor.u32 %v12238_v40, %v12236_v0  ;;  %v12737_v38 = vrot.slane %v22436_v15, 2  ;;  %v12385_v24 = vrot.slane %v22426_v39, 1  ;;  %v19486_v14 = vld [vmem:[#allocation5 + $0x8] ss:$0 sps:$4 sm:$0x77]   ;;  %v19500_v45 = vld [vmem:[%s22861_s4 + $0x190] sm:$0xff]  }
0x10b8   : > { %v12567_v28 = vrot.slane %v12565_v49, 3  ;;  %v12570_v23 = vrot.slane %v12568_v57, 4  ;;  %v12563_v8 = vor.u32 %v12562_v27, %v12559_v26  ;;  %v15753_v18 = vcombine.low %v22428_v25, %v12459_v48 }
0x10b9   : > { %v12237_v42 = vsel %vm586_vm1, %v12232_v53, %v12236_v0  ;;  %v12739_v6 = vsel %vm2506_vm5, %v12737_v38, %v12738_v10  ;;  %v12386_v17 = vsel %vm1192_vm3, %v12384_v46, %v12385_v24  ;;  %v12914_v52 = vrot.slane %v15791_v5, 3 }
0x10ba   : > { %v12571_v2 = vor.u32 %v12570_v23, %v12567_v28  ;;  %18027 = vmatprep.mubr.msk.bf16.mxu1 %vm454_vm2, %v12237_v42  ;;  %v12476_v22 = vrot.slane %v15753_v18, 3  ;;  %v12475_v59 = vrot.slane %v22422_v30, 3  ;;  %v12819_v30 = vshrl.u32 %v22436_v15, 16 }
0x10bb   : > { %18028 = vmatmul.mubr.msk.bf16.vlgmr.msra.gmra.mrb[232].mxu1 %vm454_vm2, %v12240_v50  ;;  %v12822_v19 = vshll.u32 %v22436_v15, 16  ;;  %v12830_v20 = vshll.u32 %v15791_v5, 16  ;;  %v15771_v61 = vcombine.low %v22419_v41, %v22428_v25  ;;  %v15772_v44 = vcombine.low %v22424_v43, %v22424_v43  ;;  %v19501_v25 = vld [vmem:[%s22861_s4 + $0x198] sm:$0xff]  }
0x10bc   : > { %v12572_v21 = vsel %vm9392_vm13, %v12563_v8, %v12571_v2  ;;  %18032 = vmatpush3.bf16.msra.mxu1 %v22400_v32  ;;  %18035 = vmatprep.mubr.msk.bf16.mxu1 %vm454_vm2, %v15728_v55  ;;  %v15800_v32 = vcombine.low %v12904_v47, %v12719_v56  ;;  %v19495_v55 = vld [vmem:[%s22861_s4 + $0x158] sm:$0xff]   ;;  %v12477_v39 = vsel %vm3706_vm7, %v12475_v59, %v12476_v22  ;;  %v12827_v56 = vshrl.u32 %v15791_v5, 16 }
0x10bd   : > { %18059 = vmatprep.mubr.msk.bf16.mxu0 %vm454_vm2, %v12572_v21  ;;  %18033 = vmatprep.subr.bf16.mxu1 %v19484_v1  ;;  %v12821_v63 = vrot.slane %v12819_v30, 2  ;;  %v12824_v62 = vrot.slane %v12822_v19, 3  ;;  %v12832_v49 = vrot.slane %v12830_v20, 3  ;;  %vm22893_vm1 = vcmask 1040384  }
0x10be   : > { %18060 = vmatmul.mubr.msk.bf16.vlgmr.msra.gmra.mrb[164].mxu0 %vm454_vm2, %v12571_v2  ;;  %v12829_v26 = vrot.slane %v12827_v56, 2  ;;  %vm22896_vm13 = vcmask 1041408   ;;  %vm22898_vm4 = vmmov %vm22893_vm1 }
0x10bf   : > { %18072 = vmatpush3.bf16.msra.mxu0 %v22406_v11  ;;  %18075 = vmatprep.mubr.msk.bf16.mxu0 %vm454_vm2, %v12739_v6  ;;  %v12913_v11 = vrot.slane %v15800_v32, 3  ;;  %v12825_v57 = vor.u32 %v12824_v62, %v12821_v63  ;;  %vm22901_vm10 = vmmov %vm22893_vm1 }
0x10c0   : > { %18034 = vmatpush3.bf16.msra.mxu1 %v19484_v1  ;;  %18073 = vmatprep.subr.bf16.mxu0 %v19485_v29  ;;  %v12833_v41 = vor.u32 %v12832_v49, %v12829_v26 }
0x10c1   : > { %18039 = vmatprep.subr.bf16.mxu1 %v19487_v13  ;;  %v12915_v3 = vsel %vm3706_vm7, %v12913_v11, %v12914_v52  ;;  %vm22895_vm7 = vmmov %vm22893_vm1 }
0x10c2   : > { %v12834_v0 = vsel %vm3259_vm6, %v12825_v57, %v12833_v41  ;;  %vm22894_vm6 = vmmov %vm22893_vm1 }
0x10c3   : > { %18074 = vmatpush3.bf16.msra.mxu0 %v19485_v29  ;;  %18036 = vmatmul.mubr.msk.bf16.vlgmr.msra.gmra.mrb[236].mxu1 %vm454_vm2, %v19486_v14 }
0x10c4   : > { %18040 = vmatpush3.bf16.msra.mxu1 %v19487_v13  ;;  %18043 = vmatprep.mubr.msk.bf16.mxu1 %vm454_vm2, %v12386_v17 }
0x10c5   : > { %18087 = vmatprep.subr.bf16.mxu0 %v19489_v7  ;;  %18041 = vmatprep.subr.bf16.mxu1 %v19491_v4 }
0x10c6   : > { %18076 = vmatmul.mubr.msk.bf16.vlgmr.msra.gmra.mrb[168].mxu0 %vm454_vm2, %v12738_v10 }
0x10c7   : > { %18088 = vmatpush3.bf16.msra.mxu0 %v19489_v7  ;;  %18091 = vmatprep.mubr.msk.bf16.mxu0 %vm454_vm2, %v12915_v3 }
0x10c8   : > { %18042 = vmatpush3.bf16.msra.mxu1 %v19491_v4  ;;  %18089 = vmatprep.subr.bf16.mxu0 %v19492_v60 }
0x10c9   : > { %18047 = vmatprep.subr.bf16.mxu1 %v19493_v16 }
0x10cb   : > { %18090 = vmatpush3.bf16.msra.mxu0 %v19492_v60  ;;  %18044 = vmatmul.mubr.msk.bf16.vlgmr.msra.gmra.mrb[240].mxu1 %vm454_vm2, %v12385_v24 }
0x10cc   : > { %18048 = vmatpush3.bf16.msra.mxu1 %v19493_v16  ;;  %18051 = vmatprep.mubr.msk.bf16.mxu1 %vm454_vm2, %v12477_v39 }
0x10cd   : > { %18049 = vmatprep.subr.bf16.mxu1 %v19495_v55  ;;  %18103 = vmatprep.subr.bf16.mxu0 %v19623_v34 }
0x10ce   : > { %18092 = vmatmul.mubr.msk.bf16.vlgmr.msra.gmra.mrb[172].mxu0 %vm454_vm2, %v12914_v52 }
0x10cf   : > { %18107 = vmatprep.mubr.msk.bf16.mxu0 %vm19624_vm8, %v19623_v34 }
0x10d0   : > { %18050 = vmatpush3.bf16.msra.mxu1 %v19495_v55 }
0x10d1   : > { %18063 = vmatprep.subr.bf16.mxu1 %v19496_v33 }
0x10d3   : > { %18052 = vmatmul.mubr.msk.bf16.vlgmr.msra.gmra.mrb[244].mxu1 %vm454_vm2, %v12476_v22 }
0x10d4   : > { %18064 = vmatpush3.bf16.msra.mxu1 %v19496_v33  ;;  %18067 = vmatprep.mubr.msk.bf16.mxu1 %vm454_vm2, %v15771_v61  ;;  %v12988_v33 = vld [vmem:[#allocation4 + $0xc] sm:$0x7] }
0x10d5   : > { %18065 = vmatprep.subr.bf16.mxu1 %v19498_v58  ;;  %v12992_v63 = vunpack.c.l.bf16 %v12988_v33 }
0x10d8   : > { %18066 = vmatpush3.bf16.msra.mxu1 %v19498_v58  ;;  %v12987_v58 = vld [vmem:[#allocation4 + $0x4] sm:$0xff]  }
0x10d9   : > { %18079 = vmatprep.subr.bf16.mxu1 %v19500_v45  ;;  %v12990_v26 = vunpack.c.l.bf16 %v12987_v58  ;;  %v12991_v49 = vunpack.c.h.bf16 %v12987_v58 }
0x10db   : > { %18068 = vmatmul.mubr.msk.bf16.vlgmr.msra.gmra.mrb[248].mxu1 %vm454_vm2, %v15772_v44 }
0x10dc   : > { %18080 = vmatpush3.bf16.msra.mxu1 %v19500_v45  ;;  %18083 = vmatprep.mubr.msk.bf16.mxu1 %vm454_vm2, %v12834_v0  ;;  %v12985_v45 = vld [vmem:[#allocation4] sm:$0x8] }
0x10dd   : > { %18081 = vmatprep.subr.bf16.mxu1 %v19501_v25  ;;  %v12989_v44 = vunpack.c.l.bf16 %v12985_v45 }
0x10e0   : > { %18082 = vmatpush3.bf16.msra.mxu1 %v19501_v25  ;;  %v13002_v25 = vrot.slane %v12992_v63, 7 }
0x10e1   : > { %18095 = vmatprep.subr.bf16.mxu1 %v19623_v34 }
0x10e3   : > { %18084 = vmatmul.mubr.msk.bf16.vlgmr.msra.gmra.mrb[252].mxu1 %vm454_vm2, %v12833_v41 }
0x10e4   : > { %18099 = vmatprep.mubr.msk.bf16.mxu1 %vm19624_vm8, %v19623_v34 }
0x118e   : > { %v18029_v43 = vpop.f32.mrb[232].mxu1 }
0x118f   : > { %v12293_v40 = vpop.f32.mrb[233].mxu1 }
0x1190   : > { %v18030_v27 = vpop.f32.mrb[234].mxu1 }
0x1191   : > { %v18061_v15 = vpop.f32.mrb[164].mxu0  ;;  %v12296_v53 = vpop.f32.mrb[235].mxu1 }
0x1192   : > { %v12625_v28 = vpop.f32.mrb[165].mxu0  ;;  %v13019_v27 = vpop.permute.xlu0 %13018 }
0x1193   : > { %v18062_v23 = vpop.f32.mrb[166].mxu0 }
0x1194   : > { %v12628_v9 = vpop.f32.mrb[167].mxu0 }
0x1196   : > { %v18037_v50 = vpop.f32.mrb[236].mxu1 }
0x1197   : > { %v12370_v37 = vadd.f32 %v18037_v50, %v18029_v43  ;;  %v12361_v42 = vpop.f32.mrb[237].mxu1 }
0x1198   : > { %v12362_v8 = vadd.f32 %v12361_v42, %v12293_v40  ;;  %v18038_v2 = vpop.f32.mrb[238].mxu1  ;;  %v12998_v40 = vrot.slane %v12990_v26, 7 }
0x1199   : > { %v18077_v1 = vpop.f32.mrb[168].mxu0  ;;  %v12364_v38 = vpop.f32.mrb[239].mxu1 }
0x119a   : > { %v12365_v35 = vadd.f32 %v12364_v38, %v12296_v53  ;;  %v12792_v21 = vpop.f32.mrb[169].mxu0 }
0x119b   : > { %v18078_v54 = vpop.f32.mrb[170].mxu0 }
0x119c   : > { %v12795_v10 = vpop.f32.mrb[171].mxu0 }
0x119e   : > { %v18045_v29 = vpop.f32.mrb[240].mxu1 }
0x119f   : > { %v12455_v13 = vadd.f32 %v18045_v29, %v12370_v37  ;;  %v12439_v47 = vpop.f32.mrb[241].mxu1 }
0x11a0   : > { %v12453_v6 = vadd.f32 %v12439_v47, %v12362_v8  ;;  %v18046_v32 = vpop.f32.mrb[242].mxu1 }
0x11a1   : > { %v18093_v31 = vpop.f32.mrb[172].mxu0  ;;  %v12442_v46 = vpop.f32.mrb[243].mxu1 }
0x11a2   : > { %v12454_v24 = vadd.f32 %v12442_v46, %v12365_v35  ;;  %v12968_v5 = vpop.f32.mrb[173].mxu0 }
0x11a3   : > { %v18094_v14 = vpop.f32.mrb[174].mxu0 }
0x11a4   : > { %v12971_v7 = vpop.f32.mrb[175].mxu0 }
0x11a6   : > { %v18053_v4 = vpop.f32.mrb[244].mxu1 }
0x11a7   : > { %v12546_v11 = vadd.f32 %v18053_v4, %v12455_v13  ;;  %v12530_v48 = vpop.f32.mrb[245].mxu1 }
0x11a8   : > { %v12544_v17 = vadd.f32 %v12530_v48, %v12453_v6  ;;  %v18054_v18 = vpop.f32.mrb[246].mxu1 }
0x11a9   : > { %v12533_v52 = vpop.f32.mrb[247].mxu1  ;;  %v12641_v60 = vadd.f32 %v18061_v15, %v12546_v11  ;;  %v13000_v15 = vrot.slane %v12991_v49, 7 }
0x11aa   : > { %v12545_v16 = vadd.f32 %v12533_v52, %v12454_v24  ;;  %v12639_v3 = vadd.f32 %v12625_v28, %v12544_v17 }
0x11ab   : > { %v13003_v37 = vsel %vm22893_vm1, %v13000_v15, %v13002_v25  ;;  %v13001_v54 = vsel %vm22895_vm7, %v12998_v40, %v13000_v15  ;;  %vm13884_vm7 = vsmask.f32 5386 }
0x11ac   : > { %v12640_v22 = vadd.f32 %v12628_v9, %v12545_v16  ;;  %v12997_v9 = vrot.slane %v12989_v44, 7 }
0x11ae   : > { %v18069_v59 = vpop.f32.mrb[248].mxu1 }
0x11af   : > { %v12717_v55 = vadd.f32 %v18069_v59, %v12641_v60  ;;  %v12701_v39 = vpop.f32.mrb[249].mxu1 }
0x11b0   : > { %v12715_v30 = vadd.f32 %v12701_v39, %v12639_v3  ;;  %v18070_v19 = vpop.f32.mrb[250].mxu1 }
0x11b1   : > { %v12704_v56 = vpop.f32.mrb[251].mxu1  ;;  %v12808_v20 = vadd.f32 %v18077_v1, %v12717_v55  ;;  %v12999_v1 = vsel %vm22894_vm6, %v12997_v9, %v12998_v40  ;;  %v13081_v19 = vld [vmem:[#allocation4 + $0xc] sm:$0x7]  ;;  %vm13883_vm6 = vcmask 259074  }
0x11b2   : > { %v12716_v61 = vadd.f32 %v12704_v56, %v12640_v22  ;;  %v12806_v62 = vadd.f32 %v12792_v21, %v12715_v30 }
0x11b4   : > { %v12807_v57 = vadd.f32 %v12795_v10, %v12716_v61  ;;  %v13029_v10 = vpop.permute.xlu0 %13028 }
0x11b6   : > { %v18085_v41 = vpop.f32.mrb[252].mxu1 }
0x11b7   : > { %v12903_v0 = vadd.f32 %v18085_v41, %v12808_v20  ;;  %v12887_v43 = vpop.f32.mrb[253].mxu1 }
0x11b8   : > { %v12901_v53 = vadd.f32 %v12887_v43, %v12806_v62  ;;  %v18086_v28 = vpop.f32.mrb[254].mxu1 }
0x11b9   : > { %v12984_v23 = vadd.f32 %v18093_v31, %v12903_v0  ;;  %v12890_v50 = vpop.f32.mrb[255].mxu1  ;;  %v13024_v31 = vpop.permute.xlu1 %13023 }
0x11ba   : > { %v12982_v42 = vadd.f32 %v12968_v5, %v12901_v53  ;;  %v12902_v8 = vadd.f32 %v12890_v50, %v12807_v57 }
0x11bb   : > { %v13009_v2 = vadd.f32 %v13003_v37, %v12984_v23 }
0x11bc   : > { %v13007_v38 = vadd.f32 %v12999_v1, %v12982_v42  ;;  %v12983_v35 = vadd.f32 %v12971_v7, %v12902_v8 }
0x11bd   : > { %v13012_v21 = vmax.f32 %v13009_v2, 0.0 }
0x11be   : > { %v13010_v29 = vmax.f32 %v13007_v38, 0.0  ;;  %v13008_v13 = vadd.f32 %v13001_v54, %v12983_v35 }
0x11bf   : > { %v13033_v47 = vmul.f32 %v13029_v10, %v13012_v21 }
0x11c0   : > { %v13031_v6 = vmul.f32 %v13019_v27, %v13010_v29  ;;  %v13011_v32 = vmax.f32 %v13008_v13, 0.0 }
0x11c1   : > { %v16001_v46 = vpack.c.bf16 %v13033_v47, %v13033_v47 }
0x11c2   : > { %v15999_v24 = vpack.c.bf16 %v13031_v6, %v13031_v6  ;;  %v13032_v14 = vmul.f32 %v13024_v31, %v13011_v32 }
0x11c3   : > { %v13064_v5 = vshll.u32 %v16001_v46, 16  ;;  %v13068_v4 = vshrl.u32 %v16001_v46, 16 }
0x11c4   : > { %v13045_v11 = vshll.u32 %v15999_v24, 16  ;;  %v13048_v48 = vshrl.u32 %v15999_v24, 16  ;;  %v16000_v17 = vpack.c.bf16 %v13032_v14, %v13032_v14 }
0x11c5   : > { %v13066_v18 = vrot.slane %v13064_v5, 5  ;;  %v13070_v7 = vrot.slane %v13068_v4, 4 }
0x11c6   : > { %v13047_v52 = vrot.slane %v13045_v11, 5  ;;  %v13050_v60 = vrot.slane %v13048_v48, 4  ;;  %v13054_v16 = vshll.u32 %v16000_v17, 16  ;;  %v13058_v3 = vshrl.u32 %v16000_v17, 16 }
0x11c7   : > { %v13071_v22 = vor.u32 %v13070_v7, %v13066_v18 }
0x11c8   : > { %v13051_v59 = vor.u32 %v13050_v60, %v13047_v52  ;;  %v13077_v55 = vsel %vm22291_vm15, %v13047_v52, %v12985_v45  ;;  %v13056_v39 = vrot.slane %v13054_v16, 5  ;;  %v13060_v33 = vrot.slane %v13058_v3, 4 }
0x11c9   : > { %v13072_v30 = vrot.slane %v13071_v22, 4  ;;  %13078 = vst [vmem:[#allocation4] sm:$0x8] %v13077_v55 }
0x11ca   : > { %v13052_v58 = vrot.slane %v13051_v59, 4  ;;  %v13061_v56 = vor.u32 %v13060_v33, %v13056_v39 }
0x11cb   : > { %v13082_v20 = vsel %vm22304_vm0, %v13072_v30, %v13081_v19 }
0x11cc   : > { %13083 = vst [vmem:[#allocation4 + $0xc] sm:$0x7] %v13082_v20  ;;  %v13057_v61 = vsel %vm22297_vm12, %v13052_v58, %v13056_v39  ;;  %v13062_v63 = vrot.slane %v13061_v56, 4 }
0x11cd   : > { %13079 = vst.msk [vmem:[#allocation4 + $0x4] sm:$0xf] %vm9034_vm9, %v13057_v61 }
0x11ce   : > { %v13067_v36 = vsel %vm22297_vm12, %v13062_v63, %v13066_v18 }
0x11cf   : > { %13080 = vst.msk [vmem:[#allocation4 + $0x8] sm:$0xf] %vm9034_vm9, %v13067_v36  ;;  %vm13168_vm9 = vcmask 1043456   ;;  %v13182_v36 = vld [vmem:[#allocation4 + $0x10] sm:$0x3] }
0x11d0   : > { %v13106_v62 = vld [vmem:[#allocation4] sm:$0xe] }
0x11d1   : > { %v13121_v45 = vld [vmem:[#allocation4] sm:$0x8]  ;;  %v13107_v49 = vunpack.c.l.bf16 %v13106_v62 }
0x11d2   : > { %v13123_v25 = vunpack.c.l.bf16 %v13121_v45 }
0x11d3   : > { %v13110_v15 = vrot.slane %v13107_v49, 2  ;;  %v13122_v21 = vld [vmem:[#allocation4 + $0xc] sm:$0x3] }
0x11d4   : > { %v16019_v26 = vld [vmem:[#allocation4] sm:$0xff]   ;;  %v13127_v42 = vrot.slane %v13123_v25, 6  ;;  %v13143_v32 = vrot.slane %v13123_v25, 7  ;;  %v13140_v46 = vld [vmem:[#allocation4 + $0xc] sm:$0x7]  ;;  %v13124_v11 = vunpack.c.l.bf16 %v13122_v21 }
0x11d5   : > { %v16020_v57 = vunpack.c.l.bf16 %v16019_v26  ;;  %v16021_v44 = vunpack.c.h.bf16 %v16019_v26  ;;  %v13159_v50 = vld [vmem:[#allocation4 + $0x4] sm:$0xc]  ;;  %v13141_v3 = vunpack.c.l.bf16 %v13140_v46  ;;  %v19503_v46 = vld [vmem:[%s22861_s4 + $0x1c0] sm:$0xff]  }
0x11d6   : > { %v13090_v41 = vld [vmem:[#allocation4 + $0x8] sm:$0xff]   ;;  %v13162_v29 = vunpack.c.l.bf16 %v13159_v50  ;;  %v13199_v4 = vld [vmem:[#allocation4 + $0x4] sm:$0x8]  ;;  %v13132_v58 = vrot.slane %v13124_v11, 6  ;;  %v13174_v50 = vrot.slane %v13164_v12, 4  ;;  %18104 = vmatpush3.bf16.msra.mxu0 %v19503_v46 }
0x11d7   : > { %v22532_v0 = vunpack.c.l.bf16 %v13090_v41  ;;  %v13095_v43 = vrot.slane %v16020_v57, 1  ;;  %v13096_v40 = vrot.slane %v16021_v44, 1  ;;  %v13111_v27 = vrot.slane %v16021_v44, 2  ;;  %v13086_v13 = vld [vmem:[#allocation4 + $0x8] sm:$0x7]  ;;  %18105 = vmatprep.subr.bf16.mxu0 %v19623_v34 }
0x11d8   : > { %v13128_v9 = vrot.slane %v16021_v44, 6  ;;  %v13144_v8 = vrot.slane %v16021_v44, 7  ;;  %v22541_v35 = vunpack.c.h.bf16 %v13090_v41  ;;  %v13089_v7 = vunpack.c.l.bf16 %v13086_v13 }
0x11d9   : > { %v13097_v53 = vsel %vm1192_vm3, %v13095_v43, %v13096_v40  ;;  %v13098_v28 = vrot.slane %v22532_v0, 1  ;;  %v13113_v23 = vrot.slane %v22532_v0, 2  ;;  %v13112_v1 = vsel %vm2506_vm5, %v13110_v15, %v13111_v27 }
0x11da   : > { %v13103_v37 = vadd.f32 %v16020_v57, %v13097_v53  ;;  %v13130_v38 = vrot.slane %v22532_v0, 6  ;;  %v13129_v6 = vsel %vm22896_vm13, %v13127_v42, %v13128_v9  ;;  %v13146_v31 = vrot.slane %v22532_v0, 7 }
0x11db   : > { %v13099_v2 = vsel %vm1192_vm3, %v13096_v40, %v13098_v28  ;;  %v13114_v47 = vsel %vm2506_vm5, %v13111_v27, %v13113_v23  ;;  %v13170_v5 = vrot.slane %v22532_v0, 4  ;;  %vm22897_vm3 = vmmov %vm22896_vm13  ;;  %v13145_v17 = vsel %vm22898_vm4, %v13143_v32, %v13144_v8 }
0x11dc   : > { %v13104_v54 = vadd.f32 %v16021_v44, %v13099_v2  ;;  %v13118_v10 = vadd.f32 %v13112_v1, %v13103_v37  ;;  %v13131_v48 = vsel %vm22897_vm3, %v13128_v9, %v13130_v38  ;;  %v13172_v18 = vrot.slane %v22541_v35, 4  ;;  %vm22899_vm5 = vmmov %vm22893_vm1 }
0x11dd   : > { %v13169_v16 = vrot.slane %v13162_v29, 4  ;;  %v13147_v22 = vsel %vm22899_vm5, %v13144_v8, %v13146_v31  ;;  %v13187_v59 = vrot.slane %v22532_v0, 5  ;;  %v13200_v55 = vunpack.c.l.bf16 %v13199_v4  ;;  %vm22900_vm15 = vmmov %vm22897_vm3 }
0x11de   : > { %v13119_v24 = vadd.f32 %v13114_v47, %v13104_v54  ;;  %v13137_v14 = vadd.f32 %v13129_v6, %v13118_v10  ;;  %v13105_v39 = vadd.f32 %v13098_v28, %v13089_v7  ;;  %v13173_v56 = vsel %vm13168_vm9, %v13170_v5, %v13172_v18  ;;  %vm22902_vm12 = vmmov %vm22897_vm3 }
0x11df   : > { %v13171_v19 = vsel %vm13168_vm9, %v13169_v16, %v13170_v5  ;;  %v13186_v20 = vrot.slane %v13162_v29, 5  ;;  %v13189_v61 = vrot.slane %v22541_v35, 5  ;;  %v13133_v26 = vsel %vm22900_vm15, %v13130_v38, %v13132_v58  ;;  %vm22903_vm14 = vmmov %vm22897_vm3 }
0x11e0   : > { %v13138_v52 = vadd.f32 %v13131_v48, %v13119_v24  ;;  %v13153_v60 = vadd.f32 %v13145_v17, %v13137_v14  ;;  %v13120_v63 = vadd.f32 %v13113_v23, %v13105_v39  ;;  %v13148_v49 = vrot.slane %v13141_v3, 7  ;;  %vm22904_vm0 = vmmov %vm22897_vm3  ;;  %v19504_v24 = vld [vmem:[%s22861_s4 + $0x1c8] sm:$0xff]  }
0x11e1   : > { %v13188_v57 = vsel %vm13185_vm11, %v13186_v20, %v13187_v59  ;;  %v13202_v41 = vrot.slane %v13200_v55, 6  ;;  %v13183_v15 = vunpack.c.l.bf16 %v13182_v36  ;;  %v13190_v53 = vsel %vm13185_vm11, %v13187_v59, %v13189_v61  ;;  %18106 = vmatpush3.bf16.msra.mxu0 %v19504_v24  ;;  %v19508_v55 = vld [vmem:[%s22861_s4 + $0x1d8] sm:$0xff]   ;;  %vm22684_vm13 = vmand %vm13883_vm6, %vm13884_vm7 }
0x11e2   : > { %v13154_v33 = vadd.f32 %v13147_v22, %v13138_v52  ;;  %v13156_v30 = vadd.f32 %v16021_v44, %v13153_v60  ;;  %v13204_v44 = vrot.slane %v22541_v35, 6  ;;  %v13139_v25 = vadd.f32 %v13133_v26, %v13120_v63  ;;  %18111 = vmatprep.subr.bf16.mxu0 %v19623_v34  ;;  %v19505_v60 = vld [vmem:[%s22861_s4 + $0x1b0] sm:$0xff]   ;;  %v19512_v63 = vld [vmem:[%s22861_s4 + $0x1f8] sm:$0xff]   ;;  %vm22907_vm3 = vmmov %vm22904_vm0 }
0x11e3   : > { %v13149_v27 = vsel %vm22901_vm10, %v13146_v31, %v13148_v49  ;;  %v13203_v28 = vsel %vm22902_vm12, %v13202_v41, %v13130_v38  ;;  %v13175_v2 = vsel %vm13168_vm9, %v13172_v18, %v13174_v50  ;;  %v13191_v1 = vrot.slane %v13183_v15, 5  ;;  %v19502_v31 = vld [vmem:[%s22865_s8] sm:$0xff]   ;;  %v19507_v22 = vld [vmem:[%s22861_s4 + $0x1d0] sm:$0xff]   ;;  %v19514_v41 = vld [vmem:[%s22861_s4 + $0x208] sm:$0xff]  }
0x11e4   : > { %v13157_v62 = vadd.f32 %v13154_v33, %v22532_v0  ;;  %v13179_v45 = vadd.f32 %v13171_v19, %v13156_v30  ;;  %v13155_v0 = vadd.f32 %v13149_v27, %v13139_v25  ;;  %v13205_v37 = vsel %vm22903_vm14, %v13130_v38, %v13204_v44  ;;  %v19509_v33 = vld [vmem:[%s22861_s4 + $0x1e0] sm:$0xff]   ;;  %v19510_v19 = vld [vmem:[%s22861_s4 + $0x1e8] sm:$0xff]   ;;  %v19515_v25 = vld [vmem:[%s22861_s4 + $0x210] sm:$0xff]  }
0x11e5   : > { %v13192_v10 = vsel %vm13185_vm11, %v13189_v61, %v13191_v1  ;;  %v13206_v29 = vrot.slane %v13183_v15, 6  ;;  %vm13226_vm1 = vcmask 179200   ;;  %v19513_v49 = vld [vmem:[%s22861_s4 + $0x200] sm:$0xff]  }
0x11e6   : > { %v13180_v43 = vadd.f32 %v13173_v56, %v13157_v62  ;;  %v13196_v40 = vadd.f32 %v13188_v57, %v13179_v45  ;;  %v13158_v42 = vadd.f32 %v13155_v0, %v13141_v3  ;;  %v19506_v3 = vld [vmem:[%s22861_s4 + $0x1b8] sm:$0xff]   ;;  %v19511_v56 = vld [vmem:[%s22861_s4 + $0x1f0] sm:$0xff]   ;;  %v19517_v15 = vld [vmem:[%s22861_s4 + $0x220] sm:$0xff]  }
0x11e7   : > { %v13207_v6 = vsel %vm22904_vm0, %v13204_v44, %v13206_v29  ;;  %v19518_v0 = vld [vmem:[%s22861_s4 + $0x228] sm:$0xff]  }
0x11e8   : > { %v13197_v23 = vadd.f32 %v13190_v53, %v13180_v43  ;;  %v13211_v9 = vadd.f32 %v13203_v28, %v13196_v40  ;;  %v13181_v35 = vadd.f32 %v13175_v2, %v13158_v42  ;;  %v19516_v40 = vld [vmem:[%s22861_s4 + $0x218] sm:$0xff]   ;;  %v19519_v42 = vld [vmem:[%s22861_s4 + $0x230] sm:$0xff]  }
0x11e9   : > { %v19520_v2 = vld [vmem:[%s22861_s4 + $0x238] sm:$0xff]  }
0x11ea   : > { %v13212_v8 = vadd.f32 %v13205_v37, %v13197_v23  ;;  %v13214_v21 = vmul.f32 0.11111111, %v13211_v9  ;;  %v13198_v13 = vadd.f32 %v13192_v10, %v13181_v35 }
0x11ec   : > { %v13215_v54 = vmul.f32 0.11111111, %v13212_v8  ;;  %v13213_v32 = vadd.f32 %v13207_v6, %v13198_v13 }
0x11ee   : > { %v13219_v47 = vpack.c.bf16 %v13215_v54, %v13214_v21  ;;  %v13216_v51 = vmul.f32 0.11111111, %v13213_v32  ;;  %v19521_v21 = vld [vmem:[%s22861_s4 + $0x250] sm:$0xff]   ;;  %v19522_v54 = vld [vmem:[%s22861_s4 + $0x258] sm:$0xff]  }
0x11f0   : > { %18096 = vmatpush3.bf16.msra.mxu1 %v13219_v47  ;;  %v13220_v12 = vpack.c.bf16 %v13216_v51, %v13216_v51  ;;  %v13870_v47 = vpop.permute.xlu1 %13869 }
0x11f1   : > { %18097 = vmatprep.subr.bf16.mxu1 %v19623_v34 }
0x11f2   : > { %v13231_v38 = vsel %vm13185_vm11, %v13220_v12, 0 }
0x11f4   : > { %18098 = vmatpush3.bf16.msra.mxu1 %v13231_v38 }
0x11f5   : > { %18175 = vmatprep.subr.bf16.mxu1 %v19623_v34 }
0x11f7   : > { %18100 = vmatmul.mubr.msk.bf16.vlgmr.msra.gmra.mrb[0].mxu1 %vm13226_vm1, %v19502_v31 }
0x11f8   : > { %18179 = vmatprep.mubr.msk.bf16.mxu1 %vm19624_vm8, %v19623_v34  ;;  %18176 = vmatpush3.bf16.msra.mxu1 %v19521_v21 }
0x11f9   : > { %18177 = vmatprep.subr.bf16.mxu1 %v19623_v34 }
0x11fc   : > { %18178 = vmatpush3.bf16.msra.mxu1 %v19522_v54 }
0x11fd   : > { %18183 = vmatprep.subr.bf16.mxu1 %v19623_v34 }
0x12ca   : > { %v13267_v14 = vpop.f32.mrb[0].mxu1 }
0x12cb   : > { %v18101_v5 = vpop.f32.mrb[1].mxu1 }
0x12cc   : > { %v13270_v4 = vpop.f32.mrb[2].mxu1  ;;  %v13886_v5 = vld [vmem:[#allocation7] sm:$0x3c] }
0x12cd   : > { %v13274_v11 = vpack.c.bf16 %v13270_v4, %v13267_v14  ;;  %v18102_v48 = vpop.f32.mrb[3].mxu1 }
0x12cf   : > { %13275 = vst.msk [vmem:[#allocation6] sm:$0xff] %vm454_vm2, %v13274_v11 }
0x12d6   : > { %v13282_v17 = vld [vmem:[#allocation6] sm:$0xf]  ;;  %v13667_v27 = vld [vmem:[#allocation6] sm:$0x70] }
0x12d7   : > { %v13291_v18 = vshll.u32 %v13282_v17, 16  ;;  %v13289_v7 = vshrl.u32 %v13282_v17, 16  ;;  %v13276_v59 = vld [vmem:[#allocation6] sm:$0x7]  ;;  %v13603_v44 = vld [vmem:[#allocation6] sm:$0x38] }
0x12d8   : > { %v13405_v39 = vld [vmem:[#allocation6] sm:$0xe]  ;;  %v13610_v43 = vrot.slane %v13603_v44, 3  ;;  %v13674_v53 = vrot.slane %v13667_v27, 4  ;;  %v13731_v28 = vld [vmem:[#allocation6] sm:$0xf0] }
0x12d9   : > { %v13293_v52 = vrot.slane %v13291_v18, 1  ;;  %v13412_v30 = vrot.slane %v13405_v39, 1  ;;  %v13469_v58 = vld [vmem:[#allocation6] sm:$0x1c]  ;;  %v13738_v23 = vshrl.u32 %v13731_v28, 16  ;;  %v13741_v9 = vshll.u32 %v13731_v28, 16 }
0x12da   : > { %v13476_v20 = vrot.slane %v13469_v58, 2  ;;  %v13533_v61 = vld [vmem:[#allocation6] sm:$0x3c]  ;;  %v19533_v44 = vld [vmem:[%s22861_s4 + $0x2a0] sm:$0xff]  }
0x12db   : > { %v13294_v16 = vor.u32 %v13293_v52, %v13289_v7  ;;  %v13540_v36 = vshrl.u32 %v13533_v61, 16  ;;  %v13543_v62 = vshll.u32 %v13533_v61, 16  ;;  %v13740_v50 = vrot.slane %v13738_v23, 4  ;;  %v13801_v1 = vld [vmem:[#allocation6] sm:$0xe0]  ;;  %v19523_v52 = vld [vmem:[%s22861_s4 + $0x240] sm:$0xff]  }
0x12dc   : > { %v13743_v37 = vrot.slane %v13741_v9, 5  ;;  %v13808_v35 = vrot.slane %v13801_v1, 5  ;;  %v19527_v39 = vld [vmem:[%s22861_s4 + $0x270] sm:$0xff]   ;;  %v19536_v23 = vld [vmem:[%s22861_s4 + $0x2b8] sm:$0xff]  }
0x12dd   : > { %18108 = vmatmul.mubr.msk.bf16.vlgmr.msra.gmra.mrb[176].mxu0 %vm454_vm2, %v13294_v16  ;;  %v13542_v45 = vrot.slane %v13540_v36, 2  ;;  %v13545_v26 = vrot.slane %v13543_v62, 3  ;;  %v19524_v16 = vld [vmem:[%s22861_s4 + $0x248] sm:$0xff]  }
0x12de   : > { %18112 = vmatpush3.bf16.msra.mxu0 %v19505_v60  ;;  %18115 = vmatprep.mubr.msk.bf16.mxu0 %vm19624_vm8, %v19623_v34  ;;  %v13744_v8 = vor.u32 %v13743_v37, %v13740_v50  ;;  %v19530_v36 = vld [vmem:[%s22861_s4 + $0x288] sm:$0xff]   ;;  %v19537_v37 = vld [vmem:[%s22861_s4 + $0x2c0] sm:$0xff]  }
0x12df   : > { %18113 = vmatprep.subr.bf16.mxu0 %v19623_v34  ;;  %v13546_v57 = vor.u32 %v13545_v26, %v13542_v45  ;;  %v19531_v26 = vld [vmem:[%s22861_s4 + $0x290] sm:$0xff]  }
0x12e2   : > { %18114 = vmatpush3.bf16.msra.mxu0 %v19506_v3  ;;  %v19525_v3 = vld [vmem:[%s22861_s4 + $0x260] sm:$0xff]  }
0x12e3   : > { %18119 = vmatprep.subr.bf16.mxu0 %v19623_v34 }
0x12e9   : > { %18116 = vmatmul.mubr.msk.bf16.vlgmr.msra.gmra.mrb[176].mxu0 %vm454_vm2, %v13276_v59  ;;  %v19526_v59 = vld [vmem:[%s22861_s4 + $0x268] sm:$0xff]  }
0x12ea   : > { %18120 = vmatpush3.bf16.msra.mxu0 %v19507_v22  ;;  %18123 = vmatprep.mubr.msk.bf16.mxu0 %vm19624_vm8, %v19623_v34 }
0x12eb   : > { %18121 = vmatprep.subr.bf16.mxu0 %v19623_v34 }
0x12ee   : > { %18122 = vmatpush3.bf16.msra.mxu0 %v19508_v55 }
0x12ef   : > { %18127 = vmatprep.subr.bf16.mxu0 %v19623_v34 }
0x12f5   : > { %18124 = vmatmul.mubr.msk.bf16.vlgmr.msra.gmra.mrb[176].mxu0 %vm454_vm2, %v13412_v30  ;;  %v19528_v30 = vld [vmem:[%s22861_s4 + $0x278] sm:$0xff]  }
0x12f6   : > { %18128 = vmatpush3.bf16.msra.mxu0 %v19509_v33  ;;  %18131 = vmatprep.mubr.msk.bf16.mxu0 %vm19624_vm8, %v19623_v34 }
0x12f7   : > { %18129 = vmatprep.subr.bf16.mxu0 %v19623_v34 }
0x12fa   : > { %18130 = vmatpush3.bf16.msra.mxu0 %v19510_v19 }
0x12fb   : > { %18135 = vmatprep.subr.bf16.mxu0 %v19623_v34 }
0x1301   : > { %18132 = vmatmul.mubr.msk.bf16.vlgmr.msra.gmra.mrb[176].mxu0 %vm454_vm2, %v13476_v20 }
0x1302   : > { %18136 = vmatpush3.bf16.msra.mxu0 %v19511_v56  ;;  %18139 = vmatprep.mubr.msk.bf16.mxu0 %vm19624_vm8, %v19623_v34  ;;  %v19529_v56 = vld [vmem:[%s22861_s4 + $0x280] sm:$0xff]  }
0x1303   : > { %18137 = vmatprep.subr.bf16.mxu0 %v19623_v34 }
0x1306   : > { %18138 = vmatpush3.bf16.msra.mxu0 %v19512_v63 }
0x1307   : > { %18143 = vmatprep.subr.bf16.mxu0 %v19623_v34 }
0x130d   : > { %18140 = vmatmul.mubr.msk.bf16.vlgmr.msra.gmra.mrb[176].mxu0 %vm454_vm2, %v13546_v57  ;;  %v19532_v57 = vld [vmem:[%s22861_s4 + $0x298] sm:$0xff]  }
0x130e   : > { %18144 = vmatpush3.bf16.msra.mxu0 %v19513_v49  ;;  %18147 = vmatprep.mubr.msk.bf16.mxu0 %vm19624_vm8, %v19623_v34 }
0x130f   : > { %18145 = vmatprep.subr.bf16.mxu0 %v19623_v34 }
0x1312   : > { %18146 = vmatpush3.bf16.msra.mxu0 %v19514_v41 }
0x1313   : > { %18151 = vmatprep.subr.bf16.mxu0 %v19623_v34 }
0x1319   : > { %18148 = vmatmul.mubr.msk.bf16.vlgmr.msra.gmra.mrb[176].mxu0 %vm454_vm2, %v13610_v43  ;;  %v19534_v43 = vld [vmem:[%s22861_s4 + $0x2a8] sm:$0xff]  }
0x131a   : > { %18152 = vmatpush3.bf16.msra.mxu0 %v19515_v25  ;;  %18155 = vmatprep.mubr.msk.bf16.mxu0 %vm19624_vm8, %v19623_v34 }
0x131b   : > { %18153 = vmatprep.subr.bf16.mxu0 %v19623_v34 }
0x131e   : > { %18154 = vmatpush3.bf16.msra.mxu0 %v19516_v40 }
0x131f   : > { %18159 = vmatprep.subr.bf16.mxu0 %v19623_v34 }
0x1325   : > { %18156 = vmatmul.mubr.msk.bf16.vlgmr.msra.gmra.mrb[176].mxu0 %vm454_vm2, %v13674_v53 }
0x1326   : > { %18160 = vmatpush3.bf16.msra.mxu0 %v19517_v15  ;;  %18163 = vmatprep.mubr.msk.bf16.mxu0 %vm19624_vm8, %v19623_v34  ;;  %v19535_v15 = vld [vmem:[%s22861_s4 + $0x2b0] sm:$0xff]  }
0x1327   : > { %18161 = vmatprep.subr.bf16.mxu0 %v19623_v34 }
0x132a   : > { %18162 = vmatpush3.bf16.msra.mxu0 %v19518_v0 }
0x132b   : > { %18167 = vmatprep.subr.bf16.mxu0 %v19623_v34 }
0x1331   : > { %18164 = vmatmul.mubr.msk.bf16.vlgmr.msra.gmra.mrb[176].mxu0 %vm454_vm2, %v13744_v8  ;;  %v19538_v8 = vld [vmem:[%s22861_s4 + $0x2c8] sm:$0xff]  }
0x1332   : > { %18168 = vmatpush3.bf16.msra.mxu0 %v19519_v42  ;;  %18171 = vmatprep.mubr.msk.bf16.mxu0 %vm19624_vm8, %v19623_v34 }
0x1333   : > { %18169 = vmatprep.subr.bf16.mxu0 %v19623_v34 }
0x1336   : > { %18170 = vmatpush3.bf16.msra.mxu0 %v19520_v2 }
0x1337   : > { %18247 = vmatprep.subr.bf16.mxu0 %v19623_v34 }
0x133d   : > { %18172 = vmatmul.mubr.msk.bf16.vlgmr.msra.gmra.mrb[176].mxu0 %vm454_vm2, %v13808_v35  ;;  %v19539_v35 = vld [vmem:[%s22862_s5] sm:$0xff]  }
0x133e   : > { %18249 = vmatprep.mubr.msk.bf16.mxu0 %vm19624_vm8, %v19623_v34 }
0x1410   : > { %v13858_v10 = vpop.f32.mrb[176].mxu0 }
0x1411   : > { %v13865_v29 = vmax.f32 %v13858_v10, 0.0  ;;  %v18173_v13 = vpop.f32.mrb[177].mxu0 }
0x1412   : > { %v13861_v6 = vpop.f32.mrb[178].mxu0 }
0x1413   : > { %v13872_v32 = vmul.f32 %v13870_v47, %v13865_v29  ;;  %v18174_v51 = vpop.f32.mrb[179].mxu0 }
0x1415   : > { %v13873_v12 = vpack.c.bf16 %v13872_v32, %v13872_v32 }
0x1417   : > { %v13875_v38 = vshrl.u32 %v13873_v12, 16  ;;  %v13878_v31 = vshll.u32 %v13873_v12, 16 }
0x1419   : > { %v13877_v46 = vrot.slane %v13875_v38, 5  ;;  %v13880_v24 = vrot.slane %v13878_v31, 6 }
0x141b   : > { %v13881_v4 = vor.u32 %v13880_v24, %v13877_v46 }
0x141d   : > { %v13887_v11 = vsel %vm22684_vm13, %v13881_v4, %v13886_v5 }
0x141e   : > { %13888 = vst [vmem:[#allocation7] sm:$0x3c] %v13887_v11 }
0x1425   : > { %v13895_v48 = vld [vmem:[#allocation7] sm:$0xf]  ;;  %v14280_v40 = vld [vmem:[#allocation7] sm:$0x70] }
0x1426   : > { %v13904_v17 = vshll.u32 %v13895_v48, 16  ;;  %v13902_v18 = vshrl.u32 %v13895_v48, 16  ;;  %v13889_v22 = vld [vmem:[#allocation7] sm:$0x7]  ;;  %v14216_v41 = vld [vmem:[#allocation7] sm:$0x38] }
0x1427   : > { %v14018_v55 = vld [vmem:[#allocation7] sm:$0xe]  ;;  %v14223_v25 = vrot.slane %v14216_v41, 3  ;;  %v14344_v27 = vld [vmem:[#allocation7] sm:$0xf0]  ;;  %v14287_v53 = vrot.slane %v14280_v40, 4 }
0x1428   : > { %v13906_v7 = vrot.slane %v13904_v17, 1  ;;  %v14025_v33 = vrot.slane %v14018_v55, 1  ;;  %v14082_v19 = vld [vmem:[#allocation7] sm:$0x1c]  ;;  %v14351_v28 = vshrl.u32 %v14344_v27, 16  ;;  %v14354_v0 = vshll.u32 %v14344_v27, 16 }
0x1429   : > { %v14146_v58 = vld [vmem:[#allocation7] sm:$0x3c]  ;;  %v14089_v20 = vrot.slane %v14082_v19, 2 }
0x142a   : > { %v13907_v60 = vor.u32 %v13906_v7, %v13902_v18  ;;  %v14153_v61 = vshrl.u32 %v14146_v58, 16  ;;  %v14156_v63 = vshll.u32 %v14146_v58, 16  ;;  %v14353_v9 = vrot.slane %v14351_v28, 4  ;;  %v14414_v2 = vld [vmem:[#allocation7] sm:$0xe0] }
0x142b   : > { %v14356_v50 = vrot.slane %v14354_v0, 5  ;;  %v14421_v1 = vrot.slane %v14414_v2, 5  ;;  %v14493_v0 = vpop.permute.xlu0 %14492 }
0x142c   : > { %18180 = vmatmul.mubr.msk.bf16.vlgmr.msra.gmra.mrb[4].mxu1 %vm454_vm2, %v13907_v60  ;;  %v14155_v62 = vrot.slane %v14153_v61, 2  ;;  %v14158_v45 = vrot.slane %v14156_v63, 3 }
0x142d   : > { %18184 = vmatpush3.bf16.msra.mxu1 %v19523_v52  ;;  %18187 = vmatprep.mubr.msk.bf16.mxu1 %vm19624_vm8, %v19623_v34  ;;  %v14357_v42 = vor.u32 %v14356_v50, %v14353_v9 }
0x142e   : > { %18185 = vmatprep.subr.bf16.mxu1 %v19623_v34  ;;  %v14159_v49 = vor.u32 %v14158_v45, %v14155_v62 }
0x1431   : > { %18186 = vmatpush3.bf16.msra.mxu1 %v19524_v16 }
0x1432   : > { %18191 = vmatprep.subr.bf16.mxu1 %v19623_v34 }
0x1434   : > { %18188 = vmatmul.mubr.msk.bf16.vlgmr.msra.gmra.mrb[8].mxu1 %vm454_vm2, %v13889_v22 }
0x1435   : > { %18192 = vmatpush3.bf16.msra.mxu1 %v19525_v3  ;;  %18195 = vmatprep.mubr.msk.bf16.mxu1 %vm19624_vm8, %v19623_v34 }
0x1436   : > { %18193 = vmatprep.subr.bf16.mxu1 %v19623_v34 }
0x1439   : > { %18194 = vmatpush3.bf16.msra.mxu1 %v19526_v59 }
0x143a   : > { %18199 = vmatprep.subr.bf16.mxu1 %v19623_v34 }
0x143c   : > { %18196 = vmatmul.mubr.msk.bf16.vlgmr.msra.gmra.mrb[12].mxu1 %vm454_vm2, %v14025_v33 }
0x143d   : > { %18200 = vmatpush3.bf16.msra.mxu1 %v19527_v39  ;;  %18203 = vmatprep.mubr.msk.bf16.mxu1 %vm19624_vm8, %v19623_v34 }
0x143e   : > { %18201 = vmatprep.subr.bf16.mxu1 %v19623_v34 }
0x1441   : > { %18202 = vmatpush3.bf16.msra.mxu1 %v19528_v30 }
0x1442   : > { %18207 = vmatprep.subr.bf16.mxu1 %v19623_v34 }
0x1444   : > { %18204 = vmatmul.mubr.msk.bf16.vlgmr.msra.gmra.mrb[16].mxu1 %vm454_vm2, %v14089_v20  ;;  %v14478_v20 = vld [vmem:[#allocation6] sm:$0x3c] }
0x1445   : > { %18208 = vmatpush3.bf16.msra.mxu1 %v19529_v56  ;;  %18211 = vmatprep.mubr.msk.bf16.mxu1 %vm19624_vm8, %v19623_v34  ;;  %v14479_v45 = vunpack.c.l.bf16 %v14478_v20 }
0x1446   : > { %18209 = vmatprep.subr.bf16.mxu1 %v19623_v34 }
0x1449   : > { %18210 = vmatpush3.bf16.msra.mxu1 %v19530_v36 }
0x144a   : > { %18215 = vmatprep.subr.bf16.mxu1 %v19623_v34 }
0x144c   : > { %18212 = vmatmul.mubr.msk.bf16.vlgmr.msra.gmra.mrb[20].mxu1 %vm454_vm2, %v14159_v49 }
0x144d   : > { %18216 = vmatpush3.bf16.msra.mxu1 %v19531_v26  ;;  %18219 = vmatprep.mubr.msk.bf16.mxu1 %vm19624_vm8, %v19623_v34  ;;  %v14480_v26 = vunpack.c.h.bf16 %v14478_v20 }
0x144e   : > { %18217 = vmatprep.subr.bf16.mxu1 %v19623_v34 }
0x144f   : > { %v14484_v41 = vrot.slane %v14480_v26, 5 }
0x1451   : > { %18218 = vmatpush3.bf16.msra.mxu1 %v19532_v57  ;;  %v14483_v57 = vrot.slane %v14479_v45, 5 }
0x1452   : > { %18223 = vmatprep.subr.bf16.mxu1 %v19623_v34 }
0x1453   : > { %v14485_v40 = vsel %vm13185_vm11, %v14483_v57, %v14484_v41 }
0x1454   : > { %18220 = vmatmul.mubr.msk.bf16.vlgmr.msra.gmra.mrb[24].mxu1 %vm454_vm2, %v14223_v25 }
0x1455   : > { %18224 = vmatpush3.bf16.msra.mxu1 %v19533_v44  ;;  %18227 = vmatprep.mubr.msk.bf16.mxu1 %vm19624_vm8, %v19623_v34 }
0x1456   : > { %18225 = vmatprep.subr.bf16.mxu1 %v19623_v34 }
0x1459   : > { %18226 = vmatpush3.bf16.msra.mxu1 %v19534_v43 }
0x145a   : > { %18231 = vmatprep.subr.bf16.mxu1 %v19623_v34 }
0x145c   : > { %18228 = vmatmul.mubr.msk.bf16.vlgmr.msra.gmra.mrb[28].mxu1 %vm454_vm2, %v14287_v53 }
0x145d   : > { %18232 = vmatpush3.bf16.msra.mxu1 %v19535_v15  ;;  %18235 = vmatprep.mubr.msk.bf16.mxu1 %vm19624_vm8, %v19623_v34 }
0x145e   : > { %18233 = vmatprep.subr.bf16.mxu1 %v19623_v34 }
0x1461   : > { %18234 = vmatpush3.bf16.msra.mxu1 %v19536_v23 }
0x1462   : > { %18239 = vmatprep.subr.bf16.mxu1 %v19623_v34 }
0x1464   : > { %18236 = vmatmul.mubr.msk.bf16.vlgmr.msra.gmra.mrb[32].mxu1 %vm454_vm2, %v14357_v42 }
0x1465   : > { %18240 = vmatpush3.bf16.msra.mxu1 %v19537_v37  ;;  %18243 = vmatprep.mubr.msk.bf16.mxu1 %vm19624_vm8, %v19623_v34 }
0x1466   : > { %18241 = vmatprep.subr.bf16.mxu1 %v19623_v34 }
0x1469   : > { %18242 = vmatpush3.bf16.msra.mxu1 %v19538_v8 }
0x146a   : > { %18253 = vmatprep.subr.bf16.mxu1 %v19623_v34 }
0x146c   : > { %18244 = vmatmul.mubr.msk.bf16.vlgmr.msra.gmra.mrb[36].mxu1 %vm454_vm2, %v14421_v1 }
0x146d   : > { %18257 = vmatprep.mubr.msk.bf16.mxu1 %vm19624_vm8, %v19623_v34  ;;  %18254 = vmatpush3.bf16.msra.mxu1 %v19539_v35 }
0x146e   : > { %18255 = vmatprep.subr.bf16.mxu1 %v19623_v34 }
0x14ff   : > { %v13957_v21 = vpop.f32.mrb[4].mxu1 }
0x1500   : > { %v18181_v54 = vpop.f32.mrb[5].mxu1 }
0x1501   : > { %v13960_v10 = vpop.f32.mrb[6].mxu1 }
0x1502   : > { %v18182_v29 = vpop.f32.mrb[7].mxu1 }
0x1507   : > { %v14012_v13 = vpop.f32.mrb[8].mxu1 }
0x1508   : > { %v14013_v47 = vadd.f32 %v14012_v13, %v13957_v21  ;;  %v18189_v6 = vpop.f32.mrb[9].mxu1 }
0x1509   : > { %v14015_v32 = vpop.f32.mrb[10].mxu1 }
0x150a   : > { %v18190_v51 = vpop.f32.mrb[11].mxu1 }
0x150f   : > { %v14075_v12 = vpop.f32.mrb[12].mxu1 }
0x1510   : > { %v14081_v38 = vadd.f32 %v14075_v12, %v14013_v47  ;;  %v18197_v31 = vpop.f32.mrb[13].mxu1 }
0x1511   : > { %v14078_v46 = vpop.f32.mrb[14].mxu1 }
0x1512   : > { %v18198_v24 = vpop.f32.mrb[15].mxu1 }
0x1517   : > { %v14139_v5 = vpop.f32.mrb[16].mxu1 }
0x1518   : > { %v14145_v4 = vadd.f32 %v14139_v5, %v14081_v38  ;;  %v18205_v11 = vpop.f32.mrb[17].mxu1 }
0x1519   : > { %v14142_v48 = vpop.f32.mrb[18].mxu1 }
0x151a   : > { %v18206_v17 = vpop.f32.mrb[19].mxu1 }
0x151f   : > { %v14209_v18 = vpop.f32.mrb[20].mxu1 }
0x1520   : > { %v14215_v7 = vadd.f32 %v14209_v18, %v14145_v4  ;;  %v18213_v52 = vpop.f32.mrb[21].mxu1 }
0x1521   : > { %v14212_v60 = vpop.f32.mrb[22].mxu1 }
0x1522   : > { %v18214_v16 = vpop.f32.mrb[23].mxu1 }
0x1527   : > { %v14273_v3 = vpop.f32.mrb[24].mxu1 }
0x1528   : > { %v14279_v22 = vadd.f32 %v14273_v3, %v14215_v7  ;;  %v18221_v59 = vpop.f32.mrb[25].mxu1 }
0x1529   : > { %v14276_v55 = vpop.f32.mrb[26].mxu1 }
0x152a   : > { %v18222_v39 = vpop.f32.mrb[27].mxu1 }
0x152f   : > { %v14337_v33 = vpop.f32.mrb[28].mxu1 }
0x1530   : > { %v14343_v30 = vadd.f32 %v14337_v33, %v14279_v22  ;;  %v18229_v19 = vpop.f32.mrb[29].mxu1 }
0x1531   : > { %v14340_v58 = vpop.f32.mrb[30].mxu1 }
0x1532   : > { %v18230_v56 = vpop.f32.mrb[31].mxu1 }
0x1537   : > { %v14407_v61 = vpop.f32.mrb[32].mxu1 }
0x1538   : > { %v14413_v63 = vadd.f32 %v14407_v61, %v14343_v30  ;;  %v18237_v36 = vpop.f32.mrb[33].mxu1 }
0x1539   : > { %v14410_v62 = vpop.f32.mrb[34].mxu1 }
0x153a   : > { %v18238_v49 = vpop.f32.mrb[35].mxu1 }
0x153f   : > { %v14471_v44 = vpop.f32.mrb[36].mxu1 }
0x1540   : > { %v14477_v25 = vadd.f32 %v14471_v44, %v14413_v63  ;;  %v18245_v43 = vpop.f32.mrb[37].mxu1 }
0x1541   : > { %v14474_v27 = vpop.f32.mrb[38].mxu1  ;;  %v14577_v43 = vld [vmem:[%s22869_s12] sm:$0x1] }
0x1542   : > { %v14487_v15 = vadd.f32 %v14485_v40, %v14477_v25  ;;  %v18246_v53 = vpop.f32.mrb[39].mxu1  ;;  %v19540_v40 = vld [vmem:[%s22862_s5 + $0x8] sm:$0xff]   ;;  %v19541_v27 = vld [vmem:[%s22862_s5 + $0x10] sm:$0xff]  }
0x1543   : > { %18256 = vmatpush3.bf16.msra.mxu1 %v19540_v40 }
0x1544   : > { %v14488_v28 = vmax.f32 %v14487_v15, 0.0 }
0x1546   : > { %v14495_v23 = vmul.f32 %v14493_v0, %v14488_v28 }
0x1548   : > { %v14496_v9 = vpack.c.bf16 %v14495_v23, %v14495_v23 }
0x154a   : > { %v14498_v50 = vshrl.u32 %v14496_v9, 16  ;;  %v14501_v37 = vshll.u32 %v14496_v9, 16  ;;  %v19542_v9 = vld [vmem:[%s22862_s5 + $0x18] sm:$0xff]  }
0x154c   : > { %v14500_v42 = vrot.slane %v14498_v50, 5  ;;  %v14503_v8 = vrot.slane %v14501_v37, 6 }
0x154e   : > { %v14504_v2 = vor.u32 %v14503_v8, %v14500_v42 }
0x1550   : > { %v14506_v1 = vsel %vm22684_vm13, %v14504_v2, %v14478_v20 }
0x1551   : > { %14507 = vst [vmem:[#allocation6] sm:$0x3c] %v14506_v1 }
0x1558   : > { %v14508_v35 = vld [vmem:[#allocation6] sm:$0x7]  ;;  %v14542_v6 = vld [vmem:[#allocation6] sm:$0x38] }
0x1559   : > { %v14510_v21 = vld [vmem:[#allocation6] sm:$0xf]  ;;  %v14509_v31 = vunpack.c.l.bf16 %v14508_v35  ;;  %v14543_v4 = vunpack.c.l.bf16 %v14542_v6  ;;  %v14544_v14 = vunpack.c.h.bf16 %v14542_v6  ;;  %v14558_v11 = vld [vmem:[#allocation6] sm:$0xf0] }
0x155a   : > { %v14516_v54 = vld [vmem:[#allocation6] sm:$0xe]  ;;  %v14511_v10 = vunpack.c.l.bf16 %v14510_v21  ;;  %v14552_v52 = vld [vmem:[#allocation6] sm:$0x70]  ;;  %v14560_v3 = vrot.slane %v14558_v11, 4 }
0x155b   : > { %v14517_v29 = vunpack.c.l.bf16 %v14516_v54  ;;  %v14522_v13 = vld [vmem:[#allocation6] sm:$0x1c]  ;;  %v14567_v60 = vld [vmem:[#allocation6] sm:$0xe0]  ;;  %v14547_v59 = vrot.slane %v14543_v4, 6  ;;  %v14548_v55 = vrot.slane %v14544_v14, 6 }
0x155c   : > { %v14532_v47 = vld [vmem:[#allocation6] sm:$0x3c]  ;;  %v14523_v32 = vunpack.c.l.bf16 %v14522_v13  ;;  %v14524_v51 = vunpack.c.h.bf16 %v14522_v13  ;;  %v14513_v46 = vrot.slane %v14511_v10, 1  ;;  %v14554_v33 = vrot.slane %v14552_v52, 4 }
0x155d   : > { %v14533_v12 = vunpack.c.l.bf16 %v14532_v47  ;;  %v14534_v38 = vunpack.c.h.bf16 %v14532_v47  ;;  %v14519_v17 = vrot.slane %v14517_v29, 2  ;;  %v14569_v30 = vrot.slane %v14567_v60, 4 }
0x155e   : > { %v14527_v24 = vrot.slane %v14523_v32, 4  ;;  %v14528_v5 = vrot.slane %v14524_v51, 4  ;;  %v14515_v48 = vadd.f32 %v14513_v46, %v14509_v31  ;;  %v14562_v56 = vunpack.c.l.bf16 %v14560_v3 }
0x155f   : > { %v14537_v18 = vrot.slane %v14533_v12, 5  ;;  %v14538_v7 = vrot.slane %v14534_v38, 5  ;;  %v14549_v20 = vsel %vm22907_vm3, %v14547_v59, %v14548_v55  ;;  %v14556_v63 = vunpack.c.l.bf16 %v14554_v33 }
0x1560   : > { %v14521_v16 = vadd.f32 %v14519_v17, %v14515_v48  ;;  %v14529_v22 = vsel %vm13168_vm9, %v14527_v24, %v14528_v5  ;;  %v14571_v36 = vunpack.c.l.bf16 %v14569_v30  ;;  %v14564_v45 = vrot.slane %v14562_v56, 1 }
0x1561   : > { %v14539_v19 = vsel %vm13185_vm11, %v14537_v18, %v14538_v7  ;;  %vm14579_vm9 = vcmask 48128  }
0x1562   : > { %v14531_v39 = vadd.f32 %v14529_v22, %v14521_v16  ;;  %v14573_v49 = vrot.slane %v14571_v36, 2 }
0x1564   : > { %v14541_v58 = vadd.f32 %v14539_v19, %v14531_v39 }
0x1566   : > { %v14551_v61 = vadd.f32 %v14549_v20, %v14541_v58 }
0x1568   : > { %v14557_v62 = vadd.f32 %v14556_v63, %v14551_v61 }
0x156a   : > { %v14566_v26 = vadd.f32 %v14564_v45, %v14557_v62 }
0x156c   : > { %v14575_v57 = vadd.f32 %v14573_v49, %v14566_v26 }
0x156e   : > { %v14576_v41 = vmul.f32 0.11111111, %v14575_v57 }
0x1570   : > { %v14578_v44 = vpack.c.bf16 %v14576_v41, %v14576_v41 }
0x1572   : > { %v14584_v25 = vsel %vm13185_vm11, %v14578_v44, 0 }
0x1573   : > { %18248 = vmatpush3.bf16.msra.mxu0 %v14584_v25 }
0x1574   : > { %18261 = vmatprep.subr.bf16.mxu0 %v19623_v34 }
0x1576   : > { %18250 = vmatmul.mubr.msk.bf16.vlgmr.msra.gmra.mrb[180].mxu0 %vm14579_vm9, %v14577_v43 }
0x1577   : > { %18265 = vmatprep.mubr.msk.bf16.mxu0 %vm19624_vm8, %v19623_v34  ;;  %18262 = vmatpush3.bf16.msra.mxu0 %v19541_v27  ;;  %vm14749_vm8 = vcmask 253952  }
0x1578   : > { %18263 = vmatprep.subr.bf16.mxu0 %v19623_v34 }
0x157b   : > { %18264 = vmatpush3.bf16.msra.mxu0 %v19542_v9 }
0x1649   : > { %v14620_v15 = vpop.f32.mrb[180].mxu0 }
0x164a   : > { %v14626_v53 = vpack.c.bf16 %v14620_v15, %v14620_v15  ;;  %v18251_v28 = vpop.f32.mrb[181].mxu0 }
0x164b   : > { %v14623_v0 = vpop.f32.mrb[182].mxu0 }
0x164c   : > { %18258 = vmatmul.mubr.msk.bf16.vlgmr.msra.gmra.mrb[40].mxu1 %vm454_vm2, %v14626_v53  ;;  %v18252_v23 = vpop.f32.mrb[183].mxu0 }
0x171f   : > { %v14680_v50 = vpop.f32.mrb[40].mxu1 }
0x1720   : > { %v14686_v37 = vmax.f32 %v14680_v50, 0.0  ;;  %v18259_v42 = vpop.f32.mrb[41].mxu1 }
0x1721   : > { %v14683_v8 = vpop.f32.mrb[42].mxu1 }
0x1722   : > { %v14687_v2 = vpack.c.bf16 %v14686_v37, %v14686_v37  ;;  %v18260_v34 = vpop.f32.mrb[43].mxu1 }
0x1724   : > { %18266 = vmatmul.mubr.msk.bf16.vlgmr.msra.gmra.mrb[184].mxu0 %vm454_vm2, %v14687_v2 }
0x17f7   : > { %v14742_v1 = vpop.f32.mrb[184].mxu0 }
0x17f8   : > { %v14743_v35 = vadd.f32 %v14742_v1, %v14620_v15  ;;  %v18267_v21 = vpop.f32.mrb[185].mxu0 }
0x17f9   : > { %v14745_v54 = vpop.f32.mrb[186].mxu0 }
0x17fa   : > { %v14748_v10 = vmax.f32 %v14743_v35, 0.0  ;;  %v18268_v29 = vpop.f32.mrb[187].mxu0 }
0x17fc   : > { %14750 = vst.msk [vmem:[%s432_s15] sm:$0x1] %vm14749_vm8, %v14748_v10 }
0x17fd   : > { %19572 = shalt.err (!%p19569_p3)
}
0x17fe   : > { %s19573_s24 = scalar_lea.hbm %s22815_s20, 16  ;;  %s19577_s0 = scalar_lea.hbm %s22870_s13, 32 }
0x17ff   : > { %p19574_p4 = scmp.ne.s32.totalorder %s22815_s20, %s19573_s24  ;;  %p19578_p9 = scmp.lt.u32.totalorder %s22815_s20, %s22870_s13 }
0x1800   : > { %p19579_p10 = scmp.lt.u32.totalorder %s19577_s0, %s19573_s24  ;;  %p19581_p12 = scmp.lt.u32.totalorder %s19573_s24, %s22815_s20 }
0x1801   : > { %p19575_p7 = pnand %p19574_p4, %p19735_p5 }
0x1802   : > { %p19580_p11 = por %p19579_p10, %p19578_p9 }
0x1803   : > { %p19576_p8 = pneg %p19575_p7 }
0x1804   : > { %p19582_p13 = por %p19581_p12, %p19580_p11 }
0x1806   : > { %p19583_p0 = pnand %p19582_p13, %p19576_p8 }
0x1808   : > { %19586 = shalt.err (!%p19583_p0)
}
0x1809   : > { %19111 = dma.vmem_to_hbm [thread:$0]  (%p19735_p5), %s22817_s16, 16, %s22815_s20, %s14752_s29  }
0x180a PF: > { %p19117_p1 = scmp.ge.s32.totalorder %s19621_s28, 2  ;;  %s14776_s2 = sand.u32 1, %s19609_s25  }
0x180b   : > { %s14777_s21 = scalar_lea.sflag [#allocation9], %s14776_s2 }
0x180c   : > { %p19114_p2 = pnand %p19117_p1, %p19739_p6 }
0x180e   : > { %19604 = dma.done.wait (!%p19114_p2), %s14777_s21, 16  }
0x180f   : > { %19606 = vsyncadd (!%p19114_p2), %s14777_s21, 4294967280  ;;  %p23_p3 = scmp.ge.s32.totalorder %s19722_s14, 4   ;;  %s22908_s25 = smov %s19613_s26 }
0x1810   : > { %s22909_s26 = smov %s19617_s27  ;;  %s22910_s27 = smov %s19733_s17 }
0x1811   : > { %s22911_s28 = smov %s19722_s14  ;;  %25 = sbr.rel (!%p23_p3) target bundleno = 7 (0x7), region = 194 }
0x1818   :  { %14781 = vsyncpa [#allocation9], 1 }
0x1819   :  { %14783 = vsyncpa [#allocation9 + $0x1], 1 }

</bundles_post_ra>
